<compile_context>
chip_gen: v6e
topology: v6e:2x2x1
jax: 0.10.0
libtpu: 0.0.40
codegen_flags: <defaults>
</compile_context>

<pallas_src>
import jax
import jax.numpy as jnp
from jax.experimental import pallas as pl
from jax.experimental.pallas import tpu as pltpu

EPS = 1e-5
CP = 128  # lane-padded channel width used for the hidden (width) channels


# ---------------------------------------------------------------------------
# Fused kernel: whole batch in VMEM, one invocation.
# ---------------------------------------------------------------------------
def _bottleneck_fused_kernel(x_ref, w1_ref, w2_ref, w3_ref,
                             g1_ref, b1_ref, g2_ref, b2_ref, g3_ref, b3_ref,
                             y_ref, pad_ref):
    N, H, W, Cin = x_ref.shape
    C = w1_ref.shape[1]          # padded hidden width (CP)
    Cout = w3_ref.shape[1]       # true output channels (== Cin, identity path)
    M = N * H * W

    def bn(h, g, b, relu):
        # Global (whole-batch) training-mode BN with centered variance, f32.
        mean = jnp.mean(h, axis=0, keepdims=True)
        d = h - mean
        var = jnp.mean(d * d, axis=0, keepdims=True)
        s = g * jax.lax.rsqrt(var + EPS)
        out = d * s + b
        return jnp.maximum(out, 0.0) if relu else out

    # ---- Stage 1: conv1 (1x1).  bf16 operands, f32 MXU accumulation. ----
    x_f32 = x_ref[...].reshape(M, Cin)
    h1 = jnp.dot(x_f32.astype(jnp.bfloat16), w1_ref[...],
                 preferred_element_type=jnp.float32)              # (M, C) f32
    a1 = bn(h1, g1_ref[...], b1_ref[...], relu=True)

    # ---- Stage 2: 3x3 conv (pad=1) via zero-halo scratch + 9 K=C dots. ----
    zrow = jnp.zeros((N, 1, W + 2, C), jnp.float32)
    zcol = jnp.zeros((N, H + 2, 1, C), jnp.float32)
    pad_ref[:, 0:1, :, :] = zrow
    pad_ref[:, H + 1:H + 2, :, :] = zrow
    pad_ref[:, :, 0:1, :] = zcol
    pad_ref[:, :, W + 1:W + 2, :] = zcol
    pad_ref[:, 1:H + 1, 1:W + 1, :] = a1.reshape(N, H, W, C)

    h2 = None
    for kh in range(3):
        for kw in range(3):
            tap = pad_ref[:, kh:kh + H, kw:kw + W, :].reshape(M, C)
            d = jnp.dot(tap.astype(jnp.bfloat16), w2_ref[3 * kh + kw],
                        preferred_element_type=jnp.float32)
            h2 = d if h2 is None else h2 + d                      # f32 acc
    a2 = bn(h2, g2_ref[...], b2_ref[...], relu=True)

    # ---- Stage 3: conv3 (1x1) to true Cout width + BN3. ----
    h3 = jnp.dot(a2.astype(jnp.bfloat16), w3_ref[...],
                 preferred_element_type=jnp.float32)              # (M, Cout)
    h3 = bn(h3, g3_ref[...], b3_ref[...], relu=False)

    # ---- Stage 4: identity residual + ReLU. ----
    y = jnp.maximum(h3 + x_f32, 0.0)
    y_ref[...] = y.reshape(N, H, W, Cout).astype(y_ref.dtype)


# ---------------------------------------------------------------------------
# Full block forward (NCHW in / NCHW out, matching the PyTorch module)
# ---------------------------------------------------------------------------
def bottleneck_forward(x_nchw, params):
    """x_nchw: [N, C, H, W].  downsample=None, stride=1, groups=1, dilation=1."""
    w1, w2, w3, g1, b1, g2, b2, g3, b3 = params
    N, Cin, H, W = x_nchw.shape
    width = w1.shape[1]
    Cout = w3.shape[1]
    assert Cout == Cin, "identity residual requires Cout == Cin"

    # VMEM sanity for the single fused invocation (activations + scratch).
    act_bytes = 4 * (N * H * W) * (Cin + 4 * CP + Cout) + 4 * N * (H + 2) * (W + 2) * CP
    assert act_bytes < 24 * 1024 * 1024, "shape too large for fused variant"

    # One-time NCHW -> NHWC at the module boundary (keep NHWC end-to-end in a
    # full network).  Channels stay UNPADDED in HBM.
    x_nhwc = jnp.transpose(x_nchw, (0, 2, 3, 1)).astype(jnp.float32)

    # Weights: pad channel dims of the tiny weight tensors to CP lanes, bf16.
    w1_b = (jnp.zeros((Cin, CP), jnp.float32)
            .at[:, :width].set(w1).astype(jnp.bfloat16))
    w2_b = (jnp.zeros((3, 3, CP, CP), jnp.float32)
            .at[:, :, :width, :width].set(w2)
            .reshape(9, CP, CP).astype(jnp.bfloat16))
    w3_b = (jnp.zeros((CP, Cout), jnp.float32)
            .at[:width, :].set(w3).astype(jnp.bfloat16))

    # Padded-lane gammas are ZERO so padded channels come out exactly zero.
    def pad_gb(g, b):
        gp = jnp.zeros((1, CP), jnp.float32).at[0, :width].set(g.reshape(-1))
        bp = jnp.zeros((1, CP), jnp.float32).at[0, :width].set(b.reshape(-1))
        return gp, bp

    g1p, b1p = pad_gb(g1, b1)
    g2p, b2p = pad_gb(g2, b2)
    g3v = g3.reshape(1, Cout).astype(jnp.float32)
    b3v = b3.reshape(1, Cout).astype(jnp.float32)

    M = N * H * W
    flops = 2 * M * (Cin * CP + 9 * CP * CP + CP * Cout) + 20 * M * CP
    bytes_acc = (4 * 2 * M * Cin            # x in + y out (f32)
                 + 2 * (Cin * CP + 9 * CP * CP + CP * Cout)   # bf16 weights
                 + 4 * 6 * CP)

    y_nhwc = pl.pallas_call(
        _bottleneck_fused_kernel,
        out_shape=jax.ShapeDtypeStruct((N, H, W, Cout), jnp.float32),
        scratch_shapes=[pltpu.VMEM((N, H + 2, W + 2, CP), jnp.float32)],
        compiler_params=pltpu.CompilerParams(
            vmem_limit_bytes=32 * 1024 * 1024),
        cost_estimate=pl.CostEstimate(flops=flops, transcendentals=3 * CP,
                                      bytes_accessed=bytes_acc),
    )(x_nhwc, w1_b, w2_b, w3_b, g1p, b1p, g2p, b2p, g3v, b3v)

    return jnp.transpose(y_nhwc, (0, 3, 1, 2)).astype(x_nchw.dtype)


# ---------------------------------------------------------------------------
# Reference (lax conv, NCHW).  Operands are cast to bf16 with f32 accumulation
# to mirror the kernel's MXU numerics; BN math stays f32.
# ---------------------------------------------------------------------------
def ref_forward(x, params):
    w1, w2, w3, g1, b1, g2, b2, g3, b3 = params

    def conv(x, w_oihw, padding):
        return jax.lax.conv_general_dilated(
            x.astype(jnp.bfloat16), w_oihw.astype(jnp.bfloat16),
            window_strides=(1, 1), padding=padding,
            dimension_numbers=('NCHW', 'OIHW', 'NCHW'),
            preferred_element_type=jnp.float32)

    def bn(x, g, b, relu):
        mean = jnp.mean(x, axis=(0, 2, 3), keepdims=True)
        var = jnp.mean((x - mean) ** 2, axis=(0, 2, 3), keepdims=True)
        y = (x - mean) * jax.lax.rsqrt(var + EPS)
        y = y * g.reshape(1, -1, 1, 1) + b.reshape(1, -1, 1, 1)
        return jnp.maximum(y, 0.0) if relu else y

    w1_oihw = w1.T[:, :, None, None]               # (width, Cin, 1, 1)
    w2_oihw = jnp.transpose(w2, (3, 2, 0, 1))      # (width, width, 3, 3)
    w3_oihw = w3.T[:, :, None, None]               # (Cout, width, 1, 1)

    h = bn(conv(x, w1_oihw, 'VALID'), g1, b1, relu=True)
    h = bn(conv(h, w2_oihw, ((1, 1), (1, 1))), g2, b2, relu=True)
    h = bn(conv(h, w3_oihw, 'VALID'), g3, b3, relu=False)
    return jnp.maximum(h + x.astype(jnp.float32), 0.0)


if __name__ == "__main__":
    # Bottleneck(inplanes=32, planes=8) -> width=8, out channels = 8*4 = 32
    N, H, W = 2, 16, 16
    inplanes, planes = 32, 8
    width = planes
    cout = planes * 4
    assert cout == inplanes  # required for identity residual (downsample=None)

    key = jax.random.PRNGKey(0)
    k_x, k1, k2, k3 = jax.random.split(key, 4)

    x = jax.random.normal(k_x, (N, inplanes, H, W), jnp.float32)

    # Deterministic synthetic weights (kernel layout: contraction dim first).
    w1 = jax.random.normal(k1, (inplanes, width), jnp.float32) * 0.1      # 1x1
    w2 = jax.random.normal(k2, (3, 3, width, width), jnp.float32) * 0.1   # 3x3
    w3 = jax.random.normal(k3, (width, cout), jnp.float32) * 0.1          # 1x1
    g1 = jnp.ones((width,), jnp.float32); b1 = jnp.zeros((width,), jnp.float32)
    g2 = jnp.ones((width,), jnp.float32); b2 = jnp.zeros((width,), jnp.float32)
    g3 = jnp.ones((cout,), jnp.float32);  b3 = jnp.zeros((cout,), jnp.float32)

    params = (w1, w2, w3, g1, b1, g2, b2, g3, b3)

    fwd = jax.jit(bottleneck_forward)
    out = jax.block_until_ready(fwd(x, params))
    ref = jax.block_until_ready(ref_forward(x, params))

    assert out.shape == (N, cout, H, W)
    # bf16 MXU operands (per the perf review) set the parity floor; BN math and
    # accumulation stay f32, so differences vs. the bf16-matched reference are
    # accumulation-order / rounding-boundary level.
    err = float(jnp.max(jnp.abs(out - ref)))
    assert err < 2e-2, f"max abs err {err}"

    print("KERNEL_OK")
</pallas_src>

<mosaic_0001>
module attributes {stable_mosaic.version = 11 : i64} {
  func.func @_bottleneck_fused_kernel(%arg0: memref<2x16x16x32xf32, #tpu.memory_space<vmem>>, %arg1: memref<32x128xbf16, #tpu.memory_space<vmem>>, %arg2: memref<9x128x128xbf16, #tpu.memory_space<vmem>>, %arg3: memref<128x32xbf16, #tpu.memory_space<vmem>>, %arg4: memref<1x128xf32, #tpu.memory_space<vmem>>, %arg5: memref<1x128xf32, #tpu.memory_space<vmem>>, %arg6: memref<1x128xf32, #tpu.memory_space<vmem>>, %arg7: memref<1x128xf32, #tpu.memory_space<vmem>>, %arg8: memref<1x32xf32, #tpu.memory_space<vmem>>, %arg9: memref<1x32xf32, #tpu.memory_space<vmem>>, %arg10: memref<2x16x16x32xf32, #tpu.memory_space<vmem>>, %arg11: memref<2x18x18x128xf32, #tpu.memory_space<vmem>>) attributes {dimension_semantics = [], scalar_prefetch = 0 : i64, scratch_operands = 1 : i64, tpu.core_type = #tpu.core_type<tc>} {
    %c0 = arith.constant 0 : index
    %c0_0 = arith.constant 0 : index
    %c0_1 = arith.constant 0 : index
    %c0_2 = arith.constant 0 : index
    %0 = vector.load %arg0[%c0, %c0_0, %c0_1, %c0_2] : memref<2x16x16x32xf32, #tpu.memory_space<vmem>>, vector<2x16x16x32xf32>
    %1 = vector.shape_cast %0 : vector<2x16x16x32xf32> to vector<512x32xf32>
    %2 = arith.truncf %1 : vector<512x32xf32> to vector<512x32xbf16>
    %c0_3 = arith.constant 0 : index
    %c0_4 = arith.constant 0 : index
    %3 = vector.load %arg1[%c0_3, %c0_4] : memref<32x128xbf16, #tpu.memory_space<vmem>>, vector<32x128xbf16>
    %cst = arith.constant dense<0.000000e+00> : vector<512x128xf32>
    %4 = tpu.matmul %2, %3, %cst {dimension_numbers = #tpu.dot_dimension_numbers<[1], [0], [0], [1], [0, 0, 1, 1], [], []>} : vector<512x32xbf16>, vector<32x128xbf16>, vector<512x128xf32> -> vector<512x128xf32>
    %c0_5 = arith.constant 0 : index
    %c0_6 = arith.constant 0 : index
    %5 = vector.load %arg4[%c0_5, %c0_6] : memref<1x128xf32, #tpu.memory_space<vmem>>, vector<1x128xf32>
    %c0_7 = arith.constant 0 : index
    %c0_8 = arith.constant 0 : index
    %6 = vector.load %arg5[%c0_7, %c0_8] : memref<1x128xf32, #tpu.memory_space<vmem>>, vector<1x128xf32>
    %cst_9 = arith.constant dense<0.000000e+00> : vector<128xf32>
    %7 = vector.multi_reduction <add>, %4, %cst_9 [0] : vector<512x128xf32> to vector<128xf32>
    %8 = vector.shape_cast %7 : vector<128xf32> to vector<1x128xf32>
    %cst_10 = arith.constant 5.120000e+02 : f32
    %9 = vector.broadcast %cst_10 : f32 to vector<1x128xf32>
    %10 = arith.divf %8, %9 : vector<1x128xf32>
    %11 = vector.broadcast %10 : vector<1x128xf32> to vector<512x128xf32>
    %12 = arith.subf %4, %11 : vector<512x128xf32>
    %13 = arith.mulf %12, %12 : vector<512x128xf32>
    %cst_11 = arith.constant dense<0.000000e+00> : vector<128xf32>
    %14 = vector.multi_reduction <add>, %13, %cst_11 [0] : vector<512x128xf32> to vector<128xf32>
    %15 = vector.shape_cast %14 : vector<128xf32> to vector<1x128xf32>
    %cst_12 = arith.constant 5.120000e+02 : f32
    %16 = vector.broadcast %cst_12 : f32 to vector<1x128xf32>
    %17 = arith.divf %15, %16 : vector<1x128xf32>
    %cst_13 = arith.constant 9.99999974E-6 : f32
    %18 = vector.broadcast %cst_13 : f32 to vector<1x128xf32>
    %19 = arith.addf %17, %18 : vector<1x128xf32>
    %20 = math.rsqrt %19 : vector<1x128xf32>
    %21 = arith.mulf %5, %20 : vector<1x128xf32>
    %22 = vector.broadcast %21 : vector<1x128xf32> to vector<512x128xf32>
    %23 = arith.mulf %12, %22 : vector<512x128xf32>
    %24 = vector.broadcast %6 : vector<1x128xf32> to vector<512x128xf32>
    %25 = arith.addf %23, %24 : vector<512x128xf32>
    %cst_14 = arith.constant 0.000000e+00 : f32
    %26 = vector.broadcast %cst_14 : f32 to vector<512x128xf32>
    %27 = arith.maximumf %25, %26 : vector<512x128xf32>
    %cst_15 = arith.constant 0.000000e+00 : f32
    %28 = vector.broadcast %cst_15 : f32 to vector<2x1x18x128xf32>
    %cst_16 = arith.constant 0.000000e+00 : f32
    %29 = vector.broadcast %cst_16 : f32 to vector<2x18x1x128xf32>
    %c0_17 = arith.constant 0 : index
    %c0_18 = arith.constant 0 : index
    %c0_19 = arith.constant 0 : index
    %c0_20 = arith.constant 0 : index
    %30 = vector.load %arg11[%c0_17, %c0_18, %c0_19, %c0_20] : memref<2x18x18x128xf32, #tpu.memory_space<vmem>>, vector<2x1x18x128xf32>
    tpu.vector_store %arg11[%c0_17, %c0_18, %c0_19, %c0_20], %28 {strides = array<i32>} : memref<2x18x18x128xf32, #tpu.memory_space<vmem>>, vector<2x1x18x128xf32>,
    %c0_21 = arith.constant 0 : index
    %c17 = arith.constant 17 : index
    %c0_22 = arith.constant 0 : index
    %c0_23 = arith.constant 0 : index
    %31 = vector.load %arg11[%c0_21, %c17, %c0_22, %c0_23] : memref<2x18x18x128xf32, #tpu.memory_space<vmem>>, vector<2x1x18x128xf32>
    tpu.vector_store %arg11[%c0_21, %c17, %c0_22, %c0_23], %28 {strides = array<i32>} : memref<2x18x18x128xf32, #tpu.memory_space<vmem>>, vector<2x1x18x128xf32>,
    %c0_24 = arith.constant 0 : index
    %c0_25 = arith.constant 0 : index
    %c0_26 = arith.constant 0 : index
    %c0_27 = arith.constant 0 : index
    %32 = vector.load %arg11[%c0_24, %c0_25, %c0_26, %c0_27] : memref<2x18x18x128xf32, #tpu.memory_space<vmem>>, vector<2x18x1x128xf32>
    tpu.vector_store %arg11[%c0_24, %c0_25, %c0_26, %c0_27], %29 {strides = array<i32>} : memref<2x18x18x128xf32, #tpu.memory_space<vmem>>, vector<2x18x1x128xf32>,
    %c0_28 = arith.constant 0 : index
    %c0_29 = arith.constant 0 : index
    %c17_30 = arith.constant 17 : index
    %c0_31 = arith.constant 0 : index
    %33 = vector.load %arg11[%c0_28, %c0_29, %c17_30, %c0_31] : memref<2x18x18x128xf32, #tpu.memory_space<vmem>>, vector<2x18x1x128xf32>
    tpu.vector_store %arg11[%c0_28, %c0_29, %c17_30, %c0_31], %29 {strides = array<i32>} : memref<2x18x18x128xf32, #tpu.memory_space<vmem>>, vector<2x18x1x128xf32>,
    %34 = vector.shape_cast %27 : vector<512x128xf32> to vector<2x16x16x128xf32>
    %c0_32 = arith.constant 0 : index
    %c1 = arith.constant 1 : index
    %c1_33 = arith.constant 1 : index
    %c0_34 = arith.constant 0 : index
    %35 = vector.load %arg11[%c0_32, %c1, %c1_33, %c0_34] : memref<2x18x18x128xf32, #tpu.memory_space<vmem>>, vector<2x16x16x128xf32>
    tpu.vector_store %arg11[%c0_32, %c1, %c1_33, %c0_34], %34 {strides = array<i32>} : memref<2x18x18x128xf32, #tpu.memory_space<vmem>>, vector<2x16x16x128xf32>,
    %c0_35 = arith.constant 0 : index
    %c0_36 = arith.constant 0 : index
    %c0_37 = arith.constant 0 : index
    %c0_38 = arith.constant 0 : index
    %36 = vector.load %arg11[%c0_35, %c0_36, %c0_37, %c0_38] : memref<2x18x18x128xf32, #tpu.memory_space<vmem>>, vector<2x16x16x128xf32>
    %37 = vector.shape_cast %36 : vector<2x16x16x128xf32> to vector<512x128xf32>
    %38 = arith.truncf %37 : vector<512x128xf32> to vector<512x128xbf16>
    %c0_39 = arith.constant 0 : index
    %c0_40 = arith.constant 0 : index
    %c0_41 = arith.constant 0 : index
    %39 = vector.load %arg2[%c0_39, %c0_40, %c0_41] : memref<9x128x128xbf16, #tpu.memory_space<vmem>>, vector<1x128x128xbf16>
    %40 = vector.shape_cast %39 : vector<1x128x128xbf16> to vector<128x128xbf16>
    %cst_42 = arith.constant dense<0.000000e+00> : vector<512x128xf32>
    %41 = tpu.matmul %38, %40, %cst_42 {dimension_numbers = #tpu.dot_dimension_numbers<[1], [0], [0], [1], [0, 0, 1, 1], [], []>} : vector<512x128xbf16>, vector<128x128xbf16>, vector<512x128xf32> -> vector<512x128xf32>
    %c0_43 = arith.constant 0 : index
    %c0_44 = arith.constant 0 : index
    %c1_45 = arith.constant 1 : index
    %c0_46 = arith.constant 0 : index
    %42 = vector.load %arg11[%c0_43, %c0_44, %c1_45, %c0_46] : memref<2x18x18x128xf32, #tpu.memory_space<vmem>>, vector<2x16x16x128xf32>
    %43 = vector.shape_cast %42 : vector<2x16x16x128xf32> to vector<512x128xf32>
    %44 = arith.truncf %43 : vector<512x128xf32> to vector<512x128xbf16>
    %c1_47 = arith.constant 1 : index
    %c0_48 = arith.constant 0 : index
    %c0_49 = arith.constant 0 : index
    %45 = vector.load %arg2[%c1_47, %c0_48, %c0_49] : memref<9x128x128xbf16, #tpu.memory_space<vmem>>, vector<1x128x128xbf16>
    %46 = vector.shape_cast %45 : vector<1x128x128xbf16> to vector<128x128xbf16>
    %cst_50 = arith.constant dense<0.000000e+00> : vector<512x128xf32>
    %47 = tpu.matmul %44, %46, %cst_50 {dimension_numbers = #tpu.dot_dimension_numbers<[1], [0], [0], [1], [0, 0, 1, 1], [], []>} : vector<512x128xbf16>, vector<128x128xbf16>, vector<512x128xf32> -> vector<512x128xf32>
    %48 = arith.addf %41, %47 : vector<512x128xf32>
    %c0_51 = arith.constant 0 : index
    %c0_52 = arith.constant 0 : index
    %c2 = arith.constant 2 : index
    %c0_53 = arith.constant 0 : index
    %49 = vector.load %arg11[%c0_51, %c0_52, %c2, %c0_53] : memref<2x18x18x128xf32, #tpu.memory_space<vmem>>, vector<2x16x16x128xf32>
    %50 = vector.shape_cast %49 : vector<2x16x16x128xf32> to vector<512x128xf32>
    %51 = arith.truncf %50 : vector<512x128xf32> to vector<512x128xbf16>
    %c2_54 = arith.constant 2 : index
    %c0_55 = arith.constant 0 : index
    %c0_56 = arith.constant 0 : index
    %52 = vector.load %arg2[%c2_54, %c0_55, %c0_56] : memref<9x128x128xbf16, #tpu.memory_space<vmem>>, vector<1x128x128xbf16>
    %53 = vector.shape_cast %52 : vector<1x128x128xbf16> to vector<128x128xbf16>
    %cst_57 = arith.constant dense<0.000000e+00> : vector<512x128xf32>
    %54 = tpu.matmul %51, %53, %cst_57 {dimension_numbers = #tpu.dot_dimension_numbers<[1], [0], [0], [1], [0, 0, 1, 1], [], []>} : vector<512x128xbf16>, vector<128x128xbf16>, vector<512x128xf32> -> vector<512x128xf32>
    %55 = arith.addf %48, %54 : vector<512x128xf32>
    %c0_58 = arith.constant 0 : index
    %c1_59 = arith.constant 1 : index
    %c0_60 = arith.constant 0 : index
    %c0_61 = arith.constant 0 : index
    %56 = vector.load %arg11[%c0_58, %c1_59, %c0_60, %c0_61] : memref<2x18x18x128xf32, #tpu.memory_space<vmem>>, vector<2x16x16x128xf32>
    %57 = vector.shape_cast %56 : vector<2x16x16x128xf32> to vector<512x128xf32>
    %58 = arith.truncf %57 : vector<512x128xf32> to vector<512x128xbf16>
    %c3 = arith.constant 3 : index
    %c0_62 = arith.constant 0 : index
    %c0_63 = arith.constant 0 : index
    %59 = vector.load %arg2[%c3, %c0_62, %c0_63] : memref<9x128x128xbf16, #tpu.memory_space<vmem>>, vector<1x128x128xbf16>
    %60 = vector.shape_cast %59 : vector<1x128x128xbf16> to vector<128x128xbf16>
    %cst_64 = arith.constant dense<0.000000e+00> : vector<512x128xf32>
    %61 = tpu.matmul %58, %60, %cst_64 {dimension_numbers = #tpu.dot_dimension_numbers<[1], [0], [0], [1], [0, 0, 1, 1], [], []>} : vector<512x128xbf16>, vector<128x128xbf16>, vector<512x128xf32> -> vector<512x128xf32>
    %62 = arith.addf %55, %61 : vector<512x128xf32>
    %c0_65 = arith.constant 0 : index
    %c1_66 = arith.constant 1 : index
    %c1_67 = arith.constant 1 : index
    %c0_68 = arith.constant 0 : index
    %63 = vector.load %arg11[%c0_65, %c1_66, %c1_67, %c0_68] : memref<2x18x18x128xf32, #tpu.memory_space<vmem>>, vector<2x16x16x128xf32>
    %64 = vector.shape_cast %63 : vector<2x16x16x128xf32> to vector<512x128xf32>
    %65 = arith.truncf %64 : vector<512x128xf32> to vector<512x128xbf16>
    %c4 = arith.constant 4 : index
    %c0_69 = arith.constant 0 : index
    %c0_70 = arith.constant 0 : index
    %66 = vector.load %arg2[%c4, %c0_69, %c0_70] : memref<9x128x128xbf16, #tpu.memory_space<vmem>>, vector<1x128x128xbf16>
    %67 = vector.shape_cast %66 : vector<1x128x128xbf16> to vector<128x128xbf16>
    %cst_71 = arith.constant dense<0.000000e+00> : vector<512x128xf32>
    %68 = tpu.matmul %65, %67, %cst_71 {dimension_numbers = #tpu.dot_dimension_numbers<[1], [0], [0], [1], [0, 0, 1, 1], [], []>} : vector<512x128xbf16>, vector<128x128xbf16>, vector<512x128xf32> -> vector<512x128xf32>
    %69 = arith.addf %62, %68 : vector<512x128xf32>
    %c0_72 = arith.constant 0 : index
    %c1_73 = arith.constant 1 : index
    %c2_74 = arith.constant 2 : index
    %c0_75 = arith.constant 0 : index
    %70 = vector.load %arg11[%c0_72, %c1_73, %c2_74, %c0_75] : memref<2x18x18x128xf32, #tpu.memory_space<vmem>>, vector<2x16x16x128xf32>
    %71 = vector.shape_cast %70 : vector<2x16x16x128xf32> to vector<512x128xf32>
    %72 = arith.truncf %71 : vector<512x128xf32> to vector<512x128xbf16>
    %c5 = arith.constant 5 : index
    %c0_76 = arith.constant 0 : index
    %c0_77 = arith.constant 0 : index
    %73 = vector.load %arg2[%c5, %c0_76, %c0_77] : memref<9x128x128xbf16, #tpu.memory_space<vmem>>, vector<1x128x128xbf16>
    %74 = vector.shape_cast %73 : vector<1x128x128xbf16> to vector<128x128xbf16>
    %cst_78 = arith.constant dense<0.000000e+00> : vector<512x128xf32>
    %75 = tpu.matmul %72, %74, %cst_78 {dimension_numbers = #tpu.dot_dimension_numbers<[1], [0], [0], [1], [0, 0, 1, 1], [], []>} : vector<512x128xbf16>, vector<128x128xbf16>, vector<512x128xf32> -> vector<512x128xf32>
    %76 = arith.addf %69, %75 : vector<512x128xf32>
    %c0_79 = arith.constant 0 : index
    %c2_80 = arith.constant 2 : index
    %c0_81 = arith.constant 0 : index
    %c0_82 = arith.constant 0 : index
    %77 = vector.load %arg11[%c0_79, %c2_80, %c0_81, %c0_82] : memref<2x18x18x128xf32, #tpu.memory_space<vmem>>, vector<2x16x16x128xf32>
    %78 = vector.shape_cast %77 : vector<2x16x16x128xf32> to vector<512x128xf32>
    %79 = arith.truncf %78 : vector<512x128xf32> to vector<512x128xbf16>
    %c6 = arith.constant 6 : index
    %c0_83 = arith.constant 0 : index
    %c0_84 = arith.constant 0 : index
    %80 = vector.load %arg2[%c6, %c0_83, %c0_84] : memref<9x128x128xbf16, #tpu.memory_space<vmem>>, vector<1x128x128xbf16>
    %81 = vector.shape_cast %80 : vector<1x128x128xbf16> to vector<128x128xbf16>
    %cst_85 = arith.constant dense<0.000000e+00> : vector<512x128xf32>
    %82 = tpu.matmul %79, %81, %cst_85 {dimension_numbers = #tpu.dot_dimension_numbers<[1], [0], [0], [1], [0, 0, 1, 1], [], []>} : vector<512x128xbf16>, vector<128x128xbf16>, vector<512x128xf32> -> vector<512x128xf32>
    %83 = arith.addf %76, %82 : vector<512x128xf32>
    %c0_86 = arith.constant 0 : index
    %c2_87 = arith.constant 2 : index
    %c1_88 = arith.constant 1 : index
    %c0_89 = arith.constant 0 : index
    %84 = vector.load %arg11[%c0_86, %c2_87, %c1_88, %c0_89] : memref<2x18x18x128xf32, #tpu.memory_space<vmem>>, vector<2x16x16x128xf32>
    %85 = vector.shape_cast %84 : vector<2x16x16x128xf32> to vector<512x128xf32>
    %86 = arith.truncf %85 : vector<512x128xf32> to vector<512x128xbf16>
    %c7 = arith.constant 7 : index
    %c0_90 = arith.constant 0 : index
    %c0_91 = arith.constant 0 : index
    %87 = vector.load %arg2[%c7, %c0_90, %c0_91] : memref<9x128x128xbf16, #tpu.memory_space<vmem>>, vector<1x128x128xbf16>
    %88 = vector.shape_cast %87 : vector<1x128x128xbf16> to vector<128x128xbf16>
    %cst_92 = arith.constant dense<0.000000e+00> : vector<512x128xf32>
    %89 = tpu.matmul %86, %88, %cst_92 {dimension_numbers = #tpu.dot_dimension_numbers<[1], [0], [0], [1], [0, 0, 1, 1], [], []>} : vector<512x128xbf16>, vector<128x128xbf16>, vector<512x128xf32> -> vector<512x128xf32>
    %90 = arith.addf %83, %89 : vector<512x128xf32>
    %c0_93 = arith.constant 0 : index
    %c2_94 = arith.constant 2 : index
    %c2_95 = arith.constant 2 : index
    %c0_96 = arith.constant 0 : index
    %91 = vector.load %arg11[%c0_93, %c2_94, %c2_95, %c0_96] : memref<2x18x18x128xf32, #tpu.memory_space<vmem>>, vector<2x16x16x128xf32>
    %92 = vector.shape_cast %91 : vector<2x16x16x128xf32> to vector<512x128xf32>
    %93 = arith.truncf %92 : vector<512x128xf32> to vector<512x128xbf16>
    %c8 = arith.constant 8 : index
    %c0_97 = arith.constant 0 : index
    %c0_98 = arith.constant 0 : index
    %94 = vector.load %arg2[%c8, %c0_97, %c0_98] : memref<9x128x128xbf16, #tpu.memory_space<vmem>>, vector<1x128x128xbf16>
    %95 = vector.shape_cast %94 : vector<1x128x128xbf16> to vector<128x128xbf16>
    %cst_99 = arith.constant dense<0.000000e+00> : vector<512x128xf32>
    %96 = tpu.matmul %93, %95, %cst_99 {dimension_numbers = #tpu.dot_dimension_numbers<[1], [0], [0], [1], [0, 0, 1, 1], [], []>} : vector<512x128xbf16>, vector<128x128xbf16>, vector<512x128xf32> -> vector<512x128xf32>
    %97 = arith.addf %90, %96 : vector<512x128xf32>
    %c0_100 = arith.constant 0 : index
    %c0_101 = arith.constant 0 : index
    %98 = vector.load %arg6[%c0_100, %c0_101] : memref<1x128xf32, #tpu.memory_space<vmem>>, vector<1x128xf32>
    %c0_102 = arith.constant 0 : index
    %c0_103 = arith.constant 0 : index
    %99 = vector.load %arg7[%c0_102, %c0_103] : memref<1x128xf32, #tpu.memory_space<vmem>>, vector<1x128xf32>
    %cst_104 = arith.constant dense<0.000000e+00> : vector<128xf32>
    %100 = vector.multi_reduction <add>, %97, %cst_104 [0] : vector<512x128xf32> to vector<128xf32>
    %101 = vector.shape_cast %100 : vector<128xf32> to vector<1x128xf32>
    %cst_105 = arith.constant 5.120000e+02 : f32
    %102 = vector.broadcast %cst_105 : f32 to vector<1x128xf32>
    %103 = arith.divf %101, %102 : vector<1x128xf32>
    %104 = vector.broadcast %103 : vector<1x128xf32> to vector<512x128xf32>
    %105 = arith.subf %97, %104 : vector<512x128xf32>
    %106 = arith.mulf %105, %105 : vector<512x128xf32>
    %cst_106 = arith.constant dense<0.000000e+00> : vector<128xf32>
    %107 = vector.multi_reduction <add>, %106, %cst_106 [0] : vector<512x128xf32> to vector<128xf32>
    %108 = vector.shape_cast %107 : vector<128xf32> to vector<1x128xf32>
    %cst_107 = arith.constant 5.120000e+02 : f32
    %109 = vector.broadcast %cst_107 : f32 to vector<1x128xf32>
    %110 = arith.divf %108, %109 : vector<1x128xf32>
    %cst_108 = arith.constant 9.99999974E-6 : f32
    %111 = vector.broadcast %cst_108 : f32 to vector<1x128xf32>
    %112 = arith.addf %110, %111 : vector<1x128xf32>
    %113 = math.rsqrt %112 : vector<1x128xf32>
    %114 = arith.mulf %98, %113 : vector<1x128xf32>
    %115 = vector.broadcast %114 : vector<1x128xf32> to vector<512x128xf32>
    %116 = arith.mulf %105, %115 : vector<512x128xf32>
    %117 = vector.broadcast %99 : vector<1x128xf32> to vector<512x128xf32>
    %118 = arith.addf %116, %117 : vector<512x128xf32>
    %cst_109 = arith.constant 0.000000e+00 : f32
    %119 = vector.broadcast %cst_109 : f32 to vector<512x128xf32>
    %120 = arith.maximumf %118, %119 : vector<512x128xf32>
    %121 = arith.truncf %120 : vector<512x128xf32> to vector<512x128xbf16>
    %c0_110 = arith.constant 0 : index
    %c0_111 = arith.constant 0 : index
    %122 = vector.load %arg3[%c0_110, %c0_111] : memref<128x32xbf16, #tpu.memory_space<vmem>>, vector<128x32xbf16>
    %cst_112 = arith.constant dense<0.000000e+00> : vector<512x32xf32>
    %123 = tpu.matmul %121, %122, %cst_112 {dimension_numbers = #tpu.dot_dimension_numbers<[1], [0], [0], [1], [0, 0, 1, 1], [], []>} : vector<512x128xbf16>, vector<128x32xbf16>, vector<512x32xf32> -> vector<512x32xf32>
    %c0_113 = arith.constant 0 : index
    %c0_114 = arith.constant 0 : index
    %124 = vector.load %arg8[%c0_113, %c0_114] : memref<1x32xf32, #tpu.memory_space<vmem>>, vector<1x32xf32>
    %c0_115 = arith.constant 0 : index
    %c0_116 = arith.constant 0 : index
    %125 = vector.load %arg9[%c0_115, %c0_116] : memref<1x32xf32, #tpu.memory_space<vmem>>, vector<1x32xf32>
    %cst_117 = arith.constant dense<0.000000e+00> : vector<32xf32>
    %126 = vector.multi_reduction <add>, %123, %cst_117 [0] : vector<512x32xf32> to vector<32xf32>
    %127 = vector.shape_cast %126 : vector<32xf32> to vector<1x32xf32>
    %cst_118 = arith.constant 5.120000e+02 : f32
    %128 = vector.broadcast %cst_118 : f32 to vector<1x32xf32>
    %129 = arith.divf %127, %128 : vector<1x32xf32>
    %130 = vector.broadcast %129 : vector<1x32xf32> to vector<512x32xf32>
    %131 = arith.subf %123, %130 : vector<512x32xf32>
    %132 = arith.mulf %131, %131 : vector<512x32xf32>
    %cst_119 = arith.constant dense<0.000000e+00> : vector<32xf32>
    %133 = vector.multi_reduction <add>, %132, %cst_119 [0] : vector<512x32xf32> to vector<32xf32>
    %134 = vector.shape_cast %133 : vector<32xf32> to vector<1x32xf32>
    %cst_120 = arith.constant 5.120000e+02 : f32
    %135 = vector.broadcast %cst_120 : f32 to vector<1x32xf32>
    %136 = arith.divf %134, %135 : vector<1x32xf32>
    %cst_121 = arith.constant 9.99999974E-6 : f32
    %137 = vector.broadcast %cst_121 : f32 to vector<1x32xf32>
    %138 = arith.addf %136, %137 : vector<1x32xf32>
    %139 = math.rsqrt %138 : vector<1x32xf32>
    %140 = arith.mulf %124, %139 : vector<1x32xf32>
    %141 = vector.broadcast %140 : vector<1x32xf32> to vector<512x32xf32>
    %142 = arith.mulf %131, %141 : vector<512x32xf32>
    %143 = vector.broadcast %125 : vector<1x32xf32> to vector<512x32xf32>
    %144 = arith.addf %142, %143 : vector<512x32xf32>
    %145 = arith.addf %144, %1 : vector<512x32xf32>
    %cst_122 = arith.constant 0.000000e+00 : f32
    %146 = vector.broadcast %cst_122 : f32 to vector<512x32xf32>
    %147 = arith.maximumf %145, %146 : vector<512x32xf32>
    %148 = vector.shape_cast %147 : vector<512x32xf32> to vector<2x16x16x32xf32>
    %c0_123 = arith.constant 0 : index
    %c0_124 = arith.constant 0 : index
    %c0_125 = arith.constant 0 : index
    %c0_126 = arith.constant 0 : index
    %149 = vector.load %arg10[%c0_123, %c0_124, %c0_125, %c0_126] : memref<2x16x16x32xf32, #tpu.memory_space<vmem>>, vector<2x16x16x32xf32>
    tpu.vector_store %arg10[%c0_123, %c0_124, %c0_125, %c0_126], %148 {strides = array<i32>} : memref<2x16x16x32xf32, #tpu.memory_space<vmem>>, vector<2x16x16x32xf32>,
    return
  }
}

</mosaic_0001>

<bundles_post_ra>
// kernel: bottleneck_forward.1
= control target key start
LH: loop header
LB: loop body
LE: loop exit
PB: predicated region body
PF: predicated region fallthrough
CT: control target
= control target key end

     0   :  { %vm149_vm0 = vcmask 261120   ;;  %s14792_s0 = inlined_call_operand.vmem [shape: f32[2,16,16,32], index: 0, kind: input, shape index: {}]   ;;  %s14793_s1 = inlined_call_operand.vmem [shape: bf16[32,128], index: 1, kind: input, shape index: {}]   ;;  %s14794_s2 = inlined_call_operand.vmem [shape: bf16[9,128,128], index: 2, kind: input, shape index: {}]   ;;  %s14795_s3 = inlined_call_operand.vmem [shape: bf16[128,32], index: 3, kind: input, shape index: {}]   ;;  %s14796_s4 = inlined_call_operand.vmem [shape: f32[1,128], index: 4, kind: input, shape index: {}]   ;;  %s14797_s5 = inlined_call_operand.vmem [shape: f32[1,128], index: 5, kind: input, shape index: {}]   ;;  %s14798_s6 = inlined_call_operand.vmem [shape: f32[1,128], index: 6, kind: input, shape index: {}]   ;;  %s14799_s7 = inlined_call_operand.vmem [shape: f32[1,128], index: 7, kind: input, shape index: {}]   ;;  %s14800_s8 = inlined_call_operand.vmem [shape: f32[1,32], index: 8, kind: input, shape index: {}]   ;;  %s14801_s9 = inlined_call_operand.vmem [shape: f32[1,32], index: 9, kind: input, shape index: {}]   ;;  %s14802_s10 = inlined_call_operand.hbm [shape: f32[2,16,16,32], index: 10, kind: output, shape index: {}]  }
   0x1   :  { %v8827_v0 = vld [vmem:[%s14793_s1 + $0x8] sm:$0xff]   ;;  %v8828_v1 = vld [vmem:[%s14793_s1] sm:$0xff]   ;;  %v39_v5 = vld [vmem:[%s14792_s0 + $0x10] sm:$0xff] }
   0x2   :  { %7951 = vmatprep.subr.bf16.mxu0 %v8827_v0  ;;  %v37_v2 = vld [vmem:[%s14792_s0] sm:$0xff]  ;;  %v38_v3 = vld [vmem:[%s14792_s0 + $0x8] sm:$0xff]  ;;  %8819 = vmatprep.subr.bf16.mxu1 %v8827_v0  ;;  %v40_v6 = vld [vmem:[%s14792_s0 + $0x18] sm:$0xff] }
   0x3   :  { %7952 = vmatpush3.bf16.msra.mxu0 %v8827_v0  ;;  %v101_v4 = vpack.c.bf16 %v38_v3, %v37_v2  ;;  %8821 = vmatpush3.bf16.msra.mxu1 %v8827_v0  ;;  %v41_v7 = vld [vmem:[%s14792_s0 + $0x20] sm:$0xff]  ;;  %v42_v8 = vld [vmem:[%s14792_s0 + $0x28] sm:$0xff]  ;;  %v102_v9 = vpack.c.bf16 %v40_v6, %v39_v5  ;;  %v43_v11 = vld [vmem:[%s14792_s0 + $0x30] sm:$0xff] }
   0x4   :  { %7953 = vmatprep.subr.bf16.mxu0 %v8828_v1  ;;  %8820 = vmatprep.subr.bf16.mxu1 %v8828_v1  ;;  %v103_v10 = vpack.c.bf16 %v42_v8, %v41_v7  ;;  %v44_v12 = vld [vmem:[%s14792_s0 + $0x38] sm:$0xff]  ;;  %v45_v13 = vld [vmem:[%s14792_s0 + $0x40] sm:$0xff]  ;;  %v46_v14 = vld [vmem:[%s14792_s0 + $0x48] sm:$0xff] }
   0x5   :  { %7955 = vmatprep.mubr.msk.bf16.mxu0 %vm149_vm0, %v101_v4  ;;  %v69_v15 = vld [vmem:[%s14792_s0 + $0x100] sm:$0xff]  ;;  %v70_v16 = vld [vmem:[%s14792_s0 + $0x108] sm:$0xff]  ;;  %v71_v17 = vld [vmem:[%s14792_s0 + $0x110] sm:$0xff]  ;;  %v104_v19 = vpack.c.bf16 %v44_v12, %v43_v11  ;;  %v105_v24 = vpack.c.bf16 %v46_v14, %v45_v13 }
   0x6   :  { %v72_v18 = vld [vmem:[%s14792_s0 + $0x118] sm:$0xff]  ;;  %v117_v20 = vpack.c.bf16 %v70_v16, %v69_v15  ;;  %v73_v22 = vld [vmem:[%s14792_s0 + $0x120] sm:$0xff]  ;;  %v74_v23 = vld [vmem:[%s14792_s0 + $0x128] sm:$0xff] }
   0x7   :  { %7954 = vmatpush3.bf16.msra.mxu0 %v8828_v1  ;;  %8822 = vmatpush3.bf16.msra.mxu1 %v8828_v1  ;;  %v118_v21 = vpack.c.bf16 %v72_v18, %v71_v17  ;;  %v119_v25 = vpack.c.bf16 %v74_v23, %v73_v22  ;;  %v47_v26 = vld [vmem:[%s14792_s0 + $0x50] sm:$0xff]  ;;  %v76_v28 = vld [vmem:[%s14792_s0 + $0x138] sm:$0xff]  ;;  %v77_v30 = vld [vmem:[%s14792_s0 + $0x140] sm:$0xff] }
   0x8   :  { %7987 = vmatprep.mubr.msk.bf16.mxu1 %vm149_vm0, %v117_v20  ;;  %v75_v27 = vld [vmem:[%s14792_s0 + $0x130] sm:$0xff]  ;;  %v48_v29 = vld [vmem:[%s14792_s0 + $0x58] sm:$0xff]  ;;  %v78_v31 = vld [vmem:[%s14792_s0 + $0x148] sm:$0xff] }
   0x9   :  { %v49_v32 = vld [vmem:[%s14792_s0 + $0x60] sm:$0xff]  ;;  %v50_v33 = vld [vmem:[%s14792_s0 + $0x68] sm:$0xff]  ;;  %v120_v34 = vpack.c.bf16 %v76_v28, %v75_v27  ;;  %v106_v35 = vpack.c.bf16 %v48_v29, %v47_v26  ;;  %v121_v36 = vpack.c.bf16 %v78_v31, %v77_v30  ;;  %v79_v38 = vld [vmem:[%s14792_s0 + $0x150] sm:$0xff] }
   0xa   :  { %7956 = vmatmul.mubr.msk.bf16.vlgmr.msra.gmra.mxu0 %vm149_vm0, %v102_v9  ;;  %7988 = vmatmul.mubr.msk.bf16.vlgmr.msra.gmra.mxu1 %vm149_vm0, %v118_v21  ;;  %v107_v37 = vpack.c.bf16 %v50_v33, %v49_v32  ;;  %v80_v39 = vld [vmem:[%s14792_s0 + $0x158] sm:$0xff]  ;;  %v51_v40 = vld [vmem:[%s14792_s0 + $0x70] sm:$0xff]  ;;  %v81_v42 = vld [vmem:[%s14792_s0 + $0x160] sm:$0xff] }
   0xb   :  { %7959 = vmatprep.mubr.msk.bf16.mxu0 %vm149_vm0, %v103_v10  ;;  %7991 = vmatprep.mubr.msk.bf16.mxu1 %vm149_vm0, %v119_v25  ;;  %v52_v41 = vld [vmem:[%s14792_s0 + $0x78] sm:$0xff]  ;;  %v82_v43 = vld [vmem:[%s14792_s0 + $0x168] sm:$0xff]  ;;  %v53_v44 = vld [vmem:[%s14792_s0 + $0x80] sm:$0xff]  ;;  %v122_v46 = vpack.c.bf16 %v80_v39, %v79_v38 }
   0xc   :  { %v54_v45 = vld [vmem:[%s14792_s0 + $0x88] sm:$0xff]  ;;  %v108_v47 = vpack.c.bf16 %v52_v41, %v51_v40  ;;  %v123_v48 = vpack.c.bf16 %v82_v43, %v81_v42  ;;  %v83_v50 = vld [vmem:[%s14792_s0 + $0x170] sm:$0xff]  ;;  %v84_v51 = vld [vmem:[%s14792_s0 + $0x178] sm:$0xff] }
   0xd   :  { %v109_v49 = vpack.c.bf16 %v54_v45, %v53_v44  ;;  %v55_v52 = vld [vmem:[%s14792_s0 + $0x90] sm:$0xff]  ;;  %v56_v53 = vld [vmem:[%s14792_s0 + $0x98] sm:$0xff]  ;;  %v85_v54 = vld [vmem:[%s14792_s0 + $0x180] sm:$0xff]  ;;  %v124_v58 = vpack.c.bf16 %v84_v51, %v83_v50 }
   0xe   :  { %v86_v55 = vld [vmem:[%s14792_s0 + $0x188] sm:$0xff]  ;;  %v57_v56 = vld [vmem:[%s14792_s0 + $0xa0] sm:$0xff]  ;;  %v110_v59 = vpack.c.bf16 %v56_v53, %v55_v52  ;;  %v87_v62 = vld [vmem:[%s14792_s0 + $0x190] sm:$0xff] }
   0xf   :  { %v58_v57 = vld [vmem:[%s14792_s0 + $0xa8] sm:$0xff]  ;;  %v125_v60 = vpack.c.bf16 %v86_v55, %v85_v54  ;;  %v88_v63 = vld [vmem:[%s14792_s0 + $0x198] sm:$0xff]  ;;  %v59_v0 = vld [vmem:[%s14792_s0 + $0xb0] sm:$0xff] }
  0x10   :  { %v111_v61 = vpack.c.bf16 %v58_v57, %v57_v56  ;;  %v60_v1 = vld [vmem:[%s14792_s0 + $0xb8] sm:$0xff]  ;;  %v89_v2 = vld [vmem:[%s14792_s0 + $0x1a0] sm:$0xff]  ;;  %v90_v3 = vld [vmem:[%s14792_s0 + $0x1a8] sm:$0xff]  ;;  %v126_v6 = vpack.c.bf16 %v88_v63, %v87_v62 }
  0x11   :  { %v61_v4 = vld [vmem:[%s14792_s0 + $0xc0] sm:$0xff]  ;;  %v62_v5 = vld [vmem:[%s14792_s0 + $0xc8] sm:$0xff]  ;;  %v112_v7 = vpack.c.bf16 %v60_v1, %v59_v0  ;;  %v127_v8 = vpack.c.bf16 %v90_v3, %v89_v2  ;;  %v91_v10 = vld [vmem:[%s14792_s0 + $0x1b0] sm:$0xff] }
  0x12   :  { %7960 = vmatmul.mubr.msk.bf16.gmra.mxu0 %vm149_vm0, %v104_v19  ;;  %7992 = vmatmul.mubr.msk.bf16.gmra.mxu1 %vm149_vm0, %v120_v34  ;;  %v113_v9 = vpack.c.bf16 %v62_v5, %v61_v4  ;;  %v92_v11 = vld [vmem:[%s14792_s0 + $0x1b8] sm:$0xff]  ;;  %v63_v12 = vld [vmem:[%s14792_s0 + $0xd0] sm:$0xff]  ;;  %v93_v14 = vld [vmem:[%s14792_s0 + $0x1c0] sm:$0xff] }
  0x13   :  { %7963 = vmatprep.mubr.msk.bf16.mxu0 %vm149_vm0, %v105_v24  ;;  %7995 = vmatprep.mubr.msk.bf16.mxu1 %vm149_vm0, %v121_v36  ;;  %v64_v13 = vld [vmem:[%s14792_s0 + $0xd8] sm:$0xff]  ;;  %v94_v15 = vld [vmem:[%s14792_s0 + $0x1c8] sm:$0xff]  ;;  %v65_v16 = vld [vmem:[%s14792_s0 + $0xe0] sm:$0xff]  ;;  %v128_v18 = vpack.c.bf16 %v92_v11, %v91_v10 }
  0x14   :  { %v66_v17 = vld [vmem:[%s14792_s0 + $0xe8] sm:$0xff]  ;;  %v114_v19 = vpack.c.bf16 %v64_v13, %v63_v12  ;;  %v129_v20 = vpack.c.bf16 %v94_v15, %v93_v14  ;;  %v95_v22 = vld [vmem:[%s14792_s0 + $0x1d0] sm:$0xff]  ;;  %v96_v23 = vld [vmem:[%s14792_s0 + $0x1d8] sm:$0xff] }
  0x15   :  { %v115_v21 = vpack.c.bf16 %v66_v17, %v65_v16  ;;  %v67_v24 = vld [vmem:[%s14792_s0 + $0xf0] sm:$0xff]  ;;  %v68_v25 = vld [vmem:[%s14792_s0 + $0xf8] sm:$0xff]  ;;  %v97_v26 = vld [vmem:[%s14792_s0 + $0x1e0] sm:$0xff]  ;;  %v130_v28 = vpack.c.bf16 %v96_v23, %v95_v22 }
  0x16   :  { %v98_v27 = vld [vmem:[%s14792_s0 + $0x1e8] sm:$0xff]  ;;  %v116_v29 = vpack.c.bf16 %v68_v25, %v67_v24  ;;  %v99_v31 = vld [vmem:[%s14792_s0 + $0x1f0] sm:$0xff]  ;;  %v100_v32 = vld [vmem:[%s14792_s0 + $0x1f8] sm:$0xff] }
  0x17   :  { %v131_v30 = vpack.c.bf16 %v98_v27, %v97_v26  ;;  %v132_v33 = vpack.c.bf16 %v100_v32, %v99_v31 }
  0x1a   :  { %7964 = vmatmul.mubr.msk.bf16.gmra.mxu0 %vm149_vm0, %v106_v35  ;;  %7996 = vmatmul.mubr.msk.bf16.gmra.mxu1 %vm149_vm0, %v122_v46 }
  0x1b   :  { %7967 = vmatprep.mubr.msk.bf16.mxu0 %vm149_vm0, %v107_v37  ;;  %7999 = vmatprep.mubr.msk.bf16.mxu1 %vm149_vm0, %v123_v48 }
  0x22   :  { %7968 = vmatmul.mubr.msk.bf16.gmra.mxu0 %vm149_vm0, %v108_v47  ;;  %8000 = vmatmul.mubr.msk.bf16.gmra.mxu1 %vm149_vm0, %v124_v58 }
  0x23   :  { %7971 = vmatprep.mubr.msk.bf16.mxu0 %vm149_vm0, %v109_v49  ;;  %8003 = vmatprep.mubr.msk.bf16.mxu1 %vm149_vm0, %v125_v60 }
  0x2a   :  { %7972 = vmatmul.mubr.msk.bf16.gmra.mxu0 %vm149_vm0, %v110_v59  ;;  %8004 = vmatmul.mubr.msk.bf16.gmra.mxu1 %vm149_vm0, %v126_v6 }
  0x2b   :  { %7975 = vmatprep.mubr.msk.bf16.mxu0 %vm149_vm0, %v111_v61  ;;  %8007 = vmatprep.mubr.msk.bf16.mxu1 %vm149_vm0, %v127_v8 }
  0x32   :  { %7976 = vmatmul.mubr.msk.bf16.gmra.mxu0 %vm149_vm0, %v112_v7  ;;  %8008 = vmatmul.mubr.msk.bf16.gmra.mxu1 %vm149_vm0, %v128_v18 }
  0x33   :  { %7979 = vmatprep.mubr.msk.bf16.mxu0 %vm149_vm0, %v113_v9  ;;  %8011 = vmatprep.mubr.msk.bf16.mxu1 %vm149_vm0, %v129_v20 }
  0x3a   :  { %7980 = vmatmul.mubr.msk.bf16.gmra.mxu0 %vm149_vm0, %v114_v19  ;;  %8012 = vmatmul.mubr.msk.bf16.gmra.mxu1 %vm149_vm0, %v130_v28 }
  0x3b   :  { %7983 = vmatprep.mubr.msk.bf16.mxu0 %vm149_vm0, %v115_v21  ;;  %8015 = vmatprep.mubr.msk.bf16.mxu1 %vm149_vm0, %v131_v30 }
  0x42   :  { %7984 = vmatmul.mubr.msk.bf16.gmra.mxu0 %vm149_vm0, %v116_v29  ;;  %8016 = vmatmul.mubr.msk.bf16.gmra.mxu1 %vm149_vm0, %v132_v33 }
  0x43   :  { %15 = vsyncpa [#allocation4], 0 }
  0xca   :  { %v9292_v34 = vpop.f32.mrf.mxu0  ;;  %v9302_v39 = vpop.f32.mrf.mxu1 }
  0xcc   :  { %v9294_v35 = vpop.f32.mrf.mxu0  ;;  %v9309_v43 = vpop.f32.mrf.mxu1 }
  0xce   :  { %v9296_v36 = vpop.f32.mrf.mxu0  ;;  %v9317_v48 = vpop.f32.mrf.mxu1 }
  0xd0   :  { %v9298_v37 = vpop.f32.mrf.mxu0  ;;  %v9325_v53 = vpop.f32.mrf.mxu1 }
  0xd1   :  { %v537_v38 = vadd.f32 %v9298_v37, %v9294_v35 }
  0xd2   :  { %v9304_v40 = vpop.f32.mrf.mxu0  ;;  %v9333_v58 = vpop.f32.mrf.mxu1 }
  0xd3   :  { %v538_v41 = vadd.f32 %v9292_v34, %v537_v38 }
  0xd4   :  { %v9307_v42 = vpop.f32.mrf.mxu0  ;;  %v9341_v63 = vpop.f32.mrf.mxu1 }
  0xd5   :  { %v539_v44 = vadd.f32 %v9296_v36, %v538_v41 }
  0xd6   :  { %v9312_v45 = vpop.f32.mrf.mxu0  ;;  %v9349_v4 = vpop.f32.mrf.mxu1 }
  0xd7   :  { %v540_v46 = vadd.f32 %v539_v44, %v9307_v42 }
  0xd8   :  { %v9315_v47 = vpop.f32.mrf.mxu0  ;;  %v9357_v9 = vpop.f32.mrf.mxu1 }
  0xd9   :  { %v541_v49 = vadd.f32 %v540_v46, %v9315_v47 }
  0xda   :  { %v9320_v50 = vpop.f32.mrf.mxu0  ;;  %v9365_v14 = vpop.f32.mrf.mxu1 }
  0xdb   :  { %v542_v51 = vadd.f32 %v9304_v40, %v541_v49 }
  0xdc   :  { %v9323_v52 = vpop.f32.mrf.mxu0  ;;  %v9373_v19 = vpop.f32.mrf.mxu1 }
  0xdd   :  { %v543_v54 = vadd.f32 %v9312_v45, %v542_v51 }
  0xde   :  { %v9328_v55 = vpop.f32.mrf.mxu0  ;;  %v9381_v24 = vpop.f32.mrf.mxu1 }
  0xdf   :  { %v544_v56 = vadd.f32 %v543_v54, %v9323_v52  ;;  %14954 = vst [vmem:[#allocation6_spill] sm:$0xff] %v9381_v24 }
  0xe0   :  { %v9331_v57 = vpop.f32.mrf.mxu0  ;;  %v9389_v29 = vpop.f32.mrf.mxu1 }
  0xe1   :  { %v545_v59 = vadd.f32 %v544_v56, %v9331_v57  ;;  %14955 = vst [vmem:[#allocation7_spill] sm:$0xff] %v9389_v29 }
  0xe2   :  { %v9336_v60 = vpop.f32.mrf.mxu0  ;;  %v9397_v38 = vpop.f32.mrf.mxu1 }
  0xe3   :  { %v546_v61 = vadd.f32 %v9320_v50, %v545_v59 }
  0xe4   :  { %v9339_v62 = vpop.f32.mrf.mxu0  ;;  %v9405_v51 = vpop.f32.mrf.mxu1 }
  0xe5   :  { %v547_v0 = vadd.f32 %v9328_v55, %v546_v61 }
  0xe6   :  { %v9344_v1 = vpop.f32.mrf.mxu0 }
  0xe7   :  { %v548_v2 = vadd.f32 %v547_v0, %v9339_v62  ;;  %v9413_v0 = vpop.f32.mrf.mxu1 }
  0xe8   :  { %v9347_v3 = vpop.f32.mrf.mxu0  ;;  %14956 = vst [vmem:[#allocation8_spill] sm:$0xff] %v9413_v0 }
  0xe9   :  { %v549_v5 = vadd.f32 %v548_v2, %v9347_v3 }
  0xea   :  { %v9352_v6 = vpop.f32.mrf.mxu0 }
  0xeb   :  { %v550_v7 = vadd.f32 %v9336_v60, %v549_v5 }
  0xec   :  { %v9355_v8 = vpop.f32.mrf.mxu0 }
  0xed   :  { %v551_v10 = vadd.f32 %v9344_v1, %v550_v7  ;;  %v9417_v7 = vpop.f32.mrf.mxu1 }
  0xee   :  { %v9360_v11 = vpop.f32.mrf.mxu0  ;;  %14957 = vst [vmem:[#allocation9_spill] sm:$0xff] %v9417_v7 }
  0xef   :  { %v552_v12 = vadd.f32 %v551_v10, %v9355_v8 }
  0xf0   :  { %v9363_v13 = vpop.f32.mrf.mxu0 }
  0xf1   :  { %v553_v15 = vadd.f32 %v552_v12, %v9363_v13 }
  0xf2   :  { %v9368_v16 = vpop.f32.mrf.mxu0 }
  0xf3   :  { %v554_v17 = vadd.f32 %v9352_v6, %v553_v15  ;;  %v9421_v15 = vpop.f32.mrf.mxu1 }
  0xf4   :  { %v9371_v18 = vpop.f32.mrf.mxu0 }
  0xf5   :  { %v555_v20 = vadd.f32 %v9360_v11, %v554_v17 }
  0xf6   :  { %v9376_v21 = vpop.f32.mrf.mxu0 }
  0xf7   :  { %v556_v22 = vadd.f32 %v555_v20, %v9371_v18 }
  0xf8   :  { %v9379_v23 = vpop.f32.mrf.mxu0 }
  0xf9   :  { %v557_v25 = vadd.f32 %v556_v22, %v9379_v23  ;;  %v9425_v22 = vpop.f32.mrf.mxu1 }
  0xfa   :  { %v9384_v26 = vpop.f32.mrf.mxu0 }
  0xfb   :  { %v558_v27 = vadd.f32 %v9368_v16, %v557_v25 }
  0xfc   :  { %v9387_v28 = vpop.f32.mrf.mxu0 }
  0xfd   :  { %v559_v30 = vadd.f32 %v9376_v21, %v558_v27 }
  0xfe   :  { %v9392_v31 = vpop.f32.mrf.mxu0 }
  0xff   :  { %v560_v32 = vadd.f32 %v559_v30, %v9387_v28  ;;  %v9429_v30 = vpop.f32.mrf.mxu1 }
 0x100   :  { %v9395_v33 = vpop.f32.mrf.mxu0  ;;  %14958 = vst [vmem:[#allocation10_spill] sm:$0xff] %v9429_v30 }
 0x101   :  { %v561_v41 = vadd.f32 %v560_v32, %v9395_v33 }
 0x102   :  { %v9400_v44 = vpop.f32.mrf.mxu0 }
 0x103   :  { %v562_v46 = vadd.f32 %v9384_v26, %v561_v41 }
 0x104   :  { %v9403_v49 = vpop.f32.mrf.mxu0 }
 0x105   :  { %v563_v54 = vadd.f32 %v9392_v31, %v562_v46  ;;  %v9433_v46 = vpop.f32.mrf.mxu1 }
 0x106   :  { %v9408_v56 = vpop.f32.mrf.mxu0  ;;  %14959 = vst [vmem:[#allocation11_spill] sm:$0xff] %v9433_v46 }
 0x107   :  { %v564_v59 = vadd.f32 %v563_v54, %v9403_v49 }
 0x108   :  { %v9411_v61 = vpop.f32.mrf.mxu0 }
 0x109   :  { %v565_v2 = vadd.f32 %v564_v59, %v9411_v61 }
 0x10b   :  { %v566_v5 = vadd.f32 %v9400_v44, %v565_v2  ;;  %v9437_v2 = vpop.f32.mrf.mxu1 }
 0x10c   :  { %14960 = vst [vmem:[#allocation12_spill] sm:$0xff] %v9437_v2 }
 0x10d   :  { %v567_v10 = vadd.f32 %v9408_v56, %v566_v5 }
 0x10f   :  { %v568_v12 = vadd.f32 %v567_v10, %v9309_v43 }
 0x111   :  { %v569_v17 = vadd.f32 %v568_v12, %v9325_v53  ;;  %v9441_v12 = vpop.f32.mrf.mxu1 }
 0x112   :  { %14961 = vst [vmem:[#allocation13_spill] sm:$0xff] %v9441_v12 }
 0x113   :  { %v570_v20 = vadd.f32 %v9302_v39, %v569_v17 }
 0x115   :  { %v571_v25 = vadd.f32 %v9317_v48, %v570_v20 }
 0x117   :  { %v572_v27 = vadd.f32 %v571_v25, %v9341_v63  ;;  %v9445_v25 = vpop.f32.mrf.mxu1 }
 0x118   :  { %14962 = vst [vmem:[#allocation14_spill] sm:$0xff] %v9445_v25 }
 0x119   :  { %v573_v32 = vadd.f32 %v572_v27, %v9357_v9 }
 0x11b   :  { %v574_v41 = vadd.f32 %v9333_v58, %v573_v32 }
 0x11d   :  { %v575_v54 = vadd.f32 %v9349_v4, %v574_v41  ;;  %v9449_v41 = vpop.f32.mrf.mxu1 }
 0x11e   :  { %14963 = vst [vmem:[#allocation15_spill] sm:$0xff] %v9449_v41 }
 0x11f   :  { %v576_v59 = vadd.f32 %v575_v54, %v9373_v19 }
 0x121   :  { %v577_v5 = vadd.f32 %v576_v59, %v9389_v29  ;;  %v9453_v29 = vpop.f32.mrf.mxu1 }
 0x122   :  { %14964 = vst [vmem:[#allocation16_spill] sm:$0xff] %v9453_v29 }
 0x123   :  { %v578_v10 = vadd.f32 %v9365_v14, %v577_v5 }
 0x125   :  { %v579_v17 = vadd.f32 %v9381_v24, %v578_v10  ;;  %v9457_v24 = vpop.f32.mrf.mxu1 }
 0x126   :  { %14965 = vst [vmem:[#allocation17_spill] sm:$0xff] %v9457_v24 }
 0x127   :  { %v580_v20 = vadd.f32 %v579_v17, %v9405_v51 }
 0x129   :  { %v581_v27 = vadd.f32 %v580_v20, %v9417_v7  ;;  %v9461_v7 = vpop.f32.mrf.mxu1 }
 0x12b   :  { %v582_v32 = vadd.f32 %v9397_v38, %v581_v27 }
 0x12d   :  { %v583_v54 = vadd.f32 %v9413_v0, %v582_v32  ;;  %v9465_v0 = vpop.f32.mrf.mxu1 }
 0x12e   :  { %14966 = vst [vmem:[#allocation18_spill] sm:$0xff] %v9465_v0 }
 0x12f   :  { %v584_v59 = vadd.f32 %v583_v54, %v9425_v22 }
 0x131   :  { %v585_v5 = vadd.f32 %v584_v59, %v9433_v46  ;;  %v9469_v46 = vpop.f32.mrf.mxu1 }
 0x133   :  { %v586_v10 = vadd.f32 %v9421_v15, %v585_v5 }
 0x135   :  { %v587_v17 = vadd.f32 %v9429_v30, %v586_v10  ;;  %v9473_v30 = vpop.f32.mrf.mxu1 }
 0x137   :  { %v588_v20 = vadd.f32 %v587_v17, %v9441_v12  ;;  %v9476_v12 = vpop.f32.mrf.mxu1 }
 0x139   :  { %v589_v27 = vadd.f32 %v588_v20, %v9449_v41 }
 0x13b   :  { %v590_v32 = vadd.f32 %v9437_v2, %v589_v27  ;;  %v9479_v27 = vpop.f32.mrf.mxu1 }
 0x13d   :  { %v591_v54 = vadd.f32 %v9445_v25, %v590_v32 }
 0x13f   :  { %v592_v59 = vadd.f32 %v591_v54, %v9457_v24 }
 0x141   :  { %v593_v5 = vadd.f32 %v592_v59, %v9465_v0 }
 0x143   :  { %v594_v10 = vadd.f32 %v9453_v29, %v593_v5 }
 0x145   :  { %v595_v17 = vadd.f32 %v9461_v7, %v594_v10 }
 0x147   :  { %v596_v20 = vadd.f32 %v595_v17, %v9473_v30 }
 0x149   :  { %v597_v32 = vadd.f32 %v596_v20, %v9479_v27 }
 0x14b   :  { %v598_v54 = vadd.f32 %v9469_v46, %v597_v32 }
 0x14d   :  { %v599_v24 = vadd.f32 %v9476_v12, %v598_v54 }
 0x14f   :  { %v600_v25 = vrot.slane %v599_v24, 4 }
 0x151   :  { %v601_v59 = vadd.f32 %v600_v25, %v599_v24 }
 0x153   :  { %v602_v0 = vrot.slane %v601_v59, 2 }
 0x155   :  { %v603_v5 = vadd.f32 %v602_v0, %v601_v59 }
 0x157   :  { %v604_v29 = vrot.slane %v603_v5, 1 }
 0x159   :  { %v605_v2 = vadd.f32 %v604_v29, %v603_v5 }
 0x15b   :  { %v9484_v41 = vmul.f32 0.001953125, %v605_v2 }
 0x15d   :  { %v9488_v10 = vsub.f32 %v9294_v35, %v9484_v41  ;;  %v9492_v17 = vsub.f32 %v9298_v37, %v9484_v41  ;;  %v9496_v20 = vsub.f32 %v9292_v34, %v9484_v41  ;;  %v9504_v0 = vsub.f32 %v9296_v36, %v9484_v41 }
 0x15e   :  { %v9508_v35 = vsub.f32 %v9307_v42, %v9484_v41  ;;  %v9514_v34 = vsub.f32 %v9315_v47, %v9484_v41  ;;  %v9520_v36 = vsub.f32 %v9304_v40, %v9484_v41  ;;  %v9526_v59 = vsub.f32 %v9312_v45, %v9484_v41 }
 0x15f   :  { %v672_v24 = vmul.f32 %v9488_v10, %v9488_v10  ;;  %v673_v29 = vmul.f32 %v9492_v17, %v9492_v17  ;;  %v674_v37 = vmul.f32 %v9496_v20, %v9496_v20  ;;  %v675_v25 = vmul.f32 %v9504_v0, %v9504_v0 }
 0x160   :  { %v676_v42 = vmul.f32 %v9508_v35, %v9508_v35  ;;  %v677_v47 = vmul.f32 %v9514_v34, %v9514_v34  ;;  %v678_v40 = vmul.f32 %v9520_v36, %v9520_v36  ;;  %v679_v45 = vmul.f32 %v9526_v59, %v9526_v59 }
 0x161   :  { %v736_v2 = vadd.f32 %v673_v29, %v672_v24  ;;  %v9532_v24 = vsub.f32 %v9323_v52, %v9484_v41 }
 0x163   :  { %v737_v32 = vadd.f32 %v736_v2, %v674_v37  ;;  %v9538_v37 = vsub.f32 %v9331_v57, %v9484_v41  ;;  %v680_v52 = vmul.f32 %v9532_v24, %v9532_v24 }
 0x165   :  { %v738_v54 = vadd.f32 %v737_v32, %v675_v25  ;;  %v9544_v25 = vsub.f32 %v9320_v50, %v9484_v41  ;;  %v681_v57 = vmul.f32 %v9538_v37, %v9538_v37 }
 0x167   :  { %v739_v5 = vadd.f32 %v738_v54, %v676_v42  ;;  %v9550_v42 = vsub.f32 %v9328_v55, %v9484_v41  ;;  %v682_v50 = vmul.f32 %v9544_v25, %v9544_v25 }
 0x169   :  { %v740_v29 = vadd.f32 %v739_v5, %v677_v47  ;;  %v9556_v47 = vsub.f32 %v9339_v62, %v9484_v41  ;;  %v683_v55 = vmul.f32 %v9550_v42, %v9550_v42 }
 0x16b   :  { %v741_v2 = vadd.f32 %v740_v29, %v678_v40  ;;  %v9562_v40 = vsub.f32 %v9347_v3, %v9484_v41  ;;  %v684_v62 = vmul.f32 %v9556_v47, %v9556_v47 }
 0x16d   :  { %v742_v32 = vadd.f32 %v741_v2, %v679_v45  ;;  %v9568_v45 = vsub.f32 %v9336_v60, %v9484_v41  ;;  %v685_v3 = vmul.f32 %v9562_v40, %v9562_v40 }
 0x16f   :  { %v743_v54 = vadd.f32 %v742_v32, %v680_v52  ;;  %v9574_v52 = vsub.f32 %v9344_v1, %v9484_v41  ;;  %v686_v60 = vmul.f32 %v9568_v45, %v9568_v45 }
 0x171   :  { %v744_v5 = vadd.f32 %v743_v54, %v681_v57  ;;  %v9580_v57 = vsub.f32 %v9355_v8, %v9484_v41  ;;  %v687_v1 = vmul.f32 %v9574_v52, %v9574_v52 }
 0x173   :  { %v745_v29 = vadd.f32 %v744_v5, %v682_v50  ;;  %v9586_v50 = vsub.f32 %v9363_v13, %v9484_v41  ;;  %v688_v8 = vmul.f32 %v9580_v57, %v9580_v57 }
 0x175   :  { %v746_v2 = vadd.f32 %v745_v29, %v683_v55  ;;  %v9592_v55 = vsub.f32 %v9352_v6, %v9484_v41  ;;  %v689_v13 = vmul.f32 %v9586_v50, %v9586_v50 }
 0x177   :  { %v747_v32 = vadd.f32 %v746_v2, %v684_v62  ;;  %v9598_v62 = vsub.f32 %v9360_v11, %v9484_v41  ;;  %v690_v6 = vmul.f32 %v9592_v55, %v9592_v55 }
 0x179   :  { %v748_v54 = vadd.f32 %v747_v32, %v685_v3  ;;  %v9604_v3 = vsub.f32 %v9371_v18, %v9484_v41  ;;  %v691_v11 = vmul.f32 %v9598_v62, %v9598_v62 }
 0x17b   :  { %v749_v5 = vadd.f32 %v748_v54, %v686_v60  ;;  %v9610_v60 = vsub.f32 %v9379_v23, %v9484_v41  ;;  %v692_v18 = vmul.f32 %v9604_v3, %v9604_v3 }
 0x17d   :  { %v750_v29 = vadd.f32 %v749_v5, %v687_v1  ;;  %v9616_v1 = vsub.f32 %v9368_v16, %v9484_v41  ;;  %v693_v23 = vmul.f32 %v9610_v60, %v9610_v60 }
 0x17f   :  { %v751_v2 = vadd.f32 %v750_v29, %v688_v8  ;;  %v9622_v8 = vsub.f32 %v9376_v21, %v9484_v41  ;;  %v694_v16 = vmul.f32 %v9616_v1, %v9616_v1 }
 0x181   :  { %v752_v32 = vadd.f32 %v751_v2, %v689_v13  ;;  %v9628_v13 = vsub.f32 %v9387_v28, %v9484_v41  ;;  %v695_v21 = vmul.f32 %v9622_v8, %v9622_v8 }
 0x183   :  { %v753_v54 = vadd.f32 %v752_v32, %v690_v6  ;;  %v9634_v6 = vsub.f32 %v9395_v33, %v9484_v41  ;;  %v696_v28 = vmul.f32 %v9628_v13, %v9628_v13 }
 0x185   :  { %v754_v5 = vadd.f32 %v753_v54, %v691_v11  ;;  %v9640_v11 = vsub.f32 %v9384_v26, %v9484_v41  ;;  %v697_v33 = vmul.f32 %v9634_v6, %v9634_v6 }
 0x187   :  { %v755_v29 = vadd.f32 %v754_v5, %v692_v18  ;;  %v9646_v18 = vsub.f32 %v9392_v31, %v9484_v41  ;;  %v698_v26 = vmul.f32 %v9640_v11, %v9640_v11  ;;  %v9661_v31 = vsub.f32 %v9411_v61, %v9484_v41 }
 0x188   :  { %v9676_v61 = vsub.f32 %v9408_v56, %v9484_v41  ;;  %v8834_v56 = vld [vmem:[%s14794_s2 + $0x38] sm:$0xff]  }
 0x189   :  { %v756_v2 = vadd.f32 %v755_v29, %v693_v23  ;;  %v9652_v23 = vsub.f32 %v9403_v49, %v9484_v41  ;;  %v9667_v49 = vsub.f32 %v9400_v44, %v9484_v41  ;;  %v9682_v44 = vsub.f32 %v9309_v43, %v9484_v41  ;;  %8099 = vmatprep.subr.bf16.mxu0 %v8834_v56 }
 0x18a   :  { %v703_v43 = vmul.f32 %v9676_v61, %v9676_v61  ;;  %8100 = vmatpush3.bf16.msra.mxu0 %v8834_v56 }
 0x18b   :  { %v757_v32 = vadd.f32 %v756_v2, %v694_v16  ;;  %v8829_v16 = vld [vmem:[%s14794_s2 + $0x78] sm:$0xff]   ;;  %v699_v2 = vmul.f32 %v9646_v18, %v9646_v18 }
 0x18c   :  { %8019 = vmatprep.subr.bf16.mxu1 %v8829_v16 }
 0x18d   :  { %v758_v54 = vadd.f32 %v757_v32, %v695_v21  ;;  %v700_v32 = vmul.f32 %v9652_v23, %v9652_v23  ;;  %8020 = vmatpush3.bf16.msra.mxu1 %v8829_v16  ;;  %v8831_v16 = vld [vmem:[%s14794_s2 + $0x68] sm:$0xff]  }
 0x18f   :  { %v759_v5 = vadd.f32 %v758_v54, %v696_v28  ;;  %v8830_v54 = vld [vmem:[%s14794_s2 + $0x70] sm:$0xff]  }
 0x190   :  { %8021 = vmatprep.subr.bf16.mxu1 %v8830_v54 }
 0x191   :  { %v760_v29 = vadd.f32 %v759_v5, %v697_v33  ;;  %v701_v33 = vmul.f32 %v9661_v31, %v9661_v31  ;;  %8022 = vmatpush3.bf16.msra.mxu1 %v8830_v54 }
 0x192   :  { %8023 = vmatprep.subr.bf16.mxu1 %v8831_v16 }
 0x193   :  { %v761_v21 = vadd.f32 %v760_v29, %v698_v26  ;;  %v702_v26 = vmul.f32 %v9667_v49, %v9667_v49 }
 0x195   :  { %v762_v28 = vadd.f32 %v761_v21, %v699_v2  ;;  %v9694_v2 = vsub.f32 %v9325_v53, %v9484_v41  ;;  %8024 = vmatpush3.bf16.msra.mxu1 %v8831_v16  ;;  %v8832_v53 = vld [vmem:[%s14794_s2 + $0x60] sm:$0xff]  }
 0x196   :  { %8025 = vmatprep.subr.bf16.mxu1 %v8832_v53 }
 0x197   :  { %v763_v5 = vadd.f32 %v762_v28, %v700_v32  ;;  %v9700_v32 = vsub.f32 %v9302_v39, %v9484_v41  ;;  %v704_v28 = vmul.f32 %v9682_v44, %v9682_v44  ;;  %v705_v39 = vmul.f32 %v9694_v2, %v9694_v2 }
 0x199   :  { %v764_v29 = vadd.f32 %v763_v5, %v701_v33  ;;  %v8835_v33 = vld [vmem:[%s14794_s2 + $0x30] sm:$0xff]   ;;  %v9712_v5 = vsub.f32 %v9317_v48, %v9484_v41  ;;  %v706_v16 = vmul.f32 %v9700_v32, %v9700_v32  ;;  %8026 = vmatpush3.bf16.msra.mxu1 %v8832_v53  ;;  %v8833_v48 = vld [vmem:[%s14794_s2 + $0x58] sm:$0xff]  }
 0x19a   :  { %8101 = vmatprep.subr.bf16.mxu0 %v8835_v33  ;;  %8027 = vmatprep.subr.bf16.mxu1 %v8833_v48 }
 0x19b   :  { %v765_v21 = vadd.f32 %v764_v29, %v702_v26  ;;  %v9718_v29 = vsub.f32 %v9341_v63, %v9484_v41  ;;  %8102 = vmatpush3.bf16.msra.mxu0 %v8835_v33  ;;  %v707_v63 = vmul.f32 %v9712_v5, %v9712_v5 }
 0x19d   :  { %v766_v54 = vadd.f32 %v765_v21, %v703_v43  ;;  %v8837_v43 = vld [vmem:[%s14794_s2 + $0x28] sm:$0xff]   ;;  %v9730_v21 = vsub.f32 %v9357_v9, %v9484_v41  ;;  %v708_v53 = vmul.f32 %v9718_v29, %v9718_v29  ;;  %8028 = vmatpush3.bf16.msra.mxu1 %v8833_v48  ;;  %v8836_v9 = vld [vmem:[%s14794_s2 + $0x50] sm:$0xff]  }
 0x19e   :  { %8103 = vmatprep.subr.bf16.mxu0 %v8837_v43  ;;  %8029 = vmatprep.subr.bf16.mxu1 %v8836_v9 }
 0x19f   :  { %v767_v26 = vadd.f32 %v766_v54, %v704_v28  ;;  %v9736_v54 = vsub.f32 %v9333_v58, %v9484_v41  ;;  %8104 = vmatpush3.bf16.msra.mxu0 %v8837_v43  ;;  %v709_v58 = vmul.f32 %v9730_v21, %v9730_v21 }
 0x1a1   :  { %v768_v56 = vadd.f32 %v767_v26, %v705_v39  ;;  %14967 = vst [vmem:[#allocation19_spill] sm:$0xff] %v9736_v54  ;;  %v8838_v39 = vld [vmem:[%s14794_s2 + $0x20] sm:$0xff]   ;;  %v9748_v26 = vsub.f32 %v9349_v4, %v9484_v41  ;;  %v9758_v48 = vmul.f32 %v9736_v54, %v9736_v54  ;;  %8030 = vmatpush3.bf16.msra.mxu1 %v8836_v9  ;;  %v14816_v4 = vmov 0.0  }
 0x1a2   :  { %8105 = vmatprep.subr.bf16.mxu0 %v8838_v39  ;;  %1013 = vst [vmem:[#allocation2] sm:$0xff] %v14816_v4  ;;  %1014 = vst [vmem:[#allocation2 + $0x8] sm:$0xff] %v14816_v4 }
 0x1a3   :  { %v769_v28 = vadd.f32 %v768_v56, %v706_v16  ;;  %14968 = vst [vmem:[#allocation20_spill] sm:$0xff] %v9748_v26  ;;  %v9754_v56 = vsub.f32 %v9373_v19, %v9484_v41  ;;  %8106 = vmatpush3.bf16.msra.mxu0 %v8838_v39  ;;  %1015 = vst [vmem:[#allocation2 + $0x10] sm:$0x3] %v14816_v4  ;;  %v8839_v19 = vld [vmem:[%s14794_s2 + $0x48] sm:$0xff]   ;;  %v9862_v39 = vsub.f32 %v9365_v14, %v9484_v41 }
 0x1a4   :  { %1016 = vst [vmem:[#allocation2 + $0x1b0] sm:$0xff] %v14816_v4  ;;  %1017 = vst [vmem:[#allocation2 + $0x1b8] sm:$0xff] %v14816_v4  ;;  %8031 = vmatprep.subr.bf16.mxu1 %v8839_v19 }
 0x1a5   :  { %v770_v33 = vadd.f32 %v769_v28, %v707_v63  ;;  %14969 = vst [vmem:[#allocation21_spill] sm:$0xff] %v9754_v56  ;;  %1018 = vst [vmem:[#allocation2 + $0x1c0] sm:$0x3] %v14816_v4  ;;  %v8840_v63 = vld [vmem:[%s14794_s2 + $0x18] sm:$0xff]   ;;  %v14970_v28 = vld [vmem:[#allocation7_spill] sm:$0xff]  ;;  %8032 = vmatpush3.bf16.msra.mxu1 %v8839_v19  ;;  %v9880_v19 = vsub.f32 %v9405_v51, %v9484_v41 }
 0x1a6   :  { %1020 = vst [vmem:[#allocation2 + $0x198] sm:$0xff] %v14816_v4  ;;  %1021 = vst [vmem:[#allocation2 + $0x1a0] sm:$0xff] %v14816_v4  ;;  %8107 = vmatprep.subr.bf16.mxu0 %v8840_v63  ;;  %v8844_v51 = vld [vmem:[%s14794_s2] sm:$0xff]  }
 0x1a7   :  { %v771_v16 = vadd.f32 %v770_v33, %v708_v53  ;;  %1022 = vst [vmem:[#allocation2 + $0x1a8] sm:$0x3] %v14816_v4  ;;  %1023 = vst [vmem:[#allocation2 + $0x348] sm:$0xff] %v14816_v4  ;;  %v9854_v53 = vsub.f32 %v14970_v28, %v9484_v41  ;;  %v711_v33 = vmul.f32 %v9748_v26, %v9748_v26  ;;  %8108 = vmatpush3.bf16.msra.mxu0 %v8840_v63  ;;  %v8841_v28 = vld [vmem:[%s14794_s2 + $0x10] sm:$0xff]  }
 0x1a8   :  { %1024 = vst [vmem:[#allocation2 + $0x350] sm:$0xff] %v14816_v4  ;;  %1025 = vst [vmem:[#allocation2 + $0x358] sm:$0x3] %v14816_v4  ;;  %8109 = vmatprep.subr.bf16.mxu0 %v8841_v28 }
 0x1a9   :  { %v9760_v43 = vadd.f32 %v771_v16, %v709_v58  ;;  %1027 = vst [vmem:[#allocation2 + $0x18] sm:$0x1] %v14816_v4  ;;  %1028 = vst [vmem:[#allocation2 + $0x30] sm:$0x1] %v14816_v4  ;;  %v712_v58 = vmul.f32 %v9754_v56, %v9754_v56  ;;  %v713_v14 = vmul.f32 %v9854_v53, %v9854_v53  ;;  %v1275_v63 = vld [vmem:[#allocation2 + $0x1] sm:$0xff] }
 0x1aa   :  { %1029 = vst [vmem:[#allocation2 + $0x48] sm:$0x1] %v14816_v4  ;;  %1030 = vst [vmem:[#allocation2 + $0x60] sm:$0x1] %v14816_v4 }
 0x1ab   :  { %1031 = vst [vmem:[#allocation2 + $0x78] sm:$0x1] %v14816_v4  ;;  %1032 = vst [vmem:[#allocation2 + $0x90] sm:$0x1] %v14816_v4  ;;  %v773_v9 = vadd.f32 %v9760_v43, %v9758_v48  ;;  %v8842_v48 = vld [vmem:[%s14794_s2 + $0x40] sm:$0xff]   ;;  %8110 = vmatpush3.bf16.msra.mxu0 %v8841_v28  ;;  %v14975_v28 = vmov 0.0  }
 0x1ac   :  { %1033 = vst [vmem:[#allocation2 + $0xa8] sm:$0x1] %v14816_v4  ;;  %1034 = vst [vmem:[#allocation2 + $0xc0] sm:$0x1] %v14816_v4  ;;  %v14973_v43 = vld [vmem:[#allocation6_spill] sm:$0xff]  ;;  %8033 = vmatprep.subr.bf16.mxu1 %v8842_v48 }
 0x1ad   :  { %1035 = vst [vmem:[#allocation2 + $0xd8] sm:$0x1] %v14816_v4  ;;  %1036 = vst [vmem:[#allocation2 + $0xf0] sm:$0x1] %v14816_v4  ;;  %v774_v16 = vadd.f32 %v773_v9, %v711_v33  ;;  %v1276_v33 = vld [vmem:[#allocation2 + $0x9] sm:$0xff]  ;;  %v714_v9 = vmul.f32 %v9862_v39, %v9862_v39  ;;  %8034 = vmatpush3.bf16.msra.mxu1 %v8842_v48 }
 0x1ae   :  { %1037 = vst [vmem:[#allocation2 + $0x108] sm:$0x1] %v14816_v4  ;;  %1038 = vst [vmem:[#allocation2 + $0x120] sm:$0x1] %v14816_v4 }
 0x1af   :  { %1039 = vst [vmem:[#allocation2 + $0x138] sm:$0x1] %v14816_v4  ;;  %1040 = vst [vmem:[#allocation2 + $0x150] sm:$0x1] %v14816_v4  ;;  %v775_v26 = vadd.f32 %v774_v16, %v712_v58  ;;  %v14974_v16 = vld [vmem:[#allocation9_spill] sm:$0xff] }
 0x1b0   :  { %1041 = vst [vmem:[#allocation2 + $0x168] sm:$0x1] %v14816_v4  ;;  %1042 = vst [vmem:[#allocation2 + $0x180] sm:$0x1] %v14816_v4  ;;  %v9892_v54 = vsub.f32 %v14974_v16, %v9484_v41 }
 0x1b1   :  { %1045 = vst [vmem:[#allocation2 + $0x1c8] sm:$0x1] %v14816_v4  ;;  %1046 = vst [vmem:[#allocation2 + $0x1e0] sm:$0x1] %v14816_v4  ;;  %v776_v56 = vadd.f32 %v775_v26, %v713_v14  ;;  %v9900_v14 = vld [vmem:[%s14794_s2 + $0xb8] sm:$0xff]  }
 0x1b2   :  { %1047 = vst [vmem:[#allocation2 + $0x1f8] sm:$0x1] %v14816_v4  ;;  %1048 = vst [vmem:[#allocation2 + $0x210] sm:$0x1] %v14816_v4  ;;  %8179 = vmatprep.subr.bf16.mxu1 %v9900_v14 }
 0x1b3   :  { %1049 = vst [vmem:[#allocation2 + $0x228] sm:$0x1] %v14816_v4  ;;  %1050 = vst [vmem:[#allocation2 + $0x240] sm:$0x1] %v14816_v4  ;;  %v777_v26 = vadd.f32 %v776_v56, %v714_v9  ;;  %v14977_v56 = vld [vmem:[#allocation8_spill] sm:$0xff] }
 0x1b4   :  { %1051 = vst [vmem:[#allocation2 + $0x258] sm:$0x1] %v14816_v4  ;;  %1052 = vst [vmem:[#allocation2 + $0x270] sm:$0x1] %v14816_v4  ;;  %v9911_v9 = vsub.f32 %v14977_v56, %v9484_v41 }
 0x1b5   :  { %1053 = vst [vmem:[#allocation2 + $0x288] sm:$0x1] %v14816_v4  ;;  %1054 = vst [vmem:[#allocation2 + $0x2a0] sm:$0x1] %v14816_v4 }
 0x1b6   :  { %1055 = vst [vmem:[#allocation2 + $0x2b8] sm:$0x1] %v14816_v4  ;;  %1056 = vst [vmem:[#allocation2 + $0x2d0] sm:$0x1] %v14816_v4 }
 0x1b7   :  { %1057 = vst [vmem:[#allocation2 + $0x2e8] sm:$0x1] %v14816_v4  ;;  %1058 = vst [vmem:[#allocation2 + $0x300] sm:$0x1] %v14816_v4 }
 0x1b8   :  { %1059 = vst [vmem:[#allocation2 + $0x318] sm:$0x1] %v14816_v4  ;;  %1060 = vst [vmem:[#allocation2 + $0x330] sm:$0x1] %v14816_v4 }
 0x1b9   :  { %1063 = vst [vmem:[#allocation2 + $0x29] sm:$0x1] %v14816_v4  ;;  %1064 = vst [vmem:[#allocation2 + $0x41] sm:$0x1] %v14816_v4 }
 0x1ba   :  { %1065 = vst [vmem:[#allocation2 + $0x59] sm:$0x1] %v14816_v4  ;;  %1066 = vst [vmem:[#allocation2 + $0x71] sm:$0x1] %v14816_v4 }
 0x1bb   :  { %1067 = vst [vmem:[#allocation2 + $0x89] sm:$0x1] %v14816_v4  ;;  %1068 = vst [vmem:[#allocation2 + $0xa1] sm:$0x1] %v14816_v4 }
 0x1bc   :  { %1069 = vst [vmem:[#allocation2 + $0xb9] sm:$0x1] %v14816_v4  ;;  %1070 = vst [vmem:[#allocation2 + $0xd1] sm:$0x1] %v14816_v4 }
 0x1bd   :  { %1071 = vst [vmem:[#allocation2 + $0xe9] sm:$0x1] %v14816_v4  ;;  %1072 = vst [vmem:[#allocation2 + $0x101] sm:$0x1] %v14816_v4 }
 0x1be   :  { %1073 = vst [vmem:[#allocation2 + $0x119] sm:$0x1] %v14816_v4  ;;  %1074 = vst [vmem:[#allocation2 + $0x131] sm:$0x1] %v14816_v4 }
 0x1bf   :  { %1075 = vst [vmem:[#allocation2 + $0x149] sm:$0x1] %v14816_v4  ;;  %1076 = vst [vmem:[#allocation2 + $0x161] sm:$0x1] %v14816_v4 }
 0x1c0   :  { %1077 = vst [vmem:[#allocation2 + $0x179] sm:$0x1] %v14816_v4  ;;  %1078 = vst [vmem:[#allocation2 + $0x191] sm:$0x1] %v14816_v4 }
 0x1c1   :  { %1081 = vst [vmem:[#allocation2 + $0x1d9] sm:$0x1] %v14816_v4  ;;  %1082 = vst [vmem:[#allocation2 + $0x1f1] sm:$0x1] %v14816_v4 }
 0x1c2   :  { %1083 = vst [vmem:[#allocation2 + $0x209] sm:$0x1] %v14816_v4  ;;  %1084 = vst [vmem:[#allocation2 + $0x221] sm:$0x1] %v14816_v4 }
 0x1c3   :  { %1085 = vst [vmem:[#allocation2 + $0x239] sm:$0x1] %v14816_v4  ;;  %1086 = vst [vmem:[#allocation2 + $0x251] sm:$0x1] %v14816_v4 }
 0x1c4   :  { %1087 = vst [vmem:[#allocation2 + $0x269] sm:$0x1] %v14816_v4  ;;  %1088 = vst [vmem:[#allocation2 + $0x281] sm:$0x1] %v14816_v4 }
 0x1c5   :  { %1089 = vst [vmem:[#allocation2 + $0x299] sm:$0x1] %v14816_v4  ;;  %1090 = vst [vmem:[#allocation2 + $0x2b1] sm:$0x1] %v14816_v4 }
 0x1c6   :  { %1091 = vst [vmem:[#allocation2 + $0x2c9] sm:$0x1] %v14816_v4  ;;  %1092 = vst [vmem:[#allocation2 + $0x2e1] sm:$0x1] %v14816_v4 }
 0x1c7   :  { %1093 = vst [vmem:[#allocation2 + $0x2f9] sm:$0x1] %v14816_v4  ;;  %1094 = vst [vmem:[#allocation2 + $0x311] sm:$0x1] %v14816_v4 }
 0x1c8   :  { %1095 = vst [vmem:[#allocation2 + $0x329] sm:$0x1] %v14816_v4  ;;  %1096 = vst [vmem:[#allocation2 + $0x341] sm:$0x1] %v14816_v4 }
 0x1c9   :  { %1026 = vst [vmem:[#allocation2] sm:$0x1] %v14816_v4  ;;  %1062 = vst [vmem:[#allocation2 + $0x11] sm:$0x1] %v14816_v4 }
 0x1ca   :  { %1043 = vst [vmem:[#allocation2 + $0x198] sm:$0x1] %v14816_v4  ;;  %1044 = vst [vmem:[#allocation2 + $0x1b0] sm:$0x1] %v14816_v4 }
 0x1cb   :  { %1061 = vst [vmem:[#allocation2 + $0x348] sm:$0x1] %v14816_v4  ;;  %1079 = vst [vmem:[#allocation2 + $0x1a9] sm:$0x1] %v14816_v4 }
 0x1cc   :  { %1080 = vst [vmem:[#allocation2 + $0x1c1] sm:$0x1] %v14816_v4  ;;  %1097 = vst [vmem:[#allocation2 + $0x359] sm:$0x1] %v14816_v4  ;;  %v9874_v4 = vsub.f32 %v14973_v43, %v9484_v41  ;;  %v1339_v43 = vpack.c.bf16 %v1276_v33, %v1275_v63  ;;  %v9904_v63 = vsub.f32 %v9397_v38, %v9484_v41 }
 0x1cd   :  { %14971 = vst [vmem:[#allocation7_spill] sm:$0xff] %v9854_v53  ;;  %14972 = vst [vmem:[#allocation22_spill] sm:$0xff] %v9862_v39  ;;  %v8843_v53 = vld [vmem:[%s14794_s2 + $0x8] sm:$0xff]   ;;  %v716_v33 = vmul.f32 %v9880_v19, %v9880_v19  ;;  %v9917_v38 = vsub.f32 %v9425_v22, %v9484_v41 }
 0x1ce   :  { %v715_v39 = vmul.f32 %v9874_v4, %v9874_v4  ;;  %8035 = vmatprep.mubr.bf16.mxu1 %v1339_v43  ;;  %14976 = vst [vmem:[#allocation6_spill] sm:$0xff] %v9900_v14  ;;  %8111 = vmatprep.subr.bf16.mxu0 %v8843_v53  ;;  %14978 = vst [vmem:[#allocation9_spill] sm:$0xff] %v9911_v9  ;;  %v717_v43 = vmul.f32 %v9892_v54, %v9892_v54  ;;  %v14983_v14 = vld [vmem:[#allocation10_spill] sm:$0xff] }
 0x1cf   :  { %8112 = vmatpush3.bf16.msra.mxu0 %v8843_v53  ;;  %14979 = vst [vmem:[#allocation8_spill] sm:$0xff] %v9917_v38  ;;  %v720_v22 = vmul.f32 %v9917_v38, %v9917_v38 }
 0x1d0   :  { %v1163_v58 = vld [vmem:[#allocation2] sm:$0xff]  ;;  %v778_v16 = vadd.f32 %v777_v26, %v715_v39  ;;  %8113 = vmatprep.subr.bf16.mxu0 %v8844_v51  ;;  %v718_v39 = vmul.f32 %v9904_v63, %v9904_v63  ;;  %v14980_v26 = vld [vmem:[#allocation11_spill] sm:$0xff] }
 0x1d1   :  { %v1227_v48 = vpack.c.bf16 %v14975_v28, %v1163_v58  ;;  %v9923_v28 = vsub.f32 %v14980_v26, %v9484_v41  ;;  %v14985_v26 = vld [vmem:[#allocation13_spill] sm:$0xff] }
 0x1d2   :  { %v779_v58 = vadd.f32 %v778_v16, %v716_v33  ;;  %v9929_v33 = vsub.f32 %v9421_v15, %v9484_v41 }
 0x1d3   :  { %8115 = vmatprep.mubr.bf16.mxu0 %v1227_v48  ;;  %8114 = vmatpush3.bf16.msra.mxu0 %v8844_v51  ;;  %14981 = vst [vmem:[#allocation11_spill] sm:$0xff] %v9923_v28  ;;  %v719_v48 = vmul.f32 %v9911_v9, %v9911_v9  ;;  %v721_v51 = vmul.f32 %v9923_v28, %v9923_v28 }
 0x1d4   :  { %v780_v53 = vadd.f32 %v779_v58, %v717_v43  ;;  %14982 = vst [vmem:[#allocation23_spill] sm:$0xff] %v9929_v33  ;;  %v9935_v43 = vsub.f32 %v14983_v14, %v9484_v41  ;;  %v9941_v9 = vsub.f32 %v14985_v26, %v9484_v41  ;;  %v722_v15 = vmul.f32 %v9929_v33, %v9929_v33  ;;  %v14990_v26 = vld [vmem:[#allocation14_spill] sm:$0xff] }
 0x1d5   :  { %v9959_v33 = vsub.f32 %v14990_v26, %v9484_v41  ;;  %v14996_v26 = vld [vmem:[#allocation16_spill] sm:$0xff] }
 0x1d6   :  { %v781_v56 = vadd.f32 %v780_v53, %v718_v39  ;;  %14984 = vst [vmem:[#allocation10_spill] sm:$0xff] %v9935_v43  ;;  %14986 = vst [vmem:[#allocation13_spill] sm:$0xff] %v9941_v9  ;;  %v14987_v53 = vld [vmem:[#allocation15_spill] sm:$0xff]  ;;  %v723_v14 = vmul.f32 %v9935_v43, %v9935_v43 }
 0x1d7   :  { %v9947_v38 = vsub.f32 %v14987_v53, %v9484_v41  ;;  %v14992_v53 = vld [vmem:[#allocation17_spill] sm:$0xff] }
 0x1d8   :  { %v782_v16 = vadd.f32 %v781_v56, %v719_v48  ;;  %v14989_v56 = vld [vmem:[#allocation12_spill] sm:$0xff]  ;;  %v9965_v43 = vsub.f32 %v14992_v53, %v9484_v41  ;;  %v9983_v53 = vsub.f32 %v9461_v7, %v9484_v41 }
 0x1d9   :  { %14988 = vst [vmem:[#allocation15_spill] sm:$0xff] %v9947_v38  ;;  %v9953_v28 = vsub.f32 %v14989_v56, %v9484_v41  ;;  %14991 = vst [vmem:[#allocation12_spill] sm:$0xff] %v9959_v33  ;;  %v14994_v56 = vld [vmem:[#allocation18_spill] sm:$0xff] }
 0x1da   :  { %v783_v58 = vadd.f32 %v782_v16, %v720_v22  ;;  %v724_v22 = vmul.f32 %v9941_v9, %v9941_v9  ;;  %14993 = vst [vmem:[#allocation14_spill] sm:$0xff] %v9965_v43  ;;  %v9971_v9 = vsub.f32 %v14994_v56, %v9484_v41  ;;  %14998 = vst [vmem:[#allocation16_spill] sm:$0xff] %v9983_v53 }
 0x1db   :  { %v9989_v56 = vsub.f32 %v9473_v30, %v9484_v41 }
 0x1dc   :  { %v784_v39 = vadd.f32 %v783_v58, %v721_v51  ;;  %v725_v51 = vmul.f32 %v9947_v38, %v9947_v38  ;;  %14995 = vst [vmem:[#allocation17_spill] sm:$0xff] %v9971_v9  ;;  %v9977_v38 = vsub.f32 %v14996_v26, %v9484_v41  ;;  %v669_v26 = vsub.f32 %v9479_v27, %v9484_v41 }
 0x1dd   :  { %14999 = vst [vmem:[#allocation24_spill] sm:$0xff] %v9989_v56 }
 0x1de   :  { %v785_v48 = vadd.f32 %v784_v39, %v722_v15  ;;  %v726_v15 = vmul.f32 %v9953_v28, %v9953_v28  ;;  %14997 = vst [vmem:[#allocation18_spill] sm:$0xff] %v9977_v38 }
 0x1e0   :  { %v786_v16 = vadd.f32 %v785_v48, %v723_v14  ;;  %v727_v14 = vmul.f32 %v9959_v33, %v9959_v33 }
 0x1e2   :  { %v787_v58 = vadd.f32 %v786_v16, %v724_v22  ;;  %v728_v22 = vmul.f32 %v9965_v43, %v9965_v43 }
 0x1e4   :  { %v788_v39 = vadd.f32 %v787_v58, %v725_v51  ;;  %v729_v51 = vmul.f32 %v9971_v9, %v9971_v9 }
 0x1e6   :  { %v789_v48 = vadd.f32 %v788_v39, %v726_v15  ;;  %v730_v15 = vmul.f32 %v9977_v38, %v9977_v38 }
 0x1e8   :  { %v790_v16 = vadd.f32 %v789_v48, %v727_v14  ;;  %v731_v14 = vmul.f32 %v9983_v53, %v9983_v53  ;;  %v9999_v48 = vsub.f32 %v9469_v46, %v9484_v41 }
 0x1ea   :  { %v791_v58 = vadd.f32 %v790_v16, %v728_v22  ;;  %v732_v22 = vmul.f32 %v9989_v56, %v9989_v56  ;;  %v10005_v16 = vsub.f32 %v9476_v12, %v9484_v41  ;;  %v734_v27 = vmul.f32 %v9999_v48, %v9999_v48 }
 0x1eb   :  { %v810_v41 = vlaneseq }
 0x1ec   :  { %v792_v39 = vadd.f32 %v791_v58, %v729_v51  ;;  %v733_v51 = vmul.f32 %v669_v26, %v669_v26 }
 0x1ee   :  { %v793_v7 = vadd.f32 %v792_v39, %v730_v15  ;;  %v735_v15 = vmul.f32 %v10005_v16, %v10005_v16 }
 0x1f0   :  { %v794_v30 = vadd.f32 %v793_v7, %v731_v14 }
 0x1f2   :  { %v795_v58 = vadd.f32 %v794_v30, %v732_v22  ;;  %v811_v22 = vshrl.u32 %v810_v41, 7  ;;  %v535_v30 = vld [vmem:[%s14796_s4] sm:$0x1]  ;;  %v15004_v41 = vld [vmem:[#allocation7_spill] sm:$0xff] }
 0x1f4   :  { %v796_v38 = vadd.f32 %v795_v58, %v733_v51  ;;  %v10014_v51 = vsub.s32 0, %v811_v22  ;;  %v15005_v22 = vld [vmem:[#allocation22_spill] sm:$0xff] }
 0x1f6   :  { %v797_v39 = vadd.f32 %v796_v38, %v734_v27  ;;  %15000 = vst [vmem:[#allocation25_spill] sm:$0xff] %v10014_v51 }
 0x1f8   :  { %v798_v46 = vadd.f32 %v797_v39, %v735_v15 }
 0x1fa   :  { %v799_v53 = vrot.slane %v798_v46, 4 }
 0x1fc   :  { %v800_v9 = vadd.f32 %v799_v53, %v798_v46 }
 0x1fe   :  { %v801_v43 = vrot.slane %v800_v9, 2 }
 0x200   :  { %v802_v56 = vadd.f32 %v801_v43, %v800_v9  ;;  %v10022_v9 = vld [vmem:[%s14797_s5] ss:$0 sm:$0xff] }
 0x202   :  { %v803_v14 = vrot.slane %v802_v56, 1 }
 0x204   :  { %v804_v7 = vadd.f32 %v803_v14, %v802_v56  ;;  %v15001_v14 = vld [vmem:[#allocation19_spill] sm:$0xff] }
 0x206   :  { %v805_v33 = vmul.f32 0.001953125, %v804_v7  ;;  %v15002_v7 = vld [vmem:[#allocation20_spill] sm:$0xff] }
 0x208   :  { %v806_v12 = vadd.f32 1e-05, %v805_v33 }
 0x20a   :  { %8909 = vrsqrt.f32 %v806_v12  ;;  %v15003_v12 = vld [vmem:[#allocation21_spill] sm:$0xff] }
 0x217   :  { %v8910_v58 = vpop.eup %8909 }
 0x218   :  { %v808_v38 = vmul.f32 %v8910_v58, %v535_v30 }
 0x21a   :  { %v10017_v27 = vrot.slane %v808_v38, %v10014_v51  ;;  %v15016_v51 = vld [vmem:[#allocation15_spill] sm:$0xff] }
 0x21c   :  { %v876_v33 = vmul.f32 %v10017_v27, %v669_v26  ;;  %v10027_v43 = vmul.f32 %v10017_v27, %v9488_v10  ;;  %v10031_v53 = vmul.f32 %v10017_v27, %v9492_v17  ;;  %v10035_v56 = vmul.f32 %v10017_v27, %v9496_v20 }
 0x21d   :  { %v10039_v15 = vmul.f32 %v10017_v27, %v9504_v0  ;;  %v10043_v39 = vmul.f32 %v10017_v27, %v9508_v35  ;;  %v10047_v10 = vmul.f32 %v10017_v27, %v9514_v34  ;;  %v10051_v17 = vmul.f32 %v10017_v27, %v9520_v36 }
 0x21e   :  { %v946_v26 = vadd.f32 %v10022_v9, %v876_v33  ;;  %v10056_v20 = vmul.f32 %v10017_v27, %v9526_v59  ;;  %v10060_v0 = vmul.f32 %v10017_v27, %v9532_v24  ;;  %v10064_v35 = vmul.f32 %v10017_v27, %v9538_v37 }
 0x21f   :  { %v10068_v34 = vmul.f32 %v10017_v27, %v9544_v25  ;;  %v10072_v36 = vmul.f32 %v10017_v27, %v9550_v42  ;;  %v10076_v59 = vmul.f32 %v10017_v27, %v9556_v47  ;;  %v10080_v24 = vmul.f32 %v10017_v27, %v9562_v40 }
 0x220   :  { %v1010_v46 = vmax.f32 %v946_v26, 0.0  ;;  %v10084_v37 = vmul.f32 %v10017_v27, %v9568_v45  ;;  %v10088_v25 = vmul.f32 %v10017_v27, %v9574_v52  ;;  %v10092_v42 = vmul.f32 %v10017_v27, %v9580_v57  ;;  %v15006_v26 = vld [vmem:[#allocation9_spill] sm:$0xff] }
 0x221   :  { %v10096_v47 = vmul.f32 %v10017_v27, %v9586_v50  ;;  %v10100_v40 = vmul.f32 %v10017_v27, %v9592_v55  ;;  %v10104_v45 = vmul.f32 %v10017_v27, %v9598_v62  ;;  %v10108_v52 = vmul.f32 %v10017_v27, %v9604_v3 }
 0x222   :  { %1160 = vst [vmem:[#allocation2 + $0x321] sm:$0xff] %v1010_v46  ;;  %v10112_v57 = vmul.f32 %v10017_v27, %v9610_v60  ;;  %v10116_v50 = vmul.f32 %v10017_v27, %v9616_v1  ;;  %v10120_v55 = vmul.f32 %v10017_v27, %v9622_v8  ;;  %v10124_v62 = vmul.f32 %v10017_v27, %v9628_v13 }
 0x223   :  { %v10128_v3 = vmul.f32 %v10017_v27, %v9634_v6  ;;  %v10132_v60 = vmul.f32 %v10017_v27, %v9640_v11  ;;  %v10136_v1 = vmul.f32 %v10017_v27, %v9646_v18  ;;  %v10140_v8 = vmul.f32 %v10017_v27, %v9652_v23 }
 0x224   :  { %v10144_v13 = vmul.f32 %v10017_v27, %v9661_v31  ;;  %v10148_v6 = vmul.f32 %v10017_v27, %v9667_v49  ;;  %v10152_v11 = vmul.f32 %v10017_v27, %v9676_v61  ;;  %v10156_v18 = vmul.f32 %v10017_v27, %v9682_v44 }
 0x225   :  { %v10160_v23 = vmul.f32 %v10017_v27, %v9694_v2  ;;  %v10164_v31 = vmul.f32 %v10017_v27, %v9700_v32  ;;  %v10168_v49 = vmul.f32 %v10017_v27, %v9712_v5  ;;  %v10172_v61 = vmul.f32 %v10017_v27, %v9718_v29 }
 0x226   :  { %v10176_v44 = vmul.f32 %v10017_v27, %v9730_v21  ;;  %v10180_v2 = vmul.f32 %v10017_v27, %v15001_v14  ;;  %v10184_v32 = vmul.f32 %v10017_v27, %v15002_v7  ;;  %v10188_v5 = vmul.f32 %v10017_v27, %v15003_v12  ;;  %v15007_v14 = vld [vmem:[#allocation8_spill] sm:$0xff]  ;;  %v15008_v7 = vld [vmem:[#allocation11_spill] sm:$0xff] }
 0x227   :  { %v10192_v29 = vmul.f32 %v10017_v27, %v15004_v41  ;;  %v10196_v21 = vmul.f32 %v10017_v27, %v15005_v22  ;;  %v10200_v30 = vmul.f32 %v10017_v27, %v9874_v4  ;;  %v10204_v58 = vmul.f32 %v10017_v27, %v9880_v19  ;;  %v15010_v12 = vld [vmem:[#allocation23_spill] sm:$0xff]  ;;  %v15012_v41 = vld [vmem:[#allocation10_spill] sm:$0xff]  ;;  %v15014_v22 = vld [vmem:[#allocation13_spill] sm:$0xff] }
 0x228   :  { %v10208_v38 = vmul.f32 %v10017_v27, %v9892_v54  ;;  %v10212_v33 = vmul.f32 %v10017_v27, %v9904_v63  ;;  %v10216_v46 = vmul.f32 %v10017_v27, %v15006_v26  ;;  %v10220_v4 = vmul.f32 %v10017_v27, %v15007_v14 }
 0x229   :  { %v10224_v19 = vmul.f32 %v10017_v27, %v15008_v7  ;;  %v10228_v54 = vmul.f32 %v10017_v27, %v15010_v12  ;;  %v10232_v63 = vmul.f32 %v10017_v27, %v15012_v41  ;;  %v10236_v26 = vmul.f32 %v10017_v27, %v15014_v22 }
 0x22a   :  { %v10240_v14 = vmul.f32 %v10017_v27, %v15016_v51  ;;  %v10244_v7 = vmul.f32 %v10017_v27, %v9953_v28 }
 0x22b   :  { %15009 = vst [vmem:[#allocation19_spill] sm:$0xff] %v10224_v19  ;;  %15011 = vst [vmem:[#allocation20_spill] sm:$0xff] %v10228_v54  ;;  %v15019_v19 = vld [vmem:[#allocation12_spill] sm:$0xff]  ;;  %v15020_v54 = vld [vmem:[#allocation14_spill] sm:$0xff] }
 0x22c   :  { %15013 = vst [vmem:[#allocation21_spill] sm:$0xff] %v10232_v63  ;;  %15015 = vst [vmem:[#allocation7_spill] sm:$0xff] %v10236_v26  ;;  %v10248_v12 = vmul.f32 %v10017_v27, %v15019_v19  ;;  %v10252_v41 = vmul.f32 %v10017_v27, %v15020_v54  ;;  %v15021_v63 = vld [vmem:[#allocation17_spill] sm:$0xff]  ;;  %v15022_v26 = vld [vmem:[#allocation18_spill] sm:$0xff]  ;;  %v10272_v54 = vmul.f32 %v10017_v27, %v9999_v48 }
 0x22d   :  { %15017 = vst [vmem:[#allocation22_spill] sm:$0xff] %v10240_v14  ;;  %15018 = vst [vmem:[#allocation9_spill] sm:$0xff] %v10244_v7  ;;  %v10256_v22 = vmul.f32 %v10017_v27, %v15021_v63  ;;  %v10260_v51 = vmul.f32 %v10017_v27, %v15022_v26  ;;  %v15023_v14 = vld [vmem:[#allocation16_spill] sm:$0xff]  ;;  %v10276_v63 = vmul.f32 %v10017_v27, %v10005_v16 }
 0x22e   :  { %v10264_v28 = vmul.f32 %v10017_v27, %v15023_v14  ;;  %v15024_v7 = vld [vmem:[#allocation24_spill] sm:$0xff]  ;;  %v10280_v26 = vadd.f32 %v10022_v9, %v10027_v43  ;;  %v10284_v14 = vadd.f32 %v10022_v9, %v10031_v53  ;;  %v10292_v48 = vadd.f32 %v10022_v9, %v10039_v15 }
 0x22f   :  { %v10268_v19 = vmul.f32 %v10017_v27, %v15024_v7  ;;  %v10288_v7 = vadd.f32 %v10022_v9, %v10035_v56  ;;  %v10296_v16 = vadd.f32 %v10022_v9, %v10043_v39  ;;  %v10300_v27 = vadd.f32 %v10022_v9, %v10047_v10  ;;  %v10321_v39 = vld [vmem:[%s14794_s2 + $0xf8] sm:$0xff]  }
 0x230   :  { %v10304_v43 = vadd.f32 %v10022_v9, %v10051_v17  ;;  %v10308_v53 = vadd.f32 %v10022_v9, %v10056_v20  ;;  %v10312_v56 = vadd.f32 %v10022_v9, %v10060_v0  ;;  %v10316_v15 = vadd.f32 %v10022_v9, %v10064_v35  ;;  %15025 = vst [vmem:[#allocation8_spill] sm:$0xff] %v10321_v39 }
 0x231   :  { %v10325_v10 = vadd.f32 %v10022_v9, %v10068_v34  ;;  %v10329_v17 = vadd.f32 %v10022_v9, %v10072_v36  ;;  %v10333_v20 = vadd.f32 %v10022_v9, %v10076_v59  ;;  %v10337_v0 = vadd.f32 %v10022_v9, %v10080_v24  ;;  %8259 = vmatprep.subr.bf16.mxu0 %v10321_v39 }
 0x232   :  { %v10341_v35 = vadd.f32 %v10022_v9, %v10084_v37  ;;  %v10345_v34 = vadd.f32 %v10022_v9, %v10088_v25  ;;  %v10349_v36 = vadd.f32 %v10022_v9, %v10092_v42  ;;  %v10353_v59 = vadd.f32 %v10022_v9, %v10096_v47  ;;  %v15043_v39 = vld [vmem:[#allocation19_spill] sm:$0xff] }
 0x233   :  { %v10358_v24 = vadd.f32 %v10022_v9, %v10100_v40  ;;  %v10362_v37 = vadd.f32 %v10022_v9, %v10104_v45  ;;  %v10366_v25 = vadd.f32 %v10022_v9, %v10108_v52  ;;  %v10370_v42 = vadd.f32 %v10022_v9, %v10112_v57 }
 0x234   :  { %15026 = vst [vmem:[#allocation11_spill] sm:$0xff] %v10349_v36  ;;  %15027 = vst [vmem:[#allocation23_spill] sm:$0xff] %v10353_v59  ;;  %v10374_v47 = vadd.f32 %v10022_v9, %v10116_v50  ;;  %v10378_v40 = vadd.f32 %v10022_v9, %v10120_v55  ;;  %v10382_v45 = vadd.f32 %v10022_v9, %v10124_v62 }
 0x235   :  { %15028 = vst [vmem:[#allocation10_spill] sm:$0xff] %v10358_v24  ;;  %15029 = vst [vmem:[#allocation13_spill] sm:$0xff] %v10362_v37  ;;  %v10386_v52 = vadd.f32 %v10022_v9, %v10128_v3  ;;  %v10390_v57 = vadd.f32 %v10022_v9, %v10132_v60  ;;  %v10394_v50 = vadd.f32 %v10022_v9, %v10136_v1 }
 0x236   :  { %15030 = vst [vmem:[#allocation15_spill] sm:$0xff] %v10366_v25  ;;  %15031 = vst [vmem:[#allocation12_spill] sm:$0xff] %v10370_v42  ;;  %v10398_v55 = vadd.f32 %v10022_v9, %v10140_v8  ;;  %v10402_v62 = vadd.f32 %v10022_v9, %v10144_v13  ;;  %v10406_v3 = vadd.f32 %v10022_v9, %v10148_v6 }
 0x237   :  { %15032 = vst [vmem:[#allocation14_spill] sm:$0xff] %v10374_v47  ;;  %15033 = vst [vmem:[#allocation17_spill] sm:$0xff] %v10378_v40  ;;  %v10410_v60 = vadd.f32 %v10022_v9, %v10152_v11  ;;  %v10414_v1 = vadd.f32 %v10022_v9, %v10156_v18  ;;  %v10418_v8 = vadd.f32 %v10022_v9, %v10160_v23 }
 0x238   :  { %15034 = vst [vmem:[#allocation18_spill] sm:$0xff] %v10382_v45  ;;  %15035 = vst [vmem:[#allocation16_spill] sm:$0xff] %v10386_v52  ;;  %v10422_v13 = vadd.f32 %v10022_v9, %v10164_v31  ;;  %v10426_v6 = vadd.f32 %v10022_v9, %v10168_v49  ;;  %v10430_v11 = vadd.f32 %v10022_v9, %v10172_v61 }
 0x239   :  { %15036 = vst [vmem:[#allocation24_spill] sm:$0xff] %v10390_v57  ;;  %15037 = vst [vmem:[#allocation26_spill] sm:$0xff] %v10394_v50  ;;  %v10434_v18 = vadd.f32 %v10022_v9, %v10176_v44  ;;  %v10438_v23 = vadd.f32 %v10022_v9, %v10180_v2  ;;  %v10442_v31 = vadd.f32 %v10022_v9, %v10184_v32 }
 0x23a   :  { %v10446_v49 = vadd.f32 %v10022_v9, %v10188_v5  ;;  %v10450_v61 = vadd.f32 %v10022_v9, %v10192_v29  ;;  %v10454_v44 = vadd.f32 %v10022_v9, %v10196_v21  ;;  %v10458_v2 = vadd.f32 %v10022_v9, %v10200_v30 }
 0x23b   :  { %v10462_v32 = vadd.f32 %v10022_v9, %v10204_v58  ;;  %v10466_v5 = vadd.f32 %v10022_v9, %v10208_v38  ;;  %v10470_v29 = vadd.f32 %v10022_v9, %v10212_v33  ;;  %v10474_v21 = vadd.f32 %v10022_v9, %v10216_v46 }
 0x23c   :  { %v10478_v30 = vadd.f32 %v10022_v9, %v10220_v4  ;;  %v10482_v58 = vadd.f32 %v10022_v9, %v15043_v39 }
 0x23d   :  { %15038 = vst [vmem:[#allocation27_spill] sm:$0xff] %v10462_v32  ;;  %15039 = vst [vmem:[#allocation28_spill] sm:$0xff] %v10466_v5  ;;  %v15044_v32 = vld [vmem:[#allocation20_spill] sm:$0xff]  ;;  %v15045_v5 = vld [vmem:[#allocation21_spill] sm:$0xff] }
 0x23e   :  { %15040 = vst [vmem:[#allocation29_spill] sm:$0xff] %v10470_v29  ;;  %15041 = vst [vmem:[#allocation30_spill] sm:$0xff] %v10474_v21  ;;  %v10486_v38 = vadd.f32 %v10022_v9, %v15044_v32  ;;  %v10490_v33 = vadd.f32 %v10022_v9, %v15045_v5  ;;  %v15046_v29 = vld [vmem:[#allocation7_spill] sm:$0xff]  ;;  %v15047_v21 = vld [vmem:[#allocation22_spill] sm:$0xff]  ;;  %v10506_v32 = vadd.f32 %v10022_v9, %v10248_v12 }
 0x23f   :  { %15042 = vst [vmem:[#allocation31_spill] sm:$0xff] %v10478_v30  ;;  %v10494_v46 = vadd.f32 %v10022_v9, %v15046_v29  ;;  %v10498_v4 = vadd.f32 %v10022_v9, %v15047_v21  ;;  %v15048_v30 = vld [vmem:[#allocation9_spill] sm:$0xff]  ;;  %v10510_v5 = vadd.f32 %v10022_v9, %v10252_v41  ;;  %v10514_v29 = vadd.f32 %v10022_v9, %v10256_v22 }
 0x240   :  { %v10502_v39 = vadd.f32 %v10022_v9, %v15048_v30  ;;  %v10518_v21 = vadd.f32 %v10022_v9, %v10260_v51  ;;  %v10522_v30 = vadd.f32 %v10022_v9, %v10264_v28  ;;  %v10526_v12 = vadd.f32 %v10022_v9, %v10268_v19 }
 0x241   :  { %15049 = vst [vmem:[#allocation19_spill] sm:$0xff] %v10514_v29  ;;  %v10530_v41 = vadd.f32 %v10022_v9, %v10272_v54  ;;  %v10534_v22 = vadd.f32 %v10022_v9, %v10276_v63  ;;  %v14848_v29 = vmax.f32 %v10280_v26, 0.0  ;;  %v14849_v51 = vmax.f32 %v10284_v14, 0.0 }
 0x242   :  { %15050 = vst [vmem:[#allocation20_spill] sm:$0xff] %v10518_v21  ;;  %15051 = vst [vmem:[#allocation21_spill] sm:$0xff] %v10522_v30  ;;  %v14850_v21 = vmax.f32 %v10288_v7, 0.0  ;;  %v14851_v28 = vmax.f32 %v10292_v48, 0.0  ;;  %v14852_v30 = vmax.f32 %v10296_v16, 0.0  ;;  %v14853_v9 = vmax.f32 %v10316_v15, 0.0 }
 0x243   :  { %15052 = vst [vmem:[#allocation7_spill] sm:$0xff] %v10526_v12  ;;  %15053 = vst [vmem:[#allocation22_spill] sm:$0xff] %v10530_v41  ;;  %v14854_v63 = vmax.f32 %v10325_v10, 0.0  ;;  %v14856_v12 = vmax.f32 %v10349_v36, 0.0  ;;  %v15056_v19 = vmax.f32 %v10308_v53, 0.0  ;;  %v15058_v54 = vmax.f32 %v10329_v17, 0.0 }
 0x244   :  { %1099 = vst [vmem:[#allocation2 + $0x19] sm:$0xff] %v14848_v29  ;;  %1100 = vst [vmem:[#allocation2 + $0x21] sm:$0xff] %v14849_v51  ;;  %v15054_v29 = vmax.f32 %v10300_v27, 0.0  ;;  %v15055_v51 = vmax.f32 %v10304_v43, 0.0  ;;  %v979_v41 = vmax.f32 %v10406_v3, 0.0 }
 0x245   :  { %1101 = vst [vmem:[#allocation2 + $0x31] sm:$0xff] %v14850_v21  ;;  %1102 = vst [vmem:[#allocation2 + $0x39] sm:$0xff] %v14851_v28  ;;  %v14855_v21 = vmax.f32 %v10345_v34, 0.0  ;;  %v15057_v28 = vmax.f32 %v10312_v56, 0.0  ;;  %v15074_v3 = vld [vmem:[#allocation29_spill] sm:$0xff] }
 0x246   :  { %1103 = vst [vmem:[#allocation2 + $0x49] sm:$0xff] %v14852_v30  ;;  %1104 = vst [vmem:[#allocation2 + $0x51] sm:$0xff] %v15054_v29  ;;  %v14857_v29 = vmax.f32 %v10362_v37, 0.0  ;;  %v14862_v30 = vmax.f32 %v10418_v8, 0.0 }
 0x247   :  { %1105 = vst [vmem:[#allocation2 + $0x61] sm:$0xff] %v15055_v51  ;;  %1106 = vst [vmem:[#allocation2 + $0x69] sm:$0xff] %v15056_v19  ;;  %v15059_v19 = vmax.f32 %v10333_v20, 0.0  ;;  %v14859_v51 = vmax.f32 %v10382_v45, 0.0 }
 0x248   :  { %1107 = vst [vmem:[#allocation2 + $0x79] sm:$0xff] %v15057_v28  ;;  %1108 = vst [vmem:[#allocation2 + $0x81] sm:$0xff] %v14853_v9  ;;  %v15060_v28 = vmax.f32 %v10337_v0, 0.0  ;;  %v15061_v9 = vmax.f32 %v10341_v35, 0.0  ;;  %v15088_v45 = vld [vmem:[#allocation19_spill] sm:$0xff] }
 0x249   :  { %1109 = vst [vmem:[#allocation2 + $0x91] sm:$0xff] %v14854_v63  ;;  %1110 = vst [vmem:[#allocation2 + $0x99] sm:$0xff] %v15058_v54  ;;  %v14858_v63 = vmax.f32 %v10378_v40, 0.0  ;;  %v15062_v54 = vmax.f32 %v10353_v59, 0.0  ;;  %v15089_v40 = vld [vmem:[#allocation20_spill] sm:$0xff] }
 0x24a   :  { %1111 = vst [vmem:[#allocation2 + $0xa9] sm:$0xff] %v15059_v19  ;;  %1112 = vst [vmem:[#allocation2 + $0xb1] sm:$0xff] %v15060_v28  ;;  %v15063_v19 = vmax.f32 %v10358_v24, 0.0  ;;  %v14861_v28 = vmax.f32 %v10414_v1, 0.0  ;;  %v15096_v37 = vld [vmem:[#allocation22_spill] sm:$0xff]  ;;  %v15097_v24 = vmax.f32 %v10490_v33, 0.0 }
 0x24b   :  { %1113 = vst [vmem:[#allocation2 + $0xc1] sm:$0xff] %v15061_v9  ;;  %1114 = vst [vmem:[#allocation2 + $0xc9] sm:$0xff] %v14855_v21  ;;  %v14860_v9 = vmax.f32 %v10394_v50, 0.0  ;;  %v15064_v21 = vmax.f32 %v10366_v25, 0.0  ;;  %v15080_v50 = vmax.f32 %v10442_v31, 0.0  ;;  %v15095_v25 = vld [vmem:[#allocation7_spill] sm:$0xff] }
 0x24c   :  { %1115 = vst [vmem:[#allocation2 + $0xd9] sm:$0xff] %v14856_v12  ;;  %1116 = vst [vmem:[#allocation2 + $0xe1] sm:$0xff] %v15062_v54  ;;  %v15065_v12 = vmax.f32 %v10370_v42, 0.0  ;;  %v15066_v54 = vmax.f32 %v10374_v47, 0.0  ;;  %v15094_v42 = vld [vmem:[#allocation21_spill] sm:$0xff]  ;;  %v1012_v47 = vmax.f32 %v10534_v22, 0.0 }
 0x24d   :  { %1117 = vst [vmem:[#allocation2 + $0xf1] sm:$0xff] %v15063_v19  ;;  %1118 = vst [vmem:[#allocation2 + $0xf9] sm:$0xff] %v14857_v29  ;;  %v980_v19 = vmax.f32 %v10410_v60, 0.0  ;;  %v14864_v60 = vmax.f32 %v10426_v6, 0.0  ;;  %v15079_v29 = vld [vmem:[#allocation31_spill] sm:$0xff]  ;;  %v15105_v22 = vmax.f32 %v10280_v26, 0.0 }
 0x24e   :  { %1119 = vst [vmem:[#allocation2 + $0x109] sm:$0xff] %v15064_v21  ;;  %1120 = vst [vmem:[#allocation2 + $0x111] sm:$0xff] %v15065_v12  ;;  %v15067_v21 = vmax.f32 %v10386_v52, 0.0  ;;  %v15068_v12 = vmax.f32 %v10390_v57, 0.0  ;;  %v1167_v52 = vld [vmem:[#allocation2 + $0x30] sm:$0xff]  ;;  %v1011_v57 = vmax.f32 %v15096_v37, 0.0 }
 0x24f   :  { %1121 = vst [vmem:[#allocation2 + $0x121] sm:$0xff] %v15066_v54  ;;  %1122 = vst [vmem:[#allocation2 + $0x129] sm:$0xff] %v14858_v63  ;;  %v15069_v63 = vmax.f32 %v10398_v55, 0.0  ;;  %v15102_v54 = vmax.f32 %v10510_v5, 0.0  ;;  %v15103_v37 = vmax.f32 %v15088_v45, 0.0  ;;  %v15110_v26 = vmax.f32 %v15095_v25, 0.0 }
 0x250   :  { %1123 = vst [vmem:[#allocation2 + $0x139] sm:$0xff] %v14859_v51  ;;  %1124 = vst [vmem:[#allocation2 + $0x141] sm:$0xff] %v15067_v21  ;;  %v15070_v51 = vmax.f32 %v10402_v62, 0.0  ;;  %v15073_v21 = vld [vmem:[#allocation28_spill] sm:$0xff] }
 0x251   :  { %1125 = vst [vmem:[#allocation2 + $0x151] sm:$0xff] %v15068_v12  ;;  %1126 = vst [vmem:[#allocation2 + $0x159] sm:$0xff] %v14860_v9  ;;  %v1168_v9 = vld [vmem:[#allocation2 + $0x38] sm:$0xff] }
 0x252   :  { %1127 = vst [vmem:[#allocation2 + $0x169] sm:$0xff] %v15069_v63  ;;  %1128 = vst [vmem:[#allocation2 + $0x171] sm:$0xff] %v15070_v51  ;;  %v15071_v63 = vmax.f32 %v10422_v13, 0.0  ;;  %v15072_v51 = vld [vmem:[#allocation27_spill] sm:$0xff]  ;;  %v10723_v36 = vpack.c.bf16 %v1168_v9, %v1167_v52  ;;  %v1171_v9 = vld [vmem:[#allocation2 + $0x60] sm:$0xff] }
 0x253   :  { %1129 = vst [vmem:[#allocation2 + $0x181] sm:$0xff] %v979_v41  ;;  %1130 = vst [vmem:[#allocation2 + $0x189] sm:$0xff] %v980_v19  ;;  %v15075_v19 = vmax.f32 %v10430_v11, 0.0  ;;  %v1166_v41 = vld [vmem:[#allocation2 + $0x20] sm:$0xff]  ;;  %v1169_v52 = vld [vmem:[#allocation2 + $0x48] sm:$0xff] }
 0x254   :  { %1131 = vst [vmem:[#allocation2 + $0x1c9] sm:$0xff] %v14861_v28  ;;  %1132 = vst [vmem:[#allocation2 + $0x1d1] sm:$0xff] %v14862_v30  ;;  %v15076_v28 = vmax.f32 %v10434_v18, 0.0  ;;  %v15077_v30 = vmax.f32 %v10438_v23, 0.0 }
 0x255   :  { %1133 = vst [vmem:[#allocation2 + $0x1e1] sm:$0xff] %v15071_v63  ;;  %1134 = vst [vmem:[#allocation2 + $0x1e9] sm:$0xff] %v14864_v60  ;;  %v15078_v63 = vld [vmem:[#allocation30_spill] sm:$0xff]  ;;  %v15081_v60 = vmax.f32 %v10446_v49, 0.0 }
 0x256   :  { %1135 = vst [vmem:[#allocation2 + $0x1f9] sm:$0xff] %v15075_v19  ;;  %1136 = vst [vmem:[#allocation2 + $0x201] sm:$0xff] %v15076_v28  ;;  %v15082_v19 = vmax.f32 %v10450_v61, 0.0  ;;  %v15083_v28 = vmax.f32 %v10454_v44, 0.0 }
 0x257   :  { %1137 = vst [vmem:[#allocation2 + $0x211] sm:$0xff] %v15077_v30  ;;  %1138 = vst [vmem:[#allocation2 + $0x219] sm:$0xff] %v15080_v50  ;;  %v1165_v30 = vld [vmem:[#allocation2 + $0x18] sm:$0xff]  ;;  %v15084_v50 = vmax.f32 %v10458_v2, 0.0 }
 0x258   :  { %1139 = vst [vmem:[#allocation2 + $0x229] sm:$0xff] %v15081_v60  ;;  %1140 = vst [vmem:[#allocation2 + $0x231] sm:$0xff] %v15082_v19  ;;  %v15085_v60 = vmax.f32 %v15072_v51, 0.0  ;;  %v15086_v19 = vmax.f32 %v15073_v21, 0.0  ;;  %v10717_v12 = vpack.c.bf16 %v1166_v41, %v1165_v30  ;;  %v1172_v41 = vld [vmem:[#allocation2 + $0x68] sm:$0xff]  ;;  %v15113_v30 = vmax.f32 %v10398_v55, 0.0 }
 0x259   :  { %1141 = vst [vmem:[#allocation2 + $0x241] sm:$0xff] %v15083_v28  ;;  %1142 = vst [vmem:[#allocation2 + $0x249] sm:$0xff] %v15084_v50  ;;  %v15087_v28 = vmax.f32 %v15074_v3, 0.0  ;;  %v15090_v50 = vmax.f32 %v15078_v63, 0.0  ;;  %v15119_v55 = vmax.f32 %v10422_v13, 0.0 }
 0x25a   :  { %1143 = vst [vmem:[#allocation2 + $0x259] sm:$0xff] %v15085_v60  ;;  %1144 = vst [vmem:[#allocation2 + $0x261] sm:$0xff] %v15086_v19  ;;  %v15091_v60 = vmax.f32 %v15079_v29, 0.0  ;;  %v15092_v19 = vmax.f32 %v10482_v58, 0.0  ;;  %8116 = vmatmul.mubr.bf16.vlgmr.msra.gmra.mxu0 %v10717_v12 }
 0x25b   :  { %1145 = vst [vmem:[#allocation2 + $0x271] sm:$0xff] %v15087_v28  ;;  %1146 = vst [vmem:[#allocation2 + $0x279] sm:$0xff] %v15090_v50  ;;  %v15093_v28 = vmax.f32 %v10486_v38, 0.0  ;;  %v15098_v50 = vmax.f32 %v10494_v46, 0.0  ;;  %8119 = vmatprep.mubr.bf16.mxu0 %v10723_v36 }
 0x25c   :  { %1147 = vst [vmem:[#allocation2 + $0x289] sm:$0xff] %v15091_v60  ;;  %1148 = vst [vmem:[#allocation2 + $0x291] sm:$0xff] %v15092_v19  ;;  %v15099_v60 = vmax.f32 %v10498_v4, 0.0  ;;  %v15100_v19 = vmax.f32 %v10502_v39, 0.0 }
 0x25d   :  { %1149 = vst [vmem:[#allocation2 + $0x2a1] sm:$0xff] %v15093_v28  ;;  %1150 = vst [vmem:[#allocation2 + $0x2a9] sm:$0xff] %v15097_v24  ;;  %v15101_v28 = vmax.f32 %v10506_v32, 0.0  ;;  %v15104_v24 = vmax.f32 %v15089_v40, 0.0 }
 0x25e   :  { %1151 = vst [vmem:[#allocation2 + $0x2b9] sm:$0xff] %v15098_v50  ;;  %1152 = vst [vmem:[#allocation2 + $0x2c1] sm:$0xff] %v15099_v60  ;;  %v15106_v50 = vmax.f32 %v10284_v14, 0.0  ;;  %v8853_v14 = vld [vmem:[%s14794_s2 + $0xf0] sm:$0xff]  }
 0x25f   :  { %1153 = vst [vmem:[#allocation2 + $0x2d1] sm:$0xff] %v15100_v19  ;;  %1154 = vst [vmem:[#allocation2 + $0x2d9] sm:$0xff] %v15101_v28  ;;  %v15107_v19 = vmax.f32 %v10288_v7, 0.0  ;;  %v15108_v28 = vmax.f32 %v10292_v48, 0.0  ;;  %v15111_v7 = vld [vmem:[#allocation6_spill] sm:$0xff]  ;;  %v8847_v48 = vld [vmem:[%s14794_s2 + $0xa8] sm:$0xff]  }
 0x260   :  { %1155 = vst [vmem:[#allocation2 + $0x2e9] sm:$0xff] %v15102_v54  ;;  %1156 = vst [vmem:[#allocation2 + $0x2f1] sm:$0xff] %v15103_v37  ;;  %v1340_v60 = vpack.c.bf16 %v15106_v50, %v15105_v22  ;;  %v8846_v54 = vld [vmem:[%s14794_s2 + $0xb0] sm:$0xff]   ;;  %v15109_v37 = vmax.f32 %v15094_v42, 0.0  ;;  %v15115_v22 = vmax.f32 %v10296_v16, 0.0  ;;  %v15116_v50 = vmax.f32 %v10300_v27, 0.0 }
 0x261   :  { %1157 = vst [vmem:[#allocation2 + $0x301] sm:$0xff] %v15104_v24  ;;  %v1341_v59 = vpack.c.bf16 %v15108_v28, %v15107_v19  ;;  %1159 = vst [vmem:[#allocation2 + $0x319] sm:$0xff] %v15110_v26  ;;  %v15114_v24 = vmax.f32 %v10402_v62, 0.0  ;;  %v15117_v28 = vmax.f32 %v10414_v1, 0.0  ;;  %v15120_v62 = vmax.f32 %v10426_v6, 0.0  ;;  %v8848_v1 = vld [vmem:[%s14794_s2 + $0xa0] sm:$0xff]  }
 0x262   :  { %1158 = vst [vmem:[#allocation2 + $0x309] sm:$0xff] %v15109_v37  ;;  %1161 = vst [vmem:[#allocation2 + $0x331] sm:$0xff] %v1011_v57  ;;  %8036 = vmatmul.mubr.bf16.vlgmr.msra.gmra.mxu1 %v1340_v60  ;;  %v1170_v57 = vld [vmem:[#allocation2 + $0x50] sm:$0xff]  ;;  %v1342_v60 = vpack.c.bf16 %v15116_v50, %v15115_v22  ;;  %v15118_v37 = vmax.f32 %v10418_v8, 0.0  ;;  %v15121_v16 = vmax.f32 %v10304_v43, 0.0  ;;  %v15122_v27 = vmax.f32 %v10308_v53, 0.0 }
 0x263   :  { %1162 = vst [vmem:[#allocation2 + $0x339] sm:$0xff] %v1012_v47  ;;  %8180 = vmatpush3.bf16.msra.mxu1 %v15111_v7  ;;  %8039 = vmatprep.mubr.bf16.mxu1 %v1341_v59  ;;  %v15112_v47 = vld [vmem:[#allocation8_spill] sm:$0xff]  ;;  %v10746_v59 = vpack.c.bf16 %v15114_v24, %v15113_v30  ;;  %v10752_v19 = vpack.c.bf16 %v1170_v57, %v1169_v52  ;;  %v15123_v8 = vmax.f32 %v10430_v11, 0.0  ;;  %v15124_v57 = vmax.f32 %v10434_v18, 0.0  ;;  %v8854_v11 = vld [vmem:[%s14794_s2 + $0xe8] sm:$0xff]  }
 0x264   :  { %8181 = vmatprep.subr.bf16.mxu1 %v8846_v54  ;;  %8260 = vmatpush3.bf16.msra.mxu0 %v15112_v47  ;;  %v10758_v26 = vpack.c.bf16 %v15118_v37, %v15117_v28  ;;  %v1343_v7 = vpack.c.bf16 %v15122_v27, %v15121_v16  ;;  %v10770_v52 = vpack.c.bf16 %v1172_v41, %v1171_v9  ;;  %v15125_v6 = vmax.f32 %v10438_v23, 0.0 }
 0x265   :  { %8261 = vmatprep.subr.bf16.mxu0 %v8853_v14  ;;  %v10779_v13 = vpack.c.bf16 %v15124_v57, %v15123_v8  ;;  %v15126_v47 = vmax.f32 %v10442_v31, 0.0  ;;  %8120 = vmatmul.mubr.bf16.gmra.mxu0 %v10752_v19  ;;  %v15127_v53 = vmax.f32 %v10446_v49, 0.0  ;;  %v15128_v9 = vmax.f32 %v10450_v61, 0.0 }
 0x266   :  { %8123 = vmatprep.mubr.bf16.mxu0 %v10770_v52  ;;  %v15129_v18 = vmax.f32 %v10454_v44, 0.0  ;;  %v15130_v23 = vmax.f32 %v10458_v2, 0.0  ;;  %v15132_v49 = vmax.f32 %v15073_v21, 0.0  ;;  %v15133_v30 = vmax.f32 %v15074_v3, 0.0  ;;  %v1173_v21 = vld [vmem:[#allocation2 + $0x78] sm:$0xff] }
 0x267   :  { %8182 = vmatpush3.bf16.msra.mxu1 %v8846_v54  ;;  %v10764_v54 = vpack.c.bf16 %v15120_v62, %v15119_v55  ;;  %v10785_v43 = vpack.c.bf16 %v15126_v47, %v15125_v6  ;;  %v10792_v41 = vpack.c.bf16 %v15128_v9, %v15127_v53  ;;  %v15134_v24 = vmax.f32 %v15078_v63, 0.0  ;;  %v8849_v3 = vld [vmem:[%s14794_s2 + $0x98] sm:$0xff]   ;;  %v1175_v55 = vld [vmem:[#allocation2 + $0x90] sm:$0xff] }
 0x268   :  { %8183 = vmatprep.subr.bf16.mxu1 %v8847_v48  ;;  %8262 = vmatpush3.bf16.msra.mxu0 %v8853_v14  ;;  %v10802_v31 = vpack.c.bf16 %v15130_v23, %v15129_v18  ;;  %v15131_v14 = vmax.f32 %v15072_v51, 0.0  ;;  %v15135_v50 = vmax.f32 %v15079_v29, 0.0  ;;  %v15136_v44 = vmax.f32 %v10482_v58, 0.0  ;;  %v8855_v51 = vld [vmem:[%s14794_s2 + $0xe0] sm:$0xff]   ;;  %v1176_v62 = vld [vmem:[#allocation2 + $0x98] sm:$0xff] }
 0x269   :  { %v10814_v22 = vpack.c.bf16 %v15134_v24, %v15133_v30  ;;  %v15137_v63 = vmax.f32 %v10486_v38, 0.0  ;;  %v15139_v58 = vmax.f32 %v10494_v46, 0.0  ;;  %v15140_v28 = vmax.f32 %v10498_v4, 0.0  ;;  %8263 = vmatprep.subr.bf16.mxu0 %v8854_v11 }
 0x26a   :  { %8040 = vmatmul.mubr.bf16.gmra.mxu1 %v1342_v60  ;;  %v10808_v61 = vpack.c.bf16 %v15132_v49, %v15131_v14  ;;  %v10820_v2 = vpack.c.bf16 %v15136_v44, %v15135_v50  ;;  %v1174_v60 = vld [vmem:[#allocation2 + $0x80] sm:$0xff]  ;;  %v15141_v16 = vmax.f32 %v10502_v39, 0.0  ;;  %v15142_v27 = vmax.f32 %v10506_v32, 0.0 }
 0x26b   :  { %8043 = vmatprep.mubr.bf16.mxu1 %v1343_v7  ;;  %8184 = vmatpush3.bf16.msra.mxu1 %v8847_v48  ;;  %v15138_v48 = vmax.f32 %v10490_v33, 0.0  ;;  %v10838_v37 = vpack.c.bf16 %v15140_v28, %v15139_v58  ;;  %v15143_v38 = vmax.f32 %v10510_v5, 0.0  ;;  %v15144_v33 = vmax.f32 %v15088_v45, 0.0  ;;  %v15157_v58 = vld [vmem:[#allocation23_spill] sm:$0xff] }
 0x26c   :  { %8185 = vmatprep.subr.bf16.mxu1 %v8848_v1  ;;  %v10844_v7 = vpack.c.bf16 %v15142_v27, %v15141_v16  ;;  %8264 = vmatpush3.bf16.msra.mxu0 %v8854_v11  ;;  %v15145_v46 = vmax.f32 %v15089_v40, 0.0  ;;  %v15146_v4 = vmax.f32 %v15094_v42, 0.0  ;;  %v15147_v6 = vmax.f32 %v10312_v56, 0.0  ;;  %v8850_v42 = vld [vmem:[%s14794_s2 + $0x90] sm:$0xff]   ;;  %v8857_v56 = vld [vmem:[%s14794_s2 + $0xd8] sm:$0xff]   ;;  %v1180_v11 = vld [vmem:[#allocation2 + $0xc8] sm:$0xff] }
 0x26d   :  { %v10832_v29 = vpack.c.bf16 %v15138_v48, %v15137_v63  ;;  %v10850_v8 = vpack.c.bf16 %v15144_v33, %v15143_v38  ;;  %v15148_v39 = vmax.f32 %v10316_v15, 0.0  ;;  %v10862_v47 = vpack.c.bf16 %v1174_v60, %v1173_v21  ;;  %8265 = vmatprep.subr.bf16.mxu0 %v8855_v51  ;;  %v8851_v15 = vld [vmem:[%s14794_s2 + $0x88] sm:$0xff]   ;;  %v8858_v40 = vld [vmem:[%s14794_s2 + $0xd0] sm:$0xff]   ;;  %v10910_v21 = vld [vmem:[%s14794_s2 + $0x138] sm:$0xff]  }
 0x26e   :  { %v10856_v57 = vpack.c.bf16 %v15146_v4, %v15145_v46  ;;  %v15149_v45 = vmax.f32 %v10325_v10, 0.0  ;;  %v15150_v5 = vmax.f32 %v10329_v17, 0.0  ;;  %v10868_v9 = vpack.c.bf16 %v1176_v62, %v1175_v55  ;;  %v1177_v10 = vld [vmem:[#allocation2 + $0xa8] sm:$0xff]  ;;  %v1178_v17 = vld [vmem:[#allocation2 + $0xb0] sm:$0xff]  ;;  %v15159_v16 = vld [vmem:[#allocation10_spill] sm:$0xff] }
 0x26f   :  { %v1344_v32 = vpack.c.bf16 %v15148_v39, %v15147_v6  ;;  %8186 = vmatpush3.bf16.msra.mxu1 %v8848_v1  ;;  %8124 = vmatmul.mubr.bf16.gmra.mxu0 %v10862_v47  ;;  %v1179_v1 = vld [vmem:[#allocation2 + $0xc0] sm:$0xff]  ;;  %v15151_v18 = vmax.f32 %v10333_v20, 0.0  ;;  %v15152_v23 = vmax.f32 %v10337_v0, 0.0  ;;  %v10888_v49 = vpack.c.bf16 %v1178_v17, %v1177_v10  ;;  %v8859_v20 = vld [vmem:[%s14794_s2 + $0xc8] sm:$0xff]   ;;  %v1181_v0 = vld [vmem:[#allocation2 + $0xd8] sm:$0xff] }
 0x270   :  { %v1345_v53 = vpack.c.bf16 %v15150_v5, %v15149_v45  ;;  %8187 = vmatprep.subr.bf16.mxu1 %v8849_v3  ;;  %8127 = vmatprep.mubr.bf16.mxu0 %v10868_v9  ;;  %v15153_v30 = vmax.f32 %v10341_v35, 0.0  ;;  %v15154_v24 = vmax.f32 %v10345_v34, 0.0  ;;  %v10894_v44 = vpack.c.bf16 %v1180_v11, %v1179_v1  ;;  %v1182_v35 = vld [vmem:[#allocation2 + $0xe0] sm:$0xff]  ;;  %v1183_v60 = vld [vmem:[#allocation2 + $0xf0] sm:$0xff]  ;;  %v15155_v63 = vld [vmem:[#allocation11_spill] sm:$0xff] }
 0x271   :  { %8266 = vmatpush3.bf16.msra.mxu0 %v8855_v51  ;;  %v1346_v14 = vpack.c.bf16 %v15152_v23, %v15151_v18  ;;  %v8856_v51 = vld [vmem:[%s14794_s2 + $0x80] sm:$0xff]   ;;  %v15156_v48 = vmax.f32 %v15155_v63, 0.0  ;;  %v15158_v28 = vmax.f32 %v15157_v58, 0.0  ;;  %v10916_v62 = vpack.c.bf16 %v1182_v35, %v1181_v0  ;;  %v15161_v38 = vld [vmem:[#allocation13_spill] sm:$0xff]  ;;  %v1185_v6 = vld [vmem:[#allocation2 + $0x108] sm:$0xff] }
 0x272   :  { %8044 = vmatmul.mubr.bf16.gmra.mxu1 %v1344_v32  ;;  %8267 = vmatprep.subr.bf16.mxu0 %v8857_v56  ;;  %v1347_v50 = vpack.c.bf16 %v15154_v24, %v15153_v30  ;;  %v8860_v34 = vld [vmem:[%s14794_s2 + $0xc0] sm:$0xff]   ;;  %v15160_v27 = vmax.f32 %v15159_v16, 0.0  ;;  %v15162_v33 = vmax.f32 %v15161_v38, 0.0  ;;  %v1186_v39 = vld [vmem:[#allocation2 + $0x110] sm:$0xff]  ;;  %v1188_v45 = vld [vmem:[#allocation2 + $0x128] sm:$0xff] }
 0x273   :  { %8047 = vmatprep.mubr.bf16.mxu1 %v1345_v53  ;;  %8188 = vmatpush3.bf16.msra.mxu1 %v8849_v3  ;;  %v1184_v3 = vld [vmem:[#allocation2 + $0xf8] sm:$0xff]  ;;  %v1348_v55 = vpack.c.bf16 %v15158_v28, %v15156_v48  ;;  %v1187_v32 = vld [vmem:[#allocation2 + $0x120] sm:$0xff]  ;;  %v15163_v5 = vld [vmem:[#allocation15_spill] sm:$0xff]  ;;  %v10931_v10 = vpack.c.bf16 %v1186_v39, %v1185_v6 }
 0x274   :  { %8189 = vmatprep.subr.bf16.mxu1 %v8850_v42  ;;  %v1349_v46 = vpack.c.bf16 %v15162_v33, %v15160_v27  ;;  %v10922_v4 = vpack.c.bf16 %v1184_v3, %v1183_v60  ;;  %v15164_v53 = vmax.f32 %v15163_v5, 0.0  ;;  %v15167_v17 = vld [vmem:[#allocation14_spill] sm:$0xff]  ;;  %v15169_v1 = vld [vmem:[#allocation17_spill] sm:$0xff]  ;;  %v10937_v23 = vpack.c.bf16 %v1188_v45, %v1187_v32  ;;  %v1191_v24 = vld [vmem:[#allocation2 + $0x150] sm:$0xff] }
 0x275   :  { %8268 = vmatpush3.bf16.msra.mxu0 %v8857_v56  ;;  %v15170_v11 = vmax.f32 %v15169_v1, 0.0  ;;  %v1190_v30 = vld [vmem:[#allocation2 + $0x140] sm:$0xff]  ;;  %v15173_v0 = vld [vmem:[#allocation16_spill] sm:$0xff]  ;;  %v1193_v33 = vld [vmem:[#allocation2 + $0x168] sm:$0xff] }
 0x276   :  { %8269 = vmatprep.subr.bf16.mxu0 %v8858_v40  ;;  %v15174_v35 = vmax.f32 %v15173_v0, 0.0  ;;  %v15175_v3 = vld [vmem:[#allocation24_spill] sm:$0xff]  ;;  %v15177_v48 = vld [vmem:[#allocation26_spill] sm:$0xff]  ;;  %v8915_v39 = vld [vmem:[#allocation2 + $0x8] sm:$0xff] }
 0x277   :  { %8190 = vmatpush3.bf16.msra.mxu1 %v8850_v42  ;;  %8128 = vmatmul.mubr.bf16.gmra.mxu0 %v10888_v49  ;;  %v15165_v42 = vld [vmem:[#allocation12_spill] sm:$0xff]  ;;  %v15176_v63 = vmax.f32 %v15175_v3, 0.0  ;;  %v15178_v58 = vmax.f32 %v15177_v48, 0.0  ;;  %v1308_v27 = vld [vmem:[#allocation2 + $0x1b9] sm:$0xff]  ;;  %v1197_v5 = vld [vmem:[#allocation2 + $0x1c8] sm:$0xff] }
 0x278   :  { %8191 = vmatprep.subr.bf16.mxu1 %v8851_v15  ;;  %8131 = vmatprep.mubr.bf16.mxu0 %v10894_v44  ;;  %v15166_v56 = vmax.f32 %v15165_v42, 0.0  ;;  %v1307_v16 = vld [vmem:[#allocation2 + $0x1b1] sm:$0xff]  ;;  %v1199_v42 = vld [vmem:[#allocation2 + $0x1e0] sm:$0xff] }
 0x279   :  { %8270 = vmatpush3.bf16.msra.mxu0 %v8858_v40  ;;  %v15168_v40 = vmax.f32 %v15167_v17, 0.0  ;;  %v1353_v28 = vpack.c.bf16 %v15178_v58, %v15176_v63  ;;  %v1195_v38 = vld [vmem:[#allocation2 + $0x1b0] sm:$0xff]  ;;  %v1355_v6 = vpack.c.bf16 %v1308_v27, %v1307_v16  ;;  %v1212_v0 = vld [vmem:[#allocation2 + $0x278] sm:$0xff]  ;;  %v1215_v3 = vld [vmem:[#allocation2 + $0x2a0] sm:$0xff] }
 0x27a   :  { %8048 = vmatmul.mubr.bf16.gmra.mxu1 %v1346_v14  ;;  %8271 = vmatprep.subr.bf16.mxu0 %v8859_v20  ;;  %v1189_v14 = vld [vmem:[#allocation2 + $0x138] sm:$0xff]  ;;  %v1243_v32 = vpack.c.bf16 %v8915_v39, %v1195_v38  ;;  %v1203_v1 = vld [vmem:[#allocation2 + $0x210] sm:$0xff]  ;;  %v1216_v63 = vld [vmem:[#allocation2 + $0x2a8] sm:$0xff] }
 0x27b   :  { %8051 = vmatprep.mubr.bf16.mxu1 %v1347_v50  ;;  %8192 = vmatpush3.bf16.msra.mxu1 %v8851_v15  ;;  %v1350_v15 = vpack.c.bf16 %v15166_v56, %v15164_v53  ;;  %v1351_v18 = vpack.c.bf16 %v15170_v11, %v15168_v40  ;;  %v1192_v50 = vld [vmem:[#allocation2 + $0x158] sm:$0xff]  ;;  %v10945_v60 = vpack.c.bf16 %v1190_v30, %v1189_v14  ;;  %v1198_v53 = vld [vmem:[#allocation2 + $0x1d0] sm:$0xff]  ;;  %v1200_v56 = vld [vmem:[#allocation2 + $0x1e8] sm:$0xff] }
 0x27c   :  { %8193 = vmatprep.subr.bf16.mxu1 %v8856_v51  ;;  %v10961_v17 = vpack.c.bf16 %v1200_v56, %v1199_v42  ;;  %v1202_v40 = vld [vmem:[#allocation2 + $0x200] sm:$0xff]  ;;  %v1204_v11 = vld [vmem:[#allocation2 + $0x218] sm:$0xff]  ;;  %v10993_v58 = vpack.c.bf16 %v1216_v63, %v1215_v3  ;;  %v1219_v16 = vld [vmem:[#allocation2 + $0x2d0] sm:$0xff] }
 0x27d   :  { %8272 = vmatpush3.bf16.msra.mxu0 %v8859_v20  ;;  %v10969_v14 = vpack.c.bf16 %v1204_v11, %v1203_v1  ;;  %v1207_v30 = vld [vmem:[#allocation2 + $0x240] sm:$0xff]  ;;  %v1220_v27 = vld [vmem:[#allocation2 + $0x2d8] sm:$0xff] }
 0x27e   :  { %8273 = vmatprep.subr.bf16.mxu0 %v8860_v34  ;;  %v1226_v42 = vld [vmem:[#allocation2 + $0x320] sm:$0xff]  ;;  %v2066_v11 = vld [vmem:[#allocation2 + $0x32] sm:$0xff] }
 0x27f   :  { %8194 = vmatpush3.bf16.msra.mxu1 %v8856_v51  ;;  %8132 = vmatmul.mubr.bf16.gmra.mxu0 %v10916_v62  ;;  %v15171_v51 = vld [vmem:[#allocation18_spill] sm:$0xff] }
 0x280   :  { %8339 = vmatprep.subr.bf16.mxu1 %v10910_v21  ;;  %8135 = vmatprep.mubr.bf16.mxu0 %v10922_v4  ;;  %v15172_v20 = vmax.f32 %v15171_v51, 0.0  ;;  %v2072_v3 = vld [vmem:[#allocation2 + $0x7a] sm:$0xff]  ;;  %v2073_v63 = vld [vmem:[#allocation2 + $0x82] sm:$0xff] }
 0x281   :  { %8274 = vmatpush3.bf16.msra.mxu0 %v8860_v34 }
 0x282   :  { %8052 = vmatmul.mubr.bf16.gmra.mxu1 %v1348_v55  ;;  %v1352_v34 = vpack.c.bf16 %v15174_v35, %v15172_v20  ;;  %v10951_v55 = vpack.c.bf16 %v1192_v50, %v1191_v24  ;;  %v1208_v24 = vld [vmem:[#allocation2 + $0x248] sm:$0xff]  ;;  %v1211_v20 = vld [vmem:[#allocation2 + $0x270] sm:$0xff] }
 0x283   :  { %8055 = vmatprep.mubr.bf16.mxu1 %v1349_v46  ;;  %v1194_v46 = vld [vmem:[#allocation2 + $0x170] sm:$0xff]  ;;  %v10977_v51 = vpack.c.bf16 %v1208_v24, %v1207_v30  ;;  %v8863_v24 = vld [vmem:[%s14794_s2 + $0x128] sm:$0xff]  }
 0x284   :  { %v10955_v45 = vpack.c.bf16 %v1194_v46, %v1193_v33  ;;  %v11004_v33 = vpack.c.bf16 %v1220_v27, %v1219_v16  ;;  %v1223_v46 = vld [vmem:[#allocation2 + $0x300] sm:$0xff]  ;;  %v8862_v30 = vld [vmem:[%s14794_s2 + $0x130] sm:$0xff]  }
 0x285   :  { %v8866_v27 = vld [vmem:[%s14794_s2 + $0x110] sm:$0xff]  }
 0x287   :  { %8136 = vmatmul.mubr.bf16.gmra.mxu0 %v10931_v10 }
 0x288   :  { %8139 = vmatprep.mubr.bf16.mxu0 %v10937_v23 }
 0x28a   :  { %8056 = vmatmul.mubr.bf16.gmra.mxu1 %v1350_v15  ;;  %v10959_v15 = vpack.c.bf16 %v1198_v53, %v1197_v5  ;;  %v1338_v5 = vld [vmem:[#allocation2 + $0x321] sm:$0xff]  ;;  %v1225_v53 = vld [vmem:[#allocation2 + $0x318] sm:$0xff] }
 0x28b   :  { %8059 = vmatprep.mubr.bf16.mxu1 %v1351_v18  ;;  %v11020_v1 = vpack.c.bf16 %v1226_v42, %v1225_v53  ;;  %v8872_v53 = vld [vmem:[%s14794_s2 + $0x100] sm:$0xff]  }
 0x28c   :  { %v8876_v42 = vld [vmem:[%s14794_s2 + $0x140] sm:$0xff]  }
 0x28f   :  { %8140 = vmatmul.mubr.bf16.gmra.mxu0 %v10945_v60 }
 0x290   :  { %8143 = vmatprep.mubr.bf16.mxu0 %v10951_v55 }
 0x292   :  { %8060 = vmatmul.mubr.bf16.gmra.mxu1 %v1352_v34  ;;  %v10985_v34 = vpack.c.bf16 %v1212_v0, %v1211_v20  ;;  %v2070_v20 = vld [vmem:[#allocation2 + $0x62] sm:$0xff] }
 0x293   :  { %8063 = vmatprep.mubr.bf16.mxu1 %v1353_v28  ;;  %v1218_v28 = vld [vmem:[#allocation2 + $0x2c0] sm:$0xff] }
 0x297   :  { %8144 = vmatmul.mubr.bf16.gmra.mxu0 %v10955_v45 }
 0x298   :  { %8147 = vmatprep.mubr.bf16.mxu0 %v1243_v32 }
 0x29a   :  { %8064 = vmatmul.mubr.bf16.gmra.mxu1 %v10746_v59  ;;  %v1201_v59 = vld [vmem:[#allocation2 + $0x1f8] sm:$0xff] }
 0x29b   :  { %8067 = vmatprep.mubr.bf16.mxu1 %v1355_v6  ;;  %v10967_v18 = vpack.c.bf16 %v1202_v40, %v1201_v59  ;;  %v1224_v6 = vld [vmem:[#allocation2 + $0x308] sm:$0xff]  ;;  %v15179_v59 = vmax.f32 %v15095_v25, 0.0 }
 0x29c   :  { %v11012_v32 = vpack.c.bf16 %v1224_v6, %v1223_v46  ;;  %v2077_v46 = vld [vmem:[#allocation2 + $0xb2] sm:$0xff]  ;;  %v8867_v6 = vld [vmem:[%s14794_s2 + $0x108] sm:$0xff]  }
 0x29d   :  { %v1370_v40 = vpack.c.bf16 %v1338_v5, %v15179_v59  ;;  %v2081_v59 = vld [vmem:[#allocation2 + $0xe2] sm:$0xff] }
 0x29f   :  { %8148 = vmatmul.mubr.bf16.gmra.mxu0 %v10959_v15 }
 0x2a0   :  { %8151 = vmatprep.mubr.bf16.mxu0 %v10961_v17 }
 0x2a2   :  { %8068 = vmatmul.mubr.bf16.gmra.mxu1 %v10758_v26  ;;  %v1205_v26 = vld [vmem:[#allocation2 + $0x228] sm:$0xff] }
 0x2a3   :  { %8071 = vmatprep.mubr.bf16.mxu1 %v10764_v54  ;;  %v1206_v54 = vld [vmem:[#allocation2 + $0x230] sm:$0xff] }
 0x2a4   :  { %v10975_v50 = vpack.c.bf16 %v1206_v54, %v1205_v26  ;;  %v2067_v26 = vld [vmem:[#allocation2 + $0x3a] sm:$0xff] }
 0x2a5   :  { %v11029_v25 = vpack.c.bf16 %v2067_v26, %v2066_v11  ;;  %v2085_v26 = vld [vmem:[#allocation2 + $0x112] sm:$0xff] }
 0x2a7   :  { %8152 = vmatmul.mubr.bf16.gmra.mxu0 %v10967_v18 }
 0x2a8   :  { %8155 = vmatprep.mubr.bf16.mxu0 %v10969_v14 }
 0x2aa   :  { %8072 = vmatmul.mubr.bf16.gmra.mxu1 %v10779_v13  ;;  %v1209_v13 = vld [vmem:[#allocation2 + $0x258] sm:$0xff] }
 0x2ab   :  { %8075 = vmatprep.mubr.bf16.mxu1 %v10785_v43  ;;  %v1210_v43 = vld [vmem:[#allocation2 + $0x260] sm:$0xff] }
 0x2ac   :  { %v10983_v35 = vpack.c.bf16 %v1210_v43, %v1209_v13  ;;  %v2068_v13 = vld [vmem:[#allocation2 + $0x4a] sm:$0xff]  ;;  %v2069_v43 = vld [vmem:[#allocation2 + $0x52] sm:$0xff] }
 0x2ad   :  { %v11042_v0 = vpack.c.bf16 %v2069_v43, %v2068_v13  ;;  %v2089_v43 = vld [vmem:[#allocation2 + $0x142] sm:$0xff] }
 0x2af   :  { %8156 = vmatmul.mubr.bf16.gmra.mxu0 %v10975_v50 }
 0x2b0   :  { %8159 = vmatprep.mubr.bf16.mxu0 %v10977_v51 }
 0x2b2   :  { %8076 = vmatmul.mubr.bf16.gmra.mxu1 %v10792_v41  ;;  %v1213_v41 = vld [vmem:[#allocation2 + $0x288] sm:$0xff] }
 0x2b3   :  { %8079 = vmatprep.mubr.bf16.mxu1 %v10802_v31  ;;  %v1214_v31 = vld [vmem:[#allocation2 + $0x290] sm:$0xff] }
 0x2b4   :  { %v10991_v48 = vpack.c.bf16 %v1214_v31, %v1213_v41  ;;  %v8864_v41 = vld [vmem:[%s14794_s2 + $0x120] sm:$0xff]  }
 0x2b5   :  { %v8871_v31 = vld [vmem:[%s14794_s2 + $0x160] sm:$0xff]  }
 0x2b7   :  { %8160 = vmatmul.mubr.bf16.gmra.mxu0 %v10983_v35 }
 0x2b8   :  { %8163 = vmatprep.mubr.bf16.mxu0 %v10985_v34 }
 0x2ba   :  { %8080 = vmatmul.mubr.bf16.gmra.mxu1 %v10808_v61  ;;  %v8868_v61 = vld [vmem:[%s14794_s2 + $0x178] sm:$0xff]  }
 0x2bb   :  { %8083 = vmatprep.mubr.bf16.mxu1 %v10814_v22  ;;  %v1217_v22 = vld [vmem:[#allocation2 + $0x2b8] sm:$0xff]  ;;  %8419 = vmatprep.subr.bf16.mxu0 %v8868_v61 }
 0x2bc   :  { %v11002_v38 = vpack.c.bf16 %v1218_v28, %v1217_v22  ;;  %v2074_v22 = vld [vmem:[#allocation2 + $0x92] sm:$0xff]  ;;  %v11062_v28 = vpack.c.bf16 %v2073_v63, %v2072_v3  ;;  %v2606_v3 = vld [vmem:[#allocation2 + $0x180] sm:$0xff]  ;;  %v2607_v63 = vld [vmem:[#allocation2 + $0x188] sm:$0xff] }
 0x2bf   :  { %8164 = vmatmul.mubr.bf16.gmra.mxu0 %v10991_v48 }
 0x2c0   :  { %8167 = vmatprep.mubr.bf16.mxu0 %v10993_v58 }
 0x2c2   :  { %8084 = vmatmul.mubr.bf16.gmra.mxu1 %v10820_v2  ;;  %v1221_v2 = vld [vmem:[#allocation2 + $0x2e8] sm:$0xff] }
 0x2c3   :  { %8087 = vmatprep.mubr.bf16.mxu1 %v10832_v29  ;;  %v1222_v29 = vld [vmem:[#allocation2 + $0x2f0] sm:$0xff] }
 0x2c4   :  { %v11010_v39 = vpack.c.bf16 %v1222_v29, %v1221_v2  ;;  %v8874_v2 = vld [vmem:[%s14794_s2 + $0x150] sm:$0xff]  }
 0x2c5   :  { %v2076_v29 = vld [vmem:[#allocation2 + $0xaa] sm:$0xff] }
 0x2c7   :  { %8168 = vmatmul.mubr.bf16.gmra.mxu0 %v11002_v38 }
 0x2c8   :  { %8171 = vmatprep.mubr.bf16.mxu0 %v11004_v33 }
 0x2ca   :  { %8088 = vmatmul.mubr.bf16.gmra.mxu1 %v10838_v37  ;;  %v2062_v37 = vld [vmem:[#allocation2 + $0x2] sm:$0xff] }
 0x2cb   :  { %8091 = vmatprep.mubr.bf16.mxu1 %v10844_v7  ;;  %v2063_v7 = vld [vmem:[#allocation2 + $0xa] sm:$0xff] }
 0x2cc   :  { %v2126_v56 = vpack.c.bf16 %v2063_v7, %v2062_v37  ;;  %v2078_v37 = vld [vmem:[#allocation2 + $0xc2] sm:$0xff]  ;;  %v11082_v7 = vpack.c.bf16 %v2077_v46, %v2076_v29 }
 0x2cf   :  { %8172 = vmatmul.mubr.bf16.gmra.mxu0 %v11010_v39 }
 0x2d0   :  { %8175 = vmatprep.mubr.bf16.mxu0 %v11012_v32 }
 0x2d2   :  { %8092 = vmatmul.mubr.bf16.gmra.mxu1 %v10850_v8  ;;  %v2064_v8 = vld [vmem:[#allocation2 + $0x1a] sm:$0xff] }
 0x2d3   :  { %8095 = vmatprep.mubr.bf16.mxu1 %v10856_v57  ;;  %v2065_v57 = vld [vmem:[#allocation2 + $0x22] sm:$0xff] }
 0x2d4   :  { %v11024_v54 = vpack.c.bf16 %v2065_v57, %v2064_v8  ;;  %v2083_v8 = vld [vmem:[#allocation2 + $0xfa] sm:$0xff] }
 0x2d7   :  { %8176 = vmatmul.mubr.bf16.gmra.mxu0 %v11020_v1 }
 0x2d8   :  { %8275 = vmatprep.mubr.bf16.mxu0 %v10717_v12  ;;  %v8869_v12 = vld [vmem:[%s14794_s2 + $0x170] sm:$0xff]  }
 0x2da   :  { %8096 = vmatmul.mubr.bf16.gmra.mxu1 %v1370_v40  ;;  %v11102_v40 = vld [vmem:[%s14794_s2 + $0x1b8] sm:$0xff]  }
 0x2db   :  { %8195 = vmatprep.mubr.bf16.mxu1 %v2126_v56  ;;  %v2080_v56 = vld [vmem:[#allocation2 + $0xda] sm:$0xff] }
 0x2dc   :  { %v11104_v57 = vpack.c.bf16 %v2081_v59, %v2080_v56 }
 0x2df   :  { %8276 = vmatmul.mubr.bf16.vlgmr.msra.gmra.mxu0 %v10723_v36  ;;  %v2071_v36 = vld [vmem:[#allocation2 + $0x6a] sm:$0xff] }
 0x2e0   :  { %8279 = vmatprep.mubr.bf16.mxu0 %v10752_v19  ;;  %8420 = vmatpush3.bf16.msra.mxu0 %v8868_v61  ;;  %v11047_v19 = vpack.c.bf16 %v2071_v36, %v2070_v20  ;;  %v8865_v61 = vld [vmem:[%s14794_s2 + $0x118] sm:$0xff]  }
 0x2e1   :  { %8421 = vmatprep.subr.bf16.mxu0 %v8869_v12  ;;  %v2090_v20 = vld [vmem:[#allocation2 + $0x152] sm:$0xff] }
 0x2e2   :  { %8196 = vmatmul.mubr.bf16.vlgmr.msra.gmra.mxu1 %v11024_v54 }
 0x2e3   :  { %8340 = vmatpush3.bf16.msra.mxu1 %v10910_v21  ;;  %8199 = vmatprep.mubr.bf16.mxu1 %v11029_v25  ;;  %v8870_v21 = vld [vmem:[%s14794_s2 + $0x168] sm:$0xff]  }
 0x2e4   :  { %8341 = vmatprep.subr.bf16.mxu1 %v8862_v30  ;;  %8422 = vmatpush3.bf16.msra.mxu0 %v8869_v12  ;;  %v2087_v12 = vld [vmem:[#allocation2 + $0x12a] sm:$0xff] }
 0x2e5   :  { %8423 = vmatprep.subr.bf16.mxu0 %v8870_v21 }
 0x2e7   :  { %8342 = vmatpush3.bf16.msra.mxu1 %v8862_v30  ;;  %8280 = vmatmul.mubr.bf16.gmra.mxu0 %v10770_v52  ;;  %v2075_v52 = vld [vmem:[#allocation2 + $0x9a] sm:$0xff]  ;;  %v2086_v30 = vld [vmem:[#allocation2 + $0x122] sm:$0xff] }
 0x2e8   :  { %8343 = vmatprep.subr.bf16.mxu1 %v8863_v24  ;;  %8283 = vmatprep.mubr.bf16.mxu0 %v10862_v47  ;;  %v8873_v47 = vld [vmem:[%s14794_s2 + $0x158] sm:$0xff]   ;;  %v11067_v16 = vpack.c.bf16 %v2075_v52, %v2074_v22  ;;  %v11115_v13 = vpack.c.bf16 %v2087_v12, %v2086_v30  ;;  %v2655_v52 = vpack.c.bf16 %v2607_v63, %v2606_v3 }
 0x2e9   :  { %8424 = vmatpush3.bf16.msra.mxu0 %v8870_v21 }
 0x2ea   :  { %8200 = vmatmul.mubr.bf16.gmra.mxu1 %v11042_v0  ;;  %8425 = vmatprep.subr.bf16.mxu0 %v8871_v31 }
 0x2eb   :  { %8203 = vmatprep.mubr.bf16.mxu1 %v11047_v19  ;;  %8344 = vmatpush3.bf16.msra.mxu1 %v8863_v24 }
 0x2ec   :  { %8345 = vmatprep.subr.bf16.mxu1 %v8864_v41 }
 0x2ed   :  { %8426 = vmatpush3.bf16.msra.mxu0 %v8871_v31  ;;  %v2095_v31 = vld [vmem:[#allocation2 + $0x1ba] sm:$0xff] }
 0x2ee   :  { %8427 = vmatprep.subr.bf16.mxu0 %v8873_v47 }
 0x2ef   :  { %8346 = vmatpush3.bf16.msra.mxu1 %v8864_v41  ;;  %8284 = vmatmul.mubr.bf16.gmra.mxu0 %v10868_v9  ;;  %v2079_v9 = vld [vmem:[#allocation2 + $0xca] sm:$0xff]  ;;  %v2094_v41 = vld [vmem:[#allocation2 + $0x1b2] sm:$0xff] }
 0x2f0   :  { %8347 = vmatprep.subr.bf16.mxu1 %v8865_v61  ;;  %8287 = vmatprep.mubr.bf16.mxu0 %v10888_v49  ;;  %v8875_v49 = vld [vmem:[%s14794_s2 + $0x148] sm:$0xff]   ;;  %v11087_v5 = vpack.c.bf16 %v2079_v9, %v2078_v37 }
 0x2f1   :  { %8428 = vmatpush3.bf16.msra.mxu0 %v8873_v47  ;;  %v2097_v47 = vld [vmem:[#allocation2 + $0x1d2] sm:$0xff] }
 0x2f2   :  { %8204 = vmatmul.mubr.bf16.gmra.mxu1 %v11062_v28  ;;  %8429 = vmatprep.subr.bf16.mxu0 %v8874_v2 }
 0x2f3   :  { %8207 = vmatprep.mubr.bf16.mxu1 %v11067_v16  ;;  %8348 = vmatpush3.bf16.msra.mxu1 %v8865_v61  ;;  %v2142_v61 = vpack.c.bf16 %v2095_v31, %v2094_v41  ;;  %v2104_v31 = vld [vmem:[#allocation2 + $0x22a] sm:$0xff] }
 0x2f4   :  { %8349 = vmatprep.subr.bf16.mxu1 %v8866_v27 }
 0x2f5   :  { %8430 = vmatpush3.bf16.msra.mxu0 %v8874_v2 }
 0x2f6   :  { %8431 = vmatprep.subr.bf16.mxu0 %v8875_v49 }
 0x2f7   :  { %8350 = vmatpush3.bf16.msra.mxu1 %v8866_v27  ;;  %8288 = vmatmul.mubr.bf16.gmra.mxu0 %v10894_v44  ;;  %v2082_v44 = vld [vmem:[#allocation2 + $0xf2] sm:$0xff]  ;;  %v2098_v27 = vld [vmem:[#allocation2 + $0x1e2] sm:$0xff] }
 0x2f8   :  { %8351 = vmatprep.subr.bf16.mxu1 %v8867_v6  ;;  %8291 = vmatprep.mubr.bf16.mxu0 %v10916_v62  ;;  %v11106_v11 = vpack.c.bf16 %v2083_v8, %v2082_v44  ;;  %v2084_v62 = vld [vmem:[#allocation2 + $0x10a] sm:$0xff]  ;;  %v2102_v44 = vld [vmem:[#allocation2 + $0x212] sm:$0xff]  ;;  %v2103_v8 = vld [vmem:[#allocation2 + $0x21a] sm:$0xff] }
 0x2f9   :  { %8432 = vmatpush3.bf16.msra.mxu0 %v8875_v49  ;;  %v11113_v24 = vpack.c.bf16 %v2085_v26, %v2084_v62 }
 0x2fa   :  { %8208 = vmatmul.mubr.bf16.gmra.mxu1 %v11082_v7  ;;  %8433 = vmatprep.subr.bf16.mxu0 %v8876_v42 }
 0x2fb   :  { %8211 = vmatprep.mubr.bf16.mxu1 %v11087_v5  ;;  %8352 = vmatpush3.bf16.msra.mxu1 %v8867_v6 }
 0x2fc   :  { %8353 = vmatprep.subr.bf16.mxu1 %v8872_v53 }
 0x2fd   :  { %8434 = vmatpush3.bf16.msra.mxu0 %v8876_v42  ;;  %v2101_v42 = vld [vmem:[#allocation2 + $0x202] sm:$0xff] }
 0x2ff   :  { %8354 = vmatpush3.bf16.msra.mxu1 %v8872_v53  ;;  %8292 = vmatmul.mubr.bf16.gmra.mxu0 %v10922_v4  ;;  %v2088_v4 = vld [vmem:[#allocation2 + $0x13a] sm:$0xff] }
 0x300   :  { %8499 = vmatprep.subr.bf16.mxu1 %v11102_v40  ;;  %8295 = vmatprep.mubr.bf16.mxu0 %v10931_v10  ;;  %v2091_v10 = vld [vmem:[#allocation2 + $0x15a] sm:$0xff]  ;;  %v11121_v36 = vpack.c.bf16 %v2089_v43, %v2088_v4  ;;  %v2146_v4 = vpack.c.bf16 %v2103_v8, %v2102_v44  ;;  %v2110_v8 = vld [vmem:[#allocation2 + $0x272] sm:$0xff] }
 0x301   :  { %v11123_v21 = vpack.c.bf16 %v2091_v10, %v2090_v20  ;;  %v2100_v53 = vld [vmem:[#allocation2 + $0x1fa] sm:$0xff] }
 0x302   :  { %8212 = vmatmul.mubr.bf16.gmra.mxu1 %v11104_v57 }
 0x303   :  { %8215 = vmatprep.mubr.bf16.mxu1 %v11106_v11 }
 0x307   :  { %8296 = vmatmul.mubr.bf16.gmra.mxu0 %v10937_v23  ;;  %v2092_v23 = vld [vmem:[#allocation2 + $0x16a] sm:$0xff] }
 0x308   :  { %8299 = vmatprep.mubr.bf16.mxu0 %v10945_v60  ;;  %v2093_v60 = vld [vmem:[#allocation2 + $0x172] sm:$0xff] }
 0x309   :  { %v11129_v22 = vpack.c.bf16 %v2093_v60, %v2092_v23  ;;  %v2105_v60 = vld [vmem:[#allocation2 + $0x232] sm:$0xff] }
 0x30a   :  { %8216 = vmatmul.mubr.bf16.gmra.mxu1 %v11113_v24 }
 0x30b   :  { %8219 = vmatprep.mubr.bf16.mxu1 %v11115_v13 }
 0x30f   :  { %8300 = vmatmul.mubr.bf16.gmra.mxu0 %v10951_v55  ;;  %v2096_v55 = vld [vmem:[#allocation2 + $0x1ca] sm:$0xff] }
 0x310   :  { %8303 = vmatprep.mubr.bf16.mxu0 %v10955_v45  ;;  %v2099_v45 = vld [vmem:[#allocation2 + $0x1ea] sm:$0xff]  ;;  %v11133_v2 = vpack.c.bf16 %v2097_v47, %v2096_v55 }
 0x311   :  { %v2144_v29 = vpack.c.bf16 %v2099_v45, %v2098_v27 }
 0x312   :  { %8220 = vmatmul.mubr.bf16.gmra.mxu1 %v11121_v36 }
 0x313   :  { %8223 = vmatprep.mubr.bf16.mxu1 %v11123_v21 }
 0x317   :  { %8304 = vmatmul.mubr.bf16.gmra.mxu0 %v2655_v52  ;;  %v2107_v52 = vld [vmem:[#allocation2 + $0x24a] sm:$0xff] }
 0x318   :  { %8307 = vmatprep.mubr.bf16.mxu0 %v10959_v15 }
 0x31a   :  { %8224 = vmatmul.mubr.bf16.gmra.mxu1 %v11129_v22  ;;  %v8117_v6 = vpop.f32.mrf.mxu0 }
 0x31b   :  { %8227 = vmatprep.mubr.bf16.mxu1 %v2142_v61  ;;  %v2106_v61 = vld [vmem:[#allocation2 + $0x242] sm:$0xff] }
 0x31c   :  { %v1807_v9 = vpop.f32.mrf.mxu0 }
 0x31e   :  { %v8118_v59 = vpop.f32.mrf.mxu0 }
 0x31f   :  { %8308 = vmatmul.mubr.bf16.gmra.mxu0 %v10961_v17  ;;  %v2145_v17 = vpack.c.bf16 %v2101_v42, %v2100_v53  ;;  %v2108_v42 = vld [vmem:[#allocation2 + $0x25a] sm:$0xff] }
 0x320   :  { %8311 = vmatprep.mubr.bf16.mxu0 %v10967_v18  ;;  %v1810_v30 = vpop.f32.mrf.mxu0 }
 0x322   :  { %v8037_v46 = vpop.f32.mrf.mxu1  ;;  %8228 = vmatmul.mubr.bf16.gmra.mxu1 %v11133_v2 }
 0x323   :  { %v11137_v37 = vadd.f32 %v8117_v6, %v8037_v46  ;;  %8231 = vmatprep.mubr.bf16.mxu1 %v2144_v29  ;;  %v2148_v29 = vpack.c.bf16 %v2107_v52, %v2106_v61  ;;  %v2113_v61 = vld [vmem:[#allocation2 + $0x292] sm:$0xff] }
 0x324   :  { %v1470_v15 = vpop.f32.mrf.mxu1 }
 0x325   :  { %v11140_v49 = vadd.f32 %v1807_v9, %v1470_v15  ;;  %v8121_v18 = vpop.f32.mrf.mxu0 }
 0x326   :  { %v8038_v56 = vpop.f32.mrf.mxu1 }
 0x327   :  { %v11142_v62 = vadd.f32 %v8118_v59, %v8038_v56  ;;  %8312 = vmatmul.mubr.bf16.gmra.mxu0 %v10969_v14  ;;  %v1823_v23 = vpop.f32.mrf.mxu0  ;;  %v2147_v14 = vpack.c.bf16 %v2105_v60, %v2104_v31  ;;  %v2109_v56 = vld [vmem:[#allocation2 + $0x262] sm:$0xff] }
 0x328   :  { %v1473_v26 = vpop.f32.mrf.mxu1  ;;  %8315 = vmatprep.mubr.bf16.mxu0 %v10975_v50 }
 0x329   :  { %v11144_v12 = vadd.f32 %v1810_v30, %v1473_v26  ;;  %v8122_v63 = vpop.f32.mrf.mxu0  ;;  %v2111_v26 = vld [vmem:[#allocation2 + $0x27a] sm:$0xff] }
 0x32a   :  { %v8041_v43 = vpop.f32.mrf.mxu1  ;;  %8232 = vmatmul.mubr.bf16.gmra.mxu1 %v2145_v17 }
 0x32b   :  { %v11147_v20 = vadd.f32 %v8121_v18, %v8041_v43  ;;  %8235 = vmatprep.mubr.bf16.mxu1 %v2146_v4  ;;  %v1826_v27 = vpop.f32.mrf.mxu0  ;;  %v2150_v18 = vpack.c.bf16 %v2111_v26, %v2110_v8  ;;  %v2116_v26 = vld [vmem:[#allocation2 + $0x2ba] sm:$0xff] }
 0x32c   :  { %v1486_v10 = vpop.f32.mrf.mxu1 }
 0x32d   :  { %v11150_v41 = vadd.f32 %v1823_v23, %v1486_v10 }
 0x32e   :  { %v8042_v3 = vpop.f32.mrf.mxu1 }
 0x32f   :  { %v11152_v55 = vadd.f32 %v8122_v63, %v8042_v3  ;;  %v8125_v50 = vpop.f32.mrf.mxu0  ;;  %8316 = vmatmul.mubr.bf16.gmra.mxu0 %v10977_v51  ;;  %v2149_v51 = vpack.c.bf16 %v2109_v56, %v2108_v42  ;;  %v2112_v63 = vld [vmem:[#allocation2 + $0x28a] sm:$0xff] }
 0x330   :  { %v1489_v47 = vpop.f32.mrf.mxu1  ;;  %8319 = vmatprep.mubr.bf16.mxu0 %v10983_v35 }
 0x331   :  { %v11154_v45 = vadd.f32 %v1826_v27, %v1489_v47  ;;  %v1839_v9 = vpop.f32.mrf.mxu0  ;;  %v2114_v27 = vld [vmem:[#allocation2 + $0x2a2] sm:$0xff] }
 0x332   :  { %v8045_v46 = vpop.f32.mrf.mxu1  ;;  %8236 = vmatmul.mubr.bf16.gmra.mxu1 %v2147_v14  ;;  %v2115_v14 = vld [vmem:[#allocation2 + $0x2aa] sm:$0xff] }
 0x333   :  { %v11157_v6 = vadd.f32 %v8125_v50, %v8045_v46  ;;  %8239 = vmatprep.mubr.bf16.mxu1 %v2148_v29  ;;  %v8126_v44 = vpop.f32.mrf.mxu0 }
 0x334   :  { %v1502_v15 = vpop.f32.mrf.mxu1 }
 0x335   :  { %v11160_v53 = vadd.f32 %v1839_v9, %v1502_v15  ;;  %v1842_v4 = vpop.f32.mrf.mxu0  ;;  %v2152_v9 = vpack.c.bf16 %v2115_v14, %v2114_v27 }
 0x336   :  { %v8046_v59 = vpop.f32.mrf.mxu1 }
 0x337   :  { %v11162_v30 = vadd.f32 %v8126_v44, %v8046_v59  ;;  %v8129_v35 = vpop.f32.mrf.mxu0  ;;  %8320 = vmatmul.mubr.bf16.gmra.mxu0 %v10985_v34  ;;  %v2151_v34 = vpack.c.bf16 %v2113_v61, %v2112_v63 }
 0x338   :  { %v1505_v17 = vpop.f32.mrf.mxu1  ;;  %8323 = vmatprep.mubr.bf16.mxu0 %v10991_v48 }
 0x339   :  { %v11164_v43 = vadd.f32 %v1842_v4, %v1505_v17  ;;  %v1855_v60 = vpop.f32.mrf.mxu0  ;;  %v2117_v17 = vld [vmem:[#allocation2 + $0x2c2] sm:$0xff]  ;;  %v11185_v4 = vld [vmem:[%s14794_s2 + $0x1f8] sm:$0xff]  }
 0x33a   :  { %v8049_v10 = vpop.f32.mrf.mxu1  ;;  %8240 = vmatmul.mubr.bf16.gmra.mxu1 %v2149_v51  ;;  %8579 = vmatprep.subr.bf16.mxu0 %v11185_v4 }
 0x33b   :  { %v11167_v23 = vadd.f32 %v8129_v35, %v8049_v10  ;;  %8243 = vmatprep.mubr.bf16.mxu1 %v2150_v18  ;;  %v8130_v47 = vpop.f32.mrf.mxu0  ;;  %v2118_v10 = vld [vmem:[#allocation2 + $0x2d2] sm:$0xff] }
 0x33c   :  { %v1518_v31 = vpop.f32.mrf.mxu1 }
 0x33d   :  { %v11170_v3 = vadd.f32 %v1855_v60, %v1518_v31  ;;  %v1858_v50 = vpop.f32.mrf.mxu0  ;;  %v2153_v60 = vpack.c.bf16 %v2117_v17, %v2116_v26 }
 0x33e   :  { %v8050_v52 = vpop.f32.mrf.mxu1 }
 0x33f   :  { %v11172_v29 = vadd.f32 %v8130_v47, %v8050_v52  ;;  %v8133_v48 = vpop.f32.mrf.mxu0  ;;  %8324 = vmatmul.mubr.bf16.gmra.mxu0 %v10993_v58  ;;  %v2119_v58 = vld [vmem:[#allocation2 + $0x2da] sm:$0xff] }
 0x340   :  { %v1521_v46 = vpop.f32.mrf.mxu1  ;;  %8327 = vmatprep.mubr.bf16.mxu0 %v11002_v38  ;;  %v2154_v61 = vpack.c.bf16 %v2119_v58, %v2118_v10 }
 0x341   :  { %v11174_v15 = vadd.f32 %v1858_v50, %v1521_v46  ;;  %v1871_v44 = vpop.f32.mrf.mxu0 }
 0x342   :  { %v8053_v42 = vpop.f32.mrf.mxu1  ;;  %8244 = vmatmul.mubr.bf16.gmra.mxu1 %v2151_v34  ;;  %v2120_v34 = vld [vmem:[#allocation2 + $0x2ea] sm:$0xff] }
 0x343   :  { %v11177_v56 = vadd.f32 %v8133_v48, %v8053_v42  ;;  %8247 = vmatprep.mubr.bf16.mxu1 %v2152_v9  ;;  %v8134_v18 = vpop.f32.mrf.mxu0  ;;  %v2121_v9 = vld [vmem:[#allocation2 + $0x2f2] sm:$0xff] }
 0x344   :  { %v1534_v59 = vpop.f32.mrf.mxu1 }
 0x345   :  { %v11180_v8 = vadd.f32 %v1871_v44, %v1534_v59  ;;  %v1874_v31 = vpop.f32.mrf.mxu0  ;;  %v2122_v59 = vld [vmem:[#allocation2 + $0x302] sm:$0xff]  ;;  %v2123_v44 = vld [vmem:[#allocation2 + $0x30a] sm:$0xff] }
 0x346   :  { %v8054_v51 = vpop.f32.mrf.mxu1  ;;  %v2156_v10 = vpack.c.bf16 %v2123_v44, %v2122_v59 }
 0x347   :  { %v11187_v35 = vadd.f32 %v8134_v18, %v8054_v51  ;;  %v8137_v47 = vpop.f32.mrf.mxu0  ;;  %8328 = vmatmul.mubr.bf16.gmra.mxu0 %v11004_v33  ;;  %v2155_v33 = vpack.c.bf16 %v2121_v9, %v2120_v34 }
 0x348   :  { %v1537_v38 = vpop.f32.mrf.mxu1  ;;  %8331 = vmatprep.mubr.bf16.mxu0 %v11010_v39 }
 0x349   :  { %v11190_v63 = vadd.f32 %v1874_v31, %v1537_v38  ;;  %v1887_v46 = vpop.f32.mrf.mxu0 }
 0x34a   :  { %v8057_v52 = vpop.f32.mrf.mxu1  ;;  %8248 = vmatmul.mubr.bf16.gmra.mxu1 %v2153_v60 }
 0x34b   :  { %v11193_v27 = vadd.f32 %v8137_v47, %v8057_v52  ;;  %8251 = vmatprep.mubr.bf16.mxu1 %v2154_v61  ;;  %v8138_v48 = vpop.f32.mrf.mxu0  ;;  %v2125_v61 = vld [vmem:[#allocation2 + $0x322] sm:$0xff]  ;;  %v2124_v47 = vld [vmem:[#allocation2 + $0x31a] sm:$0xff] }
 0x34c   :  { %v1550_v14 = vpop.f32.mrf.mxu1 }
 0x34d   :  { %v11196_v50 = vadd.f32 %v1887_v46, %v1550_v14  ;;  %v1890_v51 = vpop.f32.mrf.mxu0  ;;  %v2638_v14 = vld [vmem:[#allocation2 + $0x330] sm:$0xff]  ;;  %v2639_v46 = vld [vmem:[#allocation2 + $0x338] sm:$0xff] }
 0x34e   :  { %v8058_v42 = vpop.f32.mrf.mxu1 }
 0x34f   :  { %v11198_v26 = vadd.f32 %v8138_v48, %v8058_v42  ;;  %v8141_v39 = vpop.f32.mrf.mxu0  ;;  %8332 = vmatmul.mubr.bf16.gmra.mxu0 %v11012_v32  ;;  %v3090_v42 = vld [vmem:[#allocation2 + $0x19] sm:$0xff]  ;;  %v3091_v48 = vld [vmem:[#allocation2 + $0x21] sm:$0xff] }
 0x350   :  { %v1553_v17 = vpop.f32.mrf.mxu1  ;;  %8335 = vmatprep.mubr.bf16.mxu0 %v11020_v1  ;;  %v3154_v1 = vpack.c.bf16 %v3091_v48, %v3090_v42 }
 0x351   :  { %v11200_v18 = vadd.f32 %v1890_v51, %v1553_v17  ;;  %v1903_v60 = vpop.f32.mrf.mxu0  ;;  %v2157_v17 = vpack.c.bf16 %v2125_v61, %v2124_v47  ;;  %v2671_v51 = vpack.c.bf16 %v2639_v46, %v2638_v14  ;;  %v3094_v14 = vld [vmem:[#allocation2 + $0x49] sm:$0xff]  ;;  %v3095_v46 = vld [vmem:[#allocation2 + $0x51] sm:$0xff] }
 0x352   :  { %v8061_v58 = vpop.f32.mrf.mxu1  ;;  %8252 = vmatmul.mubr.bf16.gmra.mxu1 %v2155_v33 }
 0x353   :  { %v11203_v38 = vadd.f32 %v8141_v39, %v8061_v58  ;;  %8255 = vmatprep.mubr.bf16.mxu1 %v2156_v10  ;;  %v8142_v9 = vpop.f32.mrf.mxu0 }
 0x354   :  { %v1566_v31 = vpop.f32.mrf.mxu1 }
 0x355   :  { %v11206_v52 = vadd.f32 %v1903_v60, %v1566_v31  ;;  %v1906_v44 = vpop.f32.mrf.mxu0 }
 0x356   :  { %v8062_v34 = vpop.f32.mrf.mxu1 }
 0x357   :  { %v11208_v59 = vadd.f32 %v8142_v9, %v8062_v34  ;;  %v8145_v58 = vpop.f32.mrf.mxu0  ;;  %8336 = vmatmul.mubr.bf16.gmra.mxu0 %v2671_v51  ;;  %v3092_v9 = vld [vmem:[#allocation2 + $0x31] sm:$0xff]  ;;  %v3156_v51 = vpack.c.bf16 %v3095_v46, %v3094_v14 }
 0x358   :  { %v1569_v32 = vpop.f32.mrf.mxu1  ;;  %8435 = vmatprep.mubr.bf16.mxu0 %v11024_v54 }
 0x359   :  { %15180 = vst [vmem:[#allocation9_spill] sm:$0xff] %v11208_v59  ;;  %v11210_v33 = vadd.f32 %v1906_v44, %v1569_v32  ;;  %v1919_v60 = vpop.f32.mrf.mxu0  ;;  %v3093_v59 = vld [vmem:[#allocation2 + $0x39] sm:$0xff] }
 0x35a   :  { %v8065_v10 = vpop.f32.mrf.mxu1  ;;  %8256 = vmatmul.mubr.bf16.gmra.mxu1 %v2157_v17  ;;  %v3155_v44 = vpack.c.bf16 %v3093_v59, %v3092_v9  ;;  %v8878_v17 = vld [vmem:[%s14794_s2 + $0x1b0] sm:$0xff]   ;;  %v8879_v9 = vld [vmem:[%s14794_s2 + $0x1a8] sm:$0xff]  }
 0x35b   :  { %v11212_v39 = vadd.f32 %v8145_v58, %v8065_v10  ;;  %8355 = vmatprep.mubr.bf16.mxu1 %v3154_v1  ;;  %v8146_v47 = vpop.f32.mrf.mxu0  ;;  %v8885_v58 = vld [vmem:[%s14794_s2 + $0x1f0] sm:$0xff]  }
 0x35c   :  { %v1582_v31 = vpop.f32.mrf.mxu1 }
 0x35d   :  { %v11215_v34 = vadd.f32 %v1919_v60, %v1582_v31  ;;  %v1922_v32 = vpop.f32.mrf.mxu0 }
 0x35e   :  { %v8066_v61 = vpop.f32.mrf.mxu1 }
 0x35f   :  { %v11217_v42 = vadd.f32 %v8146_v47, %v8066_v61  ;;  %v8149_v10 = vpop.f32.mrf.mxu0  ;;  %8436 = vmatmul.mubr.bf16.vlgmr.msra.gmra.mxu0 %v11029_v25  ;;  %v3096_v25 = vld [vmem:[#allocation2 + $0x61] sm:$0xff]  ;;  %v3097_v47 = vld [vmem:[#allocation2 + $0x69] sm:$0xff] }
 0x360   :  { %v1585_v48 = vpop.f32.mrf.mxu1  ;;  %8439 = vmatprep.mubr.bf16.mxu0 %v11042_v0  ;;  %8580 = vmatpush3.bf16.msra.mxu0 %v11185_v4  ;;  %v8880_v4 = vld [vmem:[%s14794_s2 + $0x1a0] sm:$0xff]  }
 0x361   :  { %v11222_v54 = vadd.f32 %v1922_v32, %v1585_v48  ;;  %v1935_v60 = vpop.f32.mrf.mxu0  ;;  %v3098_v48 = vld [vmem:[#allocation2 + $0x79] sm:$0xff]  ;;  %8581 = vmatprep.subr.bf16.mxu0 %v8885_v58 }
 0x362   :  { %v8069_v1 = vpop.f32.mrf.mxu1  ;;  %8356 = vmatmul.mubr.bf16.vlgmr.msra.gmra.mxu1 %v3155_v44 }
 0x363   :  { %v11228_v31 = vadd.f32 %v8149_v10, %v8069_v1  ;;  %8500 = vmatpush3.bf16.msra.mxu1 %v11102_v40  ;;  %8359 = vmatprep.mubr.bf16.mxu1 %v3156_v51  ;;  %v8150_v46 = vpop.f32.mrf.mxu0  ;;  %v3099_v40 = vld [vmem:[#allocation2 + $0x81] sm:$0xff]  ;;  %v3157_v51 = vpack.c.bf16 %v3097_v47, %v3096_v25 }
 0x364   :  { %v1598_v59 = vpop.f32.mrf.mxu1  ;;  %8501 = vmatprep.subr.bf16.mxu1 %v8878_v17  ;;  %v8886_v1 = vld [vmem:[%s14794_s2 + $0x1e8] sm:$0xff]   ;;  %8582 = vmatpush3.bf16.msra.mxu0 %v8885_v58  ;;  %v3100_v58 = vld [vmem:[#allocation2 + $0x91] sm:$0xff] }
 0x365   :  { %v11235_v61 = vadd.f32 %v1935_v60, %v1598_v59  ;;  %v1938_v44 = vpop.f32.mrf.mxu0  ;;  %v3158_v59 = vpack.c.bf16 %v3099_v40, %v3098_v48  ;;  %8583 = vmatprep.subr.bf16.mxu0 %v8886_v1  ;;  %v3101_v40 = vld [vmem:[#allocation2 + $0x99] sm:$0xff] }
 0x366   :  { %v8070_v14 = vpop.f32.mrf.mxu1 }
 0x367   :  { %v11238_v32 = vadd.f32 %v8150_v46, %v8070_v14  ;;  %8502 = vmatpush3.bf16.msra.mxu1 %v8878_v17  ;;  %v8153_v14 = vpop.f32.mrf.mxu0  ;;  %8440 = vmatmul.mubr.bf16.gmra.mxu0 %v11047_v19  ;;  %v8887_v17 = vld [vmem:[%s14794_s2 + $0x1e0] sm:$0xff]   ;;  %v8881_v19 = vld [vmem:[%s14794_s2 + $0x198] sm:$0xff]  }
 0x368   :  { %v1601_v0 = vpop.f32.mrf.mxu1  ;;  %8503 = vmatprep.subr.bf16.mxu1 %v8879_v9  ;;  %8443 = vmatprep.mubr.bf16.mxu0 %v11062_v28 }
 0x369   :  { %v11243_v10 = vadd.f32 %v1938_v44, %v1601_v0  ;;  %v1951_v46 = vpop.f32.mrf.mxu0  ;;  %8584 = vmatpush3.bf16.msra.mxu0 %v8886_v1  ;;  %v8882_v1 = vld [vmem:[%s14794_s2 + $0x190] sm:$0xff]  }
 0x36a   :  { %v8073_v60 = vpop.f32.mrf.mxu1  ;;  %8360 = vmatmul.mubr.bf16.gmra.mxu1 %v3157_v51  ;;  %v3102_v51 = vld [vmem:[#allocation2 + $0xa9] sm:$0xff]  ;;  %8585 = vmatprep.subr.bf16.mxu0 %v8887_v17 }
 0x36b   :  { %v11252_v25 = vadd.f32 %v8153_v14, %v8073_v60  ;;  %8363 = vmatprep.mubr.bf16.mxu1 %v3158_v59  ;;  %8504 = vmatpush3.bf16.msra.mxu1 %v8879_v9  ;;  %v8154_v44 = vpop.f32.mrf.mxu0  ;;  %v3103_v59 = vld [vmem:[#allocation2 + $0xb1] sm:$0xff]  ;;  %v3159_v14 = vpack.c.bf16 %v3101_v40, %v3100_v58 }
 0x36c   :  { %v1614_v47 = vpop.f32.mrf.mxu1  ;;  %8505 = vmatprep.subr.bf16.mxu1 %v8880_v4 }
 0x36d   :  { %15181 = vst [vmem:[#allocation27_spill] sm:$0xff] %v11252_v25  ;;  %v11255_v48 = vadd.f32 %v1951_v46, %v1614_v47  ;;  %v1954_v9 = vpop.f32.mrf.mxu0  ;;  %v8889_v47 = vld [vmem:[%s14794_s2 + $0x1d8] sm:$0xff]   ;;  %8586 = vmatpush3.bf16.msra.mxu0 %v8887_v17  ;;  %v3104_v17 = vld [vmem:[#allocation2 + $0xc1] sm:$0xff] }
 0x36e   :  { %v8074_v0 = vpop.f32.mrf.mxu1  ;;  %8587 = vmatprep.subr.bf16.mxu0 %v8889_v47 }
 0x36f   :  { %15182 = vst [vmem:[#allocation28_spill] sm:$0xff] %v11255_v48  ;;  %v11260_v28 = vadd.f32 %v8154_v44, %v8074_v0  ;;  %8506 = vmatpush3.bf16.msra.mxu1 %v8880_v4  ;;  %v3160_v48 = vpack.c.bf16 %v3103_v59, %v3102_v51  ;;  %v8157_v0 = vpop.f32.mrf.mxu0  ;;  %8444 = vmatmul.mubr.bf16.gmra.mxu0 %v11067_v16  ;;  %v8890_v4 = vld [vmem:[%s14794_s2 + $0x1d0] sm:$0xff]   ;;  %v8883_v16 = vld [vmem:[%s14794_s2 + $0x188] sm:$0xff]  }
 0x370   :  { %v1617_v60 = vpop.f32.mrf.mxu1  ;;  %8507 = vmatprep.subr.bf16.mxu1 %v8881_v19  ;;  %8447 = vmatprep.mubr.bf16.mxu0 %v11082_v7  ;;  %v3105_v59 = vld [vmem:[#allocation2 + $0xc9] sm:$0xff] }
 0x371   :  { %v11265_v46 = vadd.f32 %v1954_v9, %v1617_v60  ;;  %v1967_v44 = vpop.f32.mrf.mxu0  ;;  %8588 = vmatpush3.bf16.msra.mxu0 %v8889_v47  ;;  %v3106_v9 = vld [vmem:[#allocation2 + $0xd9] sm:$0xff] }
 0x372   :  { %v8077_v25 = vpop.f32.mrf.mxu1  ;;  %8364 = vmatmul.mubr.bf16.gmra.mxu1 %v3159_v14  ;;  %8589 = vmatprep.subr.bf16.mxu0 %v8890_v4  ;;  %v8888_v47 = vld [vmem:[%s14794_s2 + $0x180] sm:$0xff]  }
 0x373   :  { %v11274_v58 = vadd.f32 %v8157_v0, %v8077_v25  ;;  %8367 = vmatprep.mubr.bf16.mxu1 %v3160_v48  ;;  %8508 = vmatpush3.bf16.msra.mxu1 %v8881_v19  ;;  %v8158_v25 = vpop.f32.mrf.mxu0  ;;  %v3107_v48 = vld [vmem:[#allocation2 + $0xe1] sm:$0xff]  ;;  %v3161_v0 = vpack.c.bf16 %v3105_v59, %v3104_v17 }
 0x374   :  { %v1630_v40 = vpop.f32.mrf.mxu1  ;;  %8509 = vmatprep.subr.bf16.mxu1 %v8882_v1 }
 0x375   :  { %15183 = vst [vmem:[#allocation29_spill] sm:$0xff] %v11274_v58  ;;  %v11277_v51 = vadd.f32 %v1967_v44, %v1630_v40  ;;  %v1970_v19 = vpop.f32.mrf.mxu0  ;;  %v8891_v40 = vld [vmem:[%s14794_s2 + $0x1c8] sm:$0xff]   ;;  %8590 = vmatpush3.bf16.msra.mxu0 %v8890_v4  ;;  %v3108_v4 = vld [vmem:[#allocation2 + $0xf1] sm:$0xff] }
 0x376   :  { %v8078_v60 = vpop.f32.mrf.mxu1  ;;  %8591 = vmatprep.subr.bf16.mxu0 %v8891_v40 }
 0x377   :  { %15184 = vst [vmem:[#allocation30_spill] sm:$0xff] %v11277_v51  ;;  %v11282_v7 = vadd.f32 %v8158_v25, %v8078_v60  ;;  %8510 = vmatpush3.bf16.msra.mxu1 %v8882_v1  ;;  %v3162_v51 = vpack.c.bf16 %v3107_v48, %v3106_v9  ;;  %v8161_v60 = vpop.f32.mrf.mxu0  ;;  %8448 = vmatmul.mubr.bf16.gmra.mxu0 %v11087_v5  ;;  %v8892_v1 = vld [vmem:[%s14794_s2 + $0x1c0] sm:$0xff]   ;;  %v11304_v5 = vld [vmem:[%s14794_s2 + $0x238] sm:$0xff]  }
 0x378   :  { %v1633_v14 = vpop.f32.mrf.mxu1  ;;  %8511 = vmatprep.subr.bf16.mxu1 %v8883_v16  ;;  %8451 = vmatprep.mubr.bf16.mxu0 %v11104_v57  ;;  %v3109_v48 = vld [vmem:[#allocation2 + $0xf9] sm:$0xff] }
 0x379   :  { %v11287_v44 = vadd.f32 %v1970_v19, %v1633_v14  ;;  %v1983_v25 = vpop.f32.mrf.mxu0  ;;  %8592 = vmatpush3.bf16.msra.mxu0 %v8891_v40  ;;  %v3111_v19 = vld [vmem:[#allocation2 + $0x111] sm:$0xff] }
 0x37a   :  { %v8081_v58 = vpop.f32.mrf.mxu1  ;;  %8368 = vmatmul.mubr.bf16.gmra.mxu1 %v3161_v0  ;;  %8593 = vmatprep.subr.bf16.mxu0 %v8892_v1 }
 0x37b   :  { %v11296_v17 = vadd.f32 %v8161_v60, %v8081_v58  ;;  %8371 = vmatprep.mubr.bf16.mxu1 %v3162_v51  ;;  %8512 = vmatpush3.bf16.msra.mxu1 %v8883_v16  ;;  %v8162_v14 = vpop.f32.mrf.mxu0  ;;  %v3110_v51 = vld [vmem:[#allocation2 + $0x109] sm:$0xff]  ;;  %v3163_v60 = vpack.c.bf16 %v3109_v48, %v3108_v4 }
 0x37c   :  { %v1646_v59 = vpop.f32.mrf.mxu1  ;;  %8513 = vmatprep.subr.bf16.mxu1 %v8888_v47  ;;  %v3113_v48 = vld [vmem:[#allocation2 + $0x129] sm:$0xff] }
 0x37d   :  { %15185 = vst [vmem:[#allocation31_spill] sm:$0xff] %v11296_v17  ;;  %v11299_v9 = vadd.f32 %v1983_v25, %v1646_v59  ;;  %v1986_v0 = vpop.f32.mrf.mxu0  ;;  %v3164_v25 = vpack.c.bf16 %v3111_v19, %v3110_v51  ;;  %8594 = vmatpush3.bf16.msra.mxu0 %v8892_v1  ;;  %v3114_v19 = vld [vmem:[#allocation2 + $0x139] sm:$0xff] }
 0x37e   :  { %v8082_v58 = vpop.f32.mrf.mxu1 }
 0x37f   :  { %15186 = vst [vmem:[#allocation19_spill] sm:$0xff] %v11299_v9  ;;  %v11306_v57 = vadd.f32 %v8162_v14, %v8082_v58  ;;  %8514 = vmatpush3.bf16.msra.mxu1 %v8888_v47  ;;  %v8165_v9 = vpop.f32.mrf.mxu0  ;;  %8452 = vmatmul.mubr.bf16.gmra.mxu0 %v11106_v11  ;;  %v3112_v47 = vld [vmem:[#allocation2 + $0x121] sm:$0xff] }
 0x380   :  { %v1649_v16 = vpop.f32.mrf.mxu1  ;;  %8659 = vmatprep.subr.bf16.mxu1 %v11304_v5  ;;  %8455 = vmatprep.mubr.bf16.mxu0 %v11113_v24  ;;  %v3165_v11 = vpack.c.bf16 %v3113_v48, %v3112_v47  ;;  %v3118_v48 = vld [vmem:[#allocation2 + $0x169] sm:$0xff] }
 0x381   :  { %v11308_v59 = vadd.f32 %v1986_v0, %v1649_v16  ;;  %v1999_v14 = vpop.f32.mrf.mxu0  ;;  %v3115_v16 = vld [vmem:[#allocation2 + $0x141] sm:$0xff] }
 0x382   :  { %v8085_v40 = vpop.f32.mrf.mxu1  ;;  %8372 = vmatmul.mubr.bf16.gmra.mxu1 %v3163_v60 }
 0x383   :  { %15187 = vst [vmem:[#allocation20_spill] sm:$0xff] %v11308_v59  ;;  %v11312_v17 = vadd.f32 %v8165_v9, %v8085_v40  ;;  %8375 = vmatprep.mubr.bf16.mxu1 %v3164_v25  ;;  %v8166_v1 = vpop.f32.mrf.mxu0  ;;  %v3166_v25 = vpack.c.bf16 %v3115_v16, %v3114_v19  ;;  %v3119_v19 = vld [vmem:[#allocation2 + $0x171] sm:$0xff] }
 0x384   :  { %v1662_v58 = vpop.f32.mrf.mxu1 }
 0x385   :  { %15188 = vst [vmem:[#allocation21_spill] sm:$0xff] %v11312_v17  ;;  %v11315_v4 = vadd.f32 %v1999_v14, %v1662_v58  ;;  %v2002_v59 = vpop.f32.mrf.mxu0 }
 0x386   :  { %v8086_v51 = vpop.f32.mrf.mxu1 }
 0x387   :  { %15189 = vst [vmem:[#allocation7_spill] sm:$0xff] %v11315_v4  ;;  %v11317_v0 = vadd.f32 %v8166_v1, %v8086_v51  ;;  %v8169_v24 = vpop.f32.mrf.mxu0  ;;  %8456 = vmatmul.mubr.bf16.gmra.mxu0 %v11115_v13  ;;  %v3116_v1 = vld [vmem:[#allocation2 + $0x151] sm:$0xff] }
 0x388   :  { %v1665_v60 = vpop.f32.mrf.mxu1  ;;  %8459 = vmatprep.mubr.bf16.mxu0 %v11121_v36 }
 0x389   :  { %15190 = vst [vmem:[#allocation22_spill] sm:$0xff] %v11317_v0  ;;  %v11319_v9 = vadd.f32 %v2002_v59, %v1665_v60  ;;  %v2015_v4 = vpop.f32.mrf.mxu0  ;;  %v3117_v0 = vld [vmem:[#allocation2 + $0x159] sm:$0xff] }
 0x38a   :  { %v8089_v40 = vpop.f32.mrf.mxu1  ;;  %8376 = vmatmul.mubr.bf16.gmra.mxu1 %v3165_v11  ;;  %v3167_v13 = vpack.c.bf16 %v3117_v0, %v3116_v1  ;;  %v3634_v0 = vld [vmem:[#allocation2 + $0x182] sm:$0xff]  ;;  %v3635_v1 = vld [vmem:[#allocation2 + $0x18a] sm:$0xff] }
 0x38b   :  { %15191 = vst [vmem:[#allocation6_spill] sm:$0xff] %v11319_v9  ;;  %v11322_v58 = vadd.f32 %v8169_v24, %v8089_v40  ;;  %8379 = vmatprep.mubr.bf16.mxu1 %v3166_v25  ;;  %v8170_v59 = vpop.f32.mrf.mxu0  ;;  %v3168_v25 = vpack.c.bf16 %v3119_v19, %v3118_v48  ;;  %v3122_v19 = vld [vmem:[#allocation2 + $0x1c9] sm:$0xff] }
 0x38c   :  { %v1678_v14 = vpop.f32.mrf.mxu1 }
 0x38d   :  { %15192 = vst [vmem:[#allocation8_spill] sm:$0xff] %v11322_v58  ;;  %v11325_v51 = vadd.f32 %v2015_v4, %v1678_v14  ;;  %v2018_v11 = vpop.f32.mrf.mxu0 }
 0x38e   :  { %v8090_v47 = vpop.f32.mrf.mxu1 }
 0x38f   :  { %15193 = vst [vmem:[#allocation11_spill] sm:$0xff] %v11325_v51  ;;  %v11327_v16 = vadd.f32 %v8170_v59, %v8090_v47  ;;  %v8173_v36 = vpop.f32.mrf.mxu0  ;;  %8460 = vmatmul.mubr.bf16.gmra.mxu0 %v11123_v21  ;;  %v3120_v47 = vld [vmem:[#allocation2 + $0x181] sm:$0xff] }
 0x390   :  { %v1681_v60 = vpop.f32.mrf.mxu1  ;;  %8463 = vmatprep.mubr.bf16.mxu0 %v11129_v22 }
 0x391   :  { %15194 = vst [vmem:[#allocation23_spill] sm:$0xff] %v11327_v16  ;;  %v11329_v40 = vadd.f32 %v2018_v11, %v1681_v60  ;;  %v2031_v51 = vpop.f32.mrf.mxu0  ;;  %v3121_v16 = vld [vmem:[#allocation2 + $0x189] sm:$0xff]  ;;  %v3123_v11 = vld [vmem:[#allocation2 + $0x1d1] sm:$0xff] }
 0x392   :  { %v8093_v24 = vpop.f32.mrf.mxu1  ;;  %8380 = vmatmul.mubr.bf16.gmra.mxu1 %v3167_v13  ;;  %v3170_v22 = vpack.c.bf16 %v3123_v11, %v3122_v19  ;;  %v3127_v11 = vld [vmem:[#allocation2 + $0x201] sm:$0xff] }
 0x393   :  { %15195 = vst [vmem:[#allocation10_spill] sm:$0xff] %v11329_v40  ;;  %v11332_v4 = vadd.f32 %v8173_v36, %v8093_v24  ;;  %8383 = vmatprep.mubr.bf16.mxu1 %v3168_v25  ;;  %v8174_v48 = vpop.f32.mrf.mxu0  ;;  %v3169_v36 = vpack.c.bf16 %v3121_v16, %v3120_v47  ;;  %v3683_v25 = vpack.c.bf16 %v3635_v1, %v3634_v0  ;;  %v3638_v16 = vld [vmem:[#allocation2 + $0x1e2] sm:$0xff]  ;;  %v3639_v47 = vld [vmem:[#allocation2 + $0x1ea] sm:$0xff]  ;;  %v3126_v0 = vld [vmem:[#allocation2 + $0x1f9] sm:$0xff] }
 0x394   :  { %v1694_v14 = vpop.f32.mrf.mxu1 }
 0x395   :  { %15196 = vst [vmem:[#allocation13_spill] sm:$0xff] %v11332_v4  ;;  %v11335_v59 = vadd.f32 %v2031_v51, %v1694_v14  ;;  %v2034_v24 = vpop.f32.mrf.mxu0 }
 0x396   :  { %v8094_v60 = vpop.f32.mrf.mxu1 }
 0x397   :  { %15197 = vst [vmem:[#allocation15_spill] sm:$0xff] %v11335_v59  ;;  %v11337_v13 = vadd.f32 %v8174_v48, %v8094_v60  ;;  %v8177_v58 = vpop.f32.mrf.mxu0  ;;  %8464 = vmatmul.mubr.bf16.gmra.mxu0 %v3683_v25  ;;  %v3124_v60 = vld [vmem:[#allocation2 + $0x1e1] sm:$0xff]  ;;  %v3125_v48 = vld [vmem:[#allocation2 + $0x1e9] sm:$0xff] }
 0x398   :  { %v1697_v21 = vpop.f32.mrf.mxu1  ;;  %8467 = vmatprep.mubr.bf16.mxu0 %v11133_v2  ;;  %v3171_v25 = vpack.c.bf16 %v3125_v48, %v3124_v60  ;;  %v3685_v2 = vpack.c.bf16 %v3639_v47, %v3638_v16  ;;  %v3642_v48 = vld [vmem:[#allocation2 + $0x212] sm:$0xff]  ;;  %v3643_v16 = vld [vmem:[#allocation2 + $0x21a] sm:$0xff]  ;;  %v3130_v47 = vld [vmem:[#allocation2 + $0x229] sm:$0xff] }
 0x399   :  { %15198 = vst [vmem:[#allocation12_spill] sm:$0xff] %v11337_v13  ;;  %v11339_v4 = vadd.f32 %v2034_v24, %v1697_v21  ;;  %v2047_v59 = vpop.f32.mrf.mxu0  ;;  %v3640_v21 = vld [vmem:[#allocation2 + $0x1fa] sm:$0xff]  ;;  %v3641_v24 = vld [vmem:[#allocation2 + $0x202] sm:$0xff] }
 0x39a   :  { %v8097_v40 = vpop.f32.mrf.mxu1  ;;  %8384 = vmatmul.mubr.bf16.gmra.mxu1 %v3169_v36 }
 0x39b   :  { %15199 = vst [vmem:[#allocation14_spill] sm:$0xff] %v11339_v4  ;;  %v11341_v51 = vadd.f32 %v8177_v58, %v8097_v40  ;;  %8387 = vmatprep.mubr.bf16.mxu1 %v3170_v22  ;;  %v8178_v19 = vpop.f32.mrf.mxu0  ;;  %v3686_v4 = vpack.c.bf16 %v3641_v24, %v3640_v21  ;;  %v3131_v21 = vld [vmem:[#allocation2 + $0x231] sm:$0xff] }
 0x39c   :  { %v1710_v14 = vpop.f32.mrf.mxu1  ;;  %v3644_v24 = vld [vmem:[#allocation2 + $0x22a] sm:$0xff] }
 0x39d   :  { %15200 = vst [vmem:[#allocation17_spill] sm:$0xff] %v11341_v51  ;;  %v11344_v13 = vadd.f32 %v2047_v59, %v1710_v14  ;;  %v2050_v40 = vpop.f32.mrf.mxu0  ;;  %v3172_v51 = vpack.c.bf16 %v3127_v11, %v3126_v0 }
 0x39e   :  { %v8098_v1 = vpop.f32.mrf.mxu1 }
 0x39f   :  { %15201 = vst [vmem:[#allocation18_spill] sm:$0xff] %v11344_v13  ;;  %v11346_v36 = vadd.f32 %v8178_v19, %v8098_v1  ;;  %v8277_v14 = vpop.f32.mrf.mxu0  ;;  %8468 = vmatmul.mubr.bf16.gmra.mxu0 %v3685_v2  ;;  %v3128_v1 = vld [vmem:[#allocation2 + $0x211] sm:$0xff]  ;;  %v3129_v19 = vld [vmem:[#allocation2 + $0x219] sm:$0xff]  ;;  %v3687_v2 = vpack.c.bf16 %v3643_v16, %v3642_v48  ;;  %v3646_v16 = vld [vmem:[#allocation2 + $0x242] sm:$0xff] }
 0x3a0   :  { %v1713_v58 = vpop.f32.mrf.mxu1  ;;  %8471 = vmatprep.mubr.bf16.mxu0 %v3686_v4 }
 0x3a1   :  { %15202 = vst [vmem:[#allocation16_spill] sm:$0xff] %v11346_v36  ;;  %v11348_v22 = vadd.f32 %v2050_v40, %v1713_v58  ;;  %v2771_v17 = vpop.f32.mrf.mxu0  ;;  %v3645_v58 = vld [vmem:[#allocation2 + $0x232] sm:$0xff] }
 0x3a2   :  { %v8197_v59 = vpop.f32.mrf.mxu1  ;;  %8388 = vmatmul.mubr.bf16.gmra.mxu1 %v3171_v25  ;;  %v3173_v25 = vpack.c.bf16 %v3129_v19, %v3128_v1  ;;  %v3132_v1 = vld [vmem:[#allocation2 + $0x241] sm:$0xff]  ;;  %v3133_v19 = vld [vmem:[#allocation2 + $0x249] sm:$0xff] }
 0x3a3   :  { %15203 = vst [vmem:[#allocation24_spill] sm:$0xff] %v11348_v22  ;;  %v2514_v13 = vadd.f32 %v8197_v59, %v11137_v37  ;;  %8391 = vmatprep.mubr.bf16.mxu1 %v3172_v51  ;;  %v8278_v11 = vpop.f32.mrf.mxu0  ;;  %v3688_v59 = vpack.c.bf16 %v3645_v58, %v3644_v24  ;;  %v3135_v24 = vld [vmem:[#allocation2 + $0x261] sm:$0xff] }
 0x3a4   :  { %v2257_v9 = vpop.f32.mrf.mxu1  ;;  %v3648_v58 = vld [vmem:[#allocation2 + $0x25a] sm:$0xff] }
 0x3a5   :  { %v11351_v36 = vadd.f32 %v8277_v14, %v2514_v13  ;;  %v2512_v60 = vadd.f32 %v2257_v9, %v11140_v49  ;;  %v2774_v51 = vpop.f32.mrf.mxu0  ;;  %v3174_v9 = vpack.c.bf16 %v3131_v21, %v3130_v47  ;;  %v3647_v47 = vld [vmem:[#allocation2 + $0x24a] sm:$0xff] }
 0x3a6   :  { %v8198_v0 = vpop.f32.mrf.mxu1 }
 0x3a7   :  { %15204 = vst [vmem:[#allocation26_spill] sm:$0xff] %v11351_v36  ;;  %v11354_v40 = vadd.f32 %v2771_v17, %v2512_v60  ;;  %v2515_v37 = vadd.f32 %v8198_v0, %v11142_v62  ;;  %v8281_v36 = vpop.f32.mrf.mxu0  ;;  %8472 = vmatmul.mubr.bf16.gmra.mxu0 %v3687_v2  ;;  %v3134_v0 = vld [vmem:[#allocation2 + $0x259] sm:$0xff]  ;;  %v3175_v2 = vpack.c.bf16 %v3133_v19, %v3132_v1  ;;  %v3136_v1 = vld [vmem:[#allocation2 + $0x271] sm:$0xff] }
 0x3a8   :  { %v2260_v4 = vpop.f32.mrf.mxu1  ;;  %8475 = vmatprep.mubr.bf16.mxu0 %v3688_v59  ;;  %v3137_v19 = vld [vmem:[#allocation2 + $0x279] sm:$0xff] }
 0x3a9   :  { %v11357_v13 = vadd.f32 %v8278_v11, %v2515_v37  ;;  %v2513_v49 = vadd.f32 %v2260_v4, %v11144_v12  ;;  %v2787_v60 = vpop.f32.mrf.mxu0  ;;  %v3649_v37 = vld [vmem:[#allocation2 + $0x262] sm:$0xff] }
 0x3aa   :  { %v8201_v14 = vpop.f32.mrf.mxu1  ;;  %8392 = vmatmul.mubr.bf16.gmra.mxu1 %v3173_v25  ;;  %v3690_v59 = vpack.c.bf16 %v3649_v37, %v3648_v58  ;;  %v3139_v58 = vld [vmem:[#allocation2 + $0x291] sm:$0xff] }
 0x3ab   :  { %v11360_v22 = vadd.f32 %v2774_v51, %v2513_v49  ;;  %v2518_v17 = vadd.f32 %v8201_v14, %v11147_v20  ;;  %8395 = vmatprep.mubr.bf16.mxu1 %v3174_v9  ;;  %v8282_v21 = vpop.f32.mrf.mxu0  ;;  %v3689_v49 = vpack.c.bf16 %v3647_v47, %v3646_v16  ;;  %v3176_v9 = vpack.c.bf16 %v3135_v24, %v3134_v0  ;;  %v3650_v47 = vld [vmem:[#allocation2 + $0x272] sm:$0xff]  ;;  %v3651_v0 = vld [vmem:[#allocation2 + $0x27a] sm:$0xff]  ;;  %v3652_v37 = vld [vmem:[#allocation2 + $0x28a] sm:$0xff] }
 0x3ac   :  { %v2273_v62 = vpop.f32.mrf.mxu1 }
 0x3ad   :  { %v11363_v48 = vadd.f32 %v8281_v36, %v2518_v17  ;;  %v2516_v12 = vadd.f32 %v2273_v62, %v11150_v41  ;;  %v2790_v25 = vpop.f32.mrf.mxu0 }
 0x3ae   :  { %v8202_v11 = vpop.f32.mrf.mxu1 }
 0x3af   :  { %v11366_v4 = vadd.f32 %v2787_v60, %v2516_v12  ;;  %v2519_v20 = vadd.f32 %v8202_v11, %v11152_v55  ;;  %v8285_v17 = vpop.f32.mrf.mxu0  ;;  %8476 = vmatmul.mubr.bf16.gmra.mxu0 %v3689_v49  ;;  %v3138_v11 = vld [vmem:[#allocation2 + $0x289] sm:$0xff]  ;;  %v3177_v49 = vpack.c.bf16 %v3137_v19, %v3136_v1  ;;  %v3140_v1 = vld [vmem:[#allocation2 + $0x2a1] sm:$0xff] }
 0x3b0   :  { %v2276_v51 = vpop.f32.mrf.mxu1  ;;  %8479 = vmatprep.mubr.bf16.mxu0 %v3690_v59  ;;  %v3178_v59 = vpack.c.bf16 %v3139_v58, %v3138_v11  ;;  %v3141_v19 = vld [vmem:[#allocation2 + $0x2a9] sm:$0xff] }
 0x3b1   :  { %v11369_v36 = vadd.f32 %v8282_v21, %v2519_v20  ;;  %v2517_v41 = vadd.f32 %v2276_v51, %v11154_v45  ;;  %v2803_v12 = vpop.f32.mrf.mxu0  ;;  %v3653_v20 = vld [vmem:[#allocation2 + $0x292] sm:$0xff]  ;;  %v3655_v11 = vld [vmem:[#allocation2 + $0x2aa] sm:$0xff] }
 0x3b2   :  { %v8205_v14 = vpop.f32.mrf.mxu1  ;;  %8396 = vmatmul.mubr.bf16.gmra.mxu1 %v3175_v2 }
 0x3b3   :  { %v11372_v62 = vadd.f32 %v2790_v25, %v2517_v41  ;;  %v2522_v60 = vadd.f32 %v8205_v14, %v11157_v6  ;;  %8399 = vmatprep.mubr.bf16.mxu1 %v3176_v9  ;;  %v8286_v24 = vpop.f32.mrf.mxu0  ;;  %v3691_v41 = vpack.c.bf16 %v3651_v0, %v3650_v47  ;;  %v3692_v14 = vpack.c.bf16 %v3653_v20, %v3652_v37  ;;  %v3654_v0 = vld [vmem:[#allocation2 + $0x2a2] sm:$0xff]  ;;  %v3656_v20 = vld [vmem:[#allocation2 + $0x2ba] sm:$0xff] }
 0x3b4   :  { %v2289_v55 = vpop.f32.mrf.mxu1  ;;  %v3143_v37 = vld [vmem:[#allocation2 + $0x2c1] sm:$0xff] }
 0x3b5   :  { %v11375_v16 = vadd.f32 %v8285_v17, %v2522_v60  ;;  %v2520_v45 = vadd.f32 %v2289_v55, %v11160_v53  ;;  %v2806_v2 = vpop.f32.mrf.mxu0 }
 0x3b6   :  { %v8206_v21 = vpop.f32.mrf.mxu1 }
 0x3b7   :  { %v11378_v51 = vadd.f32 %v2803_v12, %v2520_v45  ;;  %v2523_v6 = vadd.f32 %v8206_v21, %v11162_v30  ;;  %v8289_v60 = vpop.f32.mrf.mxu0  ;;  %8480 = vmatmul.mubr.bf16.gmra.mxu0 %v3691_v41  ;;  %v3142_v21 = vld [vmem:[#allocation2 + $0x2b9] sm:$0xff]  ;;  %v3179_v41 = vpack.c.bf16 %v3141_v19, %v3140_v1  ;;  %v3144_v1 = vld [vmem:[#allocation2 + $0x2d1] sm:$0xff] }
 0x3b8   :  { %v2292_v25 = vpop.f32.mrf.mxu1  ;;  %8483 = vmatprep.mubr.bf16.mxu0 %v3692_v14  ;;  %v3180_v14 = vpack.c.bf16 %v3143_v37, %v3142_v21  ;;  %v3145_v19 = vld [vmem:[#allocation2 + $0x2d9] sm:$0xff] }
 0x3b9   :  { %v11381_v9 = vadd.f32 %v8286_v24, %v2523_v6  ;;  %v2521_v53 = vadd.f32 %v2292_v25, %v11164_v43  ;;  %v2819_v45 = vpop.f32.mrf.mxu0  ;;  %v3657_v6 = vld [vmem:[#allocation2 + $0x2c2] sm:$0xff]  ;;  %v3659_v21 = vld [vmem:[#allocation2 + $0x2da] sm:$0xff] }
 0x3ba   :  { %v8209_v17 = vpop.f32.mrf.mxu1  ;;  %8400 = vmatmul.mubr.bf16.gmra.mxu1 %v3177_v49 }
 0x3bb   :  { %v11384_v55 = vadd.f32 %v2806_v2, %v2521_v53  ;;  %v2526_v12 = vadd.f32 %v8209_v17, %v11167_v23  ;;  %8403 = vmatprep.mubr.bf16.mxu1 %v3178_v59  ;;  %v8290_v58 = vpop.f32.mrf.mxu0  ;;  %v3693_v53 = vpack.c.bf16 %v3655_v11, %v3654_v0  ;;  %v3694_v17 = vpack.c.bf16 %v3657_v6, %v3656_v20  ;;  %v3658_v11 = vld [vmem:[#allocation2 + $0x2d2] sm:$0xff]  ;;  %v3660_v6 = vld [vmem:[#allocation2 + $0x2ea] sm:$0xff] }
 0x3bc   :  { %v2305_v30 = vpop.f32.mrf.mxu1  ;;  %v3147_v20 = vld [vmem:[#allocation2 + $0x2f1] sm:$0xff] }
 0x3bd   :  { %v11387_v47 = vadd.f32 %v8289_v60, %v2526_v12  ;;  %v2524_v43 = vadd.f32 %v2305_v30, %v11170_v3  ;;  %v2822_v49 = vpop.f32.mrf.mxu0 }
 0x3be   :  { %v8210_v24 = vpop.f32.mrf.mxu1 }
 0x3bf   :  { %v11390_v25 = vadd.f32 %v2819_v45, %v2524_v43  ;;  %v2527_v23 = vadd.f32 %v8210_v24, %v11172_v29  ;;  %v8293_v12 = vpop.f32.mrf.mxu0  ;;  %8484 = vmatmul.mubr.bf16.gmra.mxu0 %v3693_v53  ;;  %v3146_v24 = vld [vmem:[#allocation2 + $0x2e9] sm:$0xff]  ;;  %v3181_v53 = vpack.c.bf16 %v3145_v19, %v3144_v1  ;;  %v3148_v1 = vld [vmem:[#allocation2 + $0x301] sm:$0xff] }
 0x3c0   :  { %v2308_v2 = vpop.f32.mrf.mxu1  ;;  %8487 = vmatprep.mubr.bf16.mxu0 %v3694_v17  ;;  %v3182_v17 = vpack.c.bf16 %v3147_v20, %v3146_v24  ;;  %v3151_v19 = vld [vmem:[#allocation2 + $0x321] sm:$0xff] }
 0x3c1   :  { %v11393_v59 = vadd.f32 %v8290_v58, %v2527_v23  ;;  %v2525_v3 = vadd.f32 %v2308_v2, %v11174_v15  ;;  %v2835_v43 = vpop.f32.mrf.mxu0  ;;  %v3661_v23 = vld [vmem:[#allocation2 + $0x2f2] sm:$0xff]  ;;  %v3662_v24 = vld [vmem:[#allocation2 + $0x302] sm:$0xff] }
 0x3c2   :  { %v8213_v60 = vpop.f32.mrf.mxu1  ;;  %8404 = vmatmul.mubr.bf16.gmra.mxu1 %v3179_v41 }
 0x3c3   :  { %v11396_v30 = vadd.f32 %v2822_v49, %v2525_v3  ;;  %v2530_v45 = vadd.f32 %v8213_v60, %v11177_v56  ;;  %8407 = vmatprep.mubr.bf16.mxu1 %v3180_v14  ;;  %v8294_v37 = vpop.f32.mrf.mxu0  ;;  %v3695_v3 = vpack.c.bf16 %v3659_v21, %v3658_v11  ;;  %v3696_v60 = vpack.c.bf16 %v3661_v23, %v3660_v6  ;;  %v3149_v21 = vld [vmem:[#allocation2 + $0x309] sm:$0xff]  ;;  %v3150_v6 = vld [vmem:[#allocation2 + $0x319] sm:$0xff] }
 0x3c4   :  { %v2321_v29 = vpop.f32.mrf.mxu1  ;;  %v3664_v23 = vld [vmem:[#allocation2 + $0x31a] sm:$0xff] }
 0x3c5   :  { %v11399_v0 = vadd.f32 %v8293_v12, %v2530_v45  ;;  %v2528_v15 = vadd.f32 %v2321_v29, %v11180_v8  ;;  %v2838_v41 = vpop.f32.mrf.mxu0 }
 0x3c6   :  { %v8214_v58 = vpop.f32.mrf.mxu1 }
 0x3c7   :  { %v11402_v2 = vadd.f32 %v2835_v43, %v2528_v15  ;;  %v2531_v56 = vadd.f32 %v8214_v58, %v11187_v35  ;;  %v8297_v45 = vpop.f32.mrf.mxu0  ;;  %8488 = vmatmul.mubr.bf16.gmra.mxu0 %v3695_v3  ;;  %v3663_v58 = vld [vmem:[#allocation2 + $0x30a] sm:$0xff]  ;;  %v3183_v3 = vpack.c.bf16 %v3149_v21, %v3148_v1  ;;  %v3153_v21 = vld [vmem:[#allocation2 + $0x339] sm:$0xff] }
 0x3c8   :  { %v2324_v49 = vpop.f32.mrf.mxu1  ;;  %8491 = vmatprep.mubr.bf16.mxu0 %v3696_v60  ;;  %v3184_v60 = vpack.c.bf16 %v3151_v19, %v3150_v6  ;;  %v3152_v1 = vld [vmem:[#allocation2 + $0x331] sm:$0xff] }
 0x3c9   :  { %v11405_v14 = vadd.f32 %v8294_v37, %v2531_v56  ;;  %v2529_v8 = vadd.f32 %v2324_v49, %v11190_v63  ;;  %v2851_v15 = vpop.f32.mrf.mxu0  ;;  %v3665_v56 = vld [vmem:[#allocation2 + $0x322] sm:$0xff]  ;;  %v3666_v19 = vld [vmem:[#allocation2 + $0x332] sm:$0xff] }
 0x3ca   :  { %v8217_v12 = vpop.f32.mrf.mxu1  ;;  %8408 = vmatmul.mubr.bf16.gmra.mxu1 %v3181_v53 }
 0x3cb   :  { %v11408_v29 = vadd.f32 %v2838_v41, %v2529_v8  ;;  %v2534_v43 = vadd.f32 %v8217_v12, %v11193_v27  ;;  %8411 = vmatprep.mubr.bf16.mxu1 %v3182_v17  ;;  %v8298_v20 = vpop.f32.mrf.mxu0  ;;  %v3697_v8 = vpack.c.bf16 %v3663_v58, %v3662_v24  ;;  %v3698_v12 = vpack.c.bf16 %v3665_v56, %v3664_v23  ;;  %v3667_v58 = vld [vmem:[#allocation2 + $0x33a] sm:$0xff]  ;;  %v4633_v56 = vld [vmem:[#allocation2 + $0x31] sm:$0xff] }
 0x3cc   :  { %v2337_v35 = vpop.f32.mrf.mxu1  ;;  %v4120_v23 = vld [vmem:[#allocation2 + $0x38] sm:$0xff] }
 0x3cd   :  { %v11411_v11 = vadd.f32 %v8297_v45, %v2534_v43  ;;  %v2532_v63 = vadd.f32 %v2337_v35, %v11196_v50  ;;  %v2854_v53 = vpop.f32.mrf.mxu0 }
 0x3ce   :  { %v8218_v37 = vpop.f32.mrf.mxu1 }
 0x3cf   :  { %v11414_v49 = vadd.f32 %v2851_v15, %v2532_v63  ;;  %v2535_v27 = vadd.f32 %v8218_v37, %v11198_v26  ;;  %v8301_v43 = vpop.f32.mrf.mxu0  ;;  %8492 = vmatmul.mubr.bf16.gmra.mxu0 %v3697_v8  ;;  %v4119_v37 = vld [vmem:[#allocation2 + $0x30] sm:$0xff] }
 0x3d0   :  { %v2340_v41 = vpop.f32.mrf.mxu1  ;;  %8495 = vmatprep.mubr.bf16.mxu0 %v3698_v12 }
 0x3d1   :  { %v11417_v17 = vadd.f32 %v8298_v20, %v2535_v27  ;;  %v2533_v50 = vadd.f32 %v2340_v41, %v11200_v18  ;;  %v2867_v63 = vpop.f32.mrf.mxu0  ;;  %v4634_v27 = vld [vmem:[#allocation2 + $0x39] sm:$0xff] }
 0x3d2   :  { %v8221_v45 = vpop.f32.mrf.mxu1  ;;  %8412 = vmatmul.mubr.bf16.gmra.mxu1 %v3183_v3 }
 0x3d3   :  { %v11420_v35 = vadd.f32 %v2854_v53, %v2533_v50  ;;  %v2538_v15 = vadd.f32 %v8221_v45, %v11203_v38  ;;  %8415 = vmatprep.mubr.bf16.mxu1 %v3184_v60  ;;  %v8302_v6 = vpop.f32.mrf.mxu0  ;;  %v15206_v38 = vld [vmem:[#allocation9_spill] sm:$0xff]  ;;  %v3185_v50 = vpack.c.bf16 %v3153_v21, %v3152_v1  ;;  %v3699_v60 = vpack.c.bf16 %v3667_v58, %v3666_v19  ;;  %v4121_v1 = vld [vmem:[#allocation2 + $0x48] sm:$0xff] }
 0x3d4   :  { %v2353_v26 = vpop.f32.mrf.mxu1  ;;  %v4183_v45 = vpack.c.bf16 %v4120_v23, %v4119_v37  ;;  %v4635_v58 = vld [vmem:[#allocation2 + $0x49] sm:$0xff]  ;;  %v4636_v37 = vld [vmem:[#allocation2 + $0x51] sm:$0xff] }
 0x3d5   :  { %v11423_v24 = vadd.f32 %v8301_v43, %v2538_v15  ;;  %v2536_v18 = vadd.f32 %v2353_v26, %v11206_v52  ;;  %v2870_v8 = vpop.f32.mrf.mxu0  ;;  %v4697_v43 = vpack.c.bf16 %v4634_v27, %v4633_v56  ;;  %v4123_v56 = vld [vmem:[#allocation2 + $0x60] sm:$0xff]  ;;  %v4124_v27 = vld [vmem:[#allocation2 + $0x68] sm:$0xff] }
 0x3d6   :  { %v8222_v20 = vpop.f32.mrf.mxu1 }
 0x3d7   :  { %15205 = vst [vmem:[#allocation32_spill] sm:$0xff] %v11423_v24  ;;  %v11426_v41 = vadd.f32 %v2867_v63, %v2536_v18  ;;  %v2539_v53 = vadd.f32 %v8222_v20, %v15206_v38  ;;  %v8305_v26 = vpop.f32.mrf.mxu0  ;;  %8496 = vmatmul.mubr.bf16.gmra.mxu0 %v3699_v60 }
 0x3d8   :  { %v2356_v3 = vpop.f32.mrf.mxu1  ;;  %8595 = vmatprep.mubr.bf16.mxu0 %v4697_v43 }
 0x3d9   :  { %v11429_v12 = vadd.f32 %v8302_v6, %v2539_v53  ;;  %v2537_v52 = vadd.f32 %v2356_v3, %v11210_v33  ;;  %v2883_v20 = vpop.f32.mrf.mxu0  ;;  %v4122_v33 = vld [vmem:[#allocation2 + $0x50] sm:$0xff]  ;;  %v4637_v53 = vld [vmem:[#allocation2 + $0x61] sm:$0xff] }
 0x3da   :  { %v8225_v15 = vpop.f32.mrf.mxu1  ;;  %8416 = vmatmul.mubr.bf16.gmra.mxu1 %v3185_v50  ;;  %v4638_v3 = vld [vmem:[#allocation2 + $0x69] sm:$0xff]  ;;  %v4184_v60 = vpack.c.bf16 %v4122_v33, %v4121_v1  ;;  %v4125_v33 = vld [vmem:[#allocation2 + $0x78] sm:$0xff] }
 0x3db   :  { %v11432_v24 = vadd.f32 %v2870_v8, %v2537_v52  ;;  %v2542_v63 = vadd.f32 %v8225_v15, %v11212_v39  ;;  %8515 = vmatprep.mubr.bf16.mxu1 %v4183_v45  ;;  %v8306_v23 = vpop.f32.mrf.mxu0  ;;  %v4698_v52 = vpack.c.bf16 %v4636_v37, %v4635_v58  ;;  %v4185_v15 = vpack.c.bf16 %v4124_v27, %v4123_v56  ;;  %v4126_v58 = vld [vmem:[#allocation2 + $0x80] sm:$0xff] }
 0x3dc   :  { %v2369_v18 = vpop.f32.mrf.mxu1  ;;  %v4640_v56 = vld [vmem:[#allocation2 + $0x81] sm:$0xff] }
 0x3dd   :  { %v11435_v21 = vadd.f32 %v8305_v26, %v2542_v63  ;;  %v2540_v19 = vadd.f32 %v2369_v18, %v11215_v34  ;;  %v2886_v50 = vpop.f32.mrf.mxu0  ;;  %v8894_v34 = vld [vmem:[%s14794_s2 + $0x230] sm:$0xff]  }
 0x3de   :  { %v8226_v6 = vpop.f32.mrf.mxu1 }
 0x3df   :  { %v11438_v38 = vadd.f32 %v2883_v20, %v2540_v19  ;;  %v2543_v39 = vadd.f32 %v8226_v6, %v11217_v42  ;;  %v8309_v63 = vpop.f32.mrf.mxu0  ;;  %8596 = vmatmul.mubr.bf16.vlgmr.msra.gmra.mxu0 %v4698_v52  ;;  %v4699_v42 = vpack.c.bf16 %v4638_v3, %v4637_v53  ;;  %v4641_v53 = vld [vmem:[#allocation2 + $0x91] sm:$0xff]  ;;  %v4642_v3 = vld [vmem:[#allocation2 + $0x99] sm:$0xff] }
 0x3e0   :  { %v2372_v8 = vpop.f32.mrf.mxu1 }
 0x3e1   :  { %v11444_v45 = vadd.f32 %v8306_v23, %v2543_v39  ;;  %v2541_v43 = vadd.f32 %v2372_v8, %v11222_v54  ;;  %8599 = vmatprep.mubr.bf16.mxu0 %v4699_v42  ;;  %v2899_v19 = vpop.f32.mrf.mxu0  ;;  %v8895_v54 = vld [vmem:[%s14794_s2 + $0x228] sm:$0xff]   ;;  %v4639_v23 = vld [vmem:[#allocation2 + $0x79] sm:$0xff]  ;;  %v4701_v42 = vpack.c.bf16 %v4642_v3, %v4641_v53 }
 0x3e2   :  { %v8229_v26 = vpop.f32.mrf.mxu1  ;;  %8516 = vmatmul.mubr.bf16.vlgmr.msra.gmra.mxu1 %v4184_v60  ;;  %v4128_v39 = vld [vmem:[#allocation2 + $0x98] sm:$0xff]  ;;  %v4131_v53 = vld [vmem:[#allocation2 + $0xc0] sm:$0xff] }
 0x3e3   :  { %v11447_v18 = vadd.f32 %v2886_v50, %v2541_v43  ;;  %v2546_v20 = vadd.f32 %v8229_v26, %v11228_v31  ;;  %8660 = vmatpush3.bf16.msra.mxu1 %v11304_v5  ;;  %8519 = vmatprep.mubr.bf16.mxu1 %v4185_v15  ;;  %v4127_v31 = vld [vmem:[#allocation2 + $0x90] sm:$0xff]  ;;  %v8310_v5 = vpop.f32.mrf.mxu0  ;;  %v4186_v43 = vpack.c.bf16 %v4126_v58, %v4125_v33  ;;  %v8897_v3 = vld [vmem:[%s14794_s2 + $0x218] sm:$0xff]  }
 0x3e4   :  { %v2385_v1 = vpop.f32.mrf.mxu1  ;;  %8661 = vmatprep.subr.bf16.mxu1 %v8894_v34  ;;  %v4700_v15 = vpack.c.bf16 %v4640_v56, %v4639_v23  ;;  %v4129_v23 = vld [vmem:[#allocation2 + $0xa8] sm:$0xff] }
 0x3e5   :  { %v11454_v37 = vadd.f32 %v8309_v63, %v2546_v20  ;;  %v2544_v6 = vadd.f32 %v2385_v1, %v11235_v61  ;;  %v2902_v52 = vpop.f32.mrf.mxu0  ;;  %v4187_v63 = vpack.c.bf16 %v4128_v39, %v4127_v31  ;;  %v8896_v20 = vld [vmem:[%s14794_s2 + $0x220] sm:$0xff]   ;;  %v4643_v56 = vld [vmem:[#allocation2 + $0xa9] sm:$0xff]  ;;  %v4644_v39 = vld [vmem:[#allocation2 + $0xb1] sm:$0xff] }
 0x3e6   :  { %v8230_v27 = vpop.f32.mrf.mxu1 }
 0x3e7   :  { %v11457_v8 = vadd.f32 %v2899_v19, %v2544_v6  ;;  %v2547_v50 = vadd.f32 %v8230_v27, %v11238_v32  ;;  %8662 = vmatpush3.bf16.msra.mxu1 %v8894_v34  ;;  %v8313_v19 = vpop.f32.mrf.mxu0  ;;  %8600 = vmatmul.mubr.bf16.gmra.mxu0 %v4700_v15  ;;  %v15207_v34 = vld [vmem:[#allocation27_spill] sm:$0xff]  ;;  %v15209_v27 = vld [vmem:[#allocation28_spill] sm:$0xff] }
 0x3e8   :  { %v2388_v60 = vpop.f32.mrf.mxu1  ;;  %8663 = vmatprep.subr.bf16.mxu1 %v8895_v54  ;;  %8603 = vmatprep.mubr.bf16.mxu0 %v4701_v42  ;;  %v4646_v15 = vld [vmem:[#allocation2 + $0xc9] sm:$0xff] }
 0x3e9   :  { %v11460_v26 = vadd.f32 %v8310_v5, %v2547_v50  ;;  %v2545_v61 = vadd.f32 %v2388_v60, %v11243_v10  ;;  %v2915_v6 = vpop.f32.mrf.mxu0  ;;  %v4130_v10 = vld [vmem:[#allocation2 + $0xb0] sm:$0xff] }
 0x3ea   :  { %v8233_v1 = vpop.f32.mrf.mxu1  ;;  %8520 = vmatmul.mubr.bf16.gmra.mxu1 %v4186_v43  ;;  %v4645_v43 = vld [vmem:[#allocation2 + $0xc1] sm:$0xff] }
 0x3eb   :  { %v11466_v32 = vadd.f32 %v2902_v52, %v2545_v61  ;;  %v2550_v33 = vadd.f32 %v8233_v1, %v15207_v34  ;;  %8523 = vmatprep.mubr.bf16.mxu1 %v4187_v63  ;;  %8664 = vmatpush3.bf16.msra.mxu1 %v8895_v54  ;;  %v8314_v60 = vpop.f32.mrf.mxu0  ;;  %v4132_v52 = vld [vmem:[#allocation2 + $0xc8] sm:$0xff]  ;;  %v4188_v1 = vpack.c.bf16 %v4130_v10, %v4129_v23  ;;  %v15211_v23 = vld [vmem:[#allocation29_spill] sm:$0xff] }
 0x3ec   :  { %v2401_v58 = vpop.f32.mrf.mxu1  ;;  %8665 = vmatprep.subr.bf16.mxu1 %v8896_v20 }
 0x3ed   :  { %v11469_v31 = vadd.f32 %v8313_v19, %v2550_v33  ;;  %v2548_v5 = vadd.f32 %v2401_v58, %v15209_v27  ;;  %v2918_v42 = vpop.f32.mrf.mxu0  ;;  %v4702_v19 = vpack.c.bf16 %v4644_v39, %v4643_v56  ;;  %v4189_v58 = vpack.c.bf16 %v4132_v52, %v4131_v53  ;;  %v4134_v39 = vld [vmem:[#allocation2 + $0xe0] sm:$0xff] }
 0x3ee   :  { %v8234_v50 = vpop.f32.mrf.mxu1  ;;  %v4703_v27 = vpack.c.bf16 %v4646_v15, %v4645_v43  ;;  %v4647_v53 = vld [vmem:[#allocation2 + $0xd9] sm:$0xff]  ;;  %v4648_v43 = vld [vmem:[#allocation2 + $0xe1] sm:$0xff]  ;;  %v4135_v15 = vld [vmem:[#allocation2 + $0xf0] sm:$0xff] }
 0x3ef   :  { %15208 = vst [vmem:[#allocation9_spill] sm:$0xff] %v11469_v31  ;;  %v11475_v61 = vadd.f32 %v2915_v6, %v2548_v5  ;;  %v2551_v54 = vadd.f32 %v8234_v50, %v11260_v28  ;;  %8666 = vmatpush3.bf16.msra.mxu1 %v8896_v20  ;;  %v8898_v31 = vld [vmem:[%s14794_s2 + $0x210] sm:$0xff]   ;;  %v8317_v5 = vpop.f32.mrf.mxu0  ;;  %8604 = vmatmul.mubr.bf16.gmra.mxu0 %v4702_v19 }
 0x3f0   :  { %v2404_v63 = vpop.f32.mrf.mxu1  ;;  %8667 = vmatprep.subr.bf16.mxu1 %v8897_v3  ;;  %8607 = vmatprep.mubr.bf16.mxu0 %v4703_v27  ;;  %v4649_v19 = vld [vmem:[#allocation2 + $0xf1] sm:$0xff] }
 0x3f1   :  { %v11478_v34 = vadd.f32 %v8314_v60, %v2551_v54  ;;  %v2549_v33 = vadd.f32 %v2404_v63, %v11265_v46  ;;  %v2931_v56 = vpop.f32.mrf.mxu0  ;;  %v4133_v46 = vld [vmem:[#allocation2 + $0xd8] sm:$0xff]  ;;  %v15213_v60 = vld [vmem:[#allocation30_spill] sm:$0xff]  ;;  %v8899_v54 = vld [vmem:[%s14794_s2 + $0x208] sm:$0xff]  }
 0x3f2   :  { %v8237_v6 = vpop.f32.mrf.mxu1  ;;  %8524 = vmatmul.mubr.bf16.gmra.mxu1 %v4188_v1  ;;  %v4136_v1 = vld [vmem:[#allocation2 + $0xf8] sm:$0xff] }
 0x3f3   :  { %v11484_v28 = vadd.f32 %v2918_v42, %v2549_v33  ;;  %v2554_v10 = vadd.f32 %v8237_v6, %v15211_v23  ;;  %8527 = vmatprep.mubr.bf16.mxu1 %v4189_v58  ;;  %8668 = vmatpush3.bf16.msra.mxu1 %v8897_v3  ;;  %v8318_v42 = vpop.f32.mrf.mxu0  ;;  %v4650_v33 = vld [vmem:[#allocation2 + $0xf9] sm:$0xff]  ;;  %v4704_v23 = vpack.c.bf16 %v4648_v43, %v4647_v53  ;;  %v4138_v43 = vld [vmem:[#allocation2 + $0x110] sm:$0xff] }
 0x3f4   :  { %v2417_v20 = vpop.f32.mrf.mxu1  ;;  %8669 = vmatprep.subr.bf16.mxu1 %v8898_v31 }
 0x3f5   :  { %15210 = vst [vmem:[#allocation27_spill] sm:$0xff] %v11484_v28  ;;  %v11487_v50 = vadd.f32 %v8317_v5, %v2554_v10  ;;  %v2552_v52 = vadd.f32 %v2417_v20, %v15213_v60  ;;  %v2934_v6 = vpop.f32.mrf.mxu0  ;;  %v4190_v5 = vpack.c.bf16 %v4134_v39, %v4133_v46  ;;  %v4191_v60 = vpack.c.bf16 %v4136_v1, %v4135_v15  ;;  %v8900_v28 = vld [vmem:[%s14794_s2 + $0x200] sm:$0xff]   ;;  %v15217_v46 = vld [vmem:[#allocation31_spill] sm:$0xff] }
 0x3f6   :  { %v8238_v63 = vpop.f32.mrf.mxu1  ;;  %v4651_v1 = vld [vmem:[#allocation2 + $0x109] sm:$0xff] }
 0x3f7   :  { %15212 = vst [vmem:[#allocation28_spill] sm:$0xff] %v11487_v50  ;;  %v11493_v58 = vadd.f32 %v2931_v56, %v2552_v52  ;;  %v2555_v3 = vadd.f32 %v8238_v63, %v11282_v7  ;;  %8670 = vmatpush3.bf16.msra.mxu1 %v8898_v31  ;;  %v4705_v50 = vpack.c.bf16 %v4650_v33, %v4649_v19  ;;  %v8321_v52 = vpop.f32.mrf.mxu0  ;;  %v15219_v63 = vld [vmem:[#allocation19_spill] sm:$0xff]  ;;  %v4652_v19 = vld [vmem:[#allocation2 + $0x111] sm:$0xff]  ;;  %v4139_v33 = vld [vmem:[#allocation2 + $0x120] sm:$0xff] }
 0x3f8   :  { %v2420_v27 = vpop.f32.mrf.mxu1  ;;  %8671 = vmatprep.subr.bf16.mxu1 %v8899_v54  ;;  %8608 = vmatmul.mubr.bf16.gmra.mxu0 %v4704_v23  ;;  %v4654_v23 = vld [vmem:[#allocation2 + $0x129] sm:$0xff] }
 0x3f9   :  { %15214 = vst [vmem:[#allocation29_spill] sm:$0xff] %v11493_v58  ;;  %v11496_v10 = vadd.f32 %v8318_v42, %v2555_v3  ;;  %v2553_v20 = vadd.f32 %v2420_v27, %v11287_v44  ;;  %8611 = vmatprep.mubr.bf16.mxu0 %v4705_v50  ;;  %v2947_v53 = vpop.f32.mrf.mxu0  ;;  %v4137_v44 = vld [vmem:[#allocation2 + $0x108] sm:$0xff] }
 0x3fa   :  { %v8241_v56 = vpop.f32.mrf.mxu1  ;;  %8528 = vmatmul.mubr.bf16.gmra.mxu1 %v4190_v5  ;;  %v4653_v5 = vld [vmem:[#allocation2 + $0x121] sm:$0xff] }
 0x3fb   :  { %15215 = vst [vmem:[#allocation30_spill] sm:$0xff] %v11496_v10  ;;  %v11502_v7 = vadd.f32 %v2934_v6, %v2553_v20  ;;  %v2558_v39 = vadd.f32 %v8241_v56, %v15217_v46  ;;  %8531 = vmatprep.mubr.bf16.mxu1 %v4191_v60  ;;  %8672 = vmatpush3.bf16.msra.mxu1 %v8899_v54  ;;  %v8322_v27 = vpop.f32.mrf.mxu0  ;;  %v4140_v6 = vld [vmem:[#allocation2 + $0x128] sm:$0xff] }
 0x3fc   :  { %v2433_v31 = vpop.f32.mrf.mxu1  ;;  %8673 = vmatprep.subr.bf16.mxu1 %v8900_v28  ;;  %v4192_v54 = vpack.c.bf16 %v4138_v43, %v4137_v44  ;;  %v4141_v43 = vld [vmem:[#allocation2 + $0x138] sm:$0xff] }
 0x3fd   :  { %15216 = vst [vmem:[#allocation33_spill] sm:$0xff] %v11502_v7  ;;  %v11505_v15 = vadd.f32 %v8321_v52, %v2558_v39  ;;  %v2556_v42 = vadd.f32 %v2433_v31, %v15219_v63  ;;  %v2950_v56 = vpop.f32.mrf.mxu0  ;;  %v4706_v52 = vpack.c.bf16 %v4652_v19, %v4651_v1  ;;  %v15222_v39 = vld [vmem:[#allocation20_spill] sm:$0xff]  ;;  %v4193_v63 = vpack.c.bf16 %v4140_v6, %v4139_v33  ;;  %v15226_v19 = vld [vmem:[#allocation7_spill] sm:$0xff]  ;;  %v4655_v33 = vld [vmem:[#allocation2 + $0x139] sm:$0xff] }
 0x3fe   :  { %v8242_v3 = vpop.f32.mrf.mxu1  ;;  %v4143_v6 = vld [vmem:[#allocation2 + $0x150] sm:$0xff] }
 0x3ff   :  { %15218 = vst [vmem:[#allocation31_spill] sm:$0xff] %v11505_v15  ;;  %v11508_v20 = vadd.f32 %v2947_v53, %v2556_v42  ;;  %v2559_v50 = vadd.f32 %v8242_v3, %v11306_v57  ;;  %8674 = vmatpush3.bf16.msra.mxu1 %v8900_v28  ;;  %v4707_v15 = vpack.c.bf16 %v4654_v23, %v4653_v5  ;;  %v8325_v10 = vpop.f32.mrf.mxu0  ;;  %v15224_v53 = vld [vmem:[#allocation21_spill] sm:$0xff]  ;;  %v4142_v28 = vld [vmem:[#allocation2 + $0x140] sm:$0xff] }
 0x400   :  { %v2436_v60 = vpop.f32.mrf.mxu1  ;;  %8612 = vmatmul.mubr.bf16.gmra.mxu0 %v4706_v52 }
 0x401   :  { %15220 = vst [vmem:[#allocation19_spill] sm:$0xff] %v11508_v20  ;;  %v11511_v46 = vadd.f32 %v8322_v27, %v2559_v50  ;;  %v2557_v31 = vadd.f32 %v2436_v60, %v15222_v39  ;;  %8615 = vmatprep.mubr.bf16.mxu0 %v4707_v15  ;;  %v2963_v44 = vpop.f32.mrf.mxu0  ;;  %v4656_v27 = vld [vmem:[#allocation2 + $0x141] sm:$0xff]  ;;  %v4144_v50 = vld [vmem:[#allocation2 + $0x158] sm:$0xff] }
 0x402   :  { %v8245_v7 = vpop.f32.mrf.mxu1  ;;  %8532 = vmatmul.mubr.bf16.gmra.mxu1 %v4192_v54  ;;  %v4657_v60 = vld [vmem:[#allocation2 + $0x151] sm:$0xff] }
 0x403   :  { %15221 = vst [vmem:[#allocation34_spill] sm:$0xff] %v11511_v46  ;;  %v11514_v58 = vadd.f32 %v2950_v56, %v2557_v31  ;;  %v2562_v42 = vadd.f32 %v8245_v7, %v15224_v53  ;;  %8535 = vmatprep.mubr.bf16.mxu1 %v4193_v63  ;;  %v8326_v23 = vpop.f32.mrf.mxu0  ;;  %v4658_v56 = vld [vmem:[#allocation2 + $0x159] sm:$0xff]  ;;  %v4194_v31 = vpack.c.bf16 %v4142_v28, %v4141_v43  ;;  %v4145_v43 = vld [vmem:[#allocation2 + $0x168] sm:$0xff]  ;;  %v4146_v28 = vld [vmem:[#allocation2 + $0x170] sm:$0xff] }
 0x404   :  { %v2449_v57 = vpop.f32.mrf.mxu1  ;;  %v15228_v7 = vld [vmem:[#allocation22_spill] sm:$0xff]  ;;  %v4708_v63 = vpack.c.bf16 %v4656_v27, %v4655_v33  ;;  %v15234_v27 = vld [vmem:[#allocation11_spill] sm:$0xff] }
 0x405   :  { %15223 = vst [vmem:[#allocation20_spill] sm:$0xff] %v11514_v58  ;;  %v11517_v1 = vadd.f32 %v8325_v10, %v2562_v42  ;;  %v2560_v3 = vadd.f32 %v2449_v57, %v15226_v19  ;;  %v2966_v39 = vpop.f32.mrf.mxu0  ;;  %v15230_v53 = vld [vmem:[#allocation6_spill] sm:$0xff]  ;;  %v4195_v57 = vpack.c.bf16 %v4144_v50, %v4143_v6  ;;  %v4709_v19 = vpack.c.bf16 %v4658_v56, %v4657_v60  ;;  %v4659_v6 = vld [vmem:[#allocation2 + $0x169] sm:$0xff]  ;;  %v4660_v50 = vld [vmem:[#allocation2 + $0x171] sm:$0xff] }
 0x406   :  { %v8246_v5 = vpop.f32.mrf.mxu1  ;;  %v4147_v60 = vld [vmem:[#allocation2 + $0x180] sm:$0xff] }
 0x407   :  { %15225 = vst [vmem:[#allocation21_spill] sm:$0xff] %v11517_v1  ;;  %v11520_v54 = vadd.f32 %v2963_v44, %v2560_v3  ;;  %v2563_v15 = vadd.f32 %v8246_v5, %v15228_v7  ;;  %v8329_v58 = vpop.f32.mrf.mxu0  ;;  %v15232_v44 = vld [vmem:[#allocation8_spill] sm:$0xff] }
 0x408   :  { %v2452_v52 = vpop.f32.mrf.mxu1  ;;  %8616 = vmatmul.mubr.bf16.gmra.mxu0 %v4708_v63 }
 0x409   :  { %15227 = vst [vmem:[#allocation7_spill] sm:$0xff] %v11520_v54  ;;  %v11523_v10 = vadd.f32 %v8326_v23, %v2563_v15  ;;  %v2561_v42 = vadd.f32 %v2452_v52, %v15230_v53  ;;  %8619 = vmatprep.mubr.bf16.mxu0 %v4709_v19  ;;  %v2979_v7 = vpop.f32.mrf.mxu0  ;;  %v4148_v52 = vld [vmem:[#allocation2 + $0x188] sm:$0xff]  ;;  %v4196_v19 = vpack.c.bf16 %v4146_v28, %v4145_v43 }
 0x40a   :  { %v8249_v1 = vpop.f32.mrf.mxu1  ;;  %8536 = vmatmul.mubr.bf16.gmra.mxu1 %v4194_v31  ;;  %v4662_v31 = vld [vmem:[#allocation2 + $0x189] sm:$0xff]  ;;  %v4664_v43 = vld [vmem:[#allocation2 + $0x1a1] sm:$0xff] }
 0x40b   :  { %15229 = vst [vmem:[#allocation22_spill] sm:$0xff] %v11523_v10  ;;  %v11526_v46 = vadd.f32 %v2966_v39, %v2561_v42  ;;  %v2566_v3 = vadd.f32 %v8249_v1, %v15232_v44  ;;  %8539 = vmatprep.mubr.bf16.mxu1 %v4195_v57  ;;  %v8330_v15 = vpop.f32.mrf.mxu0  ;;  %v4661_v39 = vld [vmem:[#allocation2 + $0x181] sm:$0xff]  ;;  %v4710_v44 = vpack.c.bf16 %v4660_v50, %v4659_v6 }
 0x40c   :  { %v2465_v5 = vpop.f32.mrf.mxu1  ;;  %v15236_v1 = vld [vmem:[#allocation23_spill] sm:$0xff] }
 0x40d   :  { %15231 = vst [vmem:[#allocation6_spill] sm:$0xff] %v11526_v46  ;;  %v11529_v33 = vadd.f32 %v8329_v58, %v2566_v3  ;;  %v2564_v23 = vadd.f32 %v2465_v5, %v15234_v27  ;;  %v2982_v57 = vpop.f32.mrf.mxu0  ;;  %v15238_v3 = vld [vmem:[#allocation10_spill] sm:$0xff]  ;;  %v4197_v27 = vpack.c.bf16 %v4148_v52, %v4147_v60 }
 0x40e   :  { %v8250_v56 = vpop.f32.mrf.mxu1  ;;  %v4151_v52 = vld [vmem:[#allocation2 + $0x1e0] sm:$0xff] }
 0x40f   :  { %15233 = vst [vmem:[#allocation8_spill] sm:$0xff] %v11529_v33  ;;  %v11532_v63 = vadd.f32 %v2979_v7, %v2564_v23  ;;  %v2567_v53 = vadd.f32 %v8250_v56, %v15236_v1  ;;  %v4711_v33 = vpack.c.bf16 %v4662_v31, %v4661_v39  ;;  %v8333_v10 = vpop.f32.mrf.mxu0  ;;  %v15240_v7 = vld [vmem:[#allocation13_spill] sm:$0xff] }
 0x410   :  { %v2468_v42 = vpop.f32.mrf.mxu1  ;;  %8620 = vmatmul.mubr.bf16.gmra.mxu0 %v4710_v44  ;;  %v4149_v56 = vld [vmem:[#allocation2 + $0x198] sm:$0xff] }
 0x411   :  { %15235 = vst [vmem:[#allocation11_spill] sm:$0xff] %v11532_v63  ;;  %v11535_v58 = vadd.f32 %v8330_v15, %v2567_v53  ;;  %v2565_v5 = vadd.f32 %v2468_v42, %v15238_v3  ;;  %8623 = vmatprep.mubr.bf16.mxu0 %v4711_v33  ;;  %v4663_v1 = vld [vmem:[#allocation2 + $0x199] sm:$0xff]  ;;  %v2995_v6 = vpop.f32.mrf.mxu0  ;;  %v15242_v15 = vld [vmem:[#allocation15_spill] sm:$0xff]  ;;  %v15244_v3 = vld [vmem:[#allocation12_spill] sm:$0xff] }
 0x412   :  { %v8253_v46 = vpop.f32.mrf.mxu1  ;;  %8540 = vmatmul.mubr.bf16.gmra.mxu1 %v4196_v19  ;;  %v11544_v53 = vld [vmem:[#allocation2 + $0x8] sm:$0xff] }
 0x413   :  { %15237 = vst [vmem:[#allocation23_spill] sm:$0xff] %v11535_v58  ;;  %v11538_v54 = vadd.f32 %v2982_v57, %v2565_v5  ;;  %v2570_v23 = vadd.f32 %v8253_v46, %v15240_v7  ;;  %8543 = vmatprep.mubr.bf16.mxu1 %v4197_v27  ;;  %v8334_v31 = vpop.f32.mrf.mxu0  ;;  %v4198_v42 = vpack.c.bf16 %v11544_v53, %v4149_v56  ;;  %v4152_v46 = vld [vmem:[#allocation2 + $0x1e8] sm:$0xff] }
 0x414   :  { %v2481_v28 = vpop.f32.mrf.mxu1  ;;  %v4712_v57 = vpack.c.bf16 %v4664_v43, %v4663_v1  ;;  %v4665_v19 = vld [vmem:[#allocation2 + $0x1e1] sm:$0xff]  ;;  %v4666_v33 = vld [vmem:[#allocation2 + $0x1e9] sm:$0xff]  ;;  %v15248_v1 = vld [vmem:[#allocation17_spill] sm:$0xff] }
 0x415   :  { %15239 = vst [vmem:[#allocation10_spill] sm:$0xff] %v11538_v54  ;;  %v11541_v50 = vadd.f32 %v8333_v10, %v2570_v23  ;;  %v2568_v60 = vadd.f32 %v2481_v28, %v15242_v15  ;;  %v2998_v10 = vpop.f32.mrf.mxu0  ;;  %v15246_v23 = vld [vmem:[#allocation14_spill] sm:$0xff]  ;;  %v4199_v15 = vpack.c.bf16 %v4152_v46, %v4151_v52 }
 0x416   :  { %v8254_v39 = vpop.f32.mrf.mxu1  ;;  %v4667_v52 = vld [vmem:[#allocation2 + $0x1f9] sm:$0xff]  ;;  %v4668_v46 = vld [vmem:[#allocation2 + $0x201] sm:$0xff] }
 0x417   :  { %15241 = vst [vmem:[#allocation13_spill] sm:$0xff] %v11541_v50  ;;  %v11547_v44 = vadd.f32 %v2995_v6, %v2568_v60  ;;  %v2571_v5 = vadd.f32 %v8254_v39, %v15244_v3  ;;  %v4713_v50 = vpack.c.bf16 %v4666_v33, %v4665_v19  ;;  %v8337_v58 = vpop.f32.mrf.mxu0  ;;  %v4153_v39 = vld [vmem:[#allocation2 + $0x1f8] sm:$0xff]  ;;  %v4154_v3 = vld [vmem:[#allocation2 + $0x200] sm:$0xff]  ;;  %v4155_v19 = vld [vmem:[#allocation2 + $0x210] sm:$0xff] }
 0x418   :  { %v2484_v27 = vpop.f32.mrf.mxu1  ;;  %8624 = vmatmul.mubr.bf16.gmra.mxu0 %v4712_v57  ;;  %v4156_v57 = vld [vmem:[#allocation2 + $0x218] sm:$0xff] }
 0x419   :  { %15243 = vst [vmem:[#allocation15_spill] sm:$0xff] %v11547_v44  ;;  %v11550_v7 = vadd.f32 %v8334_v31, %v2571_v5  ;;  %v2569_v28 = vadd.f32 %v2484_v27, %v15246_v23  ;;  %8627 = vmatprep.mubr.bf16.mxu0 %v4713_v50  ;;  %v3011_v60 = vpop.f32.mrf.mxu0  ;;  %v15250_v5 = vld [vmem:[#allocation18_spill] sm:$0xff] }
 0x41a   :  { %v8257_v54 = vpop.f32.mrf.mxu1  ;;  %8544 = vmatmul.mubr.bf16.gmra.mxu1 %v4198_v42  ;;  %v4670_v23 = vld [vmem:[#allocation2 + $0x219] sm:$0xff] }
 0x41b   :  { %15245 = vst [vmem:[#allocation12_spill] sm:$0xff] %v11550_v7  ;;  %v11553_v56 = vadd.f32 %v2998_v10, %v2569_v28  ;;  %v2574_v43 = vadd.f32 %v8257_v54, %v15248_v1  ;;  %8547 = vmatprep.mubr.bf16.mxu1 %v4199_v15  ;;  %v8338_v42 = vpop.f32.mrf.mxu0  ;;  %v4669_v10 = vld [vmem:[#allocation2 + $0x211] sm:$0xff]  ;;  %v4714_v7 = vpack.c.bf16 %v4668_v46, %v4667_v52 }
 0x41c   :  { %v2497_v6 = vpop.f32.mrf.mxu1  ;;  %v15251_v54 = vld [vmem:[#allocation16_spill] sm:$0xff] }
 0x41d   :  { %15247 = vst [vmem:[#allocation14_spill] sm:$0xff] %v11553_v56  ;;  %v11556_v31 = vadd.f32 %v8337_v58, %v2574_v43  ;;  %v2572_v27 = vadd.f32 %v2497_v6, %v15250_v5  ;;  %v3014_v1 = vpop.f32.mrf.mxu0  ;;  %v4200_v56 = vpack.c.bf16 %v4154_v3, %v4153_v39  ;;  %v15252_v43 = vld [vmem:[#allocation24_spill] sm:$0xff]  ;;  %v4201_v5 = vpack.c.bf16 %v4156_v57, %v4155_v19  ;;  %v4157_v39 = vld [vmem:[#allocation2 + $0x228] sm:$0xff]  ;;  %v4159_v57 = vld [vmem:[#allocation2 + $0x240] sm:$0xff] }
 0x41e   :  { %v8258_v33 = vpop.f32.mrf.mxu1  ;;  %v4158_v3 = vld [vmem:[#allocation2 + $0x230] sm:$0xff] }
 0x41f   :  { %15249 = vst [vmem:[#allocation17_spill] sm:$0xff] %v11556_v31  ;;  %v11559_v28 = vadd.f32 %v3011_v60, %v2572_v27  ;;  %v2575_v50 = vadd.f32 %v8258_v33, %v15251_v54  ;;  %v4715_v31 = vpack.c.bf16 %v4670_v23, %v4669_v10  ;;  %v8437_v63 = vpop.f32.mrf.mxu0  ;;  %v15253_v60 = vld [vmem:[#allocation26_spill] sm:$0xff]  ;;  %v4671_v19 = vld [vmem:[#allocation2 + $0x229] sm:$0xff] }
 0x420   :  { %v2500_v15 = vpop.f32.mrf.mxu1  ;;  %8628 = vmatmul.mubr.bf16.gmra.mxu0 %v4714_v7  ;;  %v4160_v7 = vld [vmem:[#allocation2 + $0x248] sm:$0xff] }
 0x421   :  { %v11562_v58 = vadd.f32 %v8338_v42, %v2575_v50  ;;  %v2573_v6 = vadd.f32 %v2500_v15, %v15252_v43  ;;  %8631 = vmatprep.mubr.bf16.mxu0 %v4715_v31  ;;  %v3799_v54 = vpop.f32.mrf.mxu0  ;;  %v4672_v42 = vld [vmem:[#allocation2 + $0x231] sm:$0xff]  ;;  %v4673_v23 = vld [vmem:[#allocation2 + $0x241] sm:$0xff]  ;;  %v4674_v50 = vld [vmem:[#allocation2 + $0x249] sm:$0xff]  ;;  %v4202_v43 = vpack.c.bf16 %v4158_v3, %v4157_v39 }
 0x422   :  { %v8357_v44 = vpop.f32.mrf.mxu1  ;;  %8548 = vmatmul.mubr.bf16.gmra.mxu1 %v4200_v56  ;;  %v4161_v39 = vld [vmem:[#allocation2 + $0x258] sm:$0xff]  ;;  %v4162_v3 = vld [vmem:[#allocation2 + $0x260] sm:$0xff] }
 0x423   :  { %v11565_v20 = vadd.f32 %v3014_v1, %v2573_v6  ;;  %v3542_v27 = vadd.f32 %v8357_v44, %v15253_v60  ;;  %8551 = vmatprep.mubr.bf16.mxu1 %v4201_v5  ;;  %v8438_v56 = vpop.f32.mrf.mxu0  ;;  %v4716_v6 = vpack.c.bf16 %v4672_v42, %v4671_v19  ;;  %v4203_v5 = vpack.c.bf16 %v4160_v7, %v4159_v57  ;;  %v4675_v42 = vld [vmem:[#allocation2 + $0x259] sm:$0xff]  ;;  %v4676_v57 = vld [vmem:[#allocation2 + $0x261] sm:$0xff] }
 0x424   :  { %v3285_v33 = vpop.f32.mrf.mxu1  ;;  %v4717_v60 = vpack.c.bf16 %v4674_v50, %v4673_v23  ;;  %v4164_v23 = vld [vmem:[#allocation2 + $0x278] sm:$0xff] }
 0x425   :  { %v11568_v52 = vadd.f32 %v8437_v63, %v3542_v27  ;;  %v3540_v46 = vadd.f32 %v3285_v33, %v11354_v40  ;;  %v3802_v1 = vpop.f32.mrf.mxu0  ;;  %v4677_v50 = vld [vmem:[#allocation2 + $0x271] sm:$0xff] }
 0x426   :  { %v8358_v10 = vpop.f32.mrf.mxu1 }
 0x427   :  { %15254 = vst [vmem:[#allocation18_spill] sm:$0xff] %v11568_v52  ;;  %v11571_v15 = vadd.f32 %v3799_v54, %v3540_v46  ;;  %v3543_v44 = vadd.f32 %v8358_v10, %v11357_v13  ;;  %v8441_v33 = vpop.f32.mrf.mxu0  ;;  %v4163_v10 = vld [vmem:[#allocation2 + $0x270] sm:$0xff] }
 0x428   :  { %v3288_v31 = vpop.f32.mrf.mxu1  ;;  %8632 = vmatmul.mubr.bf16.gmra.mxu0 %v4716_v6  ;;  %v4204_v6 = vpack.c.bf16 %v4162_v3, %v4161_v39  ;;  %v4165_v39 = vld [vmem:[#allocation2 + $0x288] sm:$0xff]  ;;  %v4166_v3 = vld [vmem:[#allocation2 + $0x290] sm:$0xff] }
 0x429   :  { %v11574_v63 = vadd.f32 %v8438_v56, %v3543_v44  ;;  %v3541_v40 = vadd.f32 %v3288_v31, %v11360_v22  ;;  %8635 = vmatprep.mubr.bf16.mxu0 %v4717_v60  ;;  %v3815_v46 = vpop.f32.mrf.mxu0  ;;  %v4678_v44 = vld [vmem:[#allocation2 + $0x279] sm:$0xff]  ;;  %v4205_v60 = vpack.c.bf16 %v4164_v23, %v4163_v10  ;;  %v4680_v10 = vld [vmem:[#allocation2 + $0x291] sm:$0xff] }
 0x42a   :  { %v8361_v27 = vpop.f32.mrf.mxu1  ;;  %8552 = vmatmul.mubr.bf16.gmra.mxu1 %v4202_v43 }
 0x42b   :  { %v11577_v52 = vadd.f32 %v3802_v1, %v3541_v40  ;;  %v3546_v54 = vadd.f32 %v8361_v27, %v11363_v48  ;;  %8555 = vmatprep.mubr.bf16.mxu1 %v4203_v5  ;;  %v8442_v7 = vpop.f32.mrf.mxu0  ;;  %v4718_v40 = vpack.c.bf16 %v4676_v57, %v4675_v42  ;;  %v4719_v27 = vpack.c.bf16 %v4678_v44, %v4677_v50  ;;  %v4679_v57 = vld [vmem:[#allocation2 + $0x289] sm:$0xff]  ;;  %v4681_v44 = vld [vmem:[#allocation2 + $0x2a1] sm:$0xff] }
 0x42c   :  { %v3301_v13 = vpop.f32.mrf.mxu1  ;;  %v4168_v50 = vld [vmem:[#allocation2 + $0x2a8] sm:$0xff] }
 0x42d   :  { %v11580_v19 = vadd.f32 %v8441_v33, %v3546_v54  ;;  %v3544_v22 = vadd.f32 %v3301_v13, %v11366_v4  ;;  %v3818_v43 = vpop.f32.mrf.mxu0 }
 0x42e   :  { %v8362_v56 = vpop.f32.mrf.mxu1 }
 0x42f   :  { %v11583_v31 = vadd.f32 %v3815_v46, %v3544_v22  ;;  %v3547_v48 = vadd.f32 %v8362_v56, %v11369_v36  ;;  %v8445_v54 = vpop.f32.mrf.mxu0  ;;  %v4167_v56 = vld [vmem:[#allocation2 + $0x2a0] sm:$0xff] }
 0x430   :  { %v3304_v1 = vpop.f32.mrf.mxu1  ;;  %8636 = vmatmul.mubr.bf16.gmra.mxu0 %v4718_v40  ;;  %v4206_v40 = vpack.c.bf16 %v4166_v3, %v4165_v39  ;;  %v4169_v39 = vld [vmem:[#allocation2 + $0x2b8] sm:$0xff]  ;;  %v4170_v3 = vld [vmem:[#allocation2 + $0x2c0] sm:$0xff] }
 0x431   :  { %v11586_v5 = vadd.f32 %v8442_v7, %v3547_v48  ;;  %v3545_v4 = vadd.f32 %v3304_v1, %v11372_v62  ;;  %8639 = vmatprep.mubr.bf16.mxu0 %v4719_v27  ;;  %v3831_v22 = vpop.f32.mrf.mxu0  ;;  %v4682_v48 = vld [vmem:[#allocation2 + $0x2a9] sm:$0xff]  ;;  %v4207_v27 = vpack.c.bf16 %v4168_v50, %v4167_v56  ;;  %v4684_v56 = vld [vmem:[#allocation2 + $0x2c1] sm:$0xff] }
 0x432   :  { %v8365_v33 = vpop.f32.mrf.mxu1  ;;  %8556 = vmatmul.mubr.bf16.gmra.mxu1 %v4204_v6 }
 0x433   :  { %v11589_v13 = vadd.f32 %v3818_v43, %v3545_v4  ;;  %v3550_v46 = vadd.f32 %v8365_v33, %v11375_v16  ;;  %8559 = vmatprep.mubr.bf16.mxu1 %v4205_v60  ;;  %v8446_v23 = vpop.f32.mrf.mxu0  ;;  %v4720_v4 = vpack.c.bf16 %v4680_v10, %v4679_v57  ;;  %v4721_v33 = vpack.c.bf16 %v4682_v48, %v4681_v44  ;;  %v4683_v10 = vld [vmem:[#allocation2 + $0x2b9] sm:$0xff]  ;;  %v4685_v48 = vld [vmem:[#allocation2 + $0x2d1] sm:$0xff] }
 0x434   :  { %v3317_v36 = vpop.f32.mrf.mxu1  ;;  %v4172_v44 = vld [vmem:[#allocation2 + $0x2d8] sm:$0xff] }
 0x435   :  { %v11592_v42 = vadd.f32 %v8445_v54, %v3550_v46  ;;  %v3548_v62 = vadd.f32 %v3317_v36, %v11378_v51  ;;  %v3834_v6 = vpop.f32.mrf.mxu0 }
 0x436   :  { %v8366_v7 = vpop.f32.mrf.mxu1 }
 0x437   :  { %v11595_v1 = vadd.f32 %v3831_v22, %v3548_v62  ;;  %v3551_v16 = vadd.f32 %v8366_v7, %v11381_v9  ;;  %v8449_v46 = vpop.f32.mrf.mxu0  ;;  %v4171_v7 = vld [vmem:[#allocation2 + $0x2d0] sm:$0xff] }
 0x438   :  { %v3320_v43 = vpop.f32.mrf.mxu1  ;;  %8640 = vmatmul.mubr.bf16.gmra.mxu0 %v4720_v4  ;;  %v4208_v4 = vpack.c.bf16 %v4170_v3, %v4169_v39  ;;  %v4173_v39 = vld [vmem:[#allocation2 + $0x2e8] sm:$0xff]  ;;  %v4174_v3 = vld [vmem:[#allocation2 + $0x2f0] sm:$0xff] }
 0x439   :  { %v11598_v60 = vadd.f32 %v8446_v23, %v3551_v16  ;;  %v3549_v51 = vadd.f32 %v3320_v43, %v11384_v55  ;;  %8643 = vmatprep.mubr.bf16.mxu0 %v4721_v33  ;;  %v3847_v62 = vpop.f32.mrf.mxu0  ;;  %v4686_v16 = vld [vmem:[#allocation2 + $0x2d9] sm:$0xff]  ;;  %v4209_v33 = vpack.c.bf16 %v4172_v44, %v4171_v7  ;;  %v4688_v7 = vld [vmem:[#allocation2 + $0x2f1] sm:$0xff] }
 0x43a   :  { %v8369_v54 = vpop.f32.mrf.mxu1  ;;  %8560 = vmatmul.mubr.bf16.gmra.mxu1 %v4206_v40 }
 0x43b   :  { %v11601_v36 = vadd.f32 %v3834_v6, %v3549_v51  ;;  %v3554_v22 = vadd.f32 %v8369_v54, %v11387_v47  ;;  %8563 = vmatprep.mubr.bf16.mxu1 %v4207_v27  ;;  %v8450_v50 = vpop.f32.mrf.mxu0  ;;  %v4722_v51 = vpack.c.bf16 %v4684_v56, %v4683_v10  ;;  %v4723_v54 = vpack.c.bf16 %v4686_v16, %v4685_v48  ;;  %v4687_v56 = vld [vmem:[#allocation2 + $0x2e9] sm:$0xff]  ;;  %v4689_v16 = vld [vmem:[#allocation2 + $0x301] sm:$0xff] }
 0x43c   :  { %v3333_v9 = vpop.f32.mrf.mxu1  ;;  %v4176_v48 = vld [vmem:[#allocation2 + $0x308] sm:$0xff] }
 0x43d   :  { %v11604_v57 = vadd.f32 %v8449_v46, %v3554_v22  ;;  %v3552_v55 = vadd.f32 %v3333_v9, %v11390_v25  ;;  %v3850_v40 = vpop.f32.mrf.mxu0 }
 0x43e   :  { %v8370_v23 = vpop.f32.mrf.mxu1 }
 0x43f   :  { %v11607_v43 = vadd.f32 %v3847_v62, %v3552_v55  ;;  %v3555_v47 = vadd.f32 %v8370_v23, %v11393_v59  ;;  %v8453_v22 = vpop.f32.mrf.mxu0  ;;  %v4175_v23 = vld [vmem:[#allocation2 + $0x300] sm:$0xff] }
 0x440   :  { %v3336_v6 = vpop.f32.mrf.mxu1  ;;  %8644 = vmatmul.mubr.bf16.gmra.mxu0 %v4722_v51  ;;  %v4210_v51 = vpack.c.bf16 %v4174_v3, %v4173_v39  ;;  %v4692_v39 = vld [vmem:[#allocation2 + $0x321] sm:$0xff] }
 0x441   :  { %v11610_v27 = vadd.f32 %v8450_v50, %v3555_v47  ;;  %v3553_v25 = vadd.f32 %v3336_v6, %v11396_v30  ;;  %8647 = vmatprep.mubr.bf16.mxu0 %v4723_v54  ;;  %v3863_v55 = vpop.f32.mrf.mxu0  ;;  %v4690_v47 = vld [vmem:[#allocation2 + $0x309] sm:$0xff]  ;;  %v4211_v54 = vpack.c.bf16 %v4176_v48, %v4175_v23  ;;  %v4180_v48 = vld [vmem:[#allocation2 + $0x338] sm:$0xff] }
 0x442   :  { %v8373_v46 = vpop.f32.mrf.mxu1  ;;  %8564 = vmatmul.mubr.bf16.gmra.mxu1 %v4208_v4  ;;  %v4179_v23 = vld [vmem:[#allocation2 + $0x330] sm:$0xff] }
 0x443   :  { %v11613_v9 = vadd.f32 %v3850_v40, %v3553_v25  ;;  %v3558_v62 = vadd.f32 %v8373_v46, %v11399_v0  ;;  %8567 = vmatprep.mubr.bf16.mxu1 %v4209_v33  ;;  %v8454_v44 = vpop.f32.mrf.mxu0  ;;  %v4724_v25 = vpack.c.bf16 %v4688_v7, %v4687_v56  ;;  %v4725_v46 = vpack.c.bf16 %v4690_v47, %v4689_v16  ;;  %v4691_v7 = vld [vmem:[#allocation2 + $0x319] sm:$0xff]  ;;  %v4693_v16 = vld [vmem:[#allocation2 + $0x331] sm:$0xff] }
 0x444   :  { %v3349_v59 = vpop.f32.mrf.mxu1  ;;  %v4694_v47 = vld [vmem:[#allocation2 + $0x339] sm:$0xff] }
 0x445   :  { %v11616_v10 = vadd.f32 %v8453_v22, %v3558_v62  ;;  %v3556_v30 = vadd.f32 %v3349_v59, %v11402_v2  ;;  %v11622_v4 = vpop.f32.mrf.mxu0 }
 0x446   :  { %v8374_v50 = vpop.f32.mrf.mxu1 }
 0x447   :  { %v11619_v6 = vadd.f32 %v3863_v55, %v3556_v30  ;;  %v3559_v0 = vadd.f32 %v8374_v50, %v11405_v14  ;;  %v8457_v62 = vpop.f32.mrf.mxu0  ;;  %v4177_v30 = vld [vmem:[#allocation2 + $0x318] sm:$0xff] }
 0x448   :  { %v3352_v40 = vpop.f32.mrf.mxu1  ;;  %8648 = vmatmul.mubr.bf16.gmra.mxu0 %v4724_v25 }
 0x449   :  { %v11624_v33 = vadd.f32 %v8454_v44, %v3559_v0  ;;  %v11627_v2 = vadd.f32 %v3352_v40, %v11408_v29  ;;  %8651 = vmatprep.mubr.bf16.mxu0 %v4725_v46  ;;  %v3879_v55 = vpop.f32.mrf.mxu0  ;;  %v4178_v29 = vld [vmem:[#allocation2 + $0x320] sm:$0xff] }
 0x44a   :  { %v8377_v22 = vpop.f32.mrf.mxu1  ;;  %8568 = vmatmul.mubr.bf16.gmra.mxu1 %v4210_v51  ;;  %v4212_v25 = vpack.c.bf16 %v4178_v29, %v4177_v30 }
 0x44b   :  { %v3562_v59 = vadd.f32 %v8377_v22, %v11411_v11  ;;  %8571 = vmatprep.mubr.bf16.mxu1 %v4211_v54  ;;  %v8458_v44 = vpop.f32.mrf.mxu0  ;;  %v4726_v54 = vpack.c.bf16 %v4692_v39, %v4691_v7  ;;  %v4213_v22 = vpack.c.bf16 %v4180_v48, %v4179_v23  ;;  %v5147_v48 = vld [vmem:[#allocation2 + $0x32] sm:$0xff] }
 0x44c   :  { %v3365_v14 = vpop.f32.mrf.mxu1 }
 0x44d   :  { %v11630_v3 = vadd.f32 %v8457_v62, %v3562_v59  ;;  %v3560_v56 = vadd.f32 %v3365_v14, %v11414_v49  ;;  %v11636_v51 = vpop.f32.mrf.mxu0  ;;  %v4727_v62 = vpack.c.bf16 %v4694_v47, %v4693_v16  ;;  %v5148_v16 = vld [vmem:[#allocation2 + $0x3a] sm:$0xff] }
 0x44e   :  { %v8378_v50 = vpop.f32.mrf.mxu1  ;;  %15255 = vst [vmem:[#allocation16_spill] sm:$0xff] %v11636_v51  ;;  %v4696_v51 = vld [vmem:[#allocation2 + $0x351] sm:$0xff] }
 0x44f   :  { %v11633_v0 = vadd.f32 %v3879_v55, %v3560_v56  ;;  %v3563_v11 = vadd.f32 %v8378_v50, %v11417_v17  ;;  %v8461_v14 = vpop.f32.mrf.mxu0  ;;  %v15256_v55 = vld [vmem:[#allocation32_spill] sm:$0xff]  ;;  %v4181_v17 = vld [vmem:[#allocation2 + $0x348] sm:$0xff] }
 0x450   :  { %v3368_v40 = vpop.f32.mrf.mxu1  ;;  %8652 = vmatmul.mubr.bf16.gmra.mxu0 %v4726_v54  ;;  %v4695_v50 = vld [vmem:[#allocation2 + $0x349] sm:$0xff] }
 0x451   :  { %v11638_v46 = vadd.f32 %v8458_v44, %v3563_v11  ;;  %v11641_v49 = vadd.f32 %v3368_v40, %v11420_v35  ;;  %8655 = vmatprep.mubr.bf16.mxu0 %v4727_v62  ;;  %v3895_v39 = vpop.f32.mrf.mxu0  ;;  %v4214_v44 = vpack.c.bf16 %v11544_v53, %v4181_v17  ;;  %v4728_v47 = vpack.c.bf16 %v4696_v51, %v4695_v50  ;;  %v5149_v17 = vld [vmem:[#allocation2 + $0x4a] sm:$0xff]  ;;  %v5150_v50 = vld [vmem:[#allocation2 + $0x52] sm:$0xff] }
 0x452   :  { %v8381_v59 = vpop.f32.mrf.mxu1  ;;  %8572 = vmatmul.mubr.bf16.gmra.mxu1 %v4212_v25 }
 0x453   :  { %v3566_v56 = vadd.f32 %v8381_v59, %v15256_v55  ;;  %8575 = vmatprep.mubr.bf16.mxu1 %v4213_v22  ;;  %v8462_v23 = vpop.f32.mrf.mxu0 }
 0x454   :  { %v3381_v30 = vpop.f32.mrf.mxu1 }
 0x455   :  { %v11644_v29 = vadd.f32 %v8461_v14, %v3566_v56  ;;  %v3564_v35 = vadd.f32 %v3381_v30, %v11426_v41  ;;  %v11651_v54 = vpop.f32.mrf.mxu0  ;;  %v5211_v41 = vpack.c.bf16 %v5148_v16, %v5147_v48 }
 0x456   :  { %v8382_v7 = vpop.f32.mrf.mxu1 }
 0x457   :  { %v11648_v11 = vadd.f32 %v3895_v39, %v3564_v35  ;;  %v3567_v40 = vadd.f32 %v8382_v7, %v11429_v12  ;;  %v8465_v14 = vpop.f32.mrf.mxu0  ;;  %v5152_v35 = vld [vmem:[#allocation2 + $0x6a] sm:$0xff] }
 0x458   :  { %v3384_v25 = vpop.f32.mrf.mxu1  ;;  %8656 = vmatmul.mubr.bf16.gmra.mxu0 %v4728_v47 }
 0x459   :  { %v11653_v22 = vadd.f32 %v8462_v23, %v3567_v40  ;;  %v11656_v62 = vadd.f32 %v3384_v25, %v11432_v24  ;;  %v3911_v55 = vpop.f32.mrf.mxu0  ;;  %v5151_v24 = vld [vmem:[#allocation2 + $0x62] sm:$0xff] }
 0x45a   :  { %v8385_v59 = vpop.f32.mrf.mxu1  ;;  %8576 = vmatmul.mubr.bf16.gmra.mxu1 %v4214_v44 }
 0x45b   :  { %v3570_v53 = vadd.f32 %v8385_v59, %v11435_v21  ;;  %8675 = vmatprep.mubr.bf16.mxu1 %v5211_v41  ;;  %v8466_v39 = vpop.f32.mrf.mxu0  ;;  %v5212_v21 = vpack.c.bf16 %v5150_v50, %v5149_v17  ;;  %v5155_v50 = vld [vmem:[#allocation2 + $0x92] sm:$0xff] }
 0x45c   :  { %v3397_v51 = vpop.f32.mrf.mxu1 }
 0x45d   :  { %v11659_v56 = vadd.f32 %v8465_v14, %v3570_v53  ;;  %v3568_v12 = vadd.f32 %v3397_v51, %v11438_v38  ;;  %v11665_v48 = vpop.f32.mrf.mxu0  ;;  %v5213_v38 = vpack.c.bf16 %v5152_v35, %v5151_v24  ;;  %v5153_v51 = vld [vmem:[#allocation2 + $0x7a] sm:$0xff] }
 0x45e   :  { %v8386_v30 = vpop.f32.mrf.mxu1 }
 0x45f   :  { %v11662_v7 = vadd.f32 %v3911_v55, %v3568_v12  ;;  %v3571_v23 = vadd.f32 %v8386_v30, %v11444_v45  ;;  %v8469_v25 = vpop.f32.mrf.mxu0  ;;  %v5154_v55 = vld [vmem:[#allocation2 + $0x82] sm:$0xff] }
 0x460   :  { %v3400_v44 = vpop.f32.mrf.mxu1 }
 0x461   :  { %v11667_v16 = vadd.f32 %v8466_v39, %v3571_v23  ;;  %v11670_v47 = vadd.f32 %v3400_v44, %v11447_v18  ;;  %v3927_v14 = vpop.f32.mrf.mxu0  ;;  %v5156_v18 = vld [vmem:[#allocation2 + $0x9a] sm:$0xff] }
 0x462   :  { %v8389_v40 = vpop.f32.mrf.mxu1  ;;  %8676 = vmatmul.mubr.bf16.vlgmr.msra.gmra.mxu1 %v5212_v21 }
 0x463   :  { %v3574_v41 = vadd.f32 %v8389_v40, %v11454_v37  ;;  %8679 = vmatprep.mubr.bf16.mxu1 %v5213_v38  ;;  %v8470_v17 = vpop.f32.mrf.mxu0  ;;  %v5214_v37 = vpack.c.bf16 %v5154_v55, %v5153_v51  ;;  %v15257_v40 = vld [vmem:[#allocation9_spill] sm:$0xff] }
 0x464   :  { %v3413_v59 = vpop.f32.mrf.mxu1  ;;  %v5158_v51 = vld [vmem:[#allocation2 + $0xb2] sm:$0xff] }
 0x465   :  { %v11673_v53 = vadd.f32 %v8469_v25, %v3574_v41  ;;  %v3572_v45 = vadd.f32 %v3413_v59, %v11457_v8  ;;  %v11679_v35 = vpop.f32.mrf.mxu0  ;;  %v5215_v8 = vpack.c.bf16 %v5156_v18, %v5155_v50 }
 0x466   :  { %v8390_v12 = vpop.f32.mrf.mxu1 }
 0x467   :  { %v11676_v30 = vadd.f32 %v3927_v14, %v3572_v45  ;;  %v3575_v39 = vadd.f32 %v8390_v12, %v11460_v26  ;;  %v8473_v38 = vpop.f32.mrf.mxu0  ;;  %v5157_v45 = vld [vmem:[#allocation2 + $0xaa] sm:$0xff] }
 0x468   :  { %v3416_v24 = vpop.f32.mrf.mxu1 }
 0x469   :  { %v11681_v23 = vadd.f32 %v8470_v17, %v3575_v39  ;;  %v11684_v44 = vadd.f32 %v3416_v24, %v11466_v32  ;;  %v3943_v59 = vpop.f32.mrf.mxu0  ;;  %v5159_v17 = vld [vmem:[#allocation2 + $0xc2] sm:$0xff]  ;;  %v5160_v32 = vld [vmem:[#allocation2 + $0xca] sm:$0xff] }
 0x46a   :  { %v8393_v21 = vpop.f32.mrf.mxu1  ;;  %8680 = vmatmul.mubr.bf16.gmra.mxu1 %v5214_v37  ;;  %v5216_v37 = vpack.c.bf16 %v5158_v51, %v5157_v45  ;;  %v5162_v45 = vld [vmem:[#allocation2 + $0xe2] sm:$0xff] }
 0x46b   :  { %v3578_v25 = vadd.f32 %v8393_v21, %v15257_v40  ;;  %8683 = vmatprep.mubr.bf16.mxu1 %v5215_v8  ;;  %v8474_v12 = vpop.f32.mrf.mxu0  ;;  %v15262_v21 = vld [vmem:[#allocation27_spill] sm:$0xff] }
 0x46c   :  { %v3429_v41 = vpop.f32.mrf.mxu1 }
 0x46d   :  { %v11687_v14 = vadd.f32 %v8473_v38, %v3578_v25  ;;  %v3576_v26 = vadd.f32 %v3429_v41, %v11475_v61  ;;  %v11693_v24 = vpop.f32.mrf.mxu0  ;;  %v5217_v61 = vpack.c.bf16 %v5160_v32, %v5159_v17  ;;  %v15264_v41 = vld [vmem:[#allocation28_spill] sm:$0xff]  ;;  %v15268_v17 = vld [vmem:[#allocation30_spill] sm:$0xff] }
 0x46e   :  { %v8394_v55 = vpop.f32.mrf.mxu1  ;;  %15260 = vst [vmem:[#allocation32_spill] sm:$0xff] %v11693_v24  ;;  %v5161_v24 = vld [vmem:[#allocation2 + $0xda] sm:$0xff] }
 0x46f   :  { %15258 = vst [vmem:[#allocation24_spill] sm:$0xff] %v11687_v14  ;;  %v11690_v39 = vadd.f32 %v3943_v59, %v3576_v26  ;;  %v3579_v50 = vadd.f32 %v8394_v55, %v11478_v34  ;;  %v8477_v25 = vpop.f32.mrf.mxu0  ;;  %v15266_v34 = vld [vmem:[#allocation29_spill] sm:$0xff] }
 0x470   :  { %v3432_v18 = vpop.f32.mrf.mxu1 }
 0x471   :  { %15259 = vst [vmem:[#allocation26_spill] sm:$0xff] %v11690_v39  ;;  %v11695_v8 = vadd.f32 %v8474_v12, %v3579_v50  ;;  %v11698_v38 = vadd.f32 %v3432_v18, %v15262_v21  ;;  %v3959_v26 = vpop.f32.mrf.mxu0  ;;  %v5163_v50 = vld [vmem:[#allocation2 + $0xf2] sm:$0xff]  ;;  %v5164_v18 = vld [vmem:[#allocation2 + $0xfa] sm:$0xff] }
 0x472   :  { %v8397_v40 = vpop.f32.mrf.mxu1  ;;  %8684 = vmatmul.mubr.bf16.gmra.mxu1 %v5216_v37 }
 0x473   :  { %15261 = vst [vmem:[#allocation9_spill] sm:$0xff] %v11695_v8  ;;  %15263 = vst [vmem:[#allocation27_spill] sm:$0xff] %v11698_v38  ;;  %v3582_v14 = vadd.f32 %v8397_v40, %v15264_v41  ;;  %8687 = vmatprep.mubr.bf16.mxu1 %v5217_v61  ;;  %v8478_v12 = vpop.f32.mrf.mxu0  ;;  %v5218_v61 = vpack.c.bf16 %v5162_v45, %v5161_v24  ;;  %v5219_v41 = vpack.c.bf16 %v5164_v18, %v5163_v50  ;;  %v5166_v24 = vld [vmem:[#allocation2 + $0x112] sm:$0xff]  ;;  %v15277_v50 = vld [vmem:[#allocation34_spill] sm:$0xff] }
 0x474   :  { %v3445_v59 = vpop.f32.mrf.mxu1 }
 0x475   :  { %v11701_v39 = vadd.f32 %v8477_v25, %v3582_v14  ;;  %v3580_v55 = vadd.f32 %v3445_v59, %v15266_v34  ;;  %v11707_v8 = vpop.f32.mrf.mxu0  ;;  %v15271_v14 = vld [vmem:[#allocation33_spill] sm:$0xff] }
 0x476   :  { %v8398_v51 = vpop.f32.mrf.mxu1  ;;  %15269 = vst [vmem:[#allocation30_spill] sm:$0xff] %v11707_v8  ;;  %v5165_v8 = vld [vmem:[#allocation2 + $0x10a] sm:$0xff] }
 0x477   :  { %15265 = vst [vmem:[#allocation28_spill] sm:$0xff] %v11701_v39  ;;  %v11704_v21 = vadd.f32 %v3959_v26, %v3580_v55  ;;  %v3583_v32 = vadd.f32 %v8398_v51, %v15268_v17  ;;  %v8481_v34 = vpop.f32.mrf.mxu0  ;;  %v15273_v39 = vld [vmem:[#allocation31_spill] sm:$0xff] }
 0x478   :  { %v3448_v37 = vpop.f32.mrf.mxu1  ;;  %v15275_v51 = vld [vmem:[#allocation19_spill] sm:$0xff] }
 0x479   :  { %15267 = vst [vmem:[#allocation29_spill] sm:$0xff] %v11704_v21  ;;  %v11709_v40 = vadd.f32 %v8478_v12, %v3583_v32  ;;  %v11712_v25 = vadd.f32 %v3448_v37, %v15271_v14  ;;  %v3975_v55 = vpop.f32.mrf.mxu0  ;;  %v5167_v32 = vld [vmem:[#allocation2 + $0x122] sm:$0xff]  ;;  %v5168_v37 = vld [vmem:[#allocation2 + $0x12a] sm:$0xff] }
 0x47a   :  { %v8401_v59 = vpop.f32.mrf.mxu1  ;;  %8688 = vmatmul.mubr.bf16.gmra.mxu1 %v5218_v61 }
 0x47b   :  { %15270 = vst [vmem:[#allocation35_spill] sm:$0xff] %v11709_v40  ;;  %15272 = vst [vmem:[#allocation33_spill] sm:$0xff] %v11712_v25  ;;  %v3586_v38 = vadd.f32 %v8401_v59, %v15273_v39  ;;  %8691 = vmatprep.mubr.bf16.mxu1 %v5219_v41  ;;  %v8482_v12 = vpop.f32.mrf.mxu0  ;;  %v5220_v39 = vpack.c.bf16 %v5166_v24, %v5165_v8  ;;  %v5170_v8 = vld [vmem:[#allocation2 + $0x142] sm:$0xff] }
 0x47c   :  { %v3461_v26 = vpop.f32.mrf.mxu1 }
 0x47d   :  { %v11715_v21 = vadd.f32 %v8481_v34, %v3586_v38  ;;  %v3584_v17 = vadd.f32 %v3461_v26, %v15275_v51  ;;  %v11721_v40 = vpop.f32.mrf.mxu0  ;;  %v15280_v38 = vld [vmem:[#allocation20_spill] sm:$0xff]  ;;  %v5221_v34 = vpack.c.bf16 %v5168_v37, %v5167_v32  ;;  %v15286_v32 = vld [vmem:[#allocation22_spill] sm:$0xff] }
 0x47e   :  { %v8402_v45 = vpop.f32.mrf.mxu1  ;;  %15278 = vst [vmem:[#allocation34_spill] sm:$0xff] %v11721_v40  ;;  %v5169_v40 = vld [vmem:[#allocation2 + $0x13a] sm:$0xff] }
 0x47f   :  { %15274 = vst [vmem:[#allocation31_spill] sm:$0xff] %v11715_v21  ;;  %v11718_v14 = vadd.f32 %v3975_v55, %v3584_v17  ;;  %v3587_v18 = vadd.f32 %v8402_v45, %v15277_v50  ;;  %v8485_v51 = vpop.f32.mrf.mxu0  ;;  %v15282_v21 = vld [vmem:[#allocation21_spill] sm:$0xff]  ;;  %v15284_v45 = vld [vmem:[#allocation7_spill] sm:$0xff] }
 0x480   :  { %v3464_v61 = vpop.f32.mrf.mxu1 }
 0x481   :  { %15276 = vst [vmem:[#allocation19_spill] sm:$0xff] %v11718_v14  ;;  %v11723_v41 = vadd.f32 %v8482_v12, %v3587_v18  ;;  %v11726_v59 = vadd.f32 %v3464_v61, %v15280_v38  ;;  %v3991_v17 = vpop.f32.mrf.mxu0  ;;  %v5171_v18 = vld [vmem:[#allocation2 + $0x152] sm:$0xff]  ;;  %v5172_v61 = vld [vmem:[#allocation2 + $0x15a] sm:$0xff] }
 0x482   :  { %v8405_v26 = vpop.f32.mrf.mxu1  ;;  %8692 = vmatmul.mubr.bf16.gmra.mxu1 %v5220_v39 }
 0x483   :  { %15279 = vst [vmem:[#allocation36_spill] sm:$0xff] %v11723_v41  ;;  %15281 = vst [vmem:[#allocation20_spill] sm:$0xff] %v11726_v59  ;;  %v3590_v25 = vadd.f32 %v8405_v26, %v15282_v21  ;;  %8695 = vmatprep.mubr.bf16.mxu1 %v5221_v34  ;;  %v8486_v12 = vpop.f32.mrf.mxu0  ;;  %v5222_v21 = vpack.c.bf16 %v5170_v8, %v5169_v40  ;;  %v5174_v40 = vld [vmem:[#allocation2 + $0x172] sm:$0xff] }
 0x484   :  { %v3477_v55 = vpop.f32.mrf.mxu1 }
 0x485   :  { %v11729_v14 = vadd.f32 %v8485_v51, %v3590_v25  ;;  %v3588_v50 = vadd.f32 %v3477_v55, %v15284_v45  ;;  %v11735_v41 = vpop.f32.mrf.mxu0  ;;  %v15289_v25 = vld [vmem:[#allocation6_spill] sm:$0xff]  ;;  %v5223_v51 = vpack.c.bf16 %v5172_v61, %v5171_v18  ;;  %v15295_v18 = vld [vmem:[#allocation23_spill] sm:$0xff] }
 0x486   :  { %v8406_v24 = vpop.f32.mrf.mxu1  ;;  %15287 = vst [vmem:[#allocation22_spill] sm:$0xff] %v11735_v41  ;;  %v5173_v41 = vld [vmem:[#allocation2 + $0x16a] sm:$0xff] }
 0x487   :  { %15283 = vst [vmem:[#allocation21_spill] sm:$0xff] %v11729_v14  ;;  %v11732_v38 = vadd.f32 %v3991_v17, %v3588_v50  ;;  %v3591_v37 = vadd.f32 %v8406_v24, %v15286_v32  ;;  %v8489_v45 = vpop.f32.mrf.mxu0  ;;  %v15291_v14 = vld [vmem:[#allocation8_spill] sm:$0xff]  ;;  %v15293_v24 = vld [vmem:[#allocation11_spill] sm:$0xff] }
 0x488   :  { %v3480_v39 = vpop.f32.mrf.mxu1 }
 0x489   :  { %15285 = vst [vmem:[#allocation7_spill] sm:$0xff] %v11732_v38  ;;  %v11737_v34 = vadd.f32 %v8486_v12, %v3591_v37  ;;  %v11740_v26 = vadd.f32 %v3480_v39, %v15289_v25  ;;  %v4007_v50 = vpop.f32.mrf.mxu0  ;;  %v5175_v37 = vld [vmem:[#allocation2 + $0x182] sm:$0xff]  ;;  %v5176_v39 = vld [vmem:[#allocation2 + $0x18a] sm:$0xff] }
 0x48a   :  { %v8409_v55 = vpop.f32.mrf.mxu1  ;;  %8696 = vmatmul.mubr.bf16.gmra.mxu1 %v5222_v21 }
 0x48b   :  { %15288 = vst [vmem:[#allocation37_spill] sm:$0xff] %v11737_v34  ;;  %15290 = vst [vmem:[#allocation6_spill] sm:$0xff] %v11740_v26  ;;  %v3594_v59 = vadd.f32 %v8409_v55, %v15291_v14  ;;  %8699 = vmatprep.mubr.bf16.mxu1 %v5223_v51  ;;  %v8490_v12 = vpop.f32.mrf.mxu0  ;;  %v5224_v14 = vpack.c.bf16 %v5174_v40, %v5173_v41 }
 0x48c   :  { %v3493_v17 = vpop.f32.mrf.mxu1 }
 0x48d   :  { %v11743_v38 = vadd.f32 %v8489_v45, %v3594_v59  ;;  %v3592_v32 = vadd.f32 %v3493_v17, %v15293_v24  ;;  %v11749_v34 = vpop.f32.mrf.mxu0  ;;  %v15298_v59 = vld [vmem:[#allocation10_spill] sm:$0xff]  ;;  %v5225_v45 = vpack.c.bf16 %v5176_v39, %v5175_v37  ;;  %v15302_v39 = vld [vmem:[#allocation12_spill] sm:$0xff] }
 0x48e   :  { %v8410_v8 = vpop.f32.mrf.mxu1  ;;  %15296 = vst [vmem:[#allocation23_spill] sm:$0xff] %v11749_v34  ;;  %v15301_v34 = vld [vmem:[#allocation15_spill] sm:$0xff] }
 0x48f   :  { %15292 = vst [vmem:[#allocation8_spill] sm:$0xff] %v11743_v38  ;;  %v11746_v25 = vadd.f32 %v4007_v50, %v3592_v32  ;;  %v3595_v61 = vadd.f32 %v8410_v8, %v15295_v18  ;;  %v8493_v24 = vpop.f32.mrf.mxu0  ;;  %v15300_v38 = vld [vmem:[#allocation13_spill] sm:$0xff]  ;;  %v5178_v32 = vld [vmem:[#allocation2 + $0x1a2] sm:$0xff] }
 0x490   :  { %v3496_v21 = vpop.f32.mrf.mxu1  ;;  %v5177_v50 = vld [vmem:[#allocation2 + $0x19a] sm:$0xff] }
 0x491   :  { %15294 = vst [vmem:[#allocation11_spill] sm:$0xff] %v11746_v25  ;;  %v11751_v51 = vadd.f32 %v8490_v12, %v3595_v61  ;;  %v11754_v55 = vadd.f32 %v3496_v21, %v15298_v59  ;;  %v4023_v8 = vpop.f32.mrf.mxu0  ;;  %v5226_v61 = vpack.c.bf16 %v5178_v32, %v5177_v50  ;;  %v5179_v21 = vld [vmem:[#allocation2 + $0x1e2] sm:$0xff]  ;;  %v5180_v59 = vld [vmem:[#allocation2 + $0x1ea] sm:$0xff] }
 0x492   :  { %v8413_v17 = vpop.f32.mrf.mxu1  ;;  %8700 = vmatmul.mubr.bf16.gmra.mxu1 %v5224_v14 }
 0x493   :  { %15297 = vst [vmem:[#allocation38_spill] sm:$0xff] %v11751_v51  ;;  %15299 = vst [vmem:[#allocation10_spill] sm:$0xff] %v11754_v55  ;;  %v3598_v26 = vadd.f32 %v8413_v17, %v15300_v38  ;;  %8703 = vmatprep.mubr.bf16.mxu1 %v5225_v45  ;;  %v8494_v12 = vpop.f32.mrf.mxu0  ;;  %v15305_v17 = vld [vmem:[#allocation14_spill] sm:$0xff] }
 0x494   :  { %v3509_v25 = vpop.f32.mrf.mxu1 }
 0x495   :  { %v11757_v18 = vadd.f32 %v8493_v24, %v3598_v26  ;;  %v3596_v41 = vadd.f32 %v3509_v25, %v15301_v34  ;;  %v11763_v38 = vpop.f32.mrf.mxu0  ;;  %v5227_v26 = vpack.c.bf16 %v5180_v59, %v5179_v21  ;;  %v15306_v25 = vld [vmem:[#allocation17_spill] sm:$0xff] }
 0x496   :  { %v8414_v40 = vpop.f32.mrf.mxu1  ;;  %15303 = vst [vmem:[#allocation13_spill] sm:$0xff] %v11763_v38  ;;  %v5182_v38 = vld [vmem:[#allocation2 + $0x202] sm:$0xff] }
 0x497   :  { %v11760_v37 = vadd.f32 %v4023_v8, %v3596_v41  ;;  %v3599_v14 = vadd.f32 %v8414_v40, %v15302_v39  ;;  %v8497_v34 = vpop.f32.mrf.mxu0  ;;  %v5181_v39 = vld [vmem:[#allocation2 + $0x1fa] sm:$0xff] }
 0x498   :  { %v3512_v51 = vpop.f32.mrf.mxu1 }
 0x499   :  { %v11765_v45 = vadd.f32 %v8494_v12, %v3599_v14  ;;  %v11768_v55 = vadd.f32 %v3512_v51, %v15305_v17  ;;  %v4039_v8 = vpop.f32.mrf.mxu0  ;;  %v5184_v51 = vld [vmem:[#allocation2 + $0x21a] sm:$0xff] }
 0x49a   :  { %v8417_v24 = vpop.f32.mrf.mxu1  ;;  %8704 = vmatmul.mubr.bf16.gmra.mxu1 %v5226_v61 }
 0x49b   :  { %15304 = vst [vmem:[#allocation15_spill] sm:$0xff] %v11765_v45  ;;  %v3602_v50 = vadd.f32 %v8417_v24, %v15306_v25  ;;  %8707 = vmatprep.mubr.bf16.mxu1 %v5227_v26  ;;  %v8498_v14 = vpop.f32.mrf.mxu0  ;;  %v5183_v45 = vld [vmem:[#allocation2 + $0x212] sm:$0xff]  ;;  %v5228_v26 = vpack.c.bf16 %v5182_v38, %v5181_v39  ;;  %v5185_v38 = vld [vmem:[#allocation2 + $0x22a] sm:$0xff] }
 0x49c   :  { %v3525_v32 = vpop.f32.mrf.mxu1  ;;  %v5186_v39 = vld [vmem:[#allocation2 + $0x232] sm:$0xff] }
 0x49d   :  { %v11771_v41 = vadd.f32 %v8497_v34, %v3602_v50  ;;  %v3600_v40 = vadd.f32 %v3525_v32, %v11559_v28  ;;  %v11777_v59 = vpop.f32.mrf.mxu0  ;;  %v5229_v28 = vpack.c.bf16 %v5184_v51, %v5183_v45  ;;  %v15308_v32 = vld [vmem:[#allocation18_spill] sm:$0xff] }
 0x49e   :  { %v8418_v12 = vpop.f32.mrf.mxu1 }
 0x49f   :  { %15307 = vst [vmem:[#allocation12_spill] sm:$0xff] %v11771_v41  ;;  %v11774_v17 = vadd.f32 %v4039_v8, %v3600_v40  ;;  %v3603_v21 = vadd.f32 %v8418_v12, %v11562_v58  ;;  %v11784_v50 = vpop.f32.mrf.mxu0 }
 0x4a0   :  { %v3528_v61 = vpop.f32.mrf.mxu1 }
 0x4a1   :  { %v11779_v24 = vadd.f32 %v8498_v14, %v3603_v21  ;;  %v11782_v34 = vadd.f32 %v3528_v61, %v11565_v20  ;;  %v11789_v58 = vpop.f32.mrf.mxu0  ;;  %v5187_v20 = vld [vmem:[#allocation2 + $0x242] sm:$0xff]  ;;  %v5188_v14 = vld [vmem:[#allocation2 + $0x24a] sm:$0xff]  ;;  %v5230_v61 = vpack.c.bf16 %v5186_v39, %v5185_v38  ;;  %v5191_v38 = vld [vmem:[#allocation2 + $0x272] sm:$0xff] }
 0x4a2   :  { %v8517_v25 = vpop.f32.mrf.mxu1  ;;  %8708 = vmatmul.mubr.bf16.gmra.mxu1 %v5228_v26  ;;  %v5192_v39 = vld [vmem:[#allocation2 + $0x27a] sm:$0xff] }
 0x4a3   :  { %v11787_v41 = vadd.f32 %v8517_v25, %v15308_v32  ;;  %8711 = vmatprep.mubr.bf16.mxu1 %v5229_v28  ;;  %v11797_v51 = vpop.f32.mrf.mxu0  ;;  %v5231_v28 = vpack.c.bf16 %v5188_v14, %v5187_v20 }
 0x4a4   :  { %v4314_v8 = vpop.f32.mrf.mxu1  ;;  %15310 = vst [vmem:[#allocation17_spill] sm:$0xff] %v11797_v51  ;;  %v5190_v51 = vld [vmem:[#allocation2 + $0x262] sm:$0xff] }
 0x4a5   :  { %v11792_v40 = vadd.f32 %v4314_v8, %v11571_v15  ;;  %v11805_v32 = vpop.f32.mrf.mxu0 }
 0x4a6   :  { %v8518_v12 = vpop.f32.mrf.mxu1 }
 0x4a7   :  { %v11795_v45 = vadd.f32 %v8518_v12, %v11574_v63  ;;  %v5189_v12 = vld [vmem:[#allocation2 + $0x25a] sm:$0xff]  ;;  %v11813_v20 = vpop.f32.mrf.mxu0 }
 0x4a8   :  { %v4317_v21 = vpop.f32.mrf.mxu1  ;;  %15312 = vst [vmem:[#allocation39_spill] sm:$0xff] %v11813_v20 }
 0x4a9   :  { %15309 = vst [vmem:[#allocation14_spill] sm:$0xff] %v11795_v45  ;;  %v11800_v26 = vadd.f32 %v4317_v21, %v11577_v52 }
 0x4aa   :  { %v8521_v25 = vpop.f32.mrf.mxu1  ;;  %8712 = vmatmul.mubr.bf16.gmra.mxu1 %v5230_v61  ;;  %v5233_v61 = vpack.c.bf16 %v5192_v39, %v5191_v38 }
 0x4ab   :  { %v11803_v15 = vadd.f32 %v8521_v25, %v11580_v19  ;;  %8715 = vmatprep.mubr.bf16.mxu1 %v5231_v28  ;;  %v5232_v19 = vpack.c.bf16 %v5190_v51, %v5189_v12  ;;  %v11821_v25 = vpop.f32.mrf.mxu0  ;;  %v5195_v51 = vld [vmem:[#allocation2 + $0x2a2] sm:$0xff]  ;;  %v5196_v12 = vld [vmem:[#allocation2 + $0x2aa] sm:$0xff] }
 0x4ac   :  { %v4330_v8 = vpop.f32.mrf.mxu1 }
 0x4ad   :  { %v11808_v63 = vadd.f32 %v4330_v8, %v11583_v31  ;;  %v11829_v38 = vpop.f32.mrf.mxu0 }
 0x4ae   :  { %v8522_v45 = vpop.f32.mrf.mxu1 }
 0x4af   :  { %v11811_v52 = vadd.f32 %v8522_v45, %v11586_v5  ;;  %v5193_v45 = vld [vmem:[#allocation2 + $0x28a] sm:$0xff] }
 0x4b0   :  { %v4333_v14 = vpop.f32.mrf.mxu1 }
 0x4b1   :  { %15311 = vst [vmem:[#allocation18_spill] sm:$0xff] %v11811_v52  ;;  %v11816_v21 = vadd.f32 %v4333_v14, %v11589_v13  ;;  %v5194_v52 = vld [vmem:[#allocation2 + $0x292] sm:$0xff] }
 0x4b2   :  { %v8525_v28 = vpop.f32.mrf.mxu1  ;;  %8716 = vmatmul.mubr.bf16.gmra.mxu1 %v5232_v19  ;;  %v5235_v19 = vpack.c.bf16 %v5196_v12, %v5195_v51 }
 0x4b3   :  { %v11819_v31 = vadd.f32 %v8525_v28, %v11592_v42  ;;  %8719 = vmatprep.mubr.bf16.mxu1 %v5233_v61  ;;  %v5234_v42 = vpack.c.bf16 %v5194_v52, %v5193_v45  ;;  %v11837_v28 = vpop.f32.mrf.mxu0  ;;  %v5199_v52 = vld [vmem:[#allocation2 + $0x2d2] sm:$0xff]  ;;  %v5200_v45 = vld [vmem:[#allocation2 + $0x2da] sm:$0xff] }
 0x4b4   :  { %v4346_v8 = vpop.f32.mrf.mxu1 }
 0x4b5   :  { %15313 = vst [vmem:[#allocation40_spill] sm:$0xff] %v11819_v31  ;;  %v11824_v5 = vadd.f32 %v4346_v8, %v11595_v1  ;;  %v11845_v51 = vpop.f32.mrf.mxu0 }
 0x4b6   :  { %v8526_v20 = vpop.f32.mrf.mxu1 }
 0x4b7   :  { %v11827_v13 = vadd.f32 %v8526_v20, %v11598_v60  ;;  %v5197_v20 = vld [vmem:[#allocation2 + $0x2ba] sm:$0xff] }
 0x4b8   :  { %v4349_v39 = vpop.f32.mrf.mxu1 }
 0x4b9   :  { %15314 = vst [vmem:[#allocation41_spill] sm:$0xff] %v11827_v13  ;;  %v11832_v14 = vadd.f32 %v4349_v39, %v11601_v36  ;;  %v5198_v13 = vld [vmem:[#allocation2 + $0x2c2] sm:$0xff] }
 0x4ba   :  { %v8529_v61 = vpop.f32.mrf.mxu1  ;;  %8720 = vmatmul.mubr.bf16.gmra.mxu1 %v5234_v42  ;;  %v5237_v42 = vpack.c.bf16 %v5200_v45, %v5199_v52 }
 0x4bb   :  { %v11835_v1 = vadd.f32 %v8529_v61, %v11604_v57  ;;  %8723 = vmatprep.mubr.bf16.mxu1 %v5235_v19  ;;  %v5236_v57 = vpack.c.bf16 %v5198_v13, %v5197_v20  ;;  %v11853_v61 = vpop.f32.mrf.mxu0  ;;  %v5203_v13 = vld [vmem:[#allocation2 + $0x302] sm:$0xff]  ;;  %v5204_v20 = vld [vmem:[#allocation2 + $0x30a] sm:$0xff] }
 0x4bc   :  { %v4362_v8 = vpop.f32.mrf.mxu1 }
 0x4bd   :  { %15315 = vst [vmem:[#allocation42_spill] sm:$0xff] %v11835_v1  ;;  %v11840_v60 = vadd.f32 %v4362_v8, %v11607_v43 }
 0x4be   :  { %v8530_v31 = vpop.f32.mrf.mxu1 }
 0x4bf   :  { %v11843_v36 = vadd.f32 %v8530_v31, %v11610_v27  ;;  %v5201_v31 = vld [vmem:[#allocation2 + $0x2ea] sm:$0xff] }
 0x4c0   :  { %v4365_v12 = vpop.f32.mrf.mxu1 }
 0x4c1   :  { %15316 = vst [vmem:[#allocation43_spill] sm:$0xff] %v11843_v36  ;;  %v11848_v39 = vadd.f32 %v4365_v12, %v11613_v9  ;;  %v5202_v36 = vld [vmem:[#allocation2 + $0x2f2] sm:$0xff]  ;;  %v4071_v9 = vadd.f32 %v11622_v4, %v11627_v2  ;;  %v5206_v2 = vld [vmem:[#allocation2 + $0x322] sm:$0xff] }
 0x4c2   :  { %v8533_v19 = vpop.f32.mrf.mxu1  ;;  %8724 = vmatmul.mubr.bf16.gmra.mxu1 %v5236_v57  ;;  %v5238_v12 = vpack.c.bf16 %v5202_v36, %v5201_v31  ;;  %v5208_v36 = vld [vmem:[#allocation2 + $0x33a] sm:$0xff]  ;;  %v15321_v31 = vld [vmem:[#allocation16_spill] sm:$0xff] }
 0x4c3   :  { %v11851_v43 = vadd.f32 %v8533_v19, %v11616_v10  ;;  %8727 = vmatprep.mubr.bf16.mxu1 %v5237_v42  ;;  %v11863_v10 = vpop.f32.mrf.mxu0  ;;  %v5239_v42 = vpack.c.bf16 %v5204_v20, %v5203_v13  ;;  %v4075_v13 = vadd.f32 %v15321_v31, %v11641_v49 }
 0x4c4   :  { %v4378_v8 = vpop.f32.mrf.mxu1 }
 0x4c5   :  { %15317 = vst [vmem:[#allocation44_spill] sm:$0xff] %v11851_v43  ;;  %v11856_v27 = vadd.f32 %v4378_v8, %v11619_v6  ;;  %v11870_v8 = vpop.f32.mrf.mxu0 }
 0x4c6   :  { %v8534_v1 = vpop.f32.mrf.mxu1 }
 0x4c7   :  { %v11861_v52 = vadd.f32 %v8534_v1, %v11624_v33  ;;  %v5205_v33 = vld [vmem:[#allocation2 + $0x31a] sm:$0xff] }
 0x4c8   :  { %v4381_v45 = vpop.f32.mrf.mxu1 }
 0x4c9   :  { %15318 = vst [vmem:[#allocation45_spill] sm:$0xff] %v11861_v52  ;;  %v11865_v57 = vadd.f32 %v4381_v45, %v4071_v9  ;;  %v5207_v52 = vld [vmem:[#allocation2 + $0x332] sm:$0xff]  ;;  %v5240_v45 = vpack.c.bf16 %v5206_v2, %v5205_v33  ;;  %v4079_v33 = vadd.f32 %v11651_v54, %v11656_v62 }
 0x4ca   :  { %v8537_v6 = vpop.f32.mrf.mxu1  ;;  %8728 = vmatmul.mubr.bf16.gmra.mxu1 %v5238_v12 }
 0x4cb   :  { %v11868_v19 = vadd.f32 %v8537_v6, %v11630_v3  ;;  %8731 = vmatprep.mubr.bf16.mxu1 %v5239_v42  ;;  %v11880_v3 = vpop.f32.mrf.mxu0  ;;  %v5241_v42 = vpack.c.bf16 %v5208_v36, %v5207_v52  ;;  %v5209_v6 = vld [vmem:[#allocation2 + $0x34a] sm:$0xff] }
 0x4cc   :  { %v4394_v43 = vpop.f32.mrf.mxu1 }
 0x4cd   :  { %15319 = vst [vmem:[#allocation46_spill] sm:$0xff] %v11868_v19  ;;  %v11873_v4 = vadd.f32 %v4394_v43, %v11633_v0  ;;  %v5210_v19 = vld [vmem:[#allocation2 + $0x352] sm:$0xff] }
 0x4ce   :  { %v8538_v1 = vpop.f32.mrf.mxu1  ;;  %v5242_v31 = vpack.c.bf16 %v5210_v19, %v5209_v6 }
 0x4cf   :  { %15320 = vst [vmem:[#allocation47_spill] sm:$0xff] %v11873_v4  ;;  %v11878_v20 = vadd.f32 %v8538_v1, %v11638_v46  ;;  %v11887_v4 = vpop.f32.mrf.mxu0 }
 0x4d0   :  { %v4397_v9 = vpop.f32.mrf.mxu1 }
 0x4d1   :  { %v11882_v12 = vadd.f32 %v4397_v9, %v4075_v13  ;;  %v11897_v2 = vpop.f32.mrf.mxu0 }
 0x4d2   :  { %v8541_v0 = vpop.f32.mrf.mxu1  ;;  %8732 = vmatmul.mubr.bf16.gmra.mxu1 %v5240_v45 }
 0x4d3   :  { %v11885_v43 = vadd.f32 %v8541_v0, %v11644_v29  ;;  %8735 = vmatprep.mubr.bf16.mxu1 %v5241_v42 }
 0x4d4   :  { %v4410_v49 = vpop.f32.mrf.mxu1 }
 0x4d5   :  { %v11890_v46 = vadd.f32 %v4410_v49, %v11648_v11  ;;  %v11904_v11 = vpop.f32.mrf.mxu0 }
 0x4d6   :  { %v8542_v1 = vpop.f32.mrf.mxu1 }
 0x4d7   :  { %v11895_v52 = vadd.f32 %v8542_v1, %v11653_v22  ;;  %v4083_v22 = vadd.f32 %v11665_v48, %v11670_v47  ;;  %v11914_v42 = vpop.f32.mrf.mxu0  ;;  %v4087_v48 = vadd.f32 %v11679_v35, %v11684_v44  ;;  %v15335_v35 = vld [vmem:[#allocation27_spill] sm:$0xff]  ;;  %v15336_v44 = vld [vmem:[#allocation32_spill] sm:$0xff] }
 0x4d8   :  { %v4413_v29 = vpop.f32.mrf.mxu1 }
 0x4d9   :  { %15322 = vst [vmem:[#allocation16_spill] sm:$0xff] %v11895_v52  ;;  %v11899_v36 = vadd.f32 %v4413_v29, %v4079_v33  ;;  %v11921_v1 = vpop.f32.mrf.mxu0 }
 0x4da   :  { %v8545_v13 = vpop.f32.mrf.mxu1  ;;  %8736 = vmatmul.mubr.bf16.gmra.mxu1 %v5242_v31 }
 0x4db   :  { %v11902_v9 = vadd.f32 %v8545_v13, %v11659_v56  ;;  %v11931_v47 = vpop.f32.mrf.mxu0 }
 0x4dc   :  { %v4426_v45 = vpop.f32.mrf.mxu1 }
 0x4dd   :  { %15323 = vst [vmem:[#allocation48_spill] sm:$0xff] %v11902_v9  ;;  %v11907_v19 = vadd.f32 %v4426_v45, %v11662_v7  ;;  %v15331_v45 = vld [vmem:[#allocation24_spill] sm:$0xff] }
 0x4de   :  { %v8546_v54 = vpop.f32.mrf.mxu1 }
 0x4df   :  { %15324 = vst [vmem:[#allocation49_spill] sm:$0xff] %v11907_v19  ;;  %v11912_v62 = vadd.f32 %v8546_v54, %v11667_v16 }
 0x4e0   :  { %v4429_v0 = vpop.f32.mrf.mxu1 }
 0x4e1   :  { %15325 = vst [vmem:[#allocation50_spill] sm:$0xff] %v11912_v62  ;;  %v11916_v6 = vadd.f32 %v4429_v0, %v4083_v22  ;;  %v11938_v22 = vpop.f32.mrf.mxu0  ;;  %v15333_v0 = vld [vmem:[#allocation26_spill] sm:$0xff] }
 0x4e2   :  { %v8549_v56 = vpop.f32.mrf.mxu1 }
 0x4e3   :  { %15326 = vst [vmem:[#allocation51_spill] sm:$0xff] %v11916_v6  ;;  %v11919_v49 = vadd.f32 %v8549_v56, %v11673_v53 }
 0x4e4   :  { %v4442_v7 = vpop.f32.mrf.mxu1 }
 0x4e5   :  { %15327 = vst [vmem:[#allocation52_spill] sm:$0xff] %v11919_v49  ;;  %v11924_v31 = vadd.f32 %v4442_v7, %v11676_v30  ;;  %v11948_v49 = vpop.f32.mrf.mxu0 }
 0x4e6   :  { %v8550_v33 = vpop.f32.mrf.mxu1 }
 0x4e7   :  { %15328 = vst [vmem:[#allocation53_spill] sm:$0xff] %v11924_v31  ;;  %v11929_v16 = vadd.f32 %v8550_v33, %v11681_v23  ;;  %v4091_v23 = vadd.f32 %v15336_v44, %v15335_v35  ;;  %v15337_v33 = vld [vmem:[#allocation9_spill] sm:$0xff]  ;;  %v15345_v44 = vld [vmem:[#allocation30_spill] sm:$0xff] }
 0x4e8   :  { %v4445_v29 = vpop.f32.mrf.mxu1  ;;  %v15344_v35 = vld [vmem:[#allocation33_spill] sm:$0xff] }
 0x4e9   :  { %15329 = vst [vmem:[#allocation54_spill] sm:$0xff] %v11929_v16  ;;  %v11933_v13 = vadd.f32 %v4445_v29, %v4087_v48 }
 0x4ea   :  { %v8553_v53 = vpop.f32.mrf.mxu1 }
 0x4eb   :  { %15330 = vst [vmem:[#allocation55_spill] sm:$0xff] %v11933_v13  ;;  %v11936_v54 = vadd.f32 %v8553_v53, %v15331_v45  ;;  %v15340_v45 = vld [vmem:[#allocation28_spill] sm:$0xff]  ;;  %v11955_v13 = vpop.f32.mrf.mxu0 }
 0x4ec   :  { %v4458_v30 = vpop.f32.mrf.mxu1 }
 0x4ed   :  { %15332 = vst [vmem:[#allocation24_spill] sm:$0xff] %v11936_v54  ;;  %v11941_v56 = vadd.f32 %v4458_v30, %v15333_v0  ;;  %v15342_v0 = vld [vmem:[#allocation29_spill] sm:$0xff]  ;;  %v11965_v62 = vpop.f32.mrf.mxu0 }
 0x4ee   :  { %v8554_v7 = vpop.f32.mrf.mxu1 }
 0x4ef   :  { %15334 = vst [vmem:[#allocation26_spill] sm:$0xff] %v11941_v56  ;;  %v11946_v16 = vadd.f32 %v8554_v7, %v15337_v33  ;;  %v4095_v7 = vadd.f32 %v15345_v44, %v15344_v35  ;;  %v15346_v33 = vld [vmem:[#allocation35_spill] sm:$0xff]  ;;  %v15353_v35 = vld [vmem:[#allocation20_spill] sm:$0xff]  ;;  %v15354_v44 = vld [vmem:[#allocation34_spill] sm:$0xff] }
 0x4f0   :  { %v4461_v48 = vpop.f32.mrf.mxu1 }
 0x4f1   :  { %15338 = vst [vmem:[#allocation27_spill] sm:$0xff] %v11946_v16  ;;  %v11950_v29 = vadd.f32 %v4461_v48, %v4091_v23 }
 0x4f2   :  { %v8557_v53 = vpop.f32.mrf.mxu1 }
 0x4f3   :  { %15339 = vst [vmem:[#allocation32_spill] sm:$0xff] %v11950_v29  ;;  %v11953_v54 = vadd.f32 %v8557_v53, %v15340_v45  ;;  %v15349_v45 = vld [vmem:[#allocation31_spill] sm:$0xff]  ;;  %v11972_v29 = vpop.f32.mrf.mxu0 }
 0x4f4   :  { %v4474_v30 = vpop.f32.mrf.mxu1 }
 0x4f5   :  { %15341 = vst [vmem:[#allocation9_spill] sm:$0xff] %v11953_v54  ;;  %v11958_v56 = vadd.f32 %v4474_v30, %v15342_v0  ;;  %v15351_v0 = vld [vmem:[#allocation19_spill] sm:$0xff]  ;;  %v11982_v6 = vpop.f32.mrf.mxu0 }
 0x4f6   :  { %v8558_v31 = vpop.f32.mrf.mxu1  ;;  %15357 = vst [vmem:[#allocation19_spill] sm:$0xff] %v11982_v6 }
 0x4f7   :  { %15343 = vst [vmem:[#allocation28_spill] sm:$0xff] %v11958_v56  ;;  %v11963_v16 = vadd.f32 %v8558_v31, %v15346_v33  ;;  %v4099_v31 = vadd.f32 %v15354_v44, %v15353_v35  ;;  %v15355_v33 = vld [vmem:[#allocation36_spill] sm:$0xff]  ;;  %v15363_v35 = vld [vmem:[#allocation6_spill] sm:$0xff] }
 0x4f8   :  { %v4477_v23 = vpop.f32.mrf.mxu1  ;;  %v15364_v44 = vld [vmem:[#allocation22_spill] sm:$0xff] }
 0x4f9   :  { %15347 = vst [vmem:[#allocation29_spill] sm:$0xff] %v11963_v16  ;;  %v11967_v48 = vadd.f32 %v4477_v23, %v4095_v7 }
 0x4fa   :  { %v8561_v53 = vpop.f32.mrf.mxu1 }
 0x4fb   :  { %15348 = vst [vmem:[#allocation33_spill] sm:$0xff] %v11967_v48  ;;  %v11970_v54 = vadd.f32 %v8561_v53, %v15349_v45  ;;  %v15359_v45 = vld [vmem:[#allocation21_spill] sm:$0xff]  ;;  %v11989_v48 = vpop.f32.mrf.mxu0 }
 0x4fc   :  { %v4490_v30 = vpop.f32.mrf.mxu1 }
 0x4fd   :  { %15350 = vst [vmem:[#allocation30_spill] sm:$0xff] %v11970_v54  ;;  %v11975_v56 = vadd.f32 %v4490_v30, %v15351_v0  ;;  %v15361_v0 = vld [vmem:[#allocation7_spill] sm:$0xff]  ;;  %v11999_v52 = vpop.f32.mrf.mxu0 }
 0x4fe   :  { %v8562_v9 = vpop.f32.mrf.mxu1  ;;  %15367 = vst [vmem:[#allocation7_spill] sm:$0xff] %v11999_v52 }
 0x4ff   :  { %15352 = vst [vmem:[#allocation35_spill] sm:$0xff] %v11975_v56  ;;  %v11980_v16 = vadd.f32 %v8562_v9, %v15355_v33  ;;  %v4103_v9 = vadd.f32 %v15364_v44, %v15363_v35  ;;  %v15365_v33 = vld [vmem:[#allocation37_spill] sm:$0xff]  ;;  %v15372_v35 = vld [vmem:[#allocation10_spill] sm:$0xff]  ;;  %v15373_v44 = vld [vmem:[#allocation23_spill] sm:$0xff] }
 0x500   :  { %v4493_v7 = vpop.f32.mrf.mxu1 }
 0x501   :  { %15356 = vst [vmem:[#allocation31_spill] sm:$0xff] %v11980_v16  ;;  %v11984_v23 = vadd.f32 %v4493_v7, %v4099_v31 }
 0x502   :  { %v8565_v53 = vpop.f32.mrf.mxu1 }
 0x503   :  { %15358 = vst [vmem:[#allocation20_spill] sm:$0xff] %v11984_v23  ;;  %v11987_v54 = vadd.f32 %v8565_v53, %v15359_v45  ;;  %v15368_v45 = vld [vmem:[#allocation8_spill] sm:$0xff]  ;;  %v12006_v23 = vpop.f32.mrf.mxu0 }
 0x504   :  { %v4506_v30 = vpop.f32.mrf.mxu1 }
 0x505   :  { %15360 = vst [vmem:[#allocation34_spill] sm:$0xff] %v11987_v54  ;;  %v11992_v56 = vadd.f32 %v4506_v30, %v15361_v0  ;;  %v15370_v0 = vld [vmem:[#allocation11_spill] sm:$0xff]  ;;  %v12016_v52 = vpop.f32.mrf.mxu0 }
 0x506   :  { %v8566_v19 = vpop.f32.mrf.mxu1 }
 0x507   :  { %15362 = vst [vmem:[#allocation36_spill] sm:$0xff] %v11992_v56  ;;  %v11997_v16 = vadd.f32 %v8566_v19, %v15365_v33  ;;  %v4107_v19 = vadd.f32 %v15373_v44, %v15372_v35  ;;  %v15374_v33 = vld [vmem:[#allocation38_spill] sm:$0xff]  ;;  %v15379_v35 = vld [vmem:[#allocation13_spill] sm:$0xff]  ;;  %v15380_v44 = vld [vmem:[#allocation15_spill] sm:$0xff] }
 0x508   :  { %v4509_v31 = vpop.f32.mrf.mxu1 }
 0x509   :  { %15366 = vst [vmem:[#allocation21_spill] sm:$0xff] %v11997_v16  ;;  %v12001_v7 = vadd.f32 %v4509_v31, %v4103_v9 }
 0x50a   :  { %v8569_v53 = vpop.f32.mrf.mxu1 }
 0x50b   :  { %v12004_v54 = vadd.f32 %v8569_v53, %v15368_v45 }
 0x50c   :  { %v4522_v30 = vpop.f32.mrf.mxu1 }
 0x50d   :  { %15369 = vst [vmem:[#allocation6_spill] sm:$0xff] %v12004_v54  ;;  %v12009_v56 = vadd.f32 %v4522_v30, %v15370_v0  ;;  %v12023_v54 = vpop.f32.mrf.mxu0 }
 0x50e   :  { %v8570_v6 = vpop.f32.mrf.mxu1 }
 0x50f   :  { %15371 = vst [vmem:[#allocation22_spill] sm:$0xff] %v12009_v56  ;;  %v12014_v16 = vadd.f32 %v8570_v6, %v15374_v33  ;;  %v4111_v6 = vadd.f32 %v15379_v35, %v11768_v55  ;;  %v4115_v55 = vadd.f32 %v11777_v59, %v11782_v34  ;;  %v5085_v34 = vadd.f32 %v11784_v50, %v11787_v41 }
 0x510   :  { %v4525_v9 = vpop.f32.mrf.mxu1 }
 0x511   :  { %15375 = vst [vmem:[#allocation37_spill] sm:$0xff] %v12014_v16  ;;  %v12018_v31 = vadd.f32 %v4525_v9, %v4107_v19  ;;  %v12033_v16 = vpop.f32.mrf.mxu0 }
 0x512   :  { %v8573_v53 = vpop.f32.mrf.mxu1 }
 0x513   :  { %15376 = vst [vmem:[#allocation8_spill] sm:$0xff] %v12018_v31  ;;  %v12021_v45 = vadd.f32 %v8573_v53, %v11757_v18  ;;  %v15382_v53 = vld [vmem:[#allocation12_spill] sm:$0xff]  ;;  %v12040_v31 = vpop.f32.mrf.mxu0 }
 0x514   :  { %v4538_v30 = vpop.f32.mrf.mxu1 }
 0x515   :  { %15377 = vst [vmem:[#allocation11_spill] sm:$0xff] %v12021_v45  ;;  %v12026_v0 = vadd.f32 %v4538_v30, %v11760_v37  ;;  %v12050_v35 = vpop.f32.mrf.mxu0 }
 0x516   :  { %v8574_v56 = vpop.f32.mrf.mxu1 }
 0x517   :  { %15378 = vst [vmem:[#allocation10_spill] sm:$0xff] %v12026_v0  ;;  %v12031_v33 = vadd.f32 %v8574_v56, %v15380_v44 }
 0x518   :  { %v4541_v19 = vpop.f32.mrf.mxu1 }
 0x519   :  { %15381 = vst [vmem:[#allocation23_spill] sm:$0xff] %v12031_v33  ;;  %v12035_v9 = vadd.f32 %v4541_v19, %v4111_v6 }
 0x51a   :  { %v8577_v18 = vpop.f32.mrf.mxu1 }
 0x51b   :  { %v12038_v45 = vadd.f32 %v8577_v18, %v15382_v53  ;;  %v12054_v18 = vpop.f32.mrf.mxu0 }
 0x51c   :  { %v4554_v37 = vpop.f32.mrf.mxu1 }
 0x51d   :  { %15383 = vst [vmem:[#allocation38_spill] sm:$0xff] %v12038_v45  ;;  %v12043_v30 = vadd.f32 %v4554_v37, %v11774_v17  ;;  %v5083_v17 = vadd.f32 %v11789_v58, %v11792_v40  ;;  %v5084_v37 = vadd.f32 %v11805_v32, %v11800_v26  ;;  %v12060_v59 = vpop.f32.mrf.mxu0  ;;  %v5087_v32 = vadd.f32 %v11821_v25, %v11808_v63 }
 0x51e   :  { %v8578_v0 = vpop.f32.mrf.mxu1 }
 0x51f   :  { %15384 = vst [vmem:[#allocation13_spill] sm:$0xff] %v12043_v30  ;;  %v12048_v56 = vadd.f32 %v8578_v0, %v11779_v24  ;;  %v12074_v40 = vpop.f32.mrf.mxu0 }
 0x520   :  { %v4557_v6 = vpop.f32.mrf.mxu1 }
 0x521   :  { %15385 = vst [vmem:[#allocation15_spill] sm:$0xff] %v12048_v56  ;;  %v12052_v44 = vadd.f32 %v4557_v6, %v4115_v55  ;;  %v15387_v56 = vld [vmem:[#allocation14_spill] sm:$0xff] }
 0x522   :  { %v8677_v19 = vpop.f32.mrf.mxu1 }
 0x523   :  { %15386 = vst [vmem:[#allocation12_spill] sm:$0xff] %v12052_v44  ;;  %v15388_v44 = vld [vmem:[#allocation17_spill] sm:$0xff]  ;;  %v12070_v33 = vadd.f32 %v8677_v19, %v5085_v34  ;;  %v12086_v19 = vpop.f32.mrf.mxu0 }
 0x524   :  { %v5342_v53 = vpop.f32.mrf.mxu1  ;;  %v5086_v30 = vadd.f32 %v15388_v44, %v15387_v56 }
 0x525   :  { %v12064_v0 = vadd.f32 %v5342_v53, %v5083_v17  ;;  %15389 = vst [vmem:[#allocation14_spill] sm:$0xff] %v12070_v33  ;;  %v5088_v17 = vadd.f32 %v11837_v28, %v11816_v21  ;;  %v12098_v28 = vpop.f32.mrf.mxu0 }
 0x526   :  { %v8678_v45 = vpop.f32.mrf.mxu1 }
 0x527   :  { %v12078_v41 = vadd.f32 %v8678_v45, %v5086_v30  ;;  %v15391_v30 = vld [vmem:[#allocation18_spill] sm:$0xff] }
 0x528   :  { %v5345_v24 = vpop.f32.mrf.mxu1 }
 0x529   :  { %v12066_v55 = vadd.f32 %v5345_v24, %v5084_v37  ;;  %v15390_v24 = vld [vmem:[#allocation39_spill] sm:$0xff] }
 0x52a   :  { %v8681_v6 = vpop.f32.mrf.mxu1  ;;  %v5089_v34 = vadd.f32 %v15390_v24, %v11803_v15 }
 0x52b   :  { %v5663_v58 = vadd.f32 %v12066_v55, %v12064_v0 }
 0x52c   :  { %v5358_v26 = vpop.f32.mrf.mxu1 }
 0x52d   :  { %v5664_v50 = vadd.f32 %v5663_v58, %v12070_v33  ;;  %v12083_v56 = vadd.f32 %v5358_v26, %v5087_v32  ;;  %v5090_v58 = vadd.f32 %v11829_v38, %v15391_v30  ;;  %v12095_v33 = vadd.f32 %v8681_v6, %v5089_v34  ;;  %v12110_v6 = vpop.f32.mrf.mxu0  ;;  %v15392_v34 = vld [vmem:[#allocation40_spill] sm:$0xff]  ;;  %v15393_v30 = vld [vmem:[#allocation41_spill] sm:$0xff] }
 0x52e   :  { %v8682_v53 = vpop.f32.mrf.mxu1  ;;  %v5091_v32 = vadd.f32 %v11853_v61, %v11824_v5 }
 0x52f   :  { %v5665_v44 = vadd.f32 %v5664_v50, %v12078_v41  ;;  %v12102_v50 = vadd.f32 %v8682_v53, %v5090_v58  ;;  %v5094_v58 = vadd.f32 %v11863_v10, %v15393_v30  ;;  %v15395_v30 = vld [vmem:[#allocation43_spill] sm:$0xff] }
 0x530   :  { %v5361_v37 = vpop.f32.mrf.mxu1 }
 0x531   :  { %v5666_v63 = vadd.f32 %v5665_v44, %v12083_v56  ;;  %v12091_v25 = vadd.f32 %v5361_v37, %v5088_v17  ;;  %v5092_v44 = vadd.f32 %v11870_v8, %v11832_v14  ;;  %v12122_v8 = vpop.f32.mrf.mxu0 }
 0x532   :  { %v8685_v45 = vpop.f32.mrf.mxu1 }
 0x533   :  { %v5667_v21 = vadd.f32 %v5666_v63, %v12091_v25  ;;  %v5093_v63 = vadd.f32 %v11845_v51, %v15392_v34 }
 0x534   :  { %v5374_v26 = vpop.f32.mrf.mxu1 }
 0x535   :  { %v5668_v15 = vadd.f32 %v5667_v21, %v12095_v33  ;;  %v12107_v37 = vadd.f32 %v5374_v26, %v5091_v32  ;;  %v12119_v21 = vadd.f32 %v8685_v45, %v5093_v63  ;;  %v5095_v32 = vadd.f32 %v11887_v4, %v11840_v60  ;;  %v12134_v45 = vpop.f32.mrf.mxu0  ;;  %v15394_v63 = vld [vmem:[#allocation42_spill] sm:$0xff] }
 0x536   :  { %v8686_v17 = vpop.f32.mrf.mxu1 }
 0x537   :  { %v5669_v38 = vadd.f32 %v5668_v15, %v12102_v50  ;;  %v12126_v15 = vadd.f32 %v8686_v17, %v5094_v58  ;;  %v5098_v58 = vadd.f32 %v11897_v2, %v15395_v30  ;;  %v15398_v30 = vld [vmem:[#allocation45_spill] sm:$0xff] }
 0x538   :  { %v5377_v24 = vpop.f32.mrf.mxu1 }
 0x539   :  { %v5670_v5 = vadd.f32 %v5669_v38, %v12107_v37  ;;  %v12115_v61 = vadd.f32 %v5377_v24, %v5092_v44  ;;  %v5096_v38 = vadd.f32 %v11904_v11, %v11848_v39  ;;  %v12146_v11 = vpop.f32.mrf.mxu0 }
 0x53a   :  { %v8689_v53 = vpop.f32.mrf.mxu1 }
 0x53b   :  { %v5671_v14 = vadd.f32 %v5670_v5, %v12115_v61  ;;  %v5097_v5 = vadd.f32 %v11880_v3, %v15394_v63 }
 0x53c   :  { %v5390_v26 = vpop.f32.mrf.mxu1 }
 0x53d   :  { %v5672_v51 = vadd.f32 %v5671_v14, %v12119_v21  ;;  %v12131_v24 = vadd.f32 %v5390_v26, %v5095_v32  ;;  %v12143_v14 = vadd.f32 %v8689_v53, %v5097_v5  ;;  %v5099_v32 = vadd.f32 %v11921_v1, %v11856_v27  ;;  %v12158_v53 = vpop.f32.mrf.mxu0  ;;  %v15397_v5 = vld [vmem:[#allocation44_spill] sm:$0xff] }
 0x53e   :  { %v8690_v44 = vpop.f32.mrf.mxu1 }
 0x53f   :  { %v5673_v10 = vadd.f32 %v5672_v51, %v12126_v15  ;;  %v12150_v51 = vadd.f32 %v8690_v44, %v5098_v58  ;;  %v5102_v58 = vadd.f32 %v11931_v47, %v15398_v30 }
 0x540   :  { %v5393_v34 = vpop.f32.mrf.mxu1 }
 0x541   :  { %v5674_v60 = vadd.f32 %v5673_v10, %v12131_v24  ;;  %v12139_v4 = vadd.f32 %v5393_v34, %v5096_v38  ;;  %15396 = vst [vmem:[#allocation17_spill] sm:$0xff] %v12150_v51  ;;  %v5100_v10 = vadd.f32 %v11938_v22, %v11865_v57  ;;  %v12170_v22 = vpop.f32.mrf.mxu0 }
 0x542   :  { %v8693_v17 = vpop.f32.mrf.mxu1 }
 0x543   :  { %v5675_v39 = vadd.f32 %v5674_v60, %v12139_v4  ;;  %v5101_v60 = vadd.f32 %v11914_v42, %v15397_v5 }
 0x544   :  { %v5406_v26 = vpop.f32.mrf.mxu1 }
 0x545   :  { %v5676_v3 = vadd.f32 %v5675_v39, %v12143_v14  ;;  %v12155_v34 = vadd.f32 %v5406_v26, %v5099_v32  ;;  %v12167_v39 = vadd.f32 %v8693_v17, %v5101_v60  ;;  %v15399_v32 = vld [vmem:[#allocation47_spill] sm:$0xff]  ;;  %v12182_v17 = vpop.f32.mrf.mxu0  ;;  %v15400_v60 = vld [vmem:[#allocation46_spill] sm:$0xff] }
 0x546   :  { %v8694_v38 = vpop.f32.mrf.mxu1 }
 0x547   :  { %v5677_v2 = vadd.f32 %v5676_v3, %v12150_v51  ;;  %v5103_v3 = vadd.f32 %v11955_v13, %v15399_v32  ;;  %v12174_v51 = vadd.f32 %v8694_v38, %v5102_v58  ;;  %v5106_v58 = vadd.f32 %v11965_v62, %v11878_v20 }
 0x548   :  { %v5409_v63 = vpop.f32.mrf.mxu1  ;;  %v5107_v32 = vadd.f32 %v11989_v48, %v11890_v46 }
 0x549   :  { %v5678_v27 = vadd.f32 %v5677_v2, %v12155_v34  ;;  %v12163_v1 = vadd.f32 %v5409_v63, %v5100_v10  ;;  %v5104_v2 = vadd.f32 %v11972_v29, %v11882_v12  ;;  %v12194_v29 = vpop.f32.mrf.mxu0 }
 0x54a   :  { %v8697_v44 = vpop.f32.mrf.mxu1 }
 0x54b   :  { %v5679_v57 = vadd.f32 %v5678_v27, %v12163_v1  ;;  %v5105_v27 = vadd.f32 %v11948_v49, %v15400_v60  ;;  %v12206_v62 = vpop.f32.mrf.mxu0 }
 0x54c   :  { %v5422_v26 = vpop.f32.mrf.mxu1 }
 0x54d   :  { %v5680_v42 = vadd.f32 %v5679_v57, %v12167_v39  ;;  %v12179_v63 = vadd.f32 %v5422_v26, %v5103_v3  ;;  %v12191_v57 = vadd.f32 %v8697_v44, %v5105_v27  ;;  %v15406_v27 = vld [vmem:[#allocation16_spill] sm:$0xff] }
 0x54e   :  { %v8698_v10 = vpop.f32.mrf.mxu1 }
 0x54f   :  { %v5681_v47 = vadd.f32 %v5680_v42, %v12174_v51  ;;  %15401 = vst [vmem:[#allocation39_spill] sm:$0xff] %v12191_v57  ;;  %v12198_v3 = vadd.f32 %v8698_v10, %v5106_v58 }
 0x550   :  { %v5425_v5 = vpop.f32.mrf.mxu1 }
 0x551   :  { %v5682_v13 = vadd.f32 %v5681_v47, %v12179_v63  ;;  %v12187_v38 = vadd.f32 %v5425_v5, %v5104_v2  ;;  %15402 = vst [vmem:[#allocation18_spill] sm:$0xff] %v12198_v3  ;;  %v5108_v2 = vadd.f32 %v12006_v23, %v11899_v36  ;;  %v15404_v5 = vld [vmem:[#allocation19_spill] sm:$0xff]  ;;  %v12218_v23 = vpop.f32.mrf.mxu0 }
 0x552   :  { %v8701_v30 = vpop.f32.mrf.mxu1  ;;  %v5109_v60 = vadd.f32 %v15404_v5, %v11885_v43 }
 0x553   :  { %v5683_v12 = vadd.f32 %v5682_v13, %v12187_v38  ;;  %v15407_v13 = vld [vmem:[#allocation7_spill] sm:$0xff] }
 0x554   :  { %v5438_v26 = vpop.f32.mrf.mxu1  ;;  %v5110_v58 = vadd.f32 %v15407_v13, %v15406_v27  ;;  %v15413_v27 = vld [vmem:[#allocation48_spill] sm:$0xff] }
 0x555   :  { %v5684_v49 = vadd.f32 %v5683_v12, %v12191_v57  ;;  %v12203_v47 = vadd.f32 %v5438_v26, %v5107_v32  ;;  %v12215_v12 = vadd.f32 %v8701_v30, %v5109_v60  ;;  %v15409_v32 = vld [vmem:[#allocation49_spill] sm:$0xff]  ;;  %v12230_v60 = vpop.f32.mrf.mxu0  ;;  %v5113_v13 = vadd.f32 %v12016_v52, %v15413_v27 }
 0x556   :  { %v8702_v42 = vpop.f32.mrf.mxu1 }
 0x557   :  { %15403 = vst [vmem:[#allocation40_spill] sm:$0xff] %v12203_v47  ;;  %v5685_v20 = vadd.f32 %v5684_v49, %v12198_v3  ;;  %15408 = vst [vmem:[#allocation42_spill] sm:$0xff] %v12215_v12  ;;  %v5111_v49 = vadd.f32 %v12023_v54, %v15409_v32  ;;  %v12222_v3 = vadd.f32 %v8702_v42, %v5110_v58 }
 0x558   :  { %v5441_v44 = vpop.f32.mrf.mxu1 }
 0x559   :  { %v5686_v46 = vadd.f32 %v5685_v20, %v12203_v47  ;;  %v12211_v48 = vadd.f32 %v5441_v44, %v5108_v2  ;;  %15410 = vst [vmem:[#allocation43_spill] sm:$0xff] %v12222_v3  ;;  %v15411_v20 = vld [vmem:[#allocation51_spill] sm:$0xff] }
 0x55a   :  { %v8705_v10 = vpop.f32.mrf.mxu1  ;;  %v5112_v44 = vadd.f32 %v12040_v31, %v15411_v20 }
 0x55b   :  { %15405 = vst [vmem:[#allocation41_spill] sm:$0xff] %v12211_v48  ;;  %v5687_v36 = vadd.f32 %v5686_v46, %v12211_v48 }
 0x55c   :  { %v5454_v26 = vpop.f32.mrf.mxu1 }
 0x55d   :  { %v5688_v43 = vadd.f32 %v5687_v36, %v12215_v12  ;;  %v12227_v5 = vadd.f32 %v5454_v26, %v5111_v49  ;;  %v15415_v36 = vld [vmem:[#allocation50_spill] sm:$0xff]  ;;  %v12239_v12 = vadd.f32 %v8705_v10, %v5113_v13  ;;  %v12242_v26 = vpop.f32.mrf.mxu0 }
 0x55e   :  { %v8706_v2 = vpop.f32.mrf.mxu1  ;;  %v5114_v32 = vadd.f32 %v12033_v16, %v15415_v36 }
 0x55f   :  { %15412 = vst [vmem:[#allocation44_spill] sm:$0xff] %v12227_v5  ;;  %v5689_v30 = vadd.f32 %v5688_v43, %v12222_v3  ;;  %15416 = vst [vmem:[#allocation47_spill] sm:$0xff] %v12239_v12  ;;  %v15417_v43 = vld [vmem:[#allocation53_spill] sm:$0xff]  ;;  %v12254_v10 = vpop.f32.mrf.mxu0 }
 0x560   :  { %v5457_v46 = vpop.f32.mrf.mxu1  ;;  %v5115_v20 = vadd.f32 %v12054_v18, %v15417_v43  ;;  %v12246_v3 = vadd.f32 %v8706_v2, %v5114_v32 }
 0x561   :  { %v5690_v54 = vadd.f32 %v5689_v30, %v12227_v5  ;;  %v12235_v42 = vadd.f32 %v5457_v46, %v5112_v44  ;;  %v15419_v30 = vld [vmem:[#allocation55_spill] sm:$0xff] }
 0x562   :  { %v8709_v58 = vpop.f32.mrf.mxu1  ;;  %15418 = vst [vmem:[#allocation46_spill] sm:$0xff] %v12246_v3  ;;  %v5116_v46 = vadd.f32 %v12074_v40, %v15419_v30 }
 0x563   :  { %15414 = vst [vmem:[#allocation45_spill] sm:$0xff] %v12235_v42  ;;  %v5691_v31 = vadd.f32 %v5690_v54, %v12235_v42  ;;  %v15421_v54 = vld [vmem:[#allocation52_spill] sm:$0xff] }
 0x564   :  { %v5470_v49 = vpop.f32.mrf.mxu1  ;;  %v5117_v36 = vadd.f32 %v12050_v35, %v15421_v54 }
 0x565   :  { %v5692_v52 = vadd.f32 %v5691_v31, %v12239_v12  ;;  %v12251_v27 = vadd.f32 %v5470_v49, %v5115_v20  ;;  %v15423_v31 = vld [vmem:[#allocation54_spill] sm:$0xff]  ;;  %v5023_v49 = vpop.f32.mrf.mxu0 }
 0x566   :  { %v8710_v44 = vpop.f32.mrf.mxu1  ;;  %v5118_v43 = vadd.f32 %v12060_v59, %v15423_v31  ;;  %v12263_v12 = vadd.f32 %v8709_v58, %v5117_v36 }
 0x567   :  { %15420 = vst [vmem:[#allocation19_spill] sm:$0xff] %v12251_v27  ;;  %v5693_v16 = vadd.f32 %v5692_v52, %v12246_v3  ;;  %v15425_v52 = vld [vmem:[#allocation26_spill] sm:$0xff]  ;;  %v12276_v58 = vpop.f32.mrf.mxu0 }
 0x568   :  { %v5473_v13 = vpop.f32.mrf.mxu1  ;;  %15424 = vst [vmem:[#allocation7_spill] sm:$0xff] %v12263_v12  ;;  %v5119_v30 = vadd.f32 %v12098_v28, %v15425_v52  ;;  %v12268_v3 = vadd.f32 %v8710_v44, %v5118_v43 }
 0x569   :  { %v5694_v18 = vadd.f32 %v5693_v16, %v12251_v27  ;;  %v12259_v2 = vadd.f32 %v5473_v13, %v5116_v46  ;;  %v15427_v46 = vld [vmem:[#allocation32_spill] sm:$0xff] }
 0x56a   :  { %v8713_v32 = vpop.f32.mrf.mxu1  ;;  %15426 = vst [vmem:[#allocation49_spill] sm:$0xff] %v12268_v3  ;;  %v5120_v13 = vadd.f32 %v12122_v8, %v15427_v46 }
 0x56b   :  { %15422 = vst [vmem:[#allocation16_spill] sm:$0xff] %v12259_v2  ;;  %v5695_v40 = vadd.f32 %v5694_v18, %v12259_v2  ;;  %v15429_v18 = vld [vmem:[#allocation24_spill] sm:$0xff]  ;;  %v15454_v2 = vld [vmem:[#allocation10_spill] sm:$0xff] }
 0x56c   :  { %v5486_v20 = vpop.f32.mrf.mxu1  ;;  %v5121_v31 = vadd.f32 %v12086_v19, %v15429_v18 }
 0x56d   :  { %v5696_v35 = vadd.f32 %v5695_v40, %v12263_v12  ;;  %v12273_v54 = vadd.f32 %v5486_v20, %v5119_v30  ;;  %v15431_v40 = vld [vmem:[#allocation27_spill] sm:$0xff]  ;;  %v5036_v20 = vpop.f32.mrf.mxu0 }
 0x56e   :  { %v8714_v16 = vpop.f32.mrf.mxu1  ;;  %v5122_v52 = vadd.f32 %v12110_v6, %v15431_v40  ;;  %v12285_v12 = vadd.f32 %v8713_v32, %v5121_v31 }
 0x56f   :  { %15428 = vst [vmem:[#allocation51_spill] sm:$0xff] %v12273_v54  ;;  %v5697_v59 = vadd.f32 %v5696_v35, %v12268_v3  ;;  %v15433_v35 = vld [vmem:[#allocation28_spill] sm:$0xff]  ;;  %v8650_v32 = vpop.f32.mrf.mxu0 }
 0x570   :  { %v5489_v36 = vpop.f32.mrf.mxu1  ;;  %15432 = vst [vmem:[#allocation50_spill] sm:$0xff] %v12285_v12  ;;  %v5123_v46 = vadd.f32 %v12146_v11, %v15433_v35  ;;  %v12290_v3 = vadd.f32 %v8714_v16, %v5122_v52  ;;  %v15439_v52 = vld [vmem:[#allocation29_spill] sm:$0xff] }
 0x571   :  { %v5698_v28 = vadd.f32 %v5697_v59, %v12273_v54  ;;  %v12281_v44 = vadd.f32 %v5489_v36, %v5120_v13  ;;  %v15435_v13 = vld [vmem:[#allocation33_spill] sm:$0xff] }
 0x572   :  { %v8717_v43 = vpop.f32.mrf.mxu1  ;;  %15434 = vst [vmem:[#allocation53_spill] sm:$0xff] %v12290_v3  ;;  %v5124_v36 = vadd.f32 %v12170_v22, %v15435_v13  ;;  %v15453_v54 = vld [vmem:[#allocation37_spill] sm:$0xff] }
 0x573   :  { %15430 = vst [vmem:[#allocation48_spill] sm:$0xff] %v12281_v44  ;;  %v5699_v8 = vadd.f32 %v5698_v28, %v12281_v44  ;;  %v15437_v28 = vld [vmem:[#allocation9_spill] sm:$0xff] }
 0x574   :  { %v5502_v30 = vpop.f32.mrf.mxu1  ;;  %v5125_v40 = vadd.f32 %v12134_v45, %v15437_v28 }
 0x575   :  { %v5700_v19 = vadd.f32 %v5699_v8, %v12285_v12  ;;  %v12295_v18 = vadd.f32 %v5502_v30, %v5123_v46  ;;  %v5126_v8 = vadd.f32 %v12158_v53, %v15439_v52  ;;  %v5039_v30 = vpop.f32.mrf.mxu0 }
 0x576   :  { %v8718_v59 = vpop.f32.mrf.mxu1  ;;  %v12305_v35 = vadd.f32 %v8717_v43, %v5125_v40 }
 0x577   :  { %15436 = vst [vmem:[#allocation55_spill] sm:$0xff] %v12295_v18  ;;  %v5701_v6 = vadd.f32 %v5700_v19, %v12290_v3  ;;  %v15441_v19 = vld [vmem:[#allocation35_spill] sm:$0xff]  ;;  %v12310_v3 = vadd.f32 %v8718_v59, %v5126_v8  ;;  %v8653_v43 = vpop.f32.mrf.mxu0 }
 0x578   :  { %v5505_v31 = vpop.f32.mrf.mxu1  ;;  %15440 = vst [vmem:[#allocation54_spill] sm:$0xff] %v12305_v35  ;;  %v5127_v13 = vadd.f32 %v12194_v29, %v15441_v19  ;;  %v15446_v8 = vld [vmem:[#allocation31_spill] sm:$0xff] }
 0x579   :  { %v5702_v44 = vadd.f32 %v5701_v6, %v12295_v18  ;;  %v12301_v11 = vadd.f32 %v5505_v31, %v5124_v36  ;;  %15442 = vst [vmem:[#allocation26_spill] sm:$0xff] %v12310_v3  ;;  %v15443_v36 = vld [vmem:[#allocation20_spill] sm:$0xff] }
 0x57a   :  { %v8721_v16 = vpop.f32.mrf.mxu1  ;;  %v5128_v31 = vadd.f32 %v12218_v23, %v15443_v36 }
 0x57b   :  { %15438 = vst [vmem:[#allocation52_spill] sm:$0xff] %v12301_v11  ;;  %v5703_v22 = vadd.f32 %v5702_v44, %v12301_v11  ;;  %v15445_v44 = vld [vmem:[#allocation30_spill] sm:$0xff] }
 0x57c   :  { %v5518_v46 = vpop.f32.mrf.mxu1  ;;  %v5129_v52 = vadd.f32 %v12182_v17, %v15445_v44 }
 0x57d   :  { %v5704_v45 = vadd.f32 %v5703_v22, %v12305_v35  ;;  %v12315_v28 = vadd.f32 %v5518_v46, %v5127_v13  ;;  %v5130_v22 = vadd.f32 %v12206_v62, %v15446_v8  ;;  %v5052_v46 = vpop.f32.mrf.mxu0 }
 0x57e   :  { %v8722_v6 = vpop.f32.mrf.mxu1  ;;  %v12325_v19 = vadd.f32 %v8721_v16, %v5129_v52  ;;  %v15448_v52 = vld [vmem:[#allocation34_spill] sm:$0xff]  ;;  %v5139_v27 = vadd.f32 %v5052_v46, %v15454_v2  ;;  %v15457_v46 = vld [vmem:[#allocation13_spill] sm:$0xff] }
 0x57f   :  { %15444 = vst [vmem:[#allocation32_spill] sm:$0xff] %v12315_v28  ;;  %v5705_v53 = vadd.f32 %v5704_v45, %v12310_v3  ;;  %v15447_v45 = vld [vmem:[#allocation36_spill] sm:$0xff]  ;;  %v12330_v3 = vadd.f32 %v8722_v6, %v5130_v22  ;;  %v8654_v16 = vpop.f32.mrf.mxu0  ;;  %v15449_v6 = vld [vmem:[#allocation21_spill] sm:$0xff] }
 0x580   :  { %v5521_v40 = vpop.f32.mrf.mxu1  ;;  %v5131_v36 = vadd.f32 %v12242_v26, %v15447_v45  ;;  %v5134_v22 = vadd.f32 %v12254_v10, %v15449_v6  ;;  %v15450_v45 = vld [vmem:[#allocation22_spill] sm:$0xff] }
 0x581   :  { %v5706_v11 = vadd.f32 %v5705_v53, %v12315_v28  ;;  %v12321_v29 = vadd.f32 %v5521_v40, %v5128_v31  ;;  %v5132_v31 = vadd.f32 %v5023_v49, %v12001_v7  ;;  %v5055_v49 = vpop.f32.mrf.mxu0 }
 0x582   :  { %v8725_v59 = vpop.f32.mrf.mxu1 }
 0x583   :  { %v5707_v23 = vadd.f32 %v5706_v11, %v12321_v29  ;;  %v5133_v11 = vadd.f32 %v12230_v60, %v15448_v52  ;;  %v8657_v18 = vpop.f32.mrf.mxu0 }
 0x584   :  { %v5534_v13 = vpop.f32.mrf.mxu1 }
 0x585   :  { %v5708_v17 = vadd.f32 %v5707_v23, %v12325_v19  ;;  %v12334_v40 = vadd.f32 %v5534_v13, %v5131_v36  ;;  %v12344_v23 = vadd.f32 %v8725_v59, %v5133_v11  ;;  %v5135_v36 = vadd.f32 %v5036_v20, %v15450_v45  ;;  %v15452_v59 = vld [vmem:[#allocation6_spill] sm:$0xff]  ;;  %v5068_v45 = vpop.f32.mrf.mxu0 }
 0x586   :  { %v8726_v53 = vpop.f32.mrf.mxu1  ;;  %v5137_v11 = vadd.f32 %v12276_v58, %v15452_v59  ;;  %v5138_v20 = vadd.f32 %v8650_v32, %v15453_v54  ;;  %v15456_v32 = vld [vmem:[#allocation23_spill] sm:$0xff] }
 0x587   :  { %v5709_v62 = vadd.f32 %v5708_v17, %v12330_v3  ;;  %v12348_v17 = vadd.f32 %v8726_v53, %v5134_v22  ;;  %v8658_v5 = vpop.f32.mrf.mxu0 }
 0x588   :  { %v5537_v44 = vpop.f32.mrf.mxu1 }
 0x589   :  { %v5710_v8 = vadd.f32 %v5709_v62, %v12334_v40  ;;  %v12340_v28 = vadd.f32 %v5537_v44, %v5132_v31  ;;  %v15451_v62 = vld [vmem:[#allocation8_spill] sm:$0xff]  ;;  %v5071_v48 = vpop.f32.mrf.mxu0 }
 0x58a   :  { %v8729_v26 = vpop.f32.mrf.mxu1  ;;  %v5136_v31 = vadd.f32 %v5039_v30, %v15451_v62 }
 0x58b   :  { %v5711_v7 = vadd.f32 %v5710_v8, %v12340_v28  ;;  %v5651_v53 = vadd.f32 %v8729_v26, %v5137_v11  ;;  %v5142_v26 = vadd.f32 %v8654_v16, %v15456_v32 }
 0x58c   :  { %v5550_v13 = vpop.f32.mrf.mxu1 }
 0x58d   :  { %v5712_v60 = vadd.f32 %v5711_v7, %v12344_v23  ;;  %v5649_v44 = vadd.f32 %v5550_v13, %v5135_v36 }
 0x58e   :  { %v8730_v52 = vpop.f32.mrf.mxu1 }
 0x58f   :  { %v5713_v35 = vadd.f32 %v5712_v60, %v12348_v17  ;;  %v5652_v30 = vadd.f32 %v8730_v52, %v5138_v20  ;;  %v5140_v60 = vadd.f32 %v5055_v49, %v12035_v9  ;;  %v5143_v52 = vadd.f32 %v5068_v45, %v15457_v46 }
 0x590   :  { %v5553_v10 = vpop.f32.mrf.mxu1 }
 0x591   :  { %v5714_v8 = vadd.f32 %v5713_v35, %v5649_v44  ;;  %v5650_v6 = vadd.f32 %v5553_v10, %v5136_v31  ;;  %v15455_v35 = vld [vmem:[#allocation11_spill] sm:$0xff] }
 0x592   :  { %v8733_v12 = vpop.f32.mrf.mxu1  ;;  %v5141_v31 = vadd.f32 %v8653_v43, %v15455_v35  ;;  %v15459_v43 = vld [vmem:[#allocation38_spill] sm:$0xff]  ;;  %v15460_v35 = vld [vmem:[#allocation15_spill] sm:$0xff] }
 0x593   :  { %v5715_v22 = vadd.f32 %v5714_v8, %v5650_v6  ;;  %v5146_v16 = vadd.f32 %v8658_v5, %v15460_v35 }
 0x594   :  { %v5566_v7 = vpop.f32.mrf.mxu1  ;;  %v5655_v11 = vadd.f32 %v8733_v12, %v5141_v31 }
 0x595   :  { %v5716_v13 = vadd.f32 %v5715_v22, %v5651_v53  ;;  %v5653_v62 = vadd.f32 %v5566_v7, %v5139_v27  ;;  %v15458_v27 = vld [vmem:[#allocation12_spill] sm:$0xff] }
 0x596   :  { %v8734_v36 = vpop.f32.mrf.mxu1  ;;  %v5144_v49 = vadd.f32 %v5071_v48, %v15458_v27 }
 0x597   :  { %v5717_v42 = vadd.f32 %v5716_v13, %v5652_v30  ;;  %v5656_v20 = vadd.f32 %v8734_v36, %v5142_v26 }
 0x598   :  { %v5569_v58 = vpop.f32.mrf.mxu1 }
 0x599   :  { %v5718_v10 = vadd.f32 %v5717_v42, %v5653_v62  ;;  %v5654_v59 = vadd.f32 %v5569_v58, %v5140_v60  ;;  %v5145_v42 = vadd.f32 %v8657_v18, %v15459_v43 }
 0x59a   :  { %v8737_v54 = vpop.f32.mrf.mxu1 }
 0x59b   :  { %v5719_v8 = vadd.f32 %v5718_v10, %v5654_v59  ;;  %v5659_v12 = vadd.f32 %v8737_v54, %v5145_v42 }
 0x59c   :  { %v5582_v2 = vpop.f32.mrf.mxu1 }
 0x59d   :  { %v5720_v22 = vadd.f32 %v5719_v8, %v5655_v11  ;;  %v5657_v7 = vadd.f32 %v5582_v2, %v5143_v52 }
 0x59e   :  { %v8738_v9 = vpop.f32.mrf.mxu1 }
 0x59f   :  { %v5721_v13 = vadd.f32 %v5720_v22, %v5656_v20  ;;  %v5660_v10 = vadd.f32 %v8738_v9, %v5146_v16 }
 0x5a0   :  { %v5585_v47 = vpop.f32.mrf.mxu1 }
 0x5a1   :  { %v5722_v60 = vadd.f32 %v5721_v13, %v5657_v7  ;;  %v5658_v58 = vadd.f32 %v5585_v47, %v5144_v49 }
 0x5a3   :  { %v5723_v31 = vadd.f32 %v5722_v60, %v5658_v58 }
 0x5a5   :  { %v5724_v32 = vadd.f32 %v5723_v31, %v5659_v12 }
 0x5a7   :  { %v5725_v57 = vadd.f32 %v5724_v32, %v5660_v10 }
 0x5a9   :  { %v5726_v45 = vrot.slane %v5725_v57, 4 }
 0x5ab   :  { %v5727_v36 = vadd.f32 %v5726_v45, %v5725_v57 }
 0x5ad   :  { %v5728_v26 = vrot.slane %v5727_v36, 2 }
 0x5af   :  { %v5729_v8 = vadd.f32 %v5728_v26, %v5727_v36 }
 0x5b1   :  { %v5730_v46 = vrot.slane %v5729_v8, 1 }
 0x5b3   :  { %v5731_v48 = vadd.f32 %v5730_v46, %v5729_v8 }
 0x5b5   :  { %v12364_v2 = vmul.f32 0.001953125, %v5731_v48 }
 0x5b7   :  { %v12368_v18 = vsub.f32 %v12321_v29, %v12364_v2  ;;  %v12372_v47 = vsub.f32 %v12325_v19, %v12364_v2  ;;  %v12376_v5 = vsub.f32 %v12330_v3, %v12364_v2  ;;  %v12380_v57 = vsub.f32 %v12334_v40, %v12364_v2 }
 0x5b8   :  { %v12384_v54 = vsub.f32 %v12340_v28, %v12364_v2  ;;  %v12388_v29 = vsub.f32 %v12344_v23, %v12364_v2  ;;  %v12392_v19 = vsub.f32 %v12348_v17, %v12364_v2  ;;  %v12395_v52 = vsub.f32 %v5649_v44, %v12364_v2 }
 0x5b9   :  { %v12398_v3 = vsub.f32 %v5650_v6, %v12364_v2  ;;  %v12401_v40 = vsub.f32 %v5651_v53, %v12364_v2  ;;  %v12404_v28 = vsub.f32 %v5652_v30, %v12364_v2  ;;  %v12407_v22 = vsub.f32 %v5653_v62, %v12364_v2 }
 0x5ba   :  { %v12410_v23 = vsub.f32 %v5654_v59, %v12364_v2  ;;  %v12413_v17 = vsub.f32 %v5655_v11, %v12364_v2  ;;  %v12416_v44 = vsub.f32 %v5656_v20, %v12364_v2  ;;  %v12419_v6 = vsub.f32 %v5657_v7, %v12364_v2  ;;  %v15463_v20 = vld [vmem:[#allocation14_spill] sm:$0xff] }
 0x5bb   :  { %v12422_v53 = vsub.f32 %v5658_v58, %v12364_v2  ;;  %v12425_v30 = vsub.f32 %v5659_v12, %v12364_v2  ;;  %v12428_v62 = vsub.f32 %v5660_v10, %v12364_v2  ;;  %v12432_v59 = vsub.f32 %v12064_v0, %v12364_v2 }
 0x5bc   :  { %15461 = vst [vmem:[#allocation24_spill] sm:$0xff] %v12410_v23  ;;  %15462 = vst [vmem:[#allocation27_spill] sm:$0xff] %v12419_v6  ;;  %v12436_v11 = vsub.f32 %v12066_v55, %v12364_v2  ;;  %v12440_v9 = vsub.f32 %v15463_v20, %v12364_v2  ;;  %v12448_v7 = vsub.f32 %v12078_v41, %v12364_v2 }
 0x5bd   :  { %v5797_v27 = vmul.f32 %v12432_v59, %v12432_v59  ;;  %v12452_v0 = vsub.f32 %v12083_v56, %v12364_v2  ;;  %v12458_v43 = vsub.f32 %v12091_v25, %v12364_v2  ;;  %v12464_v41 = vsub.f32 %v12095_v33, %v12364_v2 }
 0x5be   :  { %v5798_v49 = vmul.f32 %v12436_v11, %v12436_v11  ;;  %v5799_v55 = vmul.f32 %v12440_v9, %v12440_v9  ;;  %v5800_v42 = vmul.f32 %v12448_v7, %v12448_v7  ;;  %v12470_v35 = vsub.f32 %v12102_v50, %v12364_v2 }
 0x5bf   :  { %v5801_v56 = vmul.f32 %v12452_v0, %v12452_v0  ;;  %v5802_v25 = vmul.f32 %v12458_v43, %v12458_v43  ;;  %v12476_v12 = vsub.f32 %v12107_v37, %v12364_v2  ;;  %v5803_v33 = vmul.f32 %v12464_v41, %v12464_v41 }
 0x5c0   :  { %v5861_v13 = vadd.f32 %v5798_v49, %v5797_v27  ;;  %v12482_v10 = vsub.f32 %v12115_v61, %v12364_v2  ;;  %v5804_v50 = vmul.f32 %v12470_v35, %v12470_v35  ;;  %v12488_v45 = vsub.f32 %v12119_v21, %v12364_v2 }
 0x5c1   :  { %v5805_v37 = vmul.f32 %v12476_v12, %v12476_v12  ;;  %v12494_v26 = vsub.f32 %v12126_v15, %v12364_v2  ;;  %v12500_v46 = vsub.f32 %v12131_v24, %v12364_v2  ;;  %v12506_v20 = vsub.f32 %v12139_v4, %v12364_v2 }
 0x5c2   :  { %v5862_v60 = vadd.f32 %v5861_v13, %v5799_v55  ;;  %v5806_v61 = vmul.f32 %v12482_v10, %v12482_v10  ;;  %v5807_v21 = vmul.f32 %v12488_v45, %v12488_v45  ;;  %v12512_v49 = vsub.f32 %v12143_v14, %v12364_v2  ;;  %v15464_v13 = vld [vmem:[#allocation17_spill] sm:$0xff] }
 0x5c3   :  { %v5808_v15 = vmul.f32 %v12494_v26, %v12494_v26  ;;  %v5809_v24 = vmul.f32 %v12500_v46, %v12500_v46  ;;  %v5810_v4 = vmul.f32 %v12506_v20, %v12506_v20 }
 0x5c4   :  { %v5863_v58 = vadd.f32 %v5862_v60, %v5800_v42  ;;  %v12518_v42 = vsub.f32 %v15464_v13, %v12364_v2  ;;  %v5811_v14 = vmul.f32 %v12512_v49, %v12512_v49 }
 0x5c6   :  { %v5864_v16 = vadd.f32 %v5863_v58, %v5801_v56  ;;  %v12524_v56 = vsub.f32 %v12155_v34, %v12364_v2 }
 0x5c8   :  { %v5865_v31 = vadd.f32 %v5864_v16, %v5802_v25  ;;  %v12530_v25 = vsub.f32 %v12163_v1, %v12364_v2  ;;  %v5812_v16 = vmul.f32 %v12518_v42, %v12518_v42  ;;  %v5813_v34 = vmul.f32 %v12524_v56, %v12524_v56 }
 0x5ca   :  { %v5866_v32 = vadd.f32 %v5865_v31, %v5803_v33  ;;  %v12536_v31 = vsub.f32 %v12167_v39, %v12364_v2  ;;  %v5814_v1 = vmul.f32 %v12530_v25, %v12530_v25 }
 0x5cc   :  { %v5867_v36 = vadd.f32 %v5866_v32, %v5804_v50  ;;  %15465 = vst [vmem:[#allocation28_spill] sm:$0xff] %v12536_v31  ;;  %v12542_v32 = vsub.f32 %v12174_v51, %v12364_v2  ;;  %v5815_v39 = vmul.f32 %v12536_v31, %v12536_v31 }
 0x5ce   :  { %v5868_v8 = vadd.f32 %v5867_v36, %v5805_v37  ;;  %15466 = vst [vmem:[#allocation33_spill] sm:$0xff] %v12542_v32  ;;  %v12548_v36 = vsub.f32 %v12179_v63, %v12364_v2  ;;  %v5816_v51 = vmul.f32 %v12542_v32, %v12542_v32 }
 0x5d0   :  { %v5869_v48 = vadd.f32 %v5868_v8, %v5806_v61  ;;  %15467 = vst [vmem:[#allocation9_spill] sm:$0xff] %v12548_v36  ;;  %v12554_v8 = vsub.f32 %v12187_v38, %v12364_v2  ;;  %v5817_v63 = vmul.f32 %v12548_v36, %v12548_v36 }
 0x5d2   :  { %v5870_v27 = vadd.f32 %v5869_v48, %v5807_v21  ;;  %15468 = vst [vmem:[#allocation29_spill] sm:$0xff] %v12554_v8  ;;  %v15469_v48 = vld [vmem:[#allocation39_spill] sm:$0xff]  ;;  %v5818_v38 = vmul.f32 %v12554_v8, %v12554_v8 }
 0x5d4   :  { %v5871_v55 = vadd.f32 %v5870_v27, %v5808_v15  ;;  %v12560_v15 = vsub.f32 %v15469_v48, %v12364_v2 }
 0x5d6   :  { %v5872_v60 = vadd.f32 %v5871_v55, %v5809_v24  ;;  %15470 = vst [vmem:[#allocation35_spill] sm:$0xff] %v12560_v15  ;;  %v15471_v24 = vld [vmem:[#allocation18_spill] sm:$0xff] }
 0x5d7   :  { %v12566_v55 = vsub.f32 %v15471_v24, %v12364_v2 }
 0x5d8   :  { %v5873_v58 = vadd.f32 %v5872_v60, %v5810_v4  ;;  %v15473_v4 = vld [vmem:[#allocation40_spill] sm:$0xff] }
 0x5d9   :  { %15472 = vst [vmem:[#allocation20_spill] sm:$0xff] %v12566_v55  ;;  %v12572_v60 = vsub.f32 %v15473_v4, %v12364_v2  ;;  %v15483_v4 = vld [vmem:[#allocation45_spill] sm:$0xff] }
 0x5da   :  { %v5874_v33 = vadd.f32 %v5873_v58, %v5811_v14  ;;  %v5819_v14 = vmul.f32 %v12560_v15, %v12560_v15  ;;  %v8906_v15 = vld [vmem:[%s14795_s3 + $0x10] sm:$0xff]  }
 0x5db   :  { %15474 = vst [vmem:[#allocation30_spill] sm:$0xff] %v12572_v60 }
 0x5dc   :  { %v5875_v50 = vadd.f32 %v5874_v33, %v5812_v16  ;;  %v15475_v16 = vld [vmem:[#allocation41_spill] sm:$0xff] }
 0x5dd   :  { %v12578_v33 = vsub.f32 %v15475_v16, %v12364_v2 }
 0x5de   :  { %v5876_v37 = vadd.f32 %v5875_v50, %v5813_v34  ;;  %v5820_v34 = vmul.f32 %v12566_v55, %v12566_v55 }
 0x5df   :  { %15476 = vst [vmem:[#allocation31_spill] sm:$0xff] %v12578_v33  ;;  %v5822_v48 = vmul.f32 %v12578_v33, %v12578_v33 }
 0x5e0   :  { %v5877_v61 = vadd.f32 %v5876_v37, %v5814_v1  ;;  %v15477_v1 = vld [vmem:[#allocation42_spill] sm:$0xff] }
 0x5e1   :  { %v12584_v37 = vsub.f32 %v15477_v1, %v12364_v2 }
 0x5e2   :  { %v5878_v21 = vadd.f32 %v5877_v61, %v5815_v39  ;;  %v5821_v39 = vmul.f32 %v12572_v60, %v12572_v60  ;;  %v8905_v60 = vld [vmem:[%s14795_s3 + $0x18] sm:$0xff]  }
 0x5e3   :  { %15478 = vst [vmem:[#allocation36_spill] sm:$0xff] %v12584_v37 }
 0x5e4   :  { %v5879_v27 = vadd.f32 %v5878_v21, %v5816_v51  ;;  %v15479_v51 = vld [vmem:[#allocation43_spill] sm:$0xff] }
 0x5e5   :  { %v12590_v21 = vsub.f32 %v15479_v51, %v12364_v2 }
 0x5e6   :  { %v5880_v13 = vadd.f32 %v5879_v27, %v5817_v63  ;;  %v15481_v27 = vld [vmem:[#allocation44_spill] sm:$0xff] }
 0x5e7   :  { %15480 = vst [vmem:[#allocation34_spill] sm:$0xff] %v12590_v21  ;;  %v12596_v24 = vsub.f32 %v15481_v27, %v12364_v2  ;;  %v15489_v27 = vld [vmem:[#allocation19_spill] sm:$0xff] }
 0x5e8   :  { %v5881_v58 = vadd.f32 %v5880_v13, %v5818_v38  ;;  %v5823_v38 = vmul.f32 %v12584_v37, %v12584_v37  ;;  %v8904_v37 = vld [vmem:[%s14795_s3 + $0x20] sm:$0xff]  }
 0x5e9   :  { %15482 = vst [vmem:[#allocation21_spill] sm:$0xff] %v12596_v24  ;;  %v5825_v1 = vmul.f32 %v12596_v24, %v12596_v24 }
 0x5ea   :  { %v5882_v50 = vadd.f32 %v5881_v58, %v5819_v14  ;;  %v12602_v14 = vsub.f32 %v15483_v4, %v12364_v2  ;;  %v5824_v58 = vmul.f32 %v12590_v21, %v12590_v21  ;;  %v12620_v4 = vsub.f32 %v15489_v27, %v12364_v2  ;;  %v15494_v27 = vld [vmem:[#allocation49_spill] sm:$0xff] }
 0x5ec   :  { %v5883_v61 = vadd.f32 %v5882_v50, %v5820_v34  ;;  %15484 = vst [vmem:[#allocation22_spill] sm:$0xff] %v12602_v14  ;;  %v15485_v34 = vld [vmem:[#allocation47_spill] sm:$0xff]  ;;  %15490 = vst [vmem:[#allocation37_spill] sm:$0xff] %v12620_v4 }
 0x5ed   :  { %v12608_v50 = vsub.f32 %v15485_v34, %v12364_v2  ;;  %v15491_v34 = vld [vmem:[#allocation16_spill] sm:$0xff] }
 0x5ee   :  { %v5884_v63 = vadd.f32 %v5883_v61, %v5821_v39  ;;  %v15487_v61 = vld [vmem:[#allocation46_spill] sm:$0xff]  ;;  %v12626_v24 = vsub.f32 %v15491_v34, %v12364_v2  ;;  %v15495_v34 = vld [vmem:[#allocation51_spill] sm:$0xff] }
 0x5ef   :  { %15486 = vst [vmem:[#allocation8_spill] sm:$0xff] %v12608_v50  ;;  %v12614_v51 = vsub.f32 %v15487_v61, %v12364_v2  ;;  %v15493_v61 = vld [vmem:[#allocation7_spill] sm:$0xff] }
 0x5f0   :  { %v5885_v13 = vadd.f32 %v5884_v63, %v5822_v48  ;;  %v5826_v48 = vmul.f32 %v12602_v14, %v12602_v14  ;;  %15492 = vst [vmem:[#allocation10_spill] sm:$0xff] %v12626_v24  ;;  %v12632_v14 = vsub.f32 %v15493_v61, %v12364_v2  ;;  %v15496_v61 = vld [vmem:[#allocation48_spill] sm:$0xff] }
 0x5f1   :  { %15488 = vst [vmem:[#allocation6_spill] sm:$0xff] %v12614_v51 }
 0x5f2   :  { %v5886_v16 = vadd.f32 %v5885_v13, %v5823_v38  ;;  %v5827_v38 = vmul.f32 %v12608_v50, %v12608_v50  ;;  %v12638_v50 = vsub.f32 %v15494_v27, %v12364_v2  ;;  %v12656_v27 = vsub.f32 %v15496_v61, %v12364_v2  ;;  %v8903_v61 = vld [vmem:[%s14795_s3 + $0x28] sm:$0xff]  }
 0x5f4   :  { %v5887_v39 = vadd.f32 %v5886_v16, %v5824_v58  ;;  %v5828_v58 = vmul.f32 %v12614_v51, %v12614_v51  ;;  %v12644_v51 = vsub.f32 %v15495_v34, %v12364_v2 }
 0x5f6   :  { %v5888_v63 = vadd.f32 %v5887_v39, %v5825_v1  ;;  %v5829_v1 = vmul.f32 %v12620_v4, %v12620_v4  ;;  %v5833_v34 = vmul.f32 %v12644_v51, %v12644_v51  ;;  %v15498_v4 = vld [vmem:[#allocation53_spill] sm:$0xff] }
 0x5f7   :  { %v12671_v21 = vsub.f32 %v15498_v4, %v12364_v2  ;;  %v15500_v4 = vld [vmem:[#allocation52_spill] sm:$0xff] }
 0x5f8   :  { %v5889_v13 = vadd.f32 %v5888_v63, %v5826_v48  ;;  %v5830_v48 = vmul.f32 %v12626_v24, %v12626_v24  ;;  %v12686_v33 = vsub.f32 %v15500_v4, %v12364_v2  ;;  %v15502_v4 = vld [vmem:[#allocation26_spill] sm:$0xff] }
 0x5f9   :  { %v12701_v55 = vsub.f32 %v15502_v4, %v12364_v2 }
 0x5fa   :  { %v5890_v16 = vadd.f32 %v5889_v13, %v5827_v38  ;;  %v5831_v38 = vmul.f32 %v12632_v14, %v12632_v14 }
 0x5fb   :  { %v5840_v4 = vmul.f32 %v12701_v55, %v12701_v55 }
 0x5fc   :  { %v5891_v39 = vadd.f32 %v5890_v16, %v5828_v58  ;;  %v8901_v58 = vld [vmem:[%s14795_s3 + $0x38] sm:$0xff]   ;;  %v8902_v16 = vld [vmem:[%s14795_s3 + $0x30] sm:$0xff]  }
 0x5fd   :  { %8739 = vmatprep.subr.bf16.mxu0 %v8901_v58 }
 0x5fe   :  { %v5892_v63 = vadd.f32 %v5891_v39, %v5829_v1  ;;  %v5832_v1 = vmul.f32 %v12638_v50, %v12638_v50  ;;  %8740 = vmatpush3.bf16.msra.mxu0 %v8901_v58  ;;  %v15499_v58 = vld [vmem:[#allocation55_spill] sm:$0xff] }
 0x5ff   :  { %8741 = vmatprep.subr.bf16.mxu0 %v8902_v16 }
 0x600   :  { %v5893_v13 = vadd.f32 %v5892_v63, %v5830_v48  ;;  %v15497_v48 = vld [vmem:[#allocation50_spill] sm:$0xff] }
 0x601   :  { %v12662_v63 = vsub.f32 %v15497_v48, %v12364_v2  ;;  %v12677_v48 = vsub.f32 %v15499_v58, %v12364_v2 }
 0x602   :  { %v5894_v39 = vadd.f32 %v5893_v13, %v5831_v38  ;;  %v5834_v38 = vmul.f32 %v12656_v27, %v12656_v27  ;;  %8742 = vmatpush3.bf16.msra.mxu0 %v8902_v16 }
 0x603   :  { %8743 = vmatprep.subr.bf16.mxu0 %v8903_v61 }
 0x604   :  { %v5895_v24 = vadd.f32 %v5894_v39, %v5832_v1  ;;  %v5835_v1 = vmul.f32 %v12662_v63, %v12662_v63 }
 0x606   :  { %v5896_v13 = vadd.f32 %v5895_v24, %v5833_v34  ;;  %v5836_v24 = vmul.f32 %v12671_v21, %v12671_v21  ;;  %8744 = vmatpush3.bf16.msra.mxu0 %v8903_v61  ;;  %v15501_v34 = vld [vmem:[#allocation54_spill] sm:$0xff]  ;;  %v5838_v61 = vmul.f32 %v12686_v33, %v12686_v33 }
 0x607   :  { %v12692_v58 = vsub.f32 %v15501_v34, %v12364_v2  ;;  %8745 = vmatprep.subr.bf16.mxu0 %v8904_v37 }
 0x608   :  { %v5897_v39 = vadd.f32 %v5896_v13, %v5834_v38  ;;  %v5837_v38 = vmul.f32 %v12677_v48, %v12677_v48 }
 0x60a   :  { %v5898_v16 = vadd.f32 %v5897_v39, %v5835_v1  ;;  %8746 = vmatpush3.bf16.msra.mxu0 %v8904_v37  ;;  %v15503_v39 = vld [vmem:[#allocation32_spill] sm:$0xff] }
 0x60b   :  { %v12707_v34 = vsub.f32 %v15503_v39, %v12364_v2  ;;  %8747 = vmatprep.subr.bf16.mxu0 %v8905_v60  ;;  %v8907_v2 = vld [vmem:[%s14795_s3 + $0x8] sm:$0xff]  }
 0x60c   :  { %v5899_v13 = vadd.f32 %v5898_v16, %v5836_v24  ;;  %v5839_v24 = vmul.f32 %v12692_v58, %v12692_v58 }
 0x60d   :  { %v5841_v37 = vmul.f32 %v12707_v34, %v12707_v34 }
 0x60e   :  { %v5900_v1 = vadd.f32 %v5899_v13, %v5837_v38  ;;  %8748 = vmatpush3.bf16.msra.mxu0 %v8905_v60  ;;  %v5842_v13 = vmul.f32 %v12368_v18, %v12368_v18  ;;  %v8908_v60 = vld [vmem:[%s14795_s3] sm:$0xff]  }
 0x60f   :  { %8749 = vmatprep.subr.bf16.mxu0 %v8906_v15 }
 0x610   :  { %v5901_v16 = vadd.f32 %v5900_v1, %v5838_v61  ;;  %v5843_v1 = vmul.f32 %v12372_v47, %v12372_v47 }
 0x612   :  { %v5902_v8 = vadd.f32 %v5901_v16, %v5839_v24  ;;  %8750 = vmatpush3.bf16.msra.mxu0 %v8906_v15  ;;  %v5845_v16 = vmul.f32 %v12380_v57, %v12380_v57  ;;  %v5846_v15 = vmul.f32 %v12384_v54, %v12384_v54 }
 0x613   :  { %8751 = vmatprep.subr.bf16.mxu0 %v8907_v2 }
 0x614   :  { %v5903_v38 = vadd.f32 %v5902_v8, %v5840_v4  ;;  %v5844_v8 = vmul.f32 %v12376_v5, %v12376_v5 }
 0x616   :  { %v5904_v61 = vadd.f32 %v5903_v38, %v5841_v37  ;;  %8752 = vmatpush3.bf16.msra.mxu0 %v8907_v2  ;;  %v5847_v38 = vmul.f32 %v12388_v29, %v12388_v29  ;;  %v5849_v2 = vmul.f32 %v12395_v52, %v12395_v52 }
 0x617   :  { %8753 = vmatprep.subr.bf16.mxu0 %v8908_v60 }
 0x618   :  { %v5905_v39 = vadd.f32 %v5904_v61, %v5842_v13  ;;  %v5848_v61 = vmul.f32 %v12392_v19, %v12392_v19 }
 0x61a   :  { %v5906_v24 = vadd.f32 %v5905_v39, %v5843_v1  ;;  %8754 = vmatpush3.bf16.msra.mxu0 %v8908_v60  ;;  %v5850_v39 = vmul.f32 %v12398_v3, %v12398_v3 }
 0x61c   :  { %v5907_v4 = vadd.f32 %v5906_v24, %v5844_v8  ;;  %v5851_v24 = vmul.f32 %v12401_v40, %v12401_v40 }
 0x61e   :  { %v5908_v37 = vadd.f32 %v5907_v4, %v5845_v16  ;;  %v5852_v16 = vmul.f32 %v12404_v28, %v12404_v28 }
 0x620   :  { %v5909_v13 = vadd.f32 %v5908_v37, %v5846_v15  ;;  %v5853_v15 = vmul.f32 %v12407_v22, %v12407_v22 }
 0x622   :  { %v5910_v36 = vadd.f32 %v5909_v13, %v5847_v38  ;;  %v5854_v38 = vmul.f32 %v12410_v23, %v12410_v23  ;;  %v5855_v13 = vmul.f32 %v12413_v17, %v12413_v17 }
 0x624   :  { %v5911_v1 = vadd.f32 %v5910_v36, %v5848_v61 }
 0x626   :  { %v5912_v8 = vadd.f32 %v5911_v1, %v5849_v2  ;;  %v5856_v2 = vmul.f32 %v12416_v44, %v12416_v44 }
 0x628   :  { %v5913_v60 = vadd.f32 %v5912_v8, %v5850_v39  ;;  %v5857_v39 = vmul.f32 %v12419_v6, %v12419_v6 }
 0x62a   :  { %v5914_v4 = vadd.f32 %v5913_v60, %v5851_v24  ;;  %v5858_v24 = vmul.f32 %v12422_v53, %v12422_v53 }
 0x62c   :  { %v5915_v37 = vadd.f32 %v5914_v4, %v5852_v16  ;;  %v5859_v16 = vmul.f32 %v12425_v30, %v12425_v30 }
 0x62e   :  { %v5916_v36 = vadd.f32 %v5915_v37, %v5853_v15  ;;  %v5860_v15 = vmul.f32 %v12428_v62, %v12428_v62 }
 0x630   :  { %v5917_v61 = vadd.f32 %v5916_v36, %v5854_v38 }
 0x632   :  { %v5918_v1 = vadd.f32 %v5917_v61, %v5855_v13 }
 0x634   :  { %v5919_v8 = vadd.f32 %v5918_v1, %v5856_v2 }
 0x636   :  { %v5920_v60 = vadd.f32 %v5919_v8, %v5857_v39  ;;  %v5661_v39 = vld [vmem:[%s14798_s6] sm:$0x1] }
 0x638   :  { %v5921_v4 = vadd.f32 %v5920_v60, %v5858_v24  ;;  %v15504_v24 = vld [vmem:[#allocation25_spill] sm:$0xff] }
 0x63a   :  { %v5922_v37 = vadd.f32 %v5921_v4, %v5859_v16 }
 0x63c   :  { %v5923_v38 = vadd.f32 %v5922_v37, %v5860_v15  ;;  %v12783_v15 = vld [vmem:[%s14799_s7] ss:$0 sm:$0xff] }
 0x63e   :  { %v5924_v36 = vrot.slane %v5923_v38, 4 }
 0x640   :  { %v5925_v32 = vadd.f32 %v5924_v36, %v5923_v38 }
 0x642   :  { %v5926_v13 = vrot.slane %v5925_v32, 2 }
 0x644   :  { %v5927_v61 = vadd.f32 %v5926_v13, %v5925_v32 }
 0x646   :  { %v5928_v31 = vrot.slane %v5927_v61, 1 }
 0x648   :  { %v5929_v6 = vadd.f32 %v5928_v31, %v5927_v61 }
 0x64a   :  { %v5930_v2 = vmul.f32 0.001953125, %v5929_v6 }
 0x64c   :  { %v5931_v1 = vadd.f32 1e-05, %v5930_v2 }
 0x64e   :  { %8911 = vrsqrt.f32 %v5931_v1 }
 0x65b   :  { %v8912_v23 = vpop.eup %8911 }
 0x65c   :  { %v5933_v8 = vmul.f32 %v8912_v23, %v5661_v39 }
 0x65e   :  { %v12766_v60 = vrot.slane %v5933_v8, %v15504_v24 }
 0x660   :  { %v5942_v16 = vmul.f32 %v12766_v60, %v12440_v9  ;;  %v5943_v32 = vmul.f32 %v12766_v60, %v12448_v7  ;;  %v5974_v6 = vmul.f32 %v12766_v60, %v12632_v14  ;;  %v5975_v31 = vmul.f32 %v12766_v60, %v12638_v50 }
 0x661   :  { %v5978_v4 = vmul.f32 %v12766_v60, %v12662_v63  ;;  %v5979_v23 = vmul.f32 %v12766_v60, %v12671_v21  ;;  %v5982_v9 = vmul.f32 %v12766_v60, %v12692_v58  ;;  %v5983_v7 = vmul.f32 %v12766_v60, %v12701_v55 }
 0x662   :  { %v5986_v14 = vmul.f32 %v12766_v60, %v12372_v47  ;;  %v5987_v50 = vmul.f32 %v12766_v60, %v12376_v5  ;;  %v5990_v21 = vmul.f32 %v12766_v60, %v12388_v29  ;;  %v5991_v63 = vmul.f32 %v12766_v60, %v12392_v19 }
 0x663   :  { %v5994_v37 = vmul.f32 %v12766_v60, %v12401_v40  ;;  %v5995_v58 = vmul.f32 %v12766_v60, %v12404_v28  ;;  %v5998_v55 = vmul.f32 %v12766_v60, %v12413_v17  ;;  %v5999_v47 = vmul.f32 %v12766_v60, %v12416_v44 }
 0x664   :  { %v6002_v5 = vmul.f32 %v12766_v60, %v12425_v30  ;;  %v6003_v29 = vmul.f32 %v12766_v60, %v12428_v62  ;;  %v12810_v19 = vadd.f32 %v12783_v15, %v5974_v6  ;;  %v12813_v40 = vadd.f32 %v12783_v15, %v5975_v31 }
 0x665   :  { %v12816_v28 = vadd.f32 %v12783_v15, %v5978_v4  ;;  %v12819_v17 = vadd.f32 %v12783_v15, %v5979_v23  ;;  %v12822_v44 = vadd.f32 %v12783_v15, %v5982_v9  ;;  %v12825_v30 = vadd.f32 %v12783_v15, %v5983_v7 }
 0x666   :  { %v12828_v62 = vadd.f32 %v12783_v15, %v5986_v14  ;;  %v12831_v38 = vadd.f32 %v12783_v15, %v5987_v50  ;;  %v12834_v36 = vadd.f32 %v12783_v15, %v5990_v21  ;;  %v12837_v13 = vadd.f32 %v12783_v15, %v5991_v63 }
 0x667   :  { %v12840_v61 = vadd.f32 %v12783_v15, %v5994_v37  ;;  %v12843_v2 = vadd.f32 %v12783_v15, %v5995_v58  ;;  %v12846_v1 = vadd.f32 %v12783_v15, %v5998_v55  ;;  %v12849_v39 = vadd.f32 %v12783_v15, %v5999_v47 }
 0x668   :  { %v12852_v8 = vadd.f32 %v12783_v15, %v6002_v5  ;;  %v12855_v6 = vadd.f32 %v12783_v15, %v6003_v29  ;;  %v12859_v31 = vmul.f32 %v12766_v60, %v12422_v53  ;;  %v5940_v4 = vmul.f32 %v12766_v60, %v12432_v59  ;;  %v15505_v5 = vld [vmem:[#allocation24_spill] sm:$0xff] }
 0x669   :  { %v5941_v23 = vmul.f32 %v12766_v60, %v12436_v11  ;;  %v5944_v9 = vmul.f32 %v12766_v60, %v12452_v0  ;;  %v5945_v7 = vmul.f32 %v12766_v60, %v12458_v43  ;;  %v5946_v14 = vmul.f32 %v12766_v60, %v12464_v41 }
 0x66a   :  { %v5947_v50 = vmul.f32 %v12766_v60, %v12470_v35  ;;  %v5948_v53 = vmul.f32 %v12766_v60, %v12476_v12  ;;  %v5949_v59 = vmul.f32 %v12766_v60, %v12482_v10  ;;  %v5950_v11 = vmul.f32 %v12766_v60, %v12488_v45 }
 0x66b   :  { %v5951_v0 = vmul.f32 %v12766_v60, %v12494_v26  ;;  %v5952_v43 = vmul.f32 %v12766_v60, %v12500_v46  ;;  %v12885_v41 = vmul.f32 %v12766_v60, %v12506_v20  ;;  %v6012_v35 = vadd.f32 %v12783_v15, %v5942_v16 }
 0x66c   :  { %v6013_v12 = vadd.f32 %v12783_v15, %v5943_v32  ;;  %v5954_v10 = vmul.f32 %v12766_v60, %v12512_v49  ;;  %v5955_v45 = vmul.f32 %v12766_v60, %v12518_v42  ;;  %v12895_v26 = vmul.f32 %v12766_v60, %v12524_v56 }
 0x66d   :  { %v12899_v46 = vmul.f32 %v12766_v60, %v12530_v25  ;;  %v12903_v20 = vmul.f32 %v12766_v60, %v12644_v51  ;;  %v12907_v16 = vmul.f32 %v12766_v60, %v12656_v27  ;;  %v12911_v49 = vmul.f32 %v12766_v60, %v12677_v48 }
 0x66e   :  { %v12915_v42 = vmul.f32 %v12766_v60, %v12686_v33  ;;  %v12919_v56 = vmul.f32 %v12766_v60, %v12707_v34  ;;  %v12923_v25 = vmul.f32 %v12766_v60, %v12368_v18  ;;  %v12927_v51 = vmul.f32 %v12766_v60, %v12380_v57 }
 0x66f   :  { %v12931_v27 = vmul.f32 %v12766_v60, %v12384_v54  ;;  %v12935_v33 = vmul.f32 %v12766_v60, %v12395_v52  ;;  %v12939_v48 = vmul.f32 %v12766_v60, %v12398_v3  ;;  %v6076_v34 = vmax.f32 %v6012_v35, 0.0 }
 0x670   :  { %v6077_v32 = vmax.f32 %v6013_v12, 0.0  ;;  %v12943_v18 = vmul.f32 %v12766_v60, %v12407_v22  ;;  %v6010_v57 = vadd.f32 %v12783_v15, %v5940_v4  ;;  %v6011_v21 = vadd.f32 %v12783_v15, %v5941_v23  ;;  %v15506_v4 = vld [vmem:[#allocation27_spill] sm:$0xff] }
 0x671   :  { %v6014_v54 = vadd.f32 %v12783_v15, %v5944_v9  ;;  %v6016_v63 = vadd.f32 %v12783_v15, %v5946_v14  ;;  %v6017_v52 = vadd.f32 %v12783_v15, %v5947_v50  ;;  %v6020_v37 = vadd.f32 %v12783_v15, %v5950_v11 }
 0x672   :  { %v6015_v3 = vadd.f32 %v12783_v15, %v5945_v7  ;;  %v6021_v58 = vadd.f32 %v12783_v15, %v5951_v0  ;;  %v6074_v55 = vmax.f32 %v6010_v57, 0.0  ;;  %v6075_v47 = vmax.f32 %v6011_v21, 0.0 }
 0x673   :  { %v6078_v22 = vmax.f32 %v6014_v54, 0.0  ;;  %v12955_v29 = vmul.f32 %v12766_v60, %v15505_v5  ;;  %v12959_v23 = vmul.f32 %v12766_v60, %v15506_v4  ;;  %v6139_v9 = vpack.c.bf16 %v6077_v32, %v6076_v34 }
 0x674   :  { %v6079_v14 = vmax.f32 %v6015_v3, 0.0  ;;  %v12962_v50 = vadd.f32 %v12783_v15, %v5954_v10  ;;  %v6138_v11 = vpack.c.bf16 %v6075_v47, %v6074_v55  ;;  %v6018_v7 = vadd.f32 %v12783_v15, %v5948_v53 }
 0x675   :  { %v6019_v0 = vadd.f32 %v12783_v15, %v5949_v59  ;;  %v12967_v35 = vadd.f32 %v12783_v15, %v5955_v45  ;;  %v6080_v12 = vmax.f32 %v6016_v63, 0.0  ;;  %v6081_v57 = vmax.f32 %v6017_v52, 0.0 }
 0x676   :  { %v6084_v21 = vmax.f32 %v6020_v37, 0.0  ;;  %v6085_v54 = vmax.f32 %v6021_v58, 0.0  ;;  %v6108_v5 = vmax.f32 %v12810_v19, 0.0  ;;  %v6109_v34 = vmax.f32 %v12813_v40, 0.0  ;;  %8755 = vmatprep.mubr.bf16.mxu0 %v6138_v11 }
 0x677   :  { %v6140_v32 = vpack.c.bf16 %v6079_v14, %v6078_v22  ;;  %v6112_v10 = vmax.f32 %v12816_v28, 0.0  ;;  %v6113_v3 = vmax.f32 %v12819_v17, 0.0  ;;  %v6116_v53 = vmax.f32 %v12822_v44, 0.0  ;;  %8756 = vmatmul.mubr.bf16.vlgmr.msra.gmra.mxu0 %v6139_v9 }
 0x678   :  { %v6117_v59 = vmax.f32 %v12825_v30, 0.0  ;;  %v6120_v45 = vmax.f32 %v12828_v62, 0.0  ;;  %v6121_v63 = vmax.f32 %v12831_v38, 0.0  ;;  %v6082_v52 = vmax.f32 %v6018_v7, 0.0 }
 0x679   :  { %8759 = vmatprep.mubr.bf16.mxu0 %v6140_v32  ;;  %v6083_v19 = vmax.f32 %v6019_v0, 0.0  ;;  %v6124_v40 = vmax.f32 %v12834_v36, 0.0  ;;  %v6125_v37 = vmax.f32 %v12837_v13, 0.0  ;;  %v6128_v28 = vmax.f32 %v12840_v61, 0.0 }
 0x67a   :  { %v6022_v17 = vadd.f32 %v12783_v15, %v5952_v43  ;;  %v6129_v44 = vmax.f32 %v12843_v2, 0.0  ;;  %v6132_v30 = vmax.f32 %v12846_v1, 0.0  ;;  %v6133_v58 = vmax.f32 %v12849_v39, 0.0 }
 0x67b   :  { %v6136_v62 = vmax.f32 %v12852_v8, 0.0  ;;  %v6137_v38 = vmax.f32 %v12855_v6, 0.0  ;;  %v6141_v55 = vpack.c.bf16 %v6081_v57, %v6080_v12  ;;  %v6023_v36 = vadd.f32 %v12783_v15, %v12885_v41 }
 0x67c   :  { %v12988_v47 = vpack.c.bf16 %v6109_v34, %v6108_v5  ;;  %v6142_v13 = vpack.c.bf16 %v6083_v19, %v6082_v52  ;;  %v6143_v61 = vpack.c.bf16 %v6085_v54, %v6084_v21  ;;  %v12992_v43 = vadd.f32 %v12783_v15, %v12895_v26 }
 0x67d   :  { %v6046_v2 = vadd.f32 %v12783_v15, %v12903_v20  ;;  %v6086_v1 = vmax.f32 %v6022_v17, 0.0  ;;  %v6047_v39 = vadd.f32 %v12783_v15, %v12907_v16  ;;  %v12998_v8 = vpack.c.bf16 %v6113_v3, %v6112_v10 }
 0x67e   :  { %v6050_v6 = vadd.f32 %v12783_v15, %v12911_v49  ;;  %v6027_v41 = vadd.f32 %v12783_v15, %v12899_v46  ;;  %v6051_v26 = vadd.f32 %v12783_v15, %v12915_v42  ;;  %v13006_v4 = vpack.c.bf16 %v6117_v59, %v6116_v53 }
 0x67f   :  { %v6110_v22 = vmax.f32 %v6046_v2, 0.0  ;;  %8760 = vmatmul.mubr.bf16.gmra.mxu0 %v6141_v55  ;;  %v6087_v20 = vmax.f32 %v6023_v36, 0.0  ;;  %v6111_v9 = vmax.f32 %v6047_v39, 0.0  ;;  %v6054_v16 = vadd.f32 %v12783_v15, %v12919_v56 }
 0x680   :  { %v6114_v14 = vmax.f32 %v6050_v6, 0.0  ;;  %8763 = vmatprep.mubr.bf16.mxu0 %v6142_v13  ;;  %v6115_v11 = vmax.f32 %v6051_v26, 0.0  ;;  %v6055_v49 = vadd.f32 %v12783_v15, %v12923_v25  ;;  %v13012_v7 = vpack.c.bf16 %v6121_v63, %v6120_v45 }
 0x681   :  { %v6058_v46 = vadd.f32 %v12783_v15, %v12927_v51  ;;  %v13016_v42 = vpack.c.bf16 %v6111_v9, %v6110_v22  ;;  %v6118_v0 = vmax.f32 %v6054_v16, 0.0  ;;  %v6059_v12 = vadd.f32 %v12783_v15, %v12931_v27  ;;  %v15512_v9 = vld [vmem:[#allocation20_spill] sm:$0xff]  ;;  %v15513_v16 = vld [vmem:[#allocation30_spill] sm:$0xff] }
 0x682   :  { %v13020_v57 = vpack.c.bf16 %v6125_v37, %v6124_v40  ;;  %v13022_v21 = vpack.c.bf16 %v6115_v11, %v6114_v14  ;;  %v6119_v56 = vmax.f32 %v6055_v49, 0.0  ;;  %v6062_v25 = vadd.f32 %v12783_v15, %v12935_v33  ;;  %v15507_v37 = vld [vmem:[#allocation28_spill] sm:$0xff]  ;;  %v15514_v49 = vld [vmem:[#allocation31_spill] sm:$0xff] }
 0x683   :  { %v6122_v54 = vmax.f32 %v6058_v46, 0.0  ;;  %v6123_v5 = vmax.f32 %v6059_v12, 0.0  ;;  %v6063_v34 = vadd.f32 %v12783_v15, %v12939_v48  ;;  %v13028_v51 = vpack.c.bf16 %v6129_v44, %v6128_v28 }
 0x684   :  { %v6066_v32 = vadd.f32 %v12783_v15, %v12943_v18  ;;  %v13032_v10 = vpack.c.bf16 %v6119_v56, %v6118_v0  ;;  %v6126_v27 = vmax.f32 %v6062_v25, 0.0  ;;  %v6067_v3 = vadd.f32 %v12783_v15, %v12955_v29 }
 0x685   :  { %v13036_v53 = vpack.c.bf16 %v6133_v58, %v6132_v30  ;;  %v13038_v59 = vpack.c.bf16 %v6123_v5, %v6122_v54  ;;  %v6127_v33 = vmax.f32 %v6063_v34, 0.0  ;;  %v6070_v48 = vadd.f32 %v12783_v15, %v12959_v23  ;;  %v15508_v30 = vld [vmem:[#allocation33_spill] sm:$0xff] }
 0x686   :  { %v6130_v45 = vmax.f32 %v6066_v32, 0.0  ;;  %v6144_v63 = vpack.c.bf16 %v6087_v20, %v6086_v1  ;;  %v6131_v52 = vmax.f32 %v6067_v3, 0.0  ;;  %v6071_v18 = vadd.f32 %v12783_v15, %v12859_v31  ;;  %v15509_v58 = vld [vmem:[#allocation9_spill] sm:$0xff] }
 0x687   :  { %v13044_v19 = vpack.c.bf16 %v6137_v38, %v6136_v62  ;;  %8764 = vmatmul.mubr.bf16.gmra.mxu0 %v6143_v61  ;;  %v13046_v40 = vpack.c.bf16 %v6127_v33, %v6126_v27  ;;  %v6134_v29 = vmax.f32 %v6070_v48, 0.0  ;;  %v5958_v28 = vmul.f32 %v12766_v60, %v15507_v37  ;;  %v15510_v38 = vld [vmem:[#allocation29_spill] sm:$0xff]  ;;  %v15515_v27 = vld [vmem:[#allocation36_spill] sm:$0xff]  ;;  %v15516_v33 = vld [vmem:[#allocation34_spill] sm:$0xff] }
 0x688   :  { %8767 = vmatprep.mubr.bf16.mxu0 %v6144_v63  ;;  %v13050_v17 = vpack.c.bf16 %v6131_v52, %v6130_v45  ;;  %v6135_v44 = vmax.f32 %v6071_v18, 0.0  ;;  %v5959_v23 = vmul.f32 %v12766_v60, %v15508_v30  ;;  %v5960_v55 = vmul.f32 %v12766_v60, %v15509_v58  ;;  %v15517_v52 = vld [vmem:[#allocation21_spill] sm:$0xff] }
 0x689   :  { %v6088_v31 = vmax.f32 %v12962_v50, 0.0  ;;  %v6089_v62 = vmax.f32 %v12967_v35, 0.0  ;;  %v5961_v36 = vmul.f32 %v12766_v60, %v15510_v38  ;;  %v6090_v13 = vmax.f32 %v12992_v43, 0.0  ;;  %v15511_v35 = vld [vmem:[#allocation35_spill] sm:$0xff]  ;;  %v15519_v38 = vld [vmem:[#allocation8_spill] sm:$0xff] }
 0x68a   :  { %v6091_v61 = vmax.f32 %v6027_v41, 0.0  ;;  %v13061_v2 = vpack.c.bf16 %v6135_v44, %v6134_v29  ;;  %v6028_v1 = vadd.f32 %v12783_v15, %v5958_v28  ;;  %v6029_v39 = vadd.f32 %v12783_v15, %v5959_v23  ;;  %v15518_v29 = vld [vmem:[#allocation22_spill] sm:$0xff] }
 0x68b   :  { %v6145_v6 = vpack.c.bf16 %v6089_v62, %v6088_v31  ;;  %v6030_v26 = vadd.f32 %v12783_v15, %v5960_v55  ;;  %v6031_v50 = vadd.f32 %v12783_v15, %v5961_v36  ;;  %v5962_v20 = vmul.f32 %v12766_v60, %v15511_v35 }
 0x68c   :  { %v6146_v22 = vpack.c.bf16 %v6091_v61, %v6090_v13  ;;  %v5963_v43 = vmul.f32 %v12766_v60, %v15512_v9  ;;  %v6092_v41 = vmax.f32 %v6028_v1, 0.0  ;;  %v6093_v14 = vmax.f32 %v6029_v39, 0.0  ;;  %v15520_v13 = vld [vmem:[#allocation6_spill] sm:$0xff] }
 0x68d   :  { %v5964_v11 = vmul.f32 %v12766_v60, %v15513_v16  ;;  %v5965_v46 = vmul.f32 %v12766_v60, %v15514_v49  ;;  %v6094_v0 = vmax.f32 %v6030_v26, 0.0  ;;  %v6095_v12 = vmax.f32 %v6031_v50, 0.0  ;;  %v15522_v26 = vld [vmem:[#allocation10_spill] sm:$0xff] }
 0x68e   :  { %v6032_v56 = vadd.f32 %v12783_v15, %v5962_v20  ;;  %v6033_v54 = vadd.f32 %v12783_v15, %v5963_v43  ;;  %v6147_v25 = vpack.c.bf16 %v6093_v14, %v6092_v41  ;;  %v5966_v3 = vmul.f32 %v12766_v60, %v15515_v27 }
 0x68f   :  { %8768 = vmatmul.mubr.bf16.gmra.mxu0 %v6145_v6  ;;  %v6148_v5 = vpack.c.bf16 %v6095_v12, %v6094_v0  ;;  %v6034_v34 = vadd.f32 %v12783_v15, %v5964_v11  ;;  %v6035_v32 = vadd.f32 %v12783_v15, %v5965_v46  ;;  %v5967_v45 = vmul.f32 %v12766_v60, %v15516_v33  ;;  %v15521_v6 = vld [vmem:[#allocation37_spill] sm:$0xff] }
 0x690   :  { %8771 = vmatprep.mubr.bf16.mxu0 %v6146_v22  ;;  %v6096_v48 = vmax.f32 %v6032_v56, 0.0  ;;  %v6097_v63 = vmax.f32 %v6033_v54, 0.0  ;;  %v5968_v18 = vmul.f32 %v12766_v60, %v15517_v52  ;;  %v5969_v37 = vmul.f32 %v12766_v60, %v15518_v29 }
 0x691   :  { %v6098_v28 = vmax.f32 %v6034_v34, 0.0  ;;  %v6099_v44 = vmax.f32 %v6035_v32, 0.0  ;;  %v6036_v30 = vadd.f32 %v12783_v15, %v5966_v3  ;;  %v6037_v23 = vadd.f32 %v12783_v15, %v5967_v45 }
 0x692   :  { %v6149_v58 = vpack.c.bf16 %v6097_v63, %v6096_v48  ;;  %v6038_v31 = vadd.f32 %v12783_v15, %v5968_v18  ;;  %v6039_v62 = vadd.f32 %v12783_v15, %v5969_v37  ;;  %v5970_v36 = vmul.f32 %v12766_v60, %v15519_v38 }
 0x693   :  { %v6150_v55 = vpack.c.bf16 %v6099_v44, %v6098_v28  ;;  %v5971_v61 = vmul.f32 %v12766_v60, %v15520_v13  ;;  %v6100_v1 = vmax.f32 %v6036_v30, 0.0  ;;  %v6101_v39 = vmax.f32 %v6037_v23, 0.0 }
 0x694   :  { %v5972_v22 = vmul.f32 %v12766_v60, %v15521_v6  ;;  %v5973_v50 = vmul.f32 %v12766_v60, %v15522_v26  ;;  %v6102_v35 = vmax.f32 %v6038_v31, 0.0  ;;  %v6103_v20 = vmax.f32 %v6039_v62, 0.0 }
 0x695   :  { %v6040_v9 = vadd.f32 %v12783_v15, %v5970_v36  ;;  %v6041_v43 = vadd.f32 %v12783_v15, %v5971_v61  ;;  %v6151_v41 = vpack.c.bf16 %v6101_v39, %v6100_v1 }
 0x696   :  { %v6152_v14 = vpack.c.bf16 %v6103_v20, %v6102_v35  ;;  %v6042_v16 = vadd.f32 %v12783_v15, %v5972_v22  ;;  %v6043_v11 = vadd.f32 %v12783_v15, %v5973_v50 }
 0x697   :  { %8772 = vmatmul.mubr.bf16.gmra.mxu0 %v6147_v25  ;;  %v6104_v49 = vmax.f32 %v6040_v9, 0.0  ;;  %v6105_v46 = vmax.f32 %v6041_v43, 0.0 }
 0x698   :  { %8775 = vmatprep.mubr.bf16.mxu0 %v6148_v5  ;;  %v6106_v0 = vmax.f32 %v6042_v16, 0.0  ;;  %v6107_v12 = vmax.f32 %v6043_v11, 0.0 }
 0x699   :  { %v6153_v56 = vpack.c.bf16 %v6105_v46, %v6104_v49 }
 0x69a   :  { %v6154_v60 = vpack.c.bf16 %v6107_v12, %v6106_v0 }
 0x69f   :  { %8776 = vmatmul.mubr.bf16.gmra.mxu0 %v6149_v58 }
 0x6a0   :  { %8779 = vmatprep.mubr.bf16.mxu0 %v6150_v55 }
 0x6a7   :  { %8780 = vmatmul.mubr.bf16.gmra.mxu0 %v6151_v41 }
 0x6a8   :  { %8783 = vmatprep.mubr.bf16.mxu0 %v6152_v14 }
 0x6af   :  { %8784 = vmatmul.mubr.bf16.gmra.mxu0 %v6153_v56 }
 0x6b0   :  { %8787 = vmatprep.mubr.bf16.mxu0 %v6154_v60 }
 0x6b7   :  { %8788 = vmatmul.mubr.bf16.gmra.mxu0 %v12988_v47 }
 0x6b8   :  { %8791 = vmatprep.mubr.bf16.mxu0 %v13016_v42 }
 0x6bf   :  { %8792 = vmatmul.mubr.bf16.gmra.mxu0 %v12998_v8 }
 0x6c0   :  { %8795 = vmatprep.mubr.bf16.mxu0 %v13022_v21 }
 0x6c7   :  { %8796 = vmatmul.mubr.bf16.gmra.mxu0 %v13006_v4 }
 0x6c8   :  { %8799 = vmatprep.mubr.bf16.mxu0 %v13032_v10 }
 0x6cf   :  { %8800 = vmatmul.mubr.bf16.gmra.mxu0 %v13012_v7 }
 0x6d0   :  { %8803 = vmatprep.mubr.bf16.mxu0 %v13038_v59 }
 0x6d7   :  { %8804 = vmatmul.mubr.bf16.gmra.mxu0 %v13020_v57 }
 0x6d8   :  { %8807 = vmatprep.mubr.bf16.mxu0 %v13046_v40 }
 0x6df   :  { %8808 = vmatmul.mubr.bf16.gmra.mxu0 %v13028_v51 }
 0x6e0   :  { %8811 = vmatprep.mubr.bf16.mxu0 %v13050_v17 }
 0x6e7   :  { %8812 = vmatmul.mubr.bf16.gmra.mxu0 %v13036_v53 }
 0x6e8   :  { %8815 = vmatprep.mubr.bf16.mxu0 %v13061_v2 }
 0x6ef   :  { %8816 = vmatmul.mubr.bf16.gmra.mxu0 %v13044_v19 }
 0x737   :  { %v13118_v15 = vpop.f32.mrf.mxu0 }
 0x738   :  { %v6528_v51 = vsel %vm149_vm0, %v13118_v15, 0.0 }
 0x739   :  { %v13120_v47 = vpop.f32.mrf.mxu0 }
 0x73a   :  { %v6525_v7 = vsel %vm149_vm0, %v13120_v47, 0.0 }
 0x73b   :  { %v13122_v8 = vpop.f32.mrf.mxu0 }
 0x73c   :  { %v6530_v59 = vsel %vm149_vm0, %v13122_v8, 0.0 }
 0x73d   :  { %v13124_v4 = vpop.f32.mrf.mxu0 }
 0x73e   :  { %v6526_v42 = vsel %vm149_vm0, %v13124_v4, 0.0 }
 0x73f   :  { %v6527_v57 = vadd.f32 %v6526_v42, %v6525_v7  ;;  %v13130_v21 = vpop.f32.mrf.mxu0 }
 0x740   :  { %v6536_v32 = vsel %vm149_vm0, %v13130_v21, 0.0 }
 0x741   :  { %v6529_v10 = vadd.f32 %v6528_v51, %v6527_v57  ;;  %v13134_v53 = vpop.f32.mrf.mxu0 }
 0x742   :  { %v6532_v17 = vsel %vm149_vm0, %v13134_v53, 0.0 }
 0x743   :  { %v6531_v19 = vadd.f32 %v6530_v59, %v6529_v10  ;;  %v13138_v40 = vpop.f32.mrf.mxu0 }
 0x744   :  { %v6538_v33 = vsel %vm149_vm0, %v13138_v40, 0.0 }
 0x745   :  { %v6533_v2 = vadd.f32 %v6532_v17, %v6531_v19  ;;  %v13142_v54 = vpop.f32.mrf.mxu0 }
 0x746   :  { %v6534_v25 = vsel %vm149_vm0, %v13142_v54, 0.0 }
 0x747   :  { %v6535_v5 = vadd.f32 %v6534_v25, %v6533_v2  ;;  %v13146_v34 = vpop.f32.mrf.mxu0 }
 0x748   :  { %v6544_v44 = vsel %vm149_vm0, %v13146_v34, 0.0 }
 0x749   :  { %v6537_v27 = vadd.f32 %v6536_v32, %v6535_v5  ;;  %v13150_v3 = vpop.f32.mrf.mxu0 }
 0x74a   :  { %v6540_v63 = vsel %vm149_vm0, %v13150_v3, 0.0 }
 0x74b   :  { %v6539_v45 = vadd.f32 %v6538_v33, %v6537_v27  ;;  %v13154_v48 = vpop.f32.mrf.mxu0 }
 0x74c   :  { %v6546_v58 = vsel %vm149_vm0, %v13154_v48, 0.0 }
 0x74d   :  { %v6541_v52 = vadd.f32 %v6540_v63, %v6539_v45  ;;  %v13158_v18 = vpop.f32.mrf.mxu0 }
 0x74e   :  { %v6542_v29 = vsel %vm149_vm0, %v13158_v18, 0.0 }
 0x74f   :  { %v6543_v37 = vadd.f32 %v6542_v29, %v6541_v52  ;;  %v13162_v28 = vpop.f32.mrf.mxu0 }
 0x750   :  { %v6552_v39 = vsel %vm149_vm0, %v13162_v28, 0.0 }
 0x751   :  { %v6545_v30 = vadd.f32 %v6544_v44, %v6543_v37  ;;  %v13166_v23 = vpop.f32.mrf.mxu0 }
 0x752   :  { %v6548_v62 = vsel %vm149_vm0, %v13166_v23, 0.0 }
 0x753   :  { %v6547_v55 = vadd.f32 %v6546_v58, %v6545_v30  ;;  %v13170_v31 = vpop.f32.mrf.mxu0 }
 0x754   :  { %v6554_v26 = vsel %vm149_vm0, %v13170_v31, 0.0 }
 0x755   :  { %v6549_v38 = vadd.f32 %v6548_v62, %v6547_v55  ;;  %v13174_v36 = vpop.f32.mrf.mxu0 }
 0x756   :  { %v6550_v13 = vsel %vm149_vm0, %v13174_v36, 0.0 }
 0x757   :  { %v6551_v61 = vadd.f32 %v6550_v13, %v6549_v38  ;;  %v13178_v1 = vpop.f32.mrf.mxu0 }
 0x758   :  { %v6560_v11 = vsel %vm149_vm0, %v13178_v1, 0.0 }
 0x759   :  { %v6553_v6 = vadd.f32 %v6552_v39, %v6551_v61  ;;  %v13182_v22 = vpop.f32.mrf.mxu0 }
 0x75a   :  { %v6556_v20 = vsel %vm149_vm0, %v13182_v22, 0.0 }
 0x75b   :  { %v6555_v50 = vadd.f32 %v6554_v26, %v6553_v6  ;;  %v13186_v35 = vpop.f32.mrf.mxu0 }
 0x75c   :  { %v6562_v0 = vsel %vm149_vm0, %v13186_v35, 0.0 }
 0x75d   :  { %v6557_v9 = vadd.f32 %v6556_v20, %v6555_v50  ;;  %v13190_v43 = vpop.f32.mrf.mxu0 }
 0x75e   :  { %v6558_v41 = vsel %vm149_vm0, %v13190_v43, 0.0 }
 0x75f   :  { %v6559_v14 = vadd.f32 %v6558_v41, %v6557_v9  ;;  %v13194_v16 = vpop.f32.mrf.mxu0 }
 0x760   :  { %v6568_v59 = vsel %vm149_vm0, %v13194_v16, 0.0 }
 0x761   :  { %v6561_v49 = vadd.f32 %v6560_v11, %v6559_v14  ;;  %v13198_v46 = vpop.f32.mrf.mxu0 }
 0x762   :  { %v6564_v60 = vsel %vm149_vm0, %v13198_v46, 0.0 }
 0x763   :  { %v6563_v12 = vadd.f32 %v6562_v0, %v6561_v49  ;;  %v13202_v56 = vpop.f32.mrf.mxu0 }
 0x764   :  { %v6570_v2 = vsel %vm149_vm0, %v13202_v56, 0.0 }
 0x765   :  { %v6565_v7 = vadd.f32 %v6564_v60, %v6563_v12  ;;  %v13206_v42 = vpop.f32.mrf.mxu0 }
 0x766   :  { %v6566_v57 = vsel %vm149_vm0, %v13206_v42, 0.0 }
 0x767   :  { %v6567_v51 = vadd.f32 %v6566_v57, %v6565_v7  ;;  %v13210_v10 = vpop.f32.mrf.mxu0 }
 0x768   :  { %v6576_v29 = vsel %vm149_vm0, %v13210_v10, 0.0 }
 0x769   :  { %v6569_v19 = vadd.f32 %v6568_v59, %v6567_v51  ;;  %v13214_v17 = vpop.f32.mrf.mxu0 }
 0x76a   :  { %v6572_v32 = vsel %vm149_vm0, %v13214_v17, 0.0 }
 0x76b   :  { %v6571_v25 = vadd.f32 %v6570_v2, %v6569_v19  ;;  %v13218_v5 = vpop.f32.mrf.mxu0 }
 0x76c   :  { %v6578_v30 = vsel %vm149_vm0, %v13218_v5, 0.0 }
 0x76d   :  { %v6573_v27 = vadd.f32 %v6572_v32, %v6571_v25  ;;  %v13222_v33 = vpop.f32.mrf.mxu0 }
 0x76e   :  { %v6574_v45 = vsel %vm149_vm0, %v13222_v33, 0.0 }
 0x76f   :  { %v6575_v63 = vadd.f32 %v6574_v45, %v6573_v27  ;;  %v13226_v52 = vpop.f32.mrf.mxu0 }
 0x770   :  { %v6584_v26 = vsel %vm149_vm0, %v13226_v52, 0.0 }
 0x771   :  { %v6577_v37 = vadd.f32 %v6576_v29, %v6575_v63  ;;  %v13230_v44 = vpop.f32.mrf.mxu0 }
 0x772   :  { %v6580_v62 = vsel %vm149_vm0, %v13230_v44, 0.0 }
 0x773   :  { %v6579_v58 = vadd.f32 %v6578_v30, %v6577_v37  ;;  %v13234_v55 = vpop.f32.mrf.mxu0 }
 0x774   :  { %15523 = vst [vmem:[#allocation11_spill] sm:$0xff] %v13234_v55  ;;  %v6586_v9 = vsel %vm149_vm0, %v13234_v55, 0.0 }
 0x775   :  { %v6581_v38 = vadd.f32 %v6580_v62, %v6579_v58  ;;  %v13238_v13 = vpop.f32.mrf.mxu0 }
 0x776   :  { %v6582_v61 = vsel %vm149_vm0, %v13238_v13, 0.0 }
 0x777   :  { %v6583_v39 = vadd.f32 %v6582_v61, %v6581_v38  ;;  %v13242_v6 = vpop.f32.mrf.mxu0 }
 0x778   :  { %15524 = vst [vmem:[#allocation23_spill] sm:$0xff] %v13242_v6  ;;  %v6592_v57 = vsel %vm149_vm0, %v13242_v6, 0.0 }
 0x779   :  { %v6585_v50 = vadd.f32 %v6584_v26, %v6583_v39  ;;  %v13246_v20 = vpop.f32.mrf.mxu0 }
 0x77a   :  { %15525 = vst [vmem:[#allocation13_spill] sm:$0xff] %v13246_v20  ;;  %v6588_v11 = vsel %vm149_vm0, %v13246_v20, 0.0 }
 0x77b   :  { %v6587_v41 = vadd.f32 %v6586_v9, %v6585_v50  ;;  %v13250_v14 = vpop.f32.mrf.mxu0 }
 0x77c   :  { %15526 = vst [vmem:[#allocation12_spill] sm:$0xff] %v13250_v14  ;;  %v6594_v19 = vsel %vm149_vm0, %v13250_v14, 0.0 }
 0x77d   :  { %v6589_v49 = vadd.f32 %v6588_v11, %v6587_v41  ;;  %v13254_v0 = vpop.f32.mrf.mxu0 }
 0x77e   :  { %15527 = vst [vmem:[#allocation38_spill] sm:$0xff] %v13254_v0  ;;  %v6590_v12 = vsel %vm149_vm0, %v13254_v0, 0.0 }
 0x77f   :  { %v6591_v60 = vadd.f32 %v6590_v12, %v6589_v49  ;;  %v13258_v7 = vpop.f32.mrf.mxu0 }
 0x780   :  { %15528 = vst [vmem:[#allocation15_spill] sm:$0xff] %v13258_v7  ;;  %v6600_v30 = vsel %vm149_vm0, %v13258_v7, 0.0 }
 0x781   :  { %v6593_v51 = vadd.f32 %v6592_v57, %v6591_v60  ;;  %v13262_v59 = vpop.f32.mrf.mxu0 }
 0x782   :  { %15529 = vst [vmem:[#allocation14_spill] sm:$0xff] %v13262_v59  ;;  %v6596_v32 = vsel %vm149_vm0, %v13262_v59, 0.0 }
 0x783   :  { %v6595_v2 = vadd.f32 %v6594_v19, %v6593_v51  ;;  %v13266_v25 = vpop.f32.mrf.mxu0 }
 0x784   :  { %15530 = vst [vmem:[#allocation17_spill] sm:$0xff] %v13266_v25  ;;  %v6602_v38 = vsel %vm149_vm0, %v13266_v25, 0.0 }
 0x785   :  { %v6597_v27 = vadd.f32 %v6596_v32, %v6595_v2  ;;  %v13270_v45 = vpop.f32.mrf.mxu0 }
 0x786   :  { %15531 = vst [vmem:[#allocation39_spill] sm:$0xff] %v13270_v45  ;;  %v6598_v63 = vsel %vm149_vm0, %v13270_v45, 0.0 }
 0x787   :  { %v6599_v29 = vadd.f32 %v6598_v63, %v6597_v27  ;;  %v13274_v37 = vpop.f32.mrf.mxu0 }
 0x788   :  { %15532 = vst [vmem:[#allocation18_spill] sm:$0xff] %v13274_v37  ;;  %v6608_v12 = vsel %vm149_vm0, %v13274_v37, 0.0 }
 0x789   :  { %v6601_v58 = vadd.f32 %v6600_v30, %v6599_v29  ;;  %v13278_v62 = vpop.f32.mrf.mxu0 }
 0x78a   :  { %15533 = vst [vmem:[#allocation40_spill] sm:$0xff] %v13278_v62  ;;  %v6604_v26 = vsel %vm149_vm0, %v13278_v62, 0.0 }
 0x78b   :  { %v6603_v61 = vadd.f32 %v6602_v38, %v6601_v58  ;;  %v13282_v39 = vpop.f32.mrf.mxu0 }
 0x78c   :  { %15534 = vst [vmem:[#allocation41_spill] sm:$0xff] %v13282_v39  ;;  %v6610_v51 = vsel %vm149_vm0, %v13282_v39, 0.0 }
 0x78d   :  { %v6605_v50 = vadd.f32 %v6604_v26, %v6603_v61  ;;  %v13286_v9 = vpop.f32.mrf.mxu0 }
 0x78e   :  { %15535 = vst [vmem:[#allocation42_spill] sm:$0xff] %v13286_v9  ;;  %v6606_v41 = vsel %vm149_vm0, %v13286_v9, 0.0 }
 0x78f   :  { %v6607_v11 = vadd.f32 %v6606_v41, %v6605_v50  ;;  %v13290_v49 = vpop.f32.mrf.mxu0 }
 0x790   :  { %15536 = vst [vmem:[#allocation43_spill] sm:$0xff] %v13290_v49  ;;  %v6616_v38 = vsel %vm149_vm0, %v13290_v49, 0.0 }
 0x791   :  { %v6609_v60 = vadd.f32 %v6608_v12, %v6607_v11  ;;  %v13294_v57 = vpop.f32.mrf.mxu0 }
 0x792   :  { %15537 = vst [vmem:[#allocation44_spill] sm:$0xff] %v13294_v57  ;;  %v6612_v32 = vsel %vm149_vm0, %v13294_v57, 0.0 }
 0x793   :  { %v6611_v19 = vadd.f32 %v6610_v51, %v6609_v60  ;;  %v13298_v2 = vpop.f32.mrf.mxu0 }
 0x794   :  { %15538 = vst [vmem:[#allocation45_spill] sm:$0xff] %v13298_v2  ;;  %v6618_v50 = vsel %vm149_vm0, %v13298_v2, 0.0 }
 0x795   :  { %v6613_v27 = vadd.f32 %v6612_v32, %v6611_v19  ;;  %v6447_v63 = vpop.f32.mrf.mxu0 }
 0x796   :  { %v6614_v29 = vsel %vm149_vm0, %v6447_v63, 0.0 }
 0x797   :  { %v6615_v30 = vadd.f32 %v6614_v29, %v6613_v27  ;;  %v8805_v58 = vpop.f32.mrf.mxu0 }
 0x798   :  { %v6624_v27 = vsel %vm149_vm0, %v8805_v58, 0.0 }
 0x799   :  { %v6617_v61 = vadd.f32 %v6616_v38, %v6615_v30  ;;  %v6460_v26 = vpop.f32.mrf.mxu0 }
 0x79a   :  { %v6620_v12 = vsel %vm149_vm0, %v6460_v26, 0.0 }
 0x79b   :  { %v6619_v41 = vadd.f32 %v6618_v50, %v6617_v61  ;;  %v8806_v11 = vpop.f32.mrf.mxu0 }
 0x79c   :  { %v6626_v30 = vsel %vm149_vm0, %v8806_v11, 0.0 }
 0x79d   :  { %v6621_v60 = vadd.f32 %v6620_v12, %v6619_v41  ;;  %v6463_v51 = vpop.f32.mrf.mxu0 }
 0x79e   :  { %v6622_v19 = vsel %vm149_vm0, %v6463_v51, 0.0 }
 0x79f   :  { %v6623_v32 = vadd.f32 %v6622_v19, %v6621_v60  ;;  %v8809_v24 = vpop.f32.mrf.mxu0 }
 0x7a0   :  { %v6632_v37 = vsel %vm149_vm0, %v8809_v24, 0.0 }
 0x7a1   :  { %v6625_v29 = vadd.f32 %v6624_v27, %v6623_v32  ;;  %v6476_v57 = vpop.f32.mrf.mxu0 }
 0x7a2   :  { %v6628_v2 = vsel %vm149_vm0, %v6476_v57, 0.0 }
 0x7a3   :  { %v6627_v38 = vadd.f32 %v6626_v30, %v6625_v29  ;;  %v8810_v49 = vpop.f32.mrf.mxu0 }
 0x7a4   :  { %v6634_v9 = vsel %vm149_vm0, %v8810_v49, 0.0 }
 0x7a5   :  { %v6629_v61 = vadd.f32 %v6628_v2, %v6627_v38  ;;  %v6479_v50 = vpop.f32.mrf.mxu0 }
 0x7a6   :  { %v6630_v39 = vsel %vm149_vm0, %v6479_v50, 0.0 }
 0x7a7   :  { %v6631_v41 = vadd.f32 %v6630_v39, %v6629_v61  ;;  %v8813_v12 = vpop.f32.mrf.mxu0 }
 0x7a8   :  { %v6640_v7 = vsel %vm149_vm0, %v8813_v12, 0.0 }
 0x7a9   :  { %v6633_v60 = vadd.f32 %v6632_v37, %v6631_v41  ;;  %v6492_v19 = vpop.f32.mrf.mxu0 }
 0x7aa   :  { %v6636_v62 = vsel %vm149_vm0, %v6492_v19, 0.0 }
 0x7ab   :  { %v6635_v32 = vadd.f32 %v6634_v9, %v6633_v60  ;;  %v8814_v27 = vpop.f32.mrf.mxu0 }
 0x7ac   :  { %v6642_v45 = vsel %vm149_vm0, %v8814_v27, 0.0 }
 0x7ad   :  { %v6637_v29 = vadd.f32 %v6636_v62, %v6635_v32  ;;  %v6495_v30 = vpop.f32.mrf.mxu0 }
 0x7ae   :  { %v6638_v25 = vsel %vm149_vm0, %v6495_v30, 0.0 }
 0x7af   :  { %v6639_v2 = vadd.f32 %v6638_v25, %v6637_v29  ;;  %v8817_v38 = vpop.f32.mrf.mxu0 }
 0x7b0   :  { %v6648_v32 = vsel %vm149_vm0, %v8817_v38, 0.0 }
 0x7b1   :  { %v6641_v39 = vadd.f32 %v6640_v7, %v6639_v2  ;;  %v6508_v61 = vpop.f32.mrf.mxu0 }
 0x7b2   :  { %v6644_v59 = vsel %vm149_vm0, %v6508_v61, 0.0 }
 0x7b3   :  { %v6643_v37 = vadd.f32 %v6642_v45, %v6641_v39  ;;  %v8818_v41 = vpop.f32.mrf.mxu0 }
 0x7b4   :  { %v6650_v25 = vsel %vm149_vm0, %v8818_v41, 0.0 }
 0x7b5   :  { %v6645_v9 = vadd.f32 %v6644_v59, %v6643_v37  ;;  %v6511_v60 = vpop.f32.mrf.mxu0 }
 0x7b6   :  { %v6646_v14 = vsel %vm149_vm0, %v6511_v60, 0.0 }
 0x7b7   :  { %v6647_v62 = vadd.f32 %v6646_v14, %v6645_v9 }
 0x7b9   :  { %v6649_v6 = vadd.f32 %v6648_v32, %v6647_v62 }
 0x7bb   :  { %v6651_v29 = vadd.f32 %v6650_v25, %v6649_v6 }
 0x7bd   :  { %v6652_v0 = vrot.slane %v6651_v29, 4 }
 0x7bf   :  { %v6653_v7 = vadd.f32 %v6652_v0, %v6651_v29 }
 0x7c1   :  { %v6654_v2 = vrot.slane %v6653_v7, 2 }
 0x7c3   :  { %v6655_v20 = vadd.f32 %v6654_v2, %v6653_v7 }
 0x7c5   :  { %v6656_v55 = vrot.slane %v6655_v20, 1 }
 0x7c7   :  { %v6657_v45 = vadd.f32 %v6656_v55, %v6655_v20 }
 0x7c9   :  { %v13323_v39 = vmul.f32 0.001953125, %v6657_v45 }
 0x7cb   :  { %v13326_v59 = vsub.f32 %v6447_v63, %v13323_v39  ;;  %v13329_v37 = vsub.f32 %v6460_v26, %v13323_v39  ;;  %v13332_v14 = vsub.f32 %v6463_v51, %v13323_v39  ;;  %v13335_v9 = vsub.f32 %v8805_v58, %v13323_v39 }
 0x7cc   :  { %v13338_v6 = vsub.f32 %v8806_v11, %v13323_v39  ;;  %v13341_v0 = vsub.f32 %v6476_v57, %v13323_v39  ;;  %v13344_v55 = vsub.f32 %v6479_v50, %v13323_v39  ;;  %v13347_v20 = vsub.f32 %v8809_v24, %v13323_v39 }
 0x7cd   :  { %15539 = vst [vmem:[#allocation47_spill] sm:$0xff] %v13326_v59  ;;  %v13350_v63 = vsub.f32 %v8810_v49, %v13323_v39  ;;  %v13353_v26 = vsub.f32 %v6492_v19, %v13323_v39  ;;  %v13356_v58 = vsub.f32 %v6495_v30, %v13323_v39  ;;  %v13359_v11 = vsub.f32 %v8813_v12, %v13323_v39 }
 0x7ce   :  { %v13362_v57 = vsub.f32 %v8814_v27, %v13323_v39  ;;  %v13365_v51 = vsub.f32 %v6508_v61, %v13323_v39  ;;  %v13368_v24 = vsub.f32 %v6511_v60, %v13323_v39  ;;  %v13371_v49 = vsub.f32 %v8817_v38, %v13323_v39 }
 0x7cf   :  { %15540 = vst [vmem:[#allocation46_spill] sm:$0xff] %v13359_v11  ;;  %v13374_v50 = vsub.f32 %v8818_v41, %v13323_v39  ;;  %v13378_v19 = vsub.f32 %v13120_v47, %v13323_v39  ;;  %v13382_v12 = vsub.f32 %v13124_v4, %v13323_v39  ;;  %v13386_v27 = vsub.f32 %v13118_v15, %v13323_v39 }
 0x7d0   :  { %15541 = vst [vmem:[#allocation19_spill] sm:$0xff] %v13362_v57  ;;  %15542 = vst [vmem:[#allocation16_spill] sm:$0xff] %v13365_v51  ;;  %v13390_v30 = vsub.f32 %v13122_v8, %v13323_v39  ;;  %v13398_v47 = vsub.f32 %v13134_v53, %v13323_v39  ;;  %v13404_v15 = vsub.f32 %v13142_v54, %v13323_v39 }
 0x7d1   :  { %15543 = vst [vmem:[#allocation7_spill] sm:$0xff] %v13371_v49  ;;  %v6723_v38 = vmul.f32 %v13378_v19, %v13378_v19  ;;  %v6724_v61 = vmul.f32 %v13382_v12, %v13382_v12  ;;  %v6725_v4 = vmul.f32 %v13386_v27, %v13386_v27  ;;  %v13412_v32 = vsub.f32 %v13130_v21, %v13323_v39 }
 0x7d2   :  { %v6726_v8 = vmul.f32 %v13390_v30, %v13390_v30  ;;  %v6727_v53 = vmul.f32 %v13398_v47, %v13398_v47  ;;  %v13419_v54 = vsub.f32 %v13138_v40, %v13323_v39  ;;  %v6728_v7 = vmul.f32 %v13404_v15, %v13404_v15 }
 0x7d3   :  { %v6787_v41 = vsel %vm149_vm0, %v6723_v38, 0.0  ;;  %v6788_v60 = vsel %vm149_vm0, %v6724_v61, 0.0  ;;  %v6790_v25 = vsel %vm149_vm0, %v6725_v4, 0.0  ;;  %v13426_v21 = vsub.f32 %v13150_v3, %v13323_v39 }
 0x7d4   :  { %v6789_v62 = vadd.f32 %v6788_v60, %v6787_v41  ;;  %v6792_v2 = vsel %vm149_vm0, %v6726_v8, 0.0  ;;  %v6729_v38 = vmul.f32 %v13412_v32, %v13412_v32  ;;  %v6794_v61 = vsel %vm149_vm0, %v6727_v53, 0.0 }
 0x7d5   :  { %v13433_v40 = vsub.f32 %v13158_v18, %v13323_v39  ;;  %v6730_v41 = vmul.f32 %v13419_v54, %v13419_v54  ;;  %v6796_v8 = vsel %vm149_vm0, %v6728_v7, 0.0  ;;  %v13440_v3 = vsub.f32 %v13146_v34, %v13323_v39 }
 0x7d6   :  { %v6791_v29 = vadd.f32 %v6790_v25, %v6789_v62  ;;  %v6731_v62 = vmul.f32 %v13426_v21, %v13426_v21  ;;  %v6798_v53 = vsel %vm149_vm0, %v6729_v38, 0.0  ;;  %v13447_v18 = vsub.f32 %v13154_v48, %v13323_v39 }
 0x7d7   :  { %v6800_v7 = vsel %vm149_vm0, %v6730_v41, 0.0  ;;  %v13454_v34 = vsub.f32 %v13166_v23, %v13323_v39  ;;  %v13461_v48 = vsub.f32 %v13174_v36, %v13323_v39  ;;  %v13468_v23 = vsub.f32 %v13162_v28, %v13323_v39 }
 0x7d8   :  { %v6793_v45 = vadd.f32 %v6792_v2, %v6791_v29  ;;  %v6732_v29 = vmul.f32 %v13433_v40, %v13433_v40  ;;  %v6802_v38 = vsel %vm149_vm0, %v6731_v62, 0.0  ;;  %v13475_v36 = vsub.f32 %v13170_v31, %v13323_v39 }
 0x7d9   :  { %v13482_v28 = vsub.f32 %v13182_v22, %v13323_v39  ;;  %v13489_v31 = vsub.f32 %v13190_v43, %v13323_v39  ;;  %v13496_v22 = vsub.f32 %v13178_v1, %v13323_v39  ;;  %v13503_v43 = vsub.f32 %v13186_v35, %v13323_v39 }
 0x7da   :  { %v6795_v4 = vadd.f32 %v6794_v61, %v6793_v45  ;;  %v6733_v45 = vmul.f32 %v13440_v3, %v13440_v3  ;;  %v6804_v41 = vsel %vm149_vm0, %v6732_v29, 0.0  ;;  %v13510_v1 = vsub.f32 %v13198_v46, %v13323_v39 }
 0x7db   :  { %v13517_v35 = vsub.f32 %v13206_v42, %v13323_v39  ;;  %v13524_v46 = vsub.f32 %v13194_v16, %v13323_v39  ;;  %v13531_v42 = vsub.f32 %v13202_v56, %v13323_v39  ;;  %v13538_v16 = vsub.f32 %v13214_v17, %v13323_v39 }
 0x7dc   :  { %v6797_v60 = vadd.f32 %v6796_v8, %v6795_v4  ;;  %v6734_v4 = vmul.f32 %v13447_v18, %v13447_v18  ;;  %v6806_v62 = vsel %vm149_vm0, %v6733_v45, 0.0  ;;  %v13545_v56 = vsub.f32 %v13222_v33, %v13323_v39 }
 0x7dd   :  { %v13552_v17 = vsub.f32 %v13210_v10, %v13323_v39  ;;  %v13559_v33 = vsub.f32 %v13218_v5, %v13323_v39  ;;  %v13566_v10 = vsub.f32 %v13230_v44, %v13323_v39  ;;  %v13573_v5 = vsub.f32 %v13238_v13, %v13323_v39 }
 0x7de   :  { %v6799_v25 = vadd.f32 %v6798_v53, %v6797_v60  ;;  %v6735_v60 = vmul.f32 %v13454_v34, %v13454_v34  ;;  %v6808_v29 = vsel %vm149_vm0, %v6734_v4, 0.0  ;;  %v13580_v44 = vsub.f32 %v13226_v52, %v13323_v39 }
 0x7df   :  { %15544 = vst [vmem:[#allocation49_spill] sm:$0xff] %v13573_v5 }
 0x7e0   :  { %v6801_v2 = vadd.f32 %v6800_v7, %v6799_v25  ;;  %v6736_v25 = vmul.f32 %v13461_v48, %v13461_v48  ;;  %v6810_v45 = vsel %vm149_vm0, %v6735_v60, 0.0  ;;  %15545 = vst [vmem:[#allocation51_spill] sm:$0xff] %v13580_v44 }
 0x7e2   :  { %v6803_v61 = vadd.f32 %v6802_v38, %v6801_v2  ;;  %v6737_v2 = vmul.f32 %v13468_v23, %v13468_v23  ;;  %v6812_v4 = vsel %vm149_vm0, %v6736_v25, 0.0 }
 0x7e4   :  { %v6805_v8 = vadd.f32 %v6804_v41, %v6803_v61  ;;  %v6738_v61 = vmul.f32 %v13475_v36, %v13475_v36  ;;  %v6814_v60 = vsel %vm149_vm0, %v6737_v2, 0.0 }
 0x7e6   :  { %v6807_v53 = vadd.f32 %v6806_v62, %v6805_v8  ;;  %v6739_v8 = vmul.f32 %v13482_v28, %v13482_v28  ;;  %v6816_v25 = vsel %vm149_vm0, %v6738_v61, 0.0 }
 0x7e8   :  { %v6809_v7 = vadd.f32 %v6808_v29, %v6807_v53  ;;  %v6740_v53 = vmul.f32 %v13489_v31, %v13489_v31  ;;  %v6818_v2 = vsel %vm149_vm0, %v6739_v8, 0.0 }
 0x7ea   :  { %v6811_v38 = vadd.f32 %v6810_v45, %v6809_v7  ;;  %v6741_v7 = vmul.f32 %v13496_v22, %v13496_v22  ;;  %v6820_v61 = vsel %vm149_vm0, %v6740_v53, 0.0 }
 0x7ec   :  { %v6813_v41 = vadd.f32 %v6812_v4, %v6811_v38  ;;  %v6742_v38 = vmul.f32 %v13503_v43, %v13503_v43  ;;  %v6822_v8 = vsel %vm149_vm0, %v6741_v7, 0.0 }
 0x7ee   :  { %v6815_v62 = vadd.f32 %v6814_v60, %v6813_v41  ;;  %v6743_v41 = vmul.f32 %v13510_v1, %v13510_v1  ;;  %v6824_v53 = vsel %vm149_vm0, %v6742_v38, 0.0 }
 0x7f0   :  { %v6817_v29 = vadd.f32 %v6816_v25, %v6815_v62  ;;  %v6744_v62 = vmul.f32 %v13517_v35, %v13517_v35  ;;  %v6826_v7 = vsel %vm149_vm0, %v6743_v41, 0.0 }
 0x7f2   :  { %v6819_v45 = vadd.f32 %v6818_v2, %v6817_v29  ;;  %v6745_v29 = vmul.f32 %v13524_v46, %v13524_v46  ;;  %v6828_v38 = vsel %vm149_vm0, %v6744_v62, 0.0 }
 0x7f4   :  { %v6821_v4 = vadd.f32 %v6820_v61, %v6819_v45  ;;  %v6746_v45 = vmul.f32 %v13531_v42, %v13531_v42  ;;  %v6830_v41 = vsel %vm149_vm0, %v6745_v29, 0.0 }
 0x7f6   :  { %v6823_v60 = vadd.f32 %v6822_v8, %v6821_v4  ;;  %v6747_v4 = vmul.f32 %v13538_v16, %v13538_v16  ;;  %v6832_v62 = vsel %vm149_vm0, %v6746_v45, 0.0 }
 0x7f8   :  { %v6825_v25 = vadd.f32 %v6824_v53, %v6823_v60  ;;  %v6748_v60 = vmul.f32 %v13545_v56, %v13545_v56  ;;  %v6834_v29 = vsel %vm149_vm0, %v6747_v4, 0.0 }
 0x7fa   :  { %v6827_v2 = vadd.f32 %v6826_v7, %v6825_v25  ;;  %v6749_v25 = vmul.f32 %v13552_v17, %v13552_v17  ;;  %v6836_v45 = vsel %vm149_vm0, %v6748_v60, 0.0 }
 0x7fc   :  { %v6829_v61 = vadd.f32 %v6828_v38, %v6827_v2  ;;  %v6750_v2 = vmul.f32 %v13559_v33, %v13559_v33  ;;  %v6838_v4 = vsel %vm149_vm0, %v6749_v25, 0.0 }
 0x7fe   :  { %v6831_v8 = vadd.f32 %v6830_v41, %v6829_v61  ;;  %v6751_v61 = vmul.f32 %v13566_v10, %v13566_v10  ;;  %v6840_v60 = vsel %vm149_vm0, %v6750_v2, 0.0 }
 0x800   :  { %v6833_v53 = vadd.f32 %v6832_v62, %v6831_v8  ;;  %v15546_v8 = vld [vmem:[#allocation11_spill] sm:$0xff]  ;;  %v6752_v62 = vmul.f32 %v13573_v5, %v13573_v5  ;;  %v6842_v25 = vsel %vm149_vm0, %v6751_v61, 0.0 }
 0x801   :  { %v13587_v13 = vsub.f32 %v15546_v8, %v13323_v39 }
 0x802   :  { %v6835_v7 = vadd.f32 %v6834_v29, %v6833_v53  ;;  %v15548_v29 = vld [vmem:[#allocation13_spill] sm:$0xff]  ;;  %v6844_v2 = vsel %vm149_vm0, %v6752_v62, 0.0 }
 0x803   :  { %15547 = vst [vmem:[#allocation48_spill] sm:$0xff] %v13587_v13  ;;  %v13594_v52 = vsub.f32 %v15548_v29, %v13323_v39  ;;  %v6754_v8 = vmul.f32 %v13587_v13, %v13587_v13 }
 0x804   :  { %v6837_v38 = vadd.f32 %v6836_v45, %v6835_v7  ;;  %v6753_v7 = vmul.f32 %v13580_v44, %v13580_v44 }
 0x805   :  { %15549 = vst [vmem:[#allocation50_spill] sm:$0xff] %v13594_v52  ;;  %v6755_v44 = vmul.f32 %v13594_v52, %v13594_v52  ;;  %v6848_v62 = vsel %vm149_vm0, %v6754_v8, 0.0 }
 0x806   :  { %v6839_v41 = vadd.f32 %v6838_v4, %v6837_v38  ;;  %v15550_v38 = vld [vmem:[#allocation38_spill] sm:$0xff]  ;;  %v6846_v61 = vsel %vm149_vm0, %v6753_v7, 0.0 }
 0x807   :  { %v13601_v4 = vsub.f32 %v15550_v38, %v13323_v39  ;;  %v6850_v7 = vsel %vm149_vm0, %v6755_v44, 0.0 }
 0x808   :  { %v6841_v53 = vadd.f32 %v6840_v60, %v6839_v41  ;;  %v15552_v60 = vld [vmem:[#allocation23_spill] sm:$0xff] }
 0x809   :  { %15551 = vst [vmem:[#allocation53_spill] sm:$0xff] %v13601_v4  ;;  %v13608_v29 = vsub.f32 %v15552_v60, %v13323_v39  ;;  %v6756_v13 = vmul.f32 %v13601_v4, %v13601_v4 }
 0x80a   :  { %v6843_v45 = vadd.f32 %v6842_v25, %v6841_v53  ;;  %v15554_v25 = vld [vmem:[#allocation12_spill] sm:$0xff] }
 0x80b   :  { %15553 = vst [vmem:[#allocation55_spill] sm:$0xff] %v13608_v29  ;;  %v13615_v38 = vsub.f32 %v15554_v25, %v13323_v39  ;;  %v6757_v52 = vmul.f32 %v13608_v29, %v13608_v29  ;;  %v6852_v8 = vsel %vm149_vm0, %v6756_v13, 0.0 }
 0x80c   :  { %v6845_v41 = vadd.f32 %v6844_v2, %v6843_v45  ;;  %v15556_v2 = vld [vmem:[#allocation14_spill] sm:$0xff] }
 0x80d   :  { %15555 = vst [vmem:[#allocation52_spill] sm:$0xff] %v13615_v38  ;;  %v13622_v60 = vsub.f32 %v15556_v2, %v13323_v39  ;;  %v6758_v4 = vmul.f32 %v13615_v38, %v13615_v38  ;;  %v6854_v44 = vsel %vm149_vm0, %v6757_v52, 0.0 }
 0x80e   :  { %v6847_v53 = vadd.f32 %v6846_v61, %v6845_v41  ;;  %v15558_v61 = vld [vmem:[#allocation39_spill] sm:$0xff] }
 0x80f   :  { %15557 = vst [vmem:[#allocation54_spill] sm:$0xff] %v13622_v60  ;;  %v13629_v25 = vsub.f32 %v15558_v61, %v13323_v39  ;;  %v6759_v29 = vmul.f32 %v13622_v60, %v13622_v60  ;;  %v6856_v13 = vsel %vm149_vm0, %v6758_v4, 0.0 }
 0x810   :  { %v6849_v45 = vadd.f32 %v6848_v62, %v6847_v53  ;;  %v15560_v62 = vld [vmem:[#allocation15_spill] sm:$0xff] }
 0x811   :  { %15559 = vst [vmem:[#allocation26_spill] sm:$0xff] %v13629_v25  ;;  %v13636_v2 = vsub.f32 %v15560_v62, %v13323_v39  ;;  %v6760_v38 = vmul.f32 %v13629_v25, %v13629_v25  ;;  %v6858_v52 = vsel %vm149_vm0, %v6759_v29, 0.0 }
 0x812   :  { %v6851_v41 = vadd.f32 %v6850_v7, %v6849_v45  ;;  %v15562_v7 = vld [vmem:[#allocation17_spill] sm:$0xff] }
 0x813   :  { %15561 = vst [vmem:[#allocation32_spill] sm:$0xff] %v13636_v2  ;;  %v13643_v61 = vsub.f32 %v15562_v7, %v13323_v39  ;;  %v6761_v60 = vmul.f32 %v13636_v2, %v13636_v2  ;;  %v6860_v4 = vsel %vm149_vm0, %v6760_v38, 0.0 }
 0x814   :  { %v6853_v53 = vadd.f32 %v6852_v8, %v6851_v41  ;;  %v15564_v8 = vld [vmem:[#allocation40_spill] sm:$0xff] }
 0x815   :  { %15563 = vst [vmem:[#allocation24_spill] sm:$0xff] %v13643_v61  ;;  %v13650_v62 = vsub.f32 %v15564_v8, %v13323_v39  ;;  %v6762_v25 = vmul.f32 %v13643_v61, %v13643_v61  ;;  %v6862_v29 = vsel %vm149_vm0, %v6761_v60, 0.0 }
 0x816   :  { %v6855_v45 = vadd.f32 %v6854_v44, %v6853_v53  ;;  %v15566_v44 = vld [vmem:[#allocation42_spill] sm:$0xff] }
 0x817   :  { %15565 = vst [vmem:[#allocation27_spill] sm:$0xff] %v13650_v62  ;;  %v13657_v7 = vsub.f32 %v15566_v44, %v13323_v39  ;;  %v6763_v2 = vmul.f32 %v13650_v62, %v13650_v62  ;;  %v6864_v38 = vsel %vm149_vm0, %v6762_v25, 0.0 }
 0x818   :  { %v6857_v41 = vadd.f32 %v6856_v13, %v6855_v45  ;;  %v15568_v13 = vld [vmem:[#allocation18_spill] sm:$0xff] }
 0x819   :  { %15567 = vst [vmem:[#allocation28_spill] sm:$0xff] %v13657_v7  ;;  %v13664_v8 = vsub.f32 %v15568_v13, %v13323_v39  ;;  %v6764_v61 = vmul.f32 %v13657_v7, %v13657_v7  ;;  %v6866_v60 = vsel %vm149_vm0, %v6763_v2, 0.0  ;;  %v15572_v7 = vld [vmem:[#allocation43_spill] sm:$0xff] }
 0x81a   :  { %v6859_v53 = vadd.f32 %v6858_v52, %v6857_v41  ;;  %v15570_v52 = vld [vmem:[#allocation41_spill] sm:$0xff]  ;;  %v13688_v25 = vsub.f32 %v15572_v7, %v13323_v39 }
 0x81b   :  { %15569 = vst [vmem:[#allocation33_spill] sm:$0xff] %v13664_v8  ;;  %v13671_v44 = vsub.f32 %v15570_v52, %v13323_v39  ;;  %v6765_v62 = vmul.f32 %v13664_v8, %v13664_v8  ;;  %v6868_v52 = vsel %vm149_vm0, %v6764_v61, 0.0  ;;  %v15573_v8 = vld [vmem:[#allocation45_spill] sm:$0xff] }
 0x81c   :  { %v6861_v45 = vadd.f32 %v6860_v4, %v6859_v53  ;;  %v15571_v4 = vld [vmem:[#allocation44_spill] sm:$0xff]  ;;  %v13695_v2 = vsub.f32 %v15573_v8, %v13323_v39  ;;  %v6769_v7 = vmul.f32 %v13688_v25, %v13688_v25 }
 0x81d   :  { %v13678_v13 = vsub.f32 %v15571_v4, %v13323_v39  ;;  %v6771_v39 = vmul.f32 %v13329_v37, %v13329_v37 }
 0x81e   :  { %v6863_v41 = vadd.f32 %v6862_v29, %v6861_v45  ;;  %v6766_v29 = vmul.f32 %v13671_v44, %v13671_v44  ;;  %v6878_v8 = vsel %vm149_vm0, %v6769_v7, 0.0  ;;  %v6775_v7 = vmul.f32 %v13341_v0, %v13341_v0 }
 0x820   :  { %v6865_v53 = vadd.f32 %v6864_v38, %v6863_v41  ;;  %v6767_v41 = vmul.f32 %v13678_v13, %v13678_v13  ;;  %v6870_v38 = vsel %vm149_vm0, %v6765_v62, 0.0  ;;  %v6872_v61 = vsel %vm149_vm0, %v6766_v29, 0.0 }
 0x821   :  { %v6770_v62 = vmul.f32 %v13695_v2, %v13695_v2  ;;  %v6772_v29 = vmul.f32 %v13332_v14, %v13332_v14 }
 0x822   :  { %v6867_v45 = vadd.f32 %v6866_v60, %v6865_v53  ;;  %v6768_v53 = vmul.f32 %v13326_v59, %v13326_v59 }
 0x824   :  { %v6869_v5 = vadd.f32 %v6868_v52, %v6867_v45  ;;  %v6874_v45 = vsel %vm149_vm0, %v6767_v41, 0.0  ;;  %v6773_v41 = vmul.f32 %v13335_v9, %v13335_v9 }
 0x826   :  { %v6871_v4 = vadd.f32 %v6870_v38, %v6869_v5  ;;  %v6876_v5 = vsel %vm149_vm0, %v6768_v53, 0.0  ;;  %v6774_v53 = vmul.f32 %v13338_v6, %v13338_v6 }
 0x828   :  { %v6873_v60 = vadd.f32 %v6872_v61, %v6871_v4  ;;  %v6880_v4 = vsel %vm149_vm0, %v6770_v62, 0.0  ;;  %v6888_v62 = vsel %vm149_vm0, %v6774_v53, 0.0  ;;  %v6780_v53 = vmul.f32 %v13356_v58, %v13356_v58 }
 0x82a   :  { %v6875_v52 = vadd.f32 %v6874_v45, %v6873_v60  ;;  %v6882_v60 = vsel %vm149_vm0, %v6771_v39, 0.0  ;;  %v6777_v39 = vmul.f32 %v13347_v20, %v13347_v20 }
 0x82c   :  { %v6877_v38 = vadd.f32 %v6876_v5, %v6875_v52  ;;  %v6884_v52 = vsel %vm149_vm0, %v6772_v29, 0.0  ;;  %v6778_v29 = vmul.f32 %v13350_v63, %v13350_v63 }
 0x82e   :  { %v6879_v59 = vadd.f32 %v6878_v8, %v6877_v38  ;;  %v6886_v38 = vsel %vm149_vm0, %v6773_v41, 0.0  ;;  %v6779_v41 = vmul.f32 %v13353_v26, %v13353_v26 }
 0x830   :  { %v6881_v61 = vadd.f32 %v6880_v4, %v6879_v59  ;;  %v6776_v59 = vmul.f32 %v13344_v55, %v13344_v55 }
 0x832   :  { %v6883_v45 = vadd.f32 %v6882_v60, %v6881_v61  ;;  %v6890_v61 = vsel %vm149_vm0, %v6775_v7, 0.0  ;;  %v6781_v7 = vmul.f32 %v13359_v11, %v13359_v11 }
 0x834   :  { %v6885_v5 = vadd.f32 %v6884_v52, %v6883_v45  ;;  %v6892_v45 = vsel %vm149_vm0, %v6776_v59, 0.0  ;;  %v6782_v59 = vmul.f32 %v13362_v57, %v13362_v57 }
 0x836   :  { %v6887_v8 = vadd.f32 %v6886_v38, %v6885_v5  ;;  %v6894_v5 = vsel %vm149_vm0, %v6777_v39, 0.0  ;;  %v6783_v39 = vmul.f32 %v13365_v51, %v13365_v51 }
 0x838   :  { %v6889_v4 = vadd.f32 %v6888_v62, %v6887_v8  ;;  %v6896_v8 = vsel %vm149_vm0, %v6778_v29, 0.0  ;;  %v6784_v29 = vmul.f32 %v13368_v24, %v13368_v24 }
 0x83a   :  { %v6891_v60 = vadd.f32 %v6890_v61, %v6889_v4  ;;  %v6898_v4 = vsel %vm149_vm0, %v6779_v41, 0.0  ;;  %v6785_v41 = vmul.f32 %v13371_v49, %v13371_v49 }
 0x83c   :  { %v6893_v52 = vadd.f32 %v6892_v45, %v6891_v60  ;;  %v6900_v60 = vsel %vm149_vm0, %v6780_v53, 0.0  ;;  %v6786_v53 = vmul.f32 %v13374_v50, %v13374_v50 }
 0x83e   :  { %v6895_v38 = vadd.f32 %v6894_v5, %v6893_v52  ;;  %v6902_v52 = vsel %vm149_vm0, %v6781_v7, 0.0  ;;  %v6910_v7 = vsel %vm149_vm0, %v6785_v41, 0.0  ;;  %v15574_v41 = vld [vmem:[#allocation25_spill] sm:$0xff] }
 0x840   :  { %v6897_v62 = vadd.f32 %v6896_v8, %v6895_v38  ;;  %v6904_v38 = vsel %vm149_vm0, %v6782_v59, 0.0 }
 0x842   :  { %v6899_v61 = vadd.f32 %v6898_v4, %v6897_v62  ;;  %v6906_v62 = vsel %vm149_vm0, %v6783_v39, 0.0 }
 0x844   :  { %v6901_v45 = vadd.f32 %v6900_v60, %v6899_v61  ;;  %v6908_v61 = vsel %vm149_vm0, %v6784_v29, 0.0  ;;  %v6523_v29 = vld [vmem:[%s14800_s8] sm:$0x1] }
 0x846   :  { %v6903_v5 = vadd.f32 %v6902_v52, %v6901_v45  ;;  %v6912_v52 = vsel %vm149_vm0, %v6786_v53, 0.0 }
 0x848   :  { %v6905_v8 = vadd.f32 %v6904_v38, %v6903_v5 }
 0x84a   :  { %v6907_v4 = vadd.f32 %v6906_v62, %v6905_v8 }
 0x84c   :  { %v6909_v60 = vadd.f32 %v6908_v61, %v6907_v4 }
 0x84e   :  { %v6911_v45 = vadd.f32 %v6910_v7, %v6909_v60 }
 0x850   :  { %v6913_v51 = vadd.f32 %v6912_v52, %v6911_v45 }
 0x852   :  { %v6914_v59 = vrot.slane %v6913_v51, 4 }
 0x854   :  { %v6915_v5 = vadd.f32 %v6914_v59, %v6913_v51  ;;  %v13765_v51 = vld [vmem:[%s14801_s9] ss:$0 sm:$0xff] }
 0x856   :  { %v6916_v38 = vrot.slane %v6915_v5, 2 }
 0x858   :  { %v6917_v57 = vadd.f32 %v6916_v38, %v6915_v5 }
 0x85a   :  { %v6918_v49 = vrot.slane %v6917_v57, 1 }
 0x85c   :  { %v6919_v11 = vadd.f32 %v6918_v49, %v6917_v57 }
 0x85e   :  { %v6920_v39 = vmul.f32 0.001953125, %v6919_v11 }
 0x860   :  { %v6921_v8 = vadd.f32 1e-05, %v6920_v39 }
 0x862   :  { %8913 = vrsqrt.f32 %v6921_v8 }
 0x86f   :  { %v8914_v62 = vpop.eup %8913 }
 0x870   :  { %v6923_v4 = vmul.f32 %v8914_v62, %v6523_v29  ;;  %v15579_v29 = vld [vmem:[#allocation53_spill] sm:$0xff]  ;;  %v15580_v62 = vld [vmem:[#allocation55_spill] sm:$0xff] }
 0x872   :  { %v13760_v61 = vrot.slane %v6923_v4, %v15574_v41  ;;  %v15581_v41 = vld [vmem:[#allocation52_spill] sm:$0xff] }
 0x874   :  { %v6991_v57 = vmul.f32 %v13760_v61, %v13368_v24  ;;  %v13771_v11 = vmul.f32 %v13760_v61, %v13378_v19  ;;  %v13775_v49 = vmul.f32 %v13760_v61, %v13382_v12  ;;  %v13779_v53 = vmul.f32 %v13760_v61, %v13386_v27 }
 0x875   :  { %v13783_v60 = vmul.f32 %v13760_v61, %v13390_v30  ;;  %v13787_v7 = vmul.f32 %v13760_v61, %v13398_v47  ;;  %v13791_v24 = vmul.f32 %v13760_v61, %v13404_v15  ;;  %v13795_v19 = vmul.f32 %v13760_v61, %v13412_v32 }
 0x876   :  { %v7061_v12 = vadd.f32 %v13765_v51, %v6991_v57  ;;  %v13800_v27 = vmul.f32 %v13760_v61, %v13419_v54  ;;  %v13804_v30 = vmul.f32 %v13760_v61, %v13426_v21  ;;  %v13808_v47 = vmul.f32 %v13760_v61, %v13433_v40  ;;  %v8917_v40 = vld [vmem:[%s14792_s0 + $0x1e8] sm:$0xff] }
 0x877   :  { %v13812_v15 = vmul.f32 %v13760_v61, %v13440_v3  ;;  %v13816_v32 = vmul.f32 %v13760_v61, %v13447_v18  ;;  %v13820_v54 = vmul.f32 %v13760_v61, %v13454_v34  ;;  %v13824_v21 = vmul.f32 %v13760_v61, %v13461_v48 }
 0x878   :  { %v7125_v45 = vadd.f32 %v8917_v40, %v7061_v12  ;;  %v13831_v3 = vmul.f32 %v13760_v61, %v13468_v23  ;;  %v13835_v18 = vmul.f32 %v13760_v61, %v13475_v36  ;;  %v13839_v34 = vmul.f32 %v13760_v61, %v13482_v28  ;;  %v15582_v12 = vld [vmem:[#allocation54_spill] sm:$0xff] }
 0x879   :  { %v13843_v48 = vmul.f32 %v13760_v61, %v13489_v31  ;;  %v13847_v52 = vmul.f32 %v13760_v61, %v13496_v22  ;;  %v13851_v23 = vmul.f32 %v13760_v61, %v13503_v43  ;;  %v13855_v36 = vmul.f32 %v13760_v61, %v13510_v1 }
 0x87a   :  { %v7189_v59 = vmax.f32 %v7125_v45, 0.0  ;;  %v13859_v28 = vmul.f32 %v13760_v61, %v13517_v35  ;;  %v13863_v31 = vmul.f32 %v13760_v61, %v13524_v46  ;;  %v13867_v22 = vmul.f32 %v13760_v61, %v13531_v42  ;;  %v15584_v45 = vld [vmem:[#allocation26_spill] sm:$0xff] }
 0x87b   :  { %v13871_v43 = vmul.f32 %v13760_v61, %v13538_v16  ;;  %v13875_v1 = vmul.f32 %v13760_v61, %v13545_v56  ;;  %v13879_v35 = vmul.f32 %v13760_v61, %v13552_v17  ;;  %v13883_v46 = vmul.f32 %v13760_v61, %v13559_v33  ;;  %v15575_v16 = vld [vmem:[#allocation49_spill] sm:$0xff]  ;;  %v15576_v56 = vld [vmem:[#allocation51_spill] sm:$0xff]  ;;  %v15577_v17 = vld [vmem:[#allocation48_spill] sm:$0xff] }
 0x87c   :  { %7253 = vst.msk [vmem:[#allocation3 + $0x1e8] sm:$0xff] %vm149_vm0, %v7189_v59  ;;  %v13888_v42 = vmul.f32 %v13760_v61, %v13566_v10  ;;  %v13892_v5 = vmul.f32 %v13760_v61, %v15575_v16  ;;  %v13896_v38 = vmul.f32 %v13760_v61, %v15576_v56  ;;  %v13900_v39 = vmul.f32 %v13760_v61, %v15577_v17  ;;  %v15578_v33 = vld [vmem:[#allocation50_spill] sm:$0xff]  ;;  %v15585_v16 = vld [vmem:[#allocation32_spill] sm:$0xff] }
 0x87d   :  { %v13904_v8 = vmul.f32 %v13760_v61, %v15578_v33  ;;  %v13908_v10 = vmul.f32 %v13760_v61, %v15579_v29  ;;  %v13912_v4 = vmul.f32 %v13760_v61, %v15580_v62  ;;  %v13916_v57 = vmul.f32 %v13760_v61, %v15581_v41  ;;  %v15586_v17 = vld [vmem:[#allocation24_spill] sm:$0xff]  ;;  %v15588_v29 = vld [vmem:[#allocation27_spill] sm:$0xff] }
 0x87e   :  { %v13920_v40 = vmul.f32 %v13760_v61, %v15582_v12  ;;  %v13924_v59 = vmul.f32 %v13760_v61, %v15584_v45  ;;  %v13928_v56 = vmul.f32 %v13760_v61, %v15585_v16  ;;  %v13932_v33 = vmul.f32 %v13760_v61, %v15586_v17  ;;  %v15589_v41 = vld [vmem:[#allocation28_spill] sm:$0xff] }
 0x87f   :  { %v13936_v62 = vmul.f32 %v13760_v61, %v15588_v29  ;;  %v13940_v12 = vmul.f32 %v13760_v61, %v15589_v41  ;;  %v13948_v16 = vmul.f32 %v13760_v61, %v13671_v44  ;;  %v13952_v17 = vmul.f32 %v13760_v61, %v13678_v13 }
 0x880   :  { %15583 = vst [vmem:[#allocation9_spill] sm:$0xff] %v13920_v40  ;;  %15587 = vst [vmem:[#allocation29_spill] sm:$0xff] %v13932_v33  ;;  %v15590_v40 = vld [vmem:[#allocation33_spill] sm:$0xff]  ;;  %v15591_v33 = vld [vmem:[#allocation47_spill] sm:$0xff]  ;;  %v13960_v41 = vmul.f32 %v13760_v61, %v13688_v25  ;;  %v13968_v44 = vmul.f32 %v13760_v61, %v13329_v37  ;;  %v13972_v13 = vmul.f32 %v13760_v61, %v13332_v14 }
 0x881   :  { %v13944_v45 = vmul.f32 %v13760_v61, %v15590_v40  ;;  %v13956_v29 = vmul.f32 %v13760_v61, %v15591_v33  ;;  %v13964_v40 = vmul.f32 %v13760_v61, %v13695_v2  ;;  %v13976_v33 = vmul.f32 %v13760_v61, %v13335_v9 }
 0x882   :  { %v13980_v25 = vmul.f32 %v13760_v61, %v13338_v6  ;;  %v13984_v2 = vmul.f32 %v13760_v61, %v13341_v0  ;;  %v13988_v37 = vmul.f32 %v13760_v61, %v13344_v55  ;;  %v13992_v14 = vmul.f32 %v13760_v61, %v13347_v20 }
 0x883   :  { %v13996_v9 = vmul.f32 %v13760_v61, %v13350_v63  ;;  %v14000_v6 = vmul.f32 %v13760_v61, %v13353_v26  ;;  %v14004_v0 = vmul.f32 %v13760_v61, %v13356_v58  ;;  %v14024_v58 = vmul.f32 %v13760_v61, %v13374_v50 }
 0x884   :  { %15592 = vst [vmem:[#allocation35_spill] sm:$0xff] %v13984_v2  ;;  %15593 = vst [vmem:[#allocation20_spill] sm:$0xff] %v13988_v37  ;;  %v15596_v2 = vld [vmem:[#allocation46_spill] sm:$0xff]  ;;  %v15597_v37 = vld [vmem:[#allocation19_spill] sm:$0xff]  ;;  %v14044_v50 = vadd.f32 %v13765_v51, %v13787_v7  ;;  %v14068_v7 = vadd.f32 %v13765_v51, %v13812_v15  ;;  %v14092_v15 = vadd.f32 %v13765_v51, %v13839_v34 }
 0x885   :  { %15594 = vst [vmem:[#allocation30_spill] sm:$0xff] %v13992_v14  ;;  %15595 = vst [vmem:[#allocation31_spill] sm:$0xff] %v13996_v9  ;;  %v14008_v55 = vmul.f32 %v13760_v61, %v15596_v2  ;;  %v14012_v20 = vmul.f32 %v13760_v61, %v15597_v37  ;;  %v15598_v14 = vld [vmem:[#allocation16_spill] sm:$0xff]  ;;  %v15599_v9 = vld [vmem:[#allocation7_spill] sm:$0xff]  ;;  %v14028_v2 = vadd.f32 %v13765_v51, %v13771_v11 }
 0x886   :  { %v14016_v63 = vmul.f32 %v13760_v61, %v15598_v14  ;;  %v14020_v26 = vmul.f32 %v13760_v61, %v15599_v9  ;;  %v14032_v37 = vadd.f32 %v13765_v51, %v13775_v49  ;;  %v14036_v14 = vadd.f32 %v13765_v51, %v13779_v53 }
 0x887   :  { %v14040_v9 = vadd.f32 %v13765_v51, %v13783_v60  ;;  %v14048_v61 = vadd.f32 %v13765_v51, %v13791_v24  ;;  %v14052_v11 = vadd.f32 %v13765_v51, %v13795_v19  ;;  %v14056_v49 = vadd.f32 %v13765_v51, %v13800_v27 }
 0x888   :  { %v14060_v53 = vadd.f32 %v13765_v51, %v13804_v30  ;;  %v14064_v60 = vadd.f32 %v13765_v51, %v13808_v47  ;;  %v14072_v24 = vadd.f32 %v13765_v51, %v13816_v32  ;;  %v14076_v19 = vadd.f32 %v13765_v51, %v13820_v54 }
 0x889   :  { %v14080_v27 = vadd.f32 %v13765_v51, %v13824_v21  ;;  %v14084_v30 = vadd.f32 %v13765_v51, %v13831_v3  ;;  %v14088_v47 = vadd.f32 %v13765_v51, %v13835_v18  ;;  %v14096_v32 = vadd.f32 %v13765_v51, %v13843_v48 }
 0x88a   :  { %v14100_v54 = vadd.f32 %v13765_v51, %v13847_v52  ;;  %v14104_v21 = vadd.f32 %v13765_v51, %v13851_v23  ;;  %v14108_v3 = vadd.f32 %v13765_v51, %v13855_v36  ;;  %v14112_v18 = vadd.f32 %v13765_v51, %v13859_v28 }
 0x88b   :  { %v14116_v34 = vadd.f32 %v13765_v51, %v13863_v31  ;;  %v14120_v48 = vadd.f32 %v13765_v51, %v13867_v22  ;;  %v14124_v52 = vadd.f32 %v13765_v51, %v13871_v43  ;;  %v14128_v23 = vadd.f32 %v13765_v51, %v13875_v1 }
 0x88c   :  { %v14132_v36 = vadd.f32 %v13765_v51, %v13879_v35  ;;  %v14136_v28 = vadd.f32 %v13765_v51, %v13883_v46  ;;  %v14140_v31 = vadd.f32 %v13765_v51, %v13888_v42  ;;  %v14144_v22 = vadd.f32 %v13765_v51, %v13892_v5 }
 0x88d   :  { %v14148_v43 = vadd.f32 %v13765_v51, %v13896_v38  ;;  %v14152_v1 = vadd.f32 %v13765_v51, %v13900_v39  ;;  %v14156_v35 = vadd.f32 %v13765_v51, %v13904_v8  ;;  %v14160_v46 = vadd.f32 %v13765_v51, %v13908_v10  ;;  %v15601_v38 = vld [vmem:[#allocation9_spill] sm:$0xff] }
 0x88e   :  { %v14164_v42 = vadd.f32 %v13765_v51, %v13912_v4  ;;  %v14168_v5 = vadd.f32 %v13765_v51, %v13916_v57  ;;  %v14172_v39 = vadd.f32 %v13765_v51, %v15601_v38  ;;  %v14176_v8 = vadd.f32 %v13765_v51, %v13924_v59 }
 0x88f   :  { %15600 = vst [vmem:[#allocation36_spill] sm:$0xff] %v14160_v46  ;;  %v14180_v10 = vadd.f32 %v13765_v51, %v13928_v56  ;;  %v15602_v46 = vld [vmem:[#allocation29_spill] sm:$0xff]  ;;  %v14188_v57 = vadd.f32 %v13765_v51, %v13936_v62  ;;  %v14192_v38 = vadd.f32 %v13765_v51, %v13940_v12  ;;  %v14196_v59 = vadd.f32 %v13765_v51, %v13944_v45 }
 0x890   :  { %v14184_v4 = vadd.f32 %v13765_v51, %v15602_v46  ;;  %v14200_v56 = vadd.f32 %v13765_v51, %v13948_v16  ;;  %v14204_v46 = vadd.f32 %v13765_v51, %v13952_v17  ;;  %v14208_v62 = vadd.f32 %v13765_v51, %v13956_v29 }
 0x891   :  { %v14212_v12 = vadd.f32 %v13765_v51, %v13960_v41  ;;  %v14216_v45 = vadd.f32 %v13765_v51, %v13964_v40  ;;  %v14220_v16 = vadd.f32 %v13765_v51, %v13968_v44  ;;  %v14224_v17 = vadd.f32 %v13765_v51, %v13972_v13 }
 0x892   :  { %v14228_v29 = vadd.f32 %v13765_v51, %v13976_v33  ;;  %v14232_v41 = vadd.f32 %v13765_v51, %v13980_v25  ;;  %v14252_v25 = vadd.f32 %v13765_v51, %v14000_v6  ;;  %v14272_v6 = vadd.f32 %v13765_v51, %v14020_v26  ;;  %v8920_v26 = vld [vmem:[%s14792_s0 + $0x10] sm:$0xff] }
 0x893   :  { %15603 = vst [vmem:[#allocation34_spill] sm:$0xff] %v14212_v12  ;;  %15604 = vst [vmem:[#allocation21_spill] sm:$0xff] %v14216_v45  ;;  %v15607_v12 = vld [vmem:[#allocation35_spill] sm:$0xff]  ;;  %v15608_v45 = vld [vmem:[#allocation20_spill] sm:$0xff] }
 0x894   :  { %15605 = vst [vmem:[#allocation22_spill] sm:$0xff] %v14220_v16  ;;  %15606 = vst [vmem:[#allocation8_spill] sm:$0xff] %v14224_v17  ;;  %v14236_v40 = vadd.f32 %v13765_v51, %v15607_v12  ;;  %v14240_v44 = vadd.f32 %v13765_v51, %v15608_v45  ;;  %v15609_v16 = vld [vmem:[#allocation30_spill] sm:$0xff]  ;;  %v15610_v17 = vld [vmem:[#allocation31_spill] sm:$0xff]  ;;  %v14256_v12 = vadd.f32 %v13765_v51, %v14004_v0 }
 0x895   :  { %v14244_v13 = vadd.f32 %v13765_v51, %v15609_v16  ;;  %v14248_v33 = vadd.f32 %v13765_v51, %v15610_v17  ;;  %v14260_v45 = vadd.f32 %v13765_v51, %v14008_v55  ;;  %v14264_v16 = vadd.f32 %v13765_v51, %v14012_v20  ;;  %v8918_v55 = vld [vmem:[%s14792_s0] sm:$0xff]  ;;  %v8919_v20 = vld [vmem:[%s14792_s0 + $0x8] sm:$0xff] }
 0x896   :  { %v14268_v17 = vadd.f32 %v13765_v51, %v14016_v63  ;;  %v14276_v0 = vadd.f32 %v13765_v51, %v14024_v58  ;;  %v14288_v63 = vadd.f32 %v8919_v20, %v14032_v37  ;;  %v14294_v51 = vadd.f32 %v8920_v26, %v14036_v14  ;;  %v8921_v58 = vld [vmem:[%s14792_s0 + $0x18] sm:$0xff]  ;;  %v8923_v20 = vld [vmem:[%s14792_s0 + $0x28] sm:$0xff]  ;;  %v8924_v26 = vld [vmem:[%s14792_s0 + $0x30] sm:$0xff] }
 0x897   :  { %15611 = vst [vmem:[#allocation6_spill] sm:$0xff] %v14260_v45  ;;  %v14282_v45 = vadd.f32 %v8918_v55, %v14028_v2  ;;  %v14300_v2 = vadd.f32 %v8921_v58, %v14040_v9  ;;  %v8922_v55 = vld [vmem:[%s14792_s0 + $0x20] sm:$0xff]  ;;  %v14312_v14 = vadd.f32 %v8923_v20, %v14048_v61  ;;  %v14318_v9 = vadd.f32 %v8924_v26, %v14052_v11  ;;  %v8925_v58 = vld [vmem:[%s14792_s0 + $0x38] sm:$0xff]  ;;  %v8927_v20 = vld [vmem:[%s14792_s0 + $0x48] sm:$0xff] }
 0x898   :  { %v14306_v37 = vadd.f32 %v8922_v55, %v14044_v50  ;;  %v14324_v50 = vadd.f32 %v8925_v58, %v14056_v49  ;;  %v8926_v55 = vld [vmem:[%s14792_s0 + $0x40] sm:$0xff]  ;;  %v14336_v11 = vadd.f32 %v8927_v20, %v14064_v60  ;;  %v8928_v26 = vld [vmem:[%s14792_s0 + $0x50] sm:$0xff]  ;;  %v8929_v58 = vld [vmem:[%s14792_s0 + $0x58] sm:$0xff] }
 0x899   :  { %v14330_v61 = vadd.f32 %v8926_v55, %v14060_v53  ;;  %v14342_v49 = vadd.f32 %v8928_v26, %v14068_v7  ;;  %v14348_v53 = vadd.f32 %v8929_v58, %v14072_v24  ;;  %v8930_v55 = vld [vmem:[%s14792_s0 + $0x60] sm:$0xff]  ;;  %v8931_v20 = vld [vmem:[%s14792_s0 + $0x68] sm:$0xff]  ;;  %v8932_v26 = vld [vmem:[%s14792_s0 + $0x70] sm:$0xff] }
 0x89a   :  { %v14354_v60 = vadd.f32 %v8930_v55, %v14076_v19  ;;  %v14360_v7 = vadd.f32 %v8931_v20, %v14080_v27  ;;  %v14366_v24 = vadd.f32 %v8932_v26, %v14084_v30  ;;  %v8933_v58 = vld [vmem:[%s14792_s0 + $0x78] sm:$0xff]  ;;  %v8934_v55 = vld [vmem:[%s14792_s0 + $0x80] sm:$0xff]  ;;  %v8935_v20 = vld [vmem:[%s14792_s0 + $0x88] sm:$0xff] }
 0x89b   :  { %v14372_v19 = vadd.f32 %v8933_v58, %v14088_v47  ;;  %v14378_v27 = vadd.f32 %v8934_v55, %v14092_v15  ;;  %v14384_v30 = vadd.f32 %v8935_v20, %v14096_v32  ;;  %v8936_v26 = vld [vmem:[%s14792_s0 + $0x90] sm:$0xff]  ;;  %v8937_v58 = vld [vmem:[%s14792_s0 + $0x98] sm:$0xff]  ;;  %v8938_v55 = vld [vmem:[%s14792_s0 + $0xa0] sm:$0xff] }
 0x89c   :  { %v14390_v47 = vadd.f32 %v8936_v26, %v14100_v54  ;;  %v14396_v15 = vadd.f32 %v8937_v58, %v14104_v21  ;;  %v14402_v32 = vadd.f32 %v8938_v55, %v14108_v3  ;;  %v8939_v20 = vld [vmem:[%s14792_s0 + $0xa8] sm:$0xff]  ;;  %v8940_v26 = vld [vmem:[%s14792_s0 + $0xb0] sm:$0xff]  ;;  %v8941_v58 = vld [vmem:[%s14792_s0 + $0xb8] sm:$0xff] }
 0x89d   :  { %v14408_v54 = vadd.f32 %v8939_v20, %v14112_v18  ;;  %v14414_v21 = vadd.f32 %v8940_v26, %v14116_v34  ;;  %v14420_v3 = vadd.f32 %v8941_v58, %v14120_v48  ;;  %v8942_v55 = vld [vmem:[%s14792_s0 + $0xc0] sm:$0xff]  ;;  %v8943_v20 = vld [vmem:[%s14792_s0 + $0xc8] sm:$0xff]  ;;  %v8944_v26 = vld [vmem:[%s14792_s0 + $0xd0] sm:$0xff] }
 0x89e   :  { %v14426_v18 = vadd.f32 %v8942_v55, %v14124_v52  ;;  %v14432_v34 = vadd.f32 %v8943_v20, %v14128_v23  ;;  %v14438_v48 = vadd.f32 %v8944_v26, %v14132_v36  ;;  %v8945_v58 = vld [vmem:[%s14792_s0 + $0xd8] sm:$0xff]  ;;  %v8946_v55 = vld [vmem:[%s14792_s0 + $0xe0] sm:$0xff]  ;;  %v8947_v20 = vld [vmem:[%s14792_s0 + $0xe8] sm:$0xff] }
 0x89f   :  { %v14444_v52 = vadd.f32 %v8945_v58, %v14136_v28  ;;  %v14450_v23 = vadd.f32 %v8946_v55, %v14140_v31  ;;  %v14456_v36 = vadd.f32 %v8947_v20, %v14144_v22  ;;  %v8948_v26 = vld [vmem:[%s14792_s0 + $0xf0] sm:$0xff]  ;;  %v8949_v58 = vld [vmem:[%s14792_s0 + $0xf8] sm:$0xff]  ;;  %v8950_v55 = vld [vmem:[%s14792_s0 + $0x100] sm:$0xff] }
 0x8a0   :  { %v14462_v28 = vadd.f32 %v8948_v26, %v14148_v43  ;;  %v14468_v31 = vadd.f32 %v8949_v58, %v14152_v1  ;;  %v14474_v22 = vadd.f32 %v8950_v55, %v14156_v35  ;;  %v8951_v20 = vld [vmem:[%s14792_s0 + $0x108] sm:$0xff]  ;;  %v15613_v43 = vld [vmem:[#allocation36_spill] sm:$0xff]  ;;  %v8953_v58 = vld [vmem:[%s14792_s0 + $0x118] sm:$0xff] }
 0x8a1   :  { %v14480_v26 = vadd.f32 %v8951_v20, %v15613_v43  ;;  %v14492_v35 = vadd.f32 %v8953_v58, %v14168_v5  ;;  %v8954_v55 = vld [vmem:[%s14792_s0 + $0x120] sm:$0xff]  ;;  %v8955_v43 = vld [vmem:[%s14792_s0 + $0x128] sm:$0xff]  ;;  %v8957_v58 = vld [vmem:[%s14792_s0 + $0x138] sm:$0xff] }
 0x8a2   :  { %15612 = vst [vmem:[#allocation37_spill] sm:$0xff] %v14462_v28  ;;  %v8952_v28 = vld [vmem:[%s14792_s0 + $0x110] sm:$0xff]  ;;  %v14498_v20 = vadd.f32 %v8954_v55, %v14172_v39  ;;  %v14516_v39 = vadd.f32 %v8957_v58, %v14184_v4  ;;  %v8958_v55 = vld [vmem:[%s14792_s0 + $0x140] sm:$0xff]  ;;  %v8961_v58 = vld [vmem:[%s14792_s0 + $0x158] sm:$0xff] }
 0x8a3   :  { %v14486_v1 = vadd.f32 %v8952_v28, %v14164_v42  ;;  %v14504_v42 = vadd.f32 %v8955_v43, %v14176_v8  ;;  %v8956_v28 = vld [vmem:[%s14792_s0 + $0x130] sm:$0xff]  ;;  %v14522_v8 = vadd.f32 %v8958_v55, %v14188_v57  ;;  %v8959_v43 = vld [vmem:[%s14792_s0 + $0x148] sm:$0xff]  ;;  %v14540_v57 = vadd.f32 %v8961_v58, %v14200_v56  ;;  %v8962_v55 = vld [vmem:[%s14792_s0 + $0x160] sm:$0xff] }
 0x8a4   :  { %v14510_v5 = vadd.f32 %v8956_v28, %v14180_v10  ;;  %v14528_v10 = vadd.f32 %v8959_v43, %v14192_v38  ;;  %v8960_v28 = vld [vmem:[%s14792_s0 + $0x150] sm:$0xff]  ;;  %v14546_v38 = vadd.f32 %v8962_v55, %v14204_v46  ;;  %v8963_v43 = vld [vmem:[%s14792_s0 + $0x168] sm:$0xff]  ;;  %v15617_v56 = vld [vmem:[#allocation34_spill] sm:$0xff] }
 0x8a5   :  { %v14534_v4 = vadd.f32 %v8960_v28, %v14196_v59  ;;  %15614 = vst [vmem:[#allocation10_spill] sm:$0xff] %v14540_v57  ;;  %v14552_v59 = vadd.f32 %v8963_v43, %v14208_v62  ;;  %v8964_v28 = vld [vmem:[%s14792_s0 + $0x170] sm:$0xff]  ;;  %v8965_v57 = vld [vmem:[%s14792_s0 + $0x178] sm:$0xff]  ;;  %v15620_v62 = vld [vmem:[#allocation22_spill] sm:$0xff] }
 0x8a6   :  { %15615 = vst [vmem:[#allocation11_spill] sm:$0xff] %v14546_v38  ;;  %v14558_v58 = vadd.f32 %v8964_v28, %v15617_v56  ;;  %v15619_v46 = vld [vmem:[#allocation21_spill] sm:$0xff]  ;;  %v8966_v38 = vld [vmem:[%s14792_s0 + $0x180] sm:$0xff]  ;;  %v15621_v28 = vld [vmem:[#allocation8_spill] sm:$0xff] }
 0x8a7   :  { %15616 = vst [vmem:[#allocation13_spill] sm:$0xff] %v14552_v59  ;;  %v14564_v55 = vadd.f32 %v8965_v57, %v15619_v46  ;;  %v14570_v43 = vadd.f32 %v8966_v38, %v15620_v62  ;;  %v8967_v59 = vld [vmem:[%s14792_s0 + $0x188] sm:$0xff]  ;;  %v8969_v46 = vld [vmem:[%s14792_s0 + $0x198] sm:$0xff]  ;;  %v8970_v62 = vld [vmem:[%s14792_s0 + $0x1a0] sm:$0xff] }
 0x8a8   :  { %15618 = vst [vmem:[#allocation38_spill] sm:$0xff] %v14558_v58  ;;  %v14576_v56 = vadd.f32 %v8967_v59, %v15621_v28  ;;  %v8968_v58 = vld [vmem:[%s14792_s0 + $0x190] sm:$0xff]  ;;  %v14588_v38 = vadd.f32 %v8969_v46, %v14232_v41  ;;  %v14594_v59 = vadd.f32 %v8970_v62, %v14236_v40  ;;  %v8971_v28 = vld [vmem:[%s14792_s0 + $0x1a8] sm:$0xff]  ;;  %v8973_v46 = vld [vmem:[%s14792_s0 + $0x1b8] sm:$0xff] }
 0x8a9   :  { %v14582_v57 = vadd.f32 %v8968_v58, %v14228_v29  ;;  %v14600_v29 = vadd.f32 %v8971_v28, %v14240_v44  ;;  %v8972_v58 = vld [vmem:[%s14792_s0 + $0x1b0] sm:$0xff]  ;;  %v14612_v40 = vadd.f32 %v8973_v46, %v14248_v33  ;;  %v8974_v62 = vld [vmem:[%s14792_s0 + $0x1c0] sm:$0xff]  ;;  %v8975_v28 = vld [vmem:[%s14792_s0 + $0x1c8] sm:$0xff] }
 0x8aa   :  { %v14606_v41 = vadd.f32 %v8972_v58, %v14244_v13  ;;  %v14618_v44 = vadd.f32 %v8974_v62, %v14252_v25  ;;  %v14624_v13 = vadd.f32 %v8975_v28, %v14256_v12  ;;  %v8976_v58 = vld [vmem:[%s14792_s0 + $0x1d0] sm:$0xff]  ;;  %v15623_v33 = vld [vmem:[#allocation6_spill] sm:$0xff] }
 0x8ab   :  { %15622 = vst [vmem:[#allocation23_spill] sm:$0xff] %v14612_v40  ;;  %v14630_v46 = vadd.f32 %v8976_v58, %v15623_v33  ;;  %v8977_v40 = vld [vmem:[%s14792_s0 + $0x1d8] sm:$0xff]  ;;  %v8978_v62 = vld [vmem:[%s14792_s0 + $0x1e0] sm:$0xff]  ;;  %v8979_v28 = vld [vmem:[%s14792_s0 + $0x1f0] sm:$0xff] }
 0x8ac   :  { %v14636_v25 = vadd.f32 %v8977_v40, %v14264_v16  ;;  %v14642_v12 = vadd.f32 %v8978_v62, %v14268_v17  ;;  %v14648_v58 = vadd.f32 %v8979_v28, %v14272_v6  ;;  %v8980_v33 = vld [vmem:[%s14792_s0 + $0x1f8] sm:$0xff]  ;;  %v7128_v40 = vmax.f32 %v14282_v45, 0.0  ;;  %s9004_s0 = smov [#allocation3]  }
 0x8ad   :  { %15624 = vst [vmem:[#allocation12_spill] sm:$0xff] %v14630_v46  ;;  %v14654_v16 = vadd.f32 %v8980_v33, %v14276_v0  ;;  %v7130_v17 = vmax.f32 %v14294_v51, 0.0  ;;  %v7131_v62 = vmax.f32 %v14300_v2, 0.0  ;;  %v7133_v6 = vmax.f32 %v14312_v14, 0.0  ;;  %s7261_s5 = sshll.u32 %s9004_s0, 4  ;;  %s14766_s5 = int_to_ptr.vmem [resolvable:$true] %s7261_s5 }
 0x8ae   :  { %15625 = vst [vmem:[#allocation14_spill] sm:$0xff] %v14636_v25  ;;  %15626 = vst [vmem:[#allocation39_spill] sm:$0xff] %v14642_v12  ;;  %v7129_v25 = vmax.f32 %v14288_v63, 0.0  ;;  %v7132_v12 = vmax.f32 %v14306_v37, 0.0  ;;  %v7134_v28 = vmax.f32 %v14318_v9, 0.0  ;;  %v7136_v46 = vmax.f32 %v14330_v61, 0.0  ;;  %p8986_p1 = scmp.lt.s32.totalorder %s14766_s5, %s14766_s5 }
 0x8af   :  { %15627 = vst [vmem:[#allocation15_spill] sm:$0xff] %v14648_v58  ;;  %v7135_v58 = vmax.f32 %v14324_v50, 0.0  ;;  %v7137_v0 = vmax.f32 %v14336_v11, 0.0  ;;  %v7138_v45 = vmax.f32 %v14342_v49, 0.0  ;;  %7192 = vst.msk [vmem:[#allocation3] sm:$0xff] %vm149_vm0, %v7128_v40  ;;  %v7139_v63 = vmax.f32 %v14348_v53, 0.0 }
 0x8b0   :  { %7193 = vst.msk [vmem:[#allocation3 + $0x8] sm:$0xff] %vm149_vm0, %v7129_v25  ;;  %7194 = vst.msk [vmem:[#allocation3 + $0x10] sm:$0xff] %vm149_vm0, %v7130_v17  ;;  %v7140_v51 = vmax.f32 %v14354_v60, 0.0  ;;  %v7141_v2 = vmax.f32 %v14360_v7, 0.0  ;;  %v7142_v37 = vmax.f32 %v14366_v24, 0.0  ;;  %v7143_v14 = vmax.f32 %v14372_v19, 0.0 }
 0x8b1   :  { %7195 = vst.msk [vmem:[#allocation3 + $0x18] sm:$0xff] %vm149_vm0, %v7131_v62  ;;  %7196 = vst.msk [vmem:[#allocation3 + $0x20] sm:$0xff] %vm149_vm0, %v7132_v12  ;;  %v7144_v9 = vmax.f32 %v14378_v27, 0.0  ;;  %v7145_v50 = vmax.f32 %v14384_v30, 0.0  ;;  %v7146_v61 = vmax.f32 %v14390_v47, 0.0  ;;  %v7147_v11 = vmax.f32 %v14396_v15, 0.0 }
 0x8b2   :  { %7197 = vst.msk [vmem:[#allocation3 + $0x28] sm:$0xff] %vm149_vm0, %v7133_v6  ;;  %7198 = vst.msk [vmem:[#allocation3 + $0x30] sm:$0xff] %vm149_vm0, %v7134_v28  ;;  %v7148_v49 = vmax.f32 %v14402_v32, 0.0  ;;  %v7149_v53 = vmax.f32 %v14408_v54, 0.0  ;;  %v7150_v60 = vmax.f32 %v14414_v21, 0.0  ;;  %v7151_v7 = vmax.f32 %v14420_v3, 0.0 }
 0x8b3   :  { %7199 = vst.msk [vmem:[#allocation3 + $0x38] sm:$0xff] %vm149_vm0, %v7135_v58  ;;  %7200 = vst.msk [vmem:[#allocation3 + $0x40] sm:$0xff] %vm149_vm0, %v7136_v46  ;;  %v7152_v24 = vmax.f32 %v14426_v18, 0.0  ;;  %v7153_v19 = vmax.f32 %v14432_v34, 0.0  ;;  %v7154_v27 = vmax.f32 %v14438_v48, 0.0  ;;  %v7155_v30 = vmax.f32 %v14444_v52, 0.0 }
 0x8b4   :  { %7201 = vst.msk [vmem:[#allocation3 + $0x48] sm:$0xff] %vm149_vm0, %v7137_v0  ;;  %7202 = vst.msk [vmem:[#allocation3 + $0x50] sm:$0xff] %vm149_vm0, %v7138_v45  ;;  %v7156_v47 = vmax.f32 %v14450_v23, 0.0  ;;  %v7157_v15 = vmax.f32 %v14456_v36, 0.0  ;;  %v15628_v32 = vld [vmem:[#allocation37_spill] sm:$0xff]  ;;  %v7159_v21 = vmax.f32 %v14468_v31, 0.0 }
 0x8b5   :  { %7203 = vst.msk [vmem:[#allocation3 + $0x58] sm:$0xff] %vm149_vm0, %v7139_v63  ;;  %7204 = vst.msk [vmem:[#allocation3 + $0x60] sm:$0xff] %vm149_vm0, %v7140_v51  ;;  %v7158_v54 = vmax.f32 %v15628_v32, 0.0  ;;  %v7160_v3 = vmax.f32 %v14474_v22, 0.0  ;;  %v7161_v18 = vmax.f32 %v14480_v26, 0.0  ;;  %v7162_v34 = vmax.f32 %v14486_v1, 0.0 }
 0x8b6   :  { %7205 = vst.msk [vmem:[#allocation3 + $0x68] sm:$0xff] %vm149_vm0, %v7141_v2  ;;  %7206 = vst.msk [vmem:[#allocation3 + $0x70] sm:$0xff] %vm149_vm0, %v7142_v37  ;;  %v7163_v48 = vmax.f32 %v14492_v35, 0.0  ;;  %v7164_v52 = vmax.f32 %v14498_v20, 0.0  ;;  %v7165_v23 = vmax.f32 %v14504_v42, 0.0  ;;  %v7166_v36 = vmax.f32 %v14510_v5, 0.0 }
 0x8b7   :  { %7207 = vst.msk [vmem:[#allocation3 + $0x78] sm:$0xff] %vm149_vm0, %v7143_v14  ;;  %7208 = vst.msk [vmem:[#allocation3 + $0x80] sm:$0xff] %vm149_vm0, %v7144_v9  ;;  %v7167_v31 = vmax.f32 %v14516_v39, 0.0  ;;  %v7168_v22 = vmax.f32 %v14522_v8, 0.0  ;;  %v7169_v26 = vmax.f32 %v14528_v10, 0.0  ;;  %v7170_v1 = vmax.f32 %v14534_v4, 0.0 }
 0x8b8   :  { %7209 = vst.msk [vmem:[#allocation3 + $0x88] sm:$0xff] %vm149_vm0, %v7145_v50  ;;  %7210 = vst.msk [vmem:[#allocation3 + $0x90] sm:$0xff] %vm149_vm0, %v7146_v61  ;;  %v15629_v35 = vld [vmem:[#allocation10_spill] sm:$0xff]  ;;  %v15630_v42 = vld [vmem:[#allocation11_spill] sm:$0xff]  ;;  %v7175_v10 = vmax.f32 %v14564_v55, 0.0  ;;  %v7176_v4 = vmax.f32 %v14570_v43, 0.0 }
 0x8b9   :  { %7211 = vst.msk [vmem:[#allocation3 + $0x98] sm:$0xff] %vm149_vm0, %v7147_v11  ;;  %7212 = vst.msk [vmem:[#allocation3 + $0xa0] sm:$0xff] %vm149_vm0, %v7148_v49  ;;  %v7171_v20 = vmax.f32 %v15629_v35, 0.0  ;;  %v7172_v5 = vmax.f32 %v15630_v42, 0.0  ;;  %v15631_v46 = vld [vmem:[#allocation13_spill] sm:$0xff]  ;;  %v15632_v25 = vld [vmem:[#allocation38_spill] sm:$0xff] }
 0x8ba   :  { %7213 = vst.msk [vmem:[#allocation3 + $0xa8] sm:$0xff] %vm149_vm0, %v7149_v53  ;;  %7214 = vst.msk [vmem:[#allocation3 + $0xb0] sm:$0xff] %vm149_vm0, %v7150_v60  ;;  %v7173_v39 = vmax.f32 %v15631_v46, 0.0  ;;  %v7174_v8 = vmax.f32 %v15632_v25, 0.0  ;;  %v7177_v12 = vmax.f32 %v14576_v56, 0.0  ;;  %v7178_v58 = vmax.f32 %v14582_v57, 0.0 }
 0x8bb   :  { %7215 = vst.msk [vmem:[#allocation3 + $0xb8] sm:$0xff] %vm149_vm0, %v7151_v7  ;;  %7216 = vst.msk [vmem:[#allocation3 + $0xc0] sm:$0xff] %vm149_vm0, %v7152_v24  ;;  %v7179_v33 = vmax.f32 %v14588_v38, 0.0  ;;  %v7180_v40 = vmax.f32 %v14594_v59, 0.0  ;;  %v7181_v55 = vmax.f32 %v14600_v29, 0.0  ;;  %v7182_v43 = vmax.f32 %v14606_v41, 0.0 }
 0x8bc   :  { %7217 = vst.msk [vmem:[#allocation3 + $0xc8] sm:$0xff] %vm149_vm0, %v7153_v19  ;;  %7218 = vst.msk [vmem:[#allocation3 + $0xd0] sm:$0xff] %vm149_vm0, %v7154_v27  ;;  %v15633_v56 = vld [vmem:[#allocation23_spill] sm:$0xff]  ;;  %v7184_v17 = vmax.f32 %v14618_v44, 0.0  ;;  %v7185_v38 = vmax.f32 %v14624_v13, 0.0  ;;  %v15634_v62 = vld [vmem:[#allocation12_spill] sm:$0xff] }
 0x8bd   :  { %7219 = vst.msk [vmem:[#allocation3 + $0xd8] sm:$0xff] %vm149_vm0, %v7155_v30  ;;  %7220 = vst.msk [vmem:[#allocation3 + $0xe0] sm:$0xff] %vm149_vm0, %v7156_v47  ;;  %v7183_v57 = vmax.f32 %v15633_v56, 0.0  ;;  %v7186_v59 = vmax.f32 %v15634_v62, 0.0  ;;  %v15635_v29 = vld [vmem:[#allocation14_spill] sm:$0xff]  ;;  %v15636_v6 = vld [vmem:[#allocation39_spill] sm:$0xff] }
 0x8be   :  { %7221 = vst.msk [vmem:[#allocation3 + $0xe8] sm:$0xff] %vm149_vm0, %v7157_v15  ;;  %7222 = vst.msk [vmem:[#allocation3 + $0xf0] sm:$0xff] %vm149_vm0, %v7158_v54  ;;  %v7187_v41 = vmax.f32 %v15635_v29, 0.0  ;;  %v7188_v28 = vmax.f32 %v15636_v6, 0.0  ;;  %v15637_v44 = vld [vmem:[#allocation15_spill] sm:$0xff]  ;;  %v7191_v0 = vmax.f32 %v14654_v16, 0.0 }
 0x8bf   :  { %7223 = vst.msk [vmem:[#allocation3 + $0xf8] sm:$0xff] %vm149_vm0, %v7159_v21  ;;  %7224 = vst.msk [vmem:[#allocation3 + $0x100] sm:$0xff] %vm149_vm0, %v7160_v3  ;;  %v7190_v13 = vmax.f32 %v15637_v44, 0.0  ;;  %s8981_s15 = scalar_lea.vmem %s14766_s5, 8192 }
 0x8c0   :  { %7225 = vst.msk [vmem:[#allocation3 + $0x108] sm:$0xff] %vm149_vm0, %v7161_v18  ;;  %7226 = vst.msk [vmem:[#allocation3 + $0x110] sm:$0xff] %vm149_vm0, %v7162_v34  ;;  %p8982_p0 = scmp.ne.s32.totalorder %s14766_s5, %s8981_s15  ;;  %p8987_p2 = scmp.lt.s32.totalorder %s8981_s15, %s8981_s15 }
 0x8c1   :  { %7227 = vst.msk [vmem:[#allocation3 + $0x118] sm:$0xff] %vm149_vm0, %v7163_v48  ;;  %7228 = vst.msk [vmem:[#allocation3 + $0x120] sm:$0xff] %vm149_vm0, %v7164_v52 }
 0x8c2   :  { %7229 = vst.msk [vmem:[#allocation3 + $0x128] sm:$0xff] %vm149_vm0, %v7165_v23  ;;  %7230 = vst.msk [vmem:[#allocation3 + $0x130] sm:$0xff] %vm149_vm0, %v7166_v36  ;;  %p8988_p3 = por %p8987_p2, %p8986_p1 }
 0x8c3   :  { %7231 = vst.msk [vmem:[#allocation3 + $0x138] sm:$0xff] %vm149_vm0, %v7167_v31  ;;  %7232 = vst.msk [vmem:[#allocation3 + $0x140] sm:$0xff] %vm149_vm0, %v7168_v22 }
 0x8c4   :  { %7233 = vst.msk [vmem:[#allocation3 + $0x148] sm:$0xff] %vm149_vm0, %v7169_v26  ;;  %7234 = vst.msk [vmem:[#allocation3 + $0x150] sm:$0xff] %vm149_vm0, %v7170_v1  ;;  %p8989_p4 = pnand %p8988_p3, %p8982_p0 }
 0x8c5   :  { %7235 = vst.msk [vmem:[#allocation3 + $0x158] sm:$0xff] %vm149_vm0, %v7171_v20  ;;  %7236 = vst.msk [vmem:[#allocation3 + $0x160] sm:$0xff] %vm149_vm0, %v7172_v5 }
 0x8c6   :  { %7237 = vst.msk [vmem:[#allocation3 + $0x168] sm:$0xff] %vm149_vm0, %v7173_v39  ;;  %7238 = vst.msk [vmem:[#allocation3 + $0x170] sm:$0xff] %vm149_vm0, %v7174_v8 }
 0x8c7   :  { %7239 = vst.msk [vmem:[#allocation3 + $0x178] sm:$0xff] %vm149_vm0, %v7175_v10  ;;  %7240 = vst.msk [vmem:[#allocation3 + $0x180] sm:$0xff] %vm149_vm0, %v7176_v4 }
 0x8c8   :  { %7241 = vst.msk [vmem:[#allocation3 + $0x188] sm:$0xff] %vm149_vm0, %v7177_v12  ;;  %7242 = vst.msk [vmem:[#allocation3 + $0x190] sm:$0xff] %vm149_vm0, %v7178_v58 }
 0x8c9   :  { %7243 = vst.msk [vmem:[#allocation3 + $0x198] sm:$0xff] %vm149_vm0, %v7179_v33  ;;  %7244 = vst.msk [vmem:[#allocation3 + $0x1a0] sm:$0xff] %vm149_vm0, %v7180_v40 }
 0x8ca   :  { %7245 = vst.msk [vmem:[#allocation3 + $0x1a8] sm:$0xff] %vm149_vm0, %v7181_v55  ;;  %7246 = vst.msk [vmem:[#allocation3 + $0x1b0] sm:$0xff] %vm149_vm0, %v7182_v43 }
 0x8cb   :  { %7247 = vst.msk [vmem:[#allocation3 + $0x1b8] sm:$0xff] %vm149_vm0, %v7183_v57  ;;  %7248 = vst.msk [vmem:[#allocation3 + $0x1c0] sm:$0xff] %vm149_vm0, %v7184_v17 }
 0x8cc   :  { %7249 = vst.msk [vmem:[#allocation3 + $0x1c8] sm:$0xff] %vm149_vm0, %v7185_v38  ;;  %7250 = vst.msk [vmem:[#allocation3 + $0x1d0] sm:$0xff] %vm149_vm0, %v7186_v59 }
 0x8cd   :  { %7251 = vst.msk [vmem:[#allocation3 + $0x1d8] sm:$0xff] %vm149_vm0, %v7187_v41  ;;  %7252 = vst.msk [vmem:[#allocation3 + $0x1e0] sm:$0xff] %vm149_vm0, %v7188_v28 }
 0x8ce   :  { %7254 = vst.msk [vmem:[#allocation3 + $0x1f0] sm:$0xff] %vm149_vm0, %v7190_v13  ;;  %7255 = vst.msk [vmem:[#allocation3 + $0x1f8] sm:$0xff] %vm149_vm0, %v7191_v0 }
 0x8cf   :  { %8992 = shalt.err (!%p8989_p4)
}
 0x8d0   :  { %s9005_s16 = smov 128   ;;  %s9006_s17 = smov 8  }
 0x8d1   :  { %7267 = dma.vmem_to_hbm [thread:$0]  %s14766_s5, 8192, %s14802_s10, [#allocation4], %s9005_s16, %s9005_s16, %s9006_s17  }
 0x8d2   :  { %9001 = dma.done.wait [#allocation4], 8192  }
 0x8d3   :  { %9002 = vsyncadd [#allocation4], 4294959104 }
 0x8d4   :  { %7271 = vsyncpa [#allocation4], 1 }

</bundles_post_ra>
